<compile_context>
chip_gen: v5e
topology: v5e:2x2
jax: 0.10.0
libtpu: 0.0.40
codegen_flags: <defaults>
</compile_context>

<pallas_src>
import functools
import math

import jax
import jax.numpy as jnp
from jax.experimental import pallas as pl
from jax.experimental.pallas import tpu as pltpu

NEG_INF = jnp.float32(-1e9)   # finite "minus infinity" (NaN-safe softmax)
LN_EPS = 1e-5

ENC_KEYS = ("wqkv", "bqkv", "wo", "bo", "ln1_g", "ln1_b",
            "w1", "b1", "w2", "b2", "ln2_g", "ln2_b")
DEC_KEYS = ("wqkv", "bqkv", "wos", "bos", "ln1_g", "ln1_b",
            "wqc", "bqc", "wkvc", "bkvc", "woc", "boc", "ln2_g", "ln2_b",
            "w1", "b1", "w2", "b2", "ln3_g", "ln3_b")


def _round_up(x, m):
    return (x + m - 1) // m * m


# ----------------------------------------------------------------------------
# In-kernel helpers (pure jnp/lax on VMEM-resident values)
# ----------------------------------------------------------------------------
def _mm(a, b):
    """a @ b with bf16 MXU inputs and f32 accumulation.

    Weights are pre-cast to bf16 host-side, so .astype on them is a no-op.
    """
    return jax.lax.dot_general(
        a.astype(jnp.bfloat16), b.astype(jnp.bfloat16),
        (((1,), (0,)), ((), ())), preferred_element_type=jnp.float32)


def _mm_t(a, b):
    """a @ b.T (contract last dims) with bf16 MXU inputs, f32 accumulation."""
    return jax.lax.dot_general(
        a.astype(jnp.bfloat16), b.astype(jnp.bfloat16),
        (((1,), (1,)), ((), ())), preferred_element_type=jnp.float32)


def _layernorm(x, g, b):
    mean = jnp.mean(x, axis=-1, keepdims=True)
    xc = x - mean
    var = jnp.mean(xc * xc, axis=-1, keepdims=True)
    return xc * jax.lax.rsqrt(var + LN_EPS) * g + b


def _head_masks(nhead, hdim, emb):
    """List of (1, E) f32 masks selecting each head's feature slice."""
    e_idx = jax.lax.broadcasted_iota(jnp.int32, (1, emb), 1)
    return [((e_idx >= h * hdim) & (e_idx < (h + 1) * hdim)).astype(jnp.float32)
            for h in range(nhead)]


def _mha(q, k, v, bias_rep, masks, nhead, hdim):
    """Multi-head attention for ONE batch element, all heads at once.

    q: (Tq, E), k/v: (Tk, E), bias_rep: (H*Tq, Tk) additive (finite) mask,
    already replicated over heads host-side.
    Heads fold onto sublanes via block-diagonal masking so the score matmul
    is one (H*Tq, E) x (E, Tk) MXU op and PV is (H*Tq, Tk) x (Tk, E).
    """
    Tq = q.shape[0]
    scale = 1.0 / math.sqrt(hdim)

    # (H*Tq, E): row h*Tq+t holds q[t] with only head-h features kept.
    q_bd = jnp.concatenate([q * m for m in masks], axis=0)
    s = _mm_t(q_bd, k) * scale + bias_rep                        # (H*Tq, Tk)
    m = jnp.max(s, axis=-1, keepdims=True)
    p = jnp.exp(s - m)
    denom = jnp.sum(p, axis=-1, keepdims=True)                   # >= 1
    o = _mm(p, v) / denom                                        # exact divide
    # Re-assemble: out[t, e] = o[head(e)*Tq + t, e]
    return sum(o[h * Tq:(h + 1) * Tq, :] * masks[h] for h in range(nhead))


# ----------------------------------------------------------------------------
# ONE fused kernel: conv+PE -> encoder stack -> decoder stack -> generator
# ----------------------------------------------------------------------------
def _fused_forward_kernel(
        src_ref,        # (1, L_pad_in, C)      per-batch
        tgt_ref,        # (1, Tt_pad, E)        per-batch (token emb + PE)
        enc_bias_ref,   # (1, H*Ts_pad, Ts_pad) per-batch
        sbias_ref,      # (1, H*Tt_pad, Tt_pad) per-batch
        cbias_ref,      # (1, H*Tt_pad, Ts_pad) per-batch
        pe_src_ref,     # (Ts_pad, E)           resident
        conv_w_ref,     # (K*C, E)  bf16        resident
        conv_b_ref,     # (1, E)    f32         resident
        # encoder stacks (leading axis = layer)
        e_wqkv, e_bqkv, e_wo, e_bo, e_ln1g, e_ln1b,
        e_w1, e_b1, e_w2, e_b2, e_ln2g, e_ln2b,
        # decoder stacks
        d_wqkv, d_bqkv, d_wos, d_bos, d_ln1g, d_ln1b,
        d_wqc, d_bqc, d_wkvc, d_bkvc, d_woc, d_boc, d_ln2g, d_ln2b,
        d_w1, d_b1, d_w2, d_b2, d_ln3g, d_ln3b,
        gen_w_ref, gen_b_ref,
        o_ref,          # (1, Tt_pad, V_pad)
        *, nhead, ksize, n_enc, n_dec, ts_pad):
    E = tgt_ref.shape[2]
    hdim = E // nhead
    C = src_ref.shape[2]
    masks = _head_masks(nhead, hdim, E)          # built once per invocation

    # --- Conv1d (valid, stride 1) as K accumulated matmuls + bias + PE ---
    xb = src_ref[0]                                              # (L_pad_in, C)
    mem = conv_b_ref[...] + pe_src_ref[...]                      # (Ts_pad, E)
    for j in range(ksize):
        mem = mem + _mm(xb[j:j + ts_pad, :], conv_w_ref[j * C:(j + 1) * C, :])

    # --- Encoder stack ---
    enc_bias = enc_bias_ref[0]
    for l in range(n_enc):
        qkv = _mm(mem, e_wqkv[l]) + e_bqkv[l]                    # (Ts_pad, 3E)
        q, k, v = qkv[:, :E], qkv[:, E:2 * E], qkv[:, 2 * E:]
        a = _mha(q, k, v, enc_bias, masks, nhead, hdim)
        h = _layernorm(mem + _mm(a, e_wo[l]) + e_bo[l], e_ln1g[l], e_ln1b[l])
        ff = jnp.maximum(_mm(h, e_w1[l]) + e_b1[l], 0.0)
        ff = _mm(ff, e_w2[l]) + e_b2[l]
        mem = _layernorm(h + ff, e_ln2g[l], e_ln2b[l])

    # --- Decoder stack ---
    x = tgt_ref[0]                                               # (Tt_pad, E)
    sbias = sbias_ref[0]
    cbias = cbias_ref[0]
    for l in range(n_dec):
        # Self-attention (fused QKV)
        qkv = _mm(x, d_wqkv[l]) + d_bqkv[l]
        q, k, v = qkv[:, :E], qkv[:, E:2 * E], qkv[:, 2 * E:]
        a = _mha(q, k, v, sbias, masks, nhead, hdim)
        h = _layernorm(x + _mm(a, d_wos[l]) + d_bos[l], d_ln1g[l], d_ln1b[l])
        # Cross-attention (fused KV)
        qc = _mm(h, d_wqc[l]) + d_bqc[l]
        kvc = _mm(mem, d_wkvc[l]) + d_bkvc[l]
        kc, vc = kvc[:, :E], kvc[:, E:]
        a2 = _mha(qc, kc, vc, cbias, masks, nhead, hdim)
        h2 = _layernorm(h + _mm(a2, d_woc[l]) + d_boc[l], d_ln2g[l], d_ln2b[l])
        # Feed-forward
        ff = jnp.maximum(_mm(h2, d_w1[l]) + d_b1[l], 0.0)
        ff = _mm(ff, d_w2[l]) + d_b2[l]
        x = _layernorm(h2 + ff, d_ln3g[l], d_ln3b[l])

    # --- Generator (lane-dense: V padded to 128 cols) ---
    o_ref[0] = _mm(x, gen_w_ref[...]) + gen_b_ref[...]


# ----------------------------------------------------------------------------
# pallas_call wrapper (single launch for the whole forward)
# ----------------------------------------------------------------------------
def _batch_spec(shape):
    """Per-grid-step block over the leading (batch) axis, full on the rest."""
    return pl.BlockSpec((1,) + tuple(shape[1:]),
                        lambda b: (b,) + (0,) * (len(shape) - 1))


def _rep_spec(arr):
    """Whole array, same block every grid step (resident, DMA'd once)."""
    return pl.BlockSpec(arr.shape, lambda b, _n=arr.ndim: (0,) * _n)


def fused_forward(src_p, tgt_emb_p, enc_bias, sbias, cbias, pe_src,
                  params, cfg, ts_pad, tt_pad, v_pad):
    B = src_p.shape[0]
    weights = ([params["conv_w_flat"], params["conv_b"]]
               + [params["enc"][k] for k in ENC_KEYS]
               + [params["dec"][k] for k in DEC_KEYS]
               + [params["gen_w_pad"], params["gen_b_pad"]])
    batched = [src_p, tgt_emb_p, enc_bias, sbias, cbias]
    in_specs = ([_batch_spec(a.shape) for a in batched]
                + [_rep_spec(pe_src)]
                + [_rep_spec(w) for w in weights])
    return pl.pallas_call(
        functools.partial(_fused_forward_kernel,
                          nhead=cfg["nhead"], ksize=cfg["kernel_size"],
                          n_enc=cfg["num_encoder_layers"],
                          n_dec=cfg["num_decoder_layers"],
                          ts_pad=ts_pad),
        out_shape=jax.ShapeDtypeStruct((B, tt_pad, v_pad), jnp.float32),
        grid=(B,),
        in_specs=in_specs,
        out_specs=pl.BlockSpec((1, tt_pad, v_pad), lambda b: (b, 0, 0)),
        compiler_params=pltpu.CompilerParams(
            dimension_semantics=("parallel",)),   # v7x: 2 TCs split the batch
    )(*batched, pe_src, *weights)


# ----------------------------------------------------------------------------
# Mask / positional-encoding construction (tiny host-side JAX ops, run once)
# ----------------------------------------------------------------------------
def make_padded_bias(attn_mask, key_padding_mask, B, Tq, Tk, Tq_pad, Tk_pad,
                     nhead):
    """Additive bias (B, H*Tq_pad, Tk_pad); -inf clamped to -1e9; head-replicated."""
    bias = jnp.zeros((B, Tq_pad, Tk_pad), jnp.float32)
    if Tk_pad > Tk:
        bias = bias.at[:, :, Tk:].set(NEG_INF)        # padded keys masked
    if attn_mask is not None:
        am = attn_mask.astype(jnp.float32)
        am = jnp.where(jnp.isfinite(am), am, NEG_INF)
        bias = bias.at[:, :Tq, :Tk].add(am[None, :, :])
    if key_padding_mask is not None:
        pad = jnp.where(key_padding_mask, NEG_INF, jnp.float32(0.0))
        bias = bias.at[:, :, :Tk].add(pad[:, None, :])
    return jnp.tile(bias, (1, nhead, 1))              # replicate over heads once


def positional_encoding_table(emb_size, maxlen=5000):
    den = jnp.exp(-jnp.arange(0, emb_size, 2, dtype=jnp.float32)
                  * math.log(10000.0) / emb_size)
    pos = jnp.arange(0, maxlen, dtype=jnp.float32).reshape(maxlen, 1)
    pe = jnp.zeros((maxlen, emb_size), jnp.float32)
    pe = pe.at[:, 0::2].set(jnp.sin(pos * den))
    pe = pe.at[:, 1::2].set(jnp.cos(pos * den))
    return pe                                                    # (maxlen, E)


# ----------------------------------------------------------------------------
# Parameter init (deterministic, synthetic; weights pre-fused & bf16-cast)
# ----------------------------------------------------------------------------
def _init_params(cfg):
    key = jax.random.PRNGKey(42)
    counter = [0]

    def nxt():
        counter[0] += 1
        return jax.random.fold_in(key, counter[0])

    def dense(in_dim, out_dim):
        w = (jax.random.normal(nxt(), (in_dim, out_dim), jnp.float32)
             * 0.05).astype(jnp.bfloat16)                        # bf16 weights
        b = jax.random.normal(nxt(), (1, out_dim), jnp.float32) * 0.01
        return w, b

    E, FF = cfg["emb_size"], cfg["dim_feedforward"]
    ones = lambda: jnp.ones((1, E), jnp.float32)
    zeros = lambda: jnp.zeros((1, E), jnp.float32)

    def enc_layer():
        wqkv, bqkv = dense(E, 3 * E)
        wo, bo = dense(E, E)
        w1, b1 = dense(E, FF)
        w2, b2 = dense(FF, E)
        return dict(wqkv=wqkv, bqkv=bqkv, wo=wo, bo=bo,
                    w1=w1, b1=b1, w2=w2, b2=b2,
                    ln1_g=ones(), ln1_b=zeros(), ln2_g=ones(), ln2_b=zeros())

    def dec_layer():
        wqkv, bqkv = dense(E, 3 * E)
        wos, bos = dense(E, E)
        wqc, bqc = dense(E, E)
        wkvc, bkvc = dense(E, 2 * E)
        woc, boc = dense(E, E)
        w1, b1 = dense(E, FF)
        w2, b2 = dense(FF, E)
        return dict(wqkv=wqkv, bqkv=bqkv, wos=wos, bos=bos,
                    wqc=wqc, bqc=bqc, wkvc=wkvc, bkvc=bkvc, woc=woc, boc=boc,
                    w1=w1, b1=b1, w2=w2, b2=b2,
                    ln1_g=ones(), ln1_b=zeros(),
                    ln2_g=ones(), ln2_b=zeros(),
                    ln3_g=ones(), ln3_b=zeros())

    def stack(layers):
        return {k: jnp.stack([l[k] for l in layers]) for k in layers[0]}

    C, K, Vt = cfg["src_vocab_size"], cfg["kernel_size"], cfg["tgt_vocab_size"]
    conv_w = jax.random.normal(nxt(), (E, C, K), jnp.float32) * 0.05  # (out,in,k)
    conv_b = jax.random.normal(nxt(), (1, E), jnp.float32) * 0.01
    # conv_w_flat[j*C + c, e] = W[e, c, j]
    conv_w_flat = conv_w.transpose(2, 1, 0).reshape(K * C, E).astype(jnp.bfloat16)

    gen_w, gen_b = dense(E, Vt)
    v_pad = _round_up(Vt, 128)
    gen_w_pad = jnp.zeros((E, v_pad), jnp.bfloat16).at[:, :Vt].set(gen_w)
    gen_b_pad = jnp.zeros((1, v_pad), jnp.float32).at[:, :Vt].set(gen_b)

    tgt_emb = jax.random.normal(nxt(), (Vt, E), jnp.float32) * 0.05

    return dict(
        conv_w_flat=conv_w_flat, conv_b=conv_b,
        enc=stack([enc_layer() for _ in range(cfg["num_encoder_layers"])]),
        dec=stack([dec_layer() for _ in range(cfg["num_decoder_layers"])]),
        gen_w_pad=gen_w_pad, gen_b_pad=gen_b_pad, v_pad=v_pad,
        tgt_tok_emb=tgt_emb,
        pos_emb=positional_encoding_table(E),
    )


# ----------------------------------------------------------------------------
# Full forward (one Pallas launch; tiny XLA prologue/epilogue)
# ----------------------------------------------------------------------------
def transformer_forward(params, cfg, src, tgt, src_mask, tgt_mask,
                        src_padding_mask, tgt_padding_mask,
                        memory_key_padding_mask):
    # NOTE: src_padding_mask is accepted but unused, matching the PyTorch forward.
    del src_padding_mask
    E, H, K = cfg["emb_size"], cfg["nhead"], cfg["kernel_size"]
    Vt = cfg["tgt_vocab_size"]
    B, L, _ = src.shape
    Ts = L - K + 1                                   # encoder / memory length
    Tt = tgt.shape[0]                                # target length
    Ts_pad = _round_up(Ts, 8)                        # sublane-aligned seq dims
    Tt_pad = _round_up(Tt, 8)
    v_pad = params["v_pad"]
    pe = params["pos_emb"]

    # --- Pad src so the in-kernel conv directly produces Ts_pad rows ---
    src_p = jnp.pad(src, ((0, 0), (0, (Ts_pad + K - 1) - L), (0, 0)))

    # --- Target token embedding + positional encoding (tiny XLA gather) ---
    tgt_emb = (params["tgt_tok_emb"][tgt.T] * math.sqrt(E)
               + pe[:Tt][None, :, :])                            # (B, Tt, E)
    tgt_emb_p = jnp.pad(tgt_emb, ((0, 0), (0, Tt_pad - Tt), (0, 0)))

    # --- Attention biases (clamped, padded, head-replicated once) ---
    enc_bias = make_padded_bias(src_mask, None, B, Ts, Ts, Ts_pad, Ts_pad, H)
    sbias = make_padded_bias(tgt_mask, tgt_padding_mask, B, Tt, Tt,
                             Tt_pad, Tt_pad, H)
    cbias = make_padded_bias(None, memory_key_padding_mask, B, Tt, Ts,
                             Tt_pad, Ts_pad, H)

    pe_src = pe[:Ts_pad]                                         # (Ts_pad, E)

    # --- Single fused Pallas launch ---
    logits = fused_forward(src_p, tgt_emb_p, enc_bias, sbias, cbias, pe_src,
                           params, cfg, Ts_pad, Tt_pad, v_pad)   # (B,Tt_pad,Vp)

    # Return PyTorch layout: (tgt_len, batch, tgt_vocab)
    return logits[:, :Tt, :Vt].transpose(1, 0, 2)


# ----------------------------------------------------------------------------
# Main
# ----------------------------------------------------------------------------
if __name__ == "__main__":
    cfg = dict(
        num_encoder_layers=2,
        num_decoder_layers=2,
        emb_size=32,
        src_vocab_size=16,    # Conv1d in_channels
        tgt_vocab_size=11,
        num_out_channels=32,  # unused by the PyTorch module's forward
        kernel_size=3,
        dim_feedforward=64,
        nhead=8,
    )
    params = _init_params(cfg)

    key = jax.random.PRNGKey(0)
    k_src, k_tgt = jax.random.split(key)

    B, L_src, T_tgt = 2, 12, 8
    L_out = L_src - cfg["kernel_size"] + 1

    # src is (batch, src_len, channels) — the PyTorch module transposes to NCL.
    src = jax.random.normal(k_src, (B, L_src, cfg["src_vocab_size"]), jnp.float32)
    tgt = jax.random.randint(k_tgt, (T_tgt, B), 0, cfg["tgt_vocab_size"], jnp.int32)

    # Masks, PyTorch-style
    src_mask = jnp.zeros((L_out, L_out), jnp.float32)
    tgt_mask = jnp.triu(jnp.full((T_tgt, T_tgt), -jnp.inf, jnp.float32), k=1)
    src_padding_mask = jnp.zeros((B, L_out), bool)                # unused by forward
    tgt_padding_mask = jnp.zeros((B, T_tgt), bool).at[1, -1].set(True)
    memory_key_padding_mask = jnp.zeros((B, L_out), bool).at[0, -2:].set(True)

    @jax.jit
    def fwd(src, tgt, src_mask, tgt_mask, src_pad, tgt_pad, mem_pad):
        return transformer_forward(params, cfg, src, tgt, src_mask, tgt_mask,
                                   src_pad, tgt_pad, mem_pad)

    out = fwd(src, tgt, src_mask, tgt_mask, src_padding_mask,
              tgt_padding_mask, memory_key_padding_mask)
    out = jax.block_until_ready(out)
    assert out.shape == (T_tgt, B, cfg["tgt_vocab_size"])
    assert bool(jnp.all(jnp.isfinite(out)))
    print("KERNEL_OK")
</pallas_src>

<mosaic_0001>
module attributes {stable_mosaic.version = 11 : i64} {
  func.func @_fused_forward_kernel(%arg0: i32, %arg1: memref<1x18x16xf32, #tpu.memory_space<vmem>>, %arg2: memref<1x8x32xf32, #tpu.memory_space<vmem>>, %arg3: memref<1x128x16xf32, #tpu.memory_space<vmem>>, %arg4: memref<1x64x8xf32, #tpu.memory_space<vmem>>, %arg5: memref<1x64x16xf32, #tpu.memory_space<vmem>>, %arg6: memref<16x32xf32, #tpu.memory_space<vmem>>, %arg7: memref<48x32xbf16, #tpu.memory_space<vmem>>, %arg8: memref<1x32xf32, #tpu.memory_space<vmem>>, %arg9: memref<2x32x96xbf16, #tpu.memory_space<vmem>>, %arg10: memref<2x1x96xf32, #tpu.memory_space<vmem>>, %arg11: memref<2x32x32xbf16, #tpu.memory_space<vmem>>, %arg12: memref<2x1x32xf32, #tpu.memory_space<vmem>>, %arg13: memref<2x1x32xf32, #tpu.memory_space<vmem>>, %arg14: memref<2x1x32xf32, #tpu.memory_space<vmem>>, %arg15: memref<2x32x64xbf16, #tpu.memory_space<vmem>>, %arg16: memref<2x1x64xf32, #tpu.memory_space<vmem>>, %arg17: memref<2x64x32xbf16, #tpu.memory_space<vmem>>, %arg18: memref<2x1x32xf32, #tpu.memory_space<vmem>>, %arg19: memref<2x1x32xf32, #tpu.memory_space<vmem>>, %arg20: memref<2x1x32xf32, #tpu.memory_space<vmem>>, %arg21: memref<2x32x96xbf16, #tpu.memory_space<vmem>>, %arg22: memref<2x1x96xf32, #tpu.memory_space<vmem>>, %arg23: memref<2x32x32xbf16, #tpu.memory_space<vmem>>, %arg24: memref<2x1x32xf32, #tpu.memory_space<vmem>>, %arg25: memref<2x1x32xf32, #tpu.memory_space<vmem>>, %arg26: memref<2x1x32xf32, #tpu.memory_space<vmem>>, %arg27: memref<2x32x32xbf16, #tpu.memory_space<vmem>>, %arg28: memref<2x1x32xf32, #tpu.memory_space<vmem>>, %arg29: memref<2x32x64xbf16, #tpu.memory_space<vmem>>, %arg30: memref<2x1x64xf32, #tpu.memory_space<vmem>>, %arg31: memref<2x32x32xbf16, #tpu.memory_space<vmem>>, %arg32: memref<2x1x32xf32, #tpu.memory_space<vmem>>, %arg33: memref<2x1x32xf32, #tpu.memory_space<vmem>>, %arg34: memref<2x1x32xf32, #tpu.memory_space<vmem>>, %arg35: memref<2x32x64xbf16, #tpu.memory_space<vmem>>, %arg36: memref<2x1x64xf32, #tpu.memory_space<vmem>>, %arg37: memref<2x64x32xbf16, #tpu.memory_space<vmem>>, %arg38: memref<2x1x32xf32, #tpu.memory_space<vmem>>, %arg39: memref<2x1x32xf32, #tpu.memory_space<vmem>>, %arg40: memref<2x1x32xf32, #tpu.memory_space<vmem>>, %arg41: memref<32x128xbf16, #tpu.memory_space<vmem>>, %arg42: memref<1x128xf32, #tpu.memory_space<vmem>>, %arg43: memref<1x8x128xf32, #tpu.memory_space<vmem>>) attributes {dimension_semantics = [#tpu.dimension_semantics<parallel>], iteration_bounds = array<i64: 2>, scalar_prefetch = 0 : i64, scratch_operands = 0 : i64, tpu.core_type = #tpu.core_type<tc>, window_params = [{transform_indices = @transform_0, window_bounds = array<i64: 1, 18, 16>}, {transform_indices = @transform_1, window_bounds = array<i64: 1, 8, 32>}, {transform_indices = @transform_2, window_bounds = array<i64: 1, 128, 16>}, {transform_indices = @transform_3, window_bounds = array<i64: 1, 64, 8>}, {transform_indices = @transform_4, window_bounds = array<i64: 1, 64, 16>}, {pipeline_mode = #tpu.pipeline_mode<synchronous>, transform_indices = @transform_5, window_bounds = array<i64: 16, 32>}, {pipeline_mode = #tpu.pipeline_mode<synchronous>, transform_indices = @transform_6, window_bounds = array<i64: 48, 32>}, {pipeline_mode = #tpu.pipeline_mode<synchronous>, transform_indices = @transform_7, window_bounds = array<i64: 1, 32>}, {pipeline_mode = #tpu.pipeline_mode<synchronous>, transform_indices = @transform_8, window_bounds = array<i64: 2, 32, 96>}, {pipeline_mode = #tpu.pipeline_mode<synchronous>, transform_indices = @transform_9, window_bounds = array<i64: 2, 1, 96>}, {pipeline_mode = #tpu.pipeline_mode<synchronous>, transform_indices = @transform_10, window_bounds = array<i64: 2, 32, 32>}, {pipeline_mode = #tpu.pipeline_mode<synchronous>, transform_indices = @transform_11, window_bounds = array<i64: 2, 1, 32>}, {pipeline_mode = #tpu.pipeline_mode<synchronous>, transform_indices = @transform_12, window_bounds = array<i64: 2, 1, 32>}, {pipeline_mode = #tpu.pipeline_mode<synchronous>, transform_indices = @transform_13, window_bounds = array<i64: 2, 1, 32>}, {pipeline_mode = #tpu.pipeline_mode<synchronous>, transform_indices = @transform_14, window_bounds = array<i64: 2, 32, 64>}, {pipeline_mode = #tpu.pipeline_mode<synchronous>, transform_indices = @transform_15, window_bounds = array<i64: 2, 1, 64>}, {pipeline_mode = #tpu.pipeline_mode<synchronous>, transform_indices = @transform_16, window_bounds = array<i64: 2, 64, 32>}, {pipeline_mode = #tpu.pipeline_mode<synchronous>, transform_indices = @transform_17, window_bounds = array<i64: 2, 1, 32>}, {pipeline_mode = #tpu.pipeline_mode<synchronous>, transform_indices = @transform_18, window_bounds = array<i64: 2, 1, 32>}, {pipeline_mode = #tpu.pipeline_mode<synchronous>, transform_indices = @transform_19, window_bounds = array<i64: 2, 1, 32>}, {pipeline_mode = #tpu.pipeline_mode<synchronous>, transform_indices = @transform_20, window_bounds = array<i64: 2, 32, 96>}, {pipeline_mode = #tpu.pipeline_mode<synchronous>, transform_indices = @transform_21, window_bounds = array<i64: 2, 1, 96>}, {pipeline_mode = #tpu.pipeline_mode<synchronous>, transform_indices = @transform_22, window_bounds = array<i64: 2, 32, 32>}, {pipeline_mode = #tpu.pipeline_mode<synchronous>, transform_indices = @transform_23, window_bounds = array<i64: 2, 1, 32>}, {pipeline_mode = #tpu.pipeline_mode<synchronous>, transform_indices = @transform_24, window_bounds = array<i64: 2, 1, 32>}, {pipeline_mode = #tpu.pipeline_mode<synchronous>, transform_indices = @transform_25, window_bounds = array<i64: 2, 1, 32>}, {pipeline_mode = #tpu.pipeline_mode<synchronous>, transform_indices = @transform_26, window_bounds = array<i64: 2, 32, 32>}, {pipeline_mode = #tpu.pipeline_mode<synchronous>, transform_indices = @transform_27, window_bounds = array<i64: 2, 1, 32>}, {pipeline_mode = #tpu.pipeline_mode<synchronous>, transform_indices = @transform_28, window_bounds = array<i64: 2, 32, 64>}, {pipeline_mode = #tpu.pipeline_mode<synchronous>, transform_indices = @transform_29, window_bounds = array<i64: 2, 1, 64>}, {pipeline_mode = #tpu.pipeline_mode<synchronous>, transform_indices = @transform_30, window_bounds = array<i64: 2, 32, 32>}, {pipeline_mode = #tpu.pipeline_mode<synchronous>, transform_indices = @transform_31, window_bounds = array<i64: 2, 1, 32>}, {pipeline_mode = #tpu.pipeline_mode<synchronous>, transform_indices = @transform_32, window_bounds = array<i64: 2, 1, 32>}, {pipeline_mode = #tpu.pipeline_mode<synchronous>, transform_indices = @transform_33, window_bounds = array<i64: 2, 1, 32>}, {pipeline_mode = #tpu.pipeline_mode<synchronous>, transform_indices = @transform_34, window_bounds = array<i64: 2, 32, 64>}, {pipeline_mode = #tpu.pipeline_mode<synchronous>, transform_indices = @transform_35, window_bounds = array<i64: 2, 1, 64>}, {pipeline_mode = #tpu.pipeline_mode<synchronous>, transform_indices = @transform_36, window_bounds = array<i64: 2, 64, 32>}, {pipeline_mode = #tpu.pipeline_mode<synchronous>, transform_indices = @transform_37, window_bounds = array<i64: 2, 1, 32>}, {pipeline_mode = #tpu.pipeline_mode<synchronous>, transform_indices = @transform_38, window_bounds = array<i64: 2, 1, 32>}, {pipeline_mode = #tpu.pipeline_mode<synchronous>, transform_indices = @transform_39, window_bounds = array<i64: 2, 1, 32>}, {pipeline_mode = #tpu.pipeline_mode<synchronous>, transform_indices = @transform_40, window_bounds = array<i64: 32, 128>}, {pipeline_mode = #tpu.pipeline_mode<synchronous>, transform_indices = @transform_41, window_bounds = array<i64: 1, 128>}, {transform_indices = @transform_42, window_bounds = array<i64: 1, 8, 128>}]} {
    %0 = tpu.iota {dimensions = array<i32: 1>} : vector<1x32xi32>
    %c0_i32 = arith.constant 0 : i32
    %1 = vector.broadcast %c0_i32 : i32 to vector<1x32xi32>
    %2 = arith.cmpi sge, %0, %1 : vector<1x32xi32>
    %c4_i32 = arith.constant 4 : i32
    %3 = vector.broadcast %c4_i32 : i32 to vector<1x32xi32>
    %4 = arith.cmpi slt, %0, %3 : vector<1x32xi32>
    %5 = arith.andi %2, %4 : vector<1x32xi1>
    %6 = arith.extui %5 : vector<1x32xi1> to vector<1x32xi32>
    %7 = arith.sitofp %6 : vector<1x32xi32> to vector<1x32xf32>
    %c4_i32_0 = arith.constant 4 : i32
    %8 = vector.broadcast %c4_i32_0 : i32 to vector<1x32xi32>
    %9 = arith.cmpi sge, %0, %8 : vector<1x32xi32>
    %c8_i32 = arith.constant 8 : i32
    %10 = vector.broadcast %c8_i32 : i32 to vector<1x32xi32>
    %11 = arith.cmpi slt, %0, %10 : vector<1x32xi32>
    %12 = arith.andi %9, %11 : vector<1x32xi1>
    %13 = arith.extui %12 : vector<1x32xi1> to vector<1x32xi32>
    %14 = arith.sitofp %13 : vector<1x32xi32> to vector<1x32xf32>
    %c8_i32_1 = arith.constant 8 : i32
    %15 = vector.broadcast %c8_i32_1 : i32 to vector<1x32xi32>
    %16 = arith.cmpi sge, %0, %15 : vector<1x32xi32>
    %c12_i32 = arith.constant 12 : i32
    %17 = vector.broadcast %c12_i32 : i32 to vector<1x32xi32>
    %18 = arith.cmpi slt, %0, %17 : vector<1x32xi32>
    %19 = arith.andi %16, %18 : vector<1x32xi1>
    %20 = arith.extui %19 : vector<1x32xi1> to vector<1x32xi32>
    %21 = arith.sitofp %20 : vector<1x32xi32> to vector<1x32xf32>
    %c12_i32_2 = arith.constant 12 : i32
    %22 = vector.broadcast %c12_i32_2 : i32 to vector<1x32xi32>
    %23 = arith.cmpi sge, %0, %22 : vector<1x32xi32>
    %c16_i32 = arith.constant 16 : i32
    %24 = vector.broadcast %c16_i32 : i32 to vector<1x32xi32>
    %25 = arith.cmpi slt, %0, %24 : vector<1x32xi32>
    %26 = arith.andi %23, %25 : vector<1x32xi1>
    %27 = arith.extui %26 : vector<1x32xi1> to vector<1x32xi32>
    %28 = arith.sitofp %27 : vector<1x32xi32> to vector<1x32xf32>
    %c16_i32_3 = arith.constant 16 : i32
    %29 = vector.broadcast %c16_i32_3 : i32 to vector<1x32xi32>
    %30 = arith.cmpi sge, %0, %29 : vector<1x32xi32>
    %c20_i32 = arith.constant 20 : i32
    %31 = vector.broadcast %c20_i32 : i32 to vector<1x32xi32>
    %32 = arith.cmpi slt, %0, %31 : vector<1x32xi32>
    %33 = arith.andi %30, %32 : vector<1x32xi1>
    %34 = arith.extui %33 : vector<1x32xi1> to vector<1x32xi32>
    %35 = arith.sitofp %34 : vector<1x32xi32> to vector<1x32xf32>
    %c20_i32_4 = arith.constant 20 : i32
    %36 = vector.broadcast %c20_i32_4 : i32 to vector<1x32xi32>
    %37 = arith.cmpi sge, %0, %36 : vector<1x32xi32>
    %c24_i32 = arith.constant 24 : i32
    %38 = vector.broadcast %c24_i32 : i32 to vector<1x32xi32>
    %39 = arith.cmpi slt, %0, %38 : vector<1x32xi32>
    %40 = arith.andi %37, %39 : vector<1x32xi1>
    %41 = arith.extui %40 : vector<1x32xi1> to vector<1x32xi32>
    %42 = arith.sitofp %41 : vector<1x32xi32> to vector<1x32xf32>
    %c24_i32_5 = arith.constant 24 : i32
    %43 = vector.broadcast %c24_i32_5 : i32 to vector<1x32xi32>
    %44 = arith.cmpi sge, %0, %43 : vector<1x32xi32>
    %c28_i32 = arith.constant 28 : i32
    %45 = vector.broadcast %c28_i32 : i32 to vector<1x32xi32>
    %46 = arith.cmpi slt, %0, %45 : vector<1x32xi32>
    %47 = arith.andi %44, %46 : vector<1x32xi1>
    %48 = arith.extui %47 : vector<1x32xi1> to vector<1x32xi32>
    %49 = arith.sitofp %48 : vector<1x32xi32> to vector<1x32xf32>
    %c28_i32_6 = arith.constant 28 : i32
    %50 = vector.broadcast %c28_i32_6 : i32 to vector<1x32xi32>
    %51 = arith.cmpi sge, %0, %50 : vector<1x32xi32>
    %c32_i32 = arith.constant 32 : i32
    %52 = vector.broadcast %c32_i32 : i32 to vector<1x32xi32>
    %53 = arith.cmpi slt, %0, %52 : vector<1x32xi32>
    %54 = arith.andi %51, %53 : vector<1x32xi1>
    %55 = arith.extui %54 : vector<1x32xi1> to vector<1x32xi32>
    %56 = arith.sitofp %55 : vector<1x32xi32> to vector<1x32xf32>
    %c0 = arith.constant 0 : index
    %c0_7 = arith.constant 0 : index
    %c0_8 = arith.constant 0 : index
    %57 = vector.load %arg1[%c0, %c0_7, %c0_8] : memref<1x18x16xf32, #tpu.memory_space<vmem>>, vector<1x18x16xf32>
    %58 = vector.shape_cast %57 : vector<1x18x16xf32> to vector<18x16xf32>
    %c0_9 = arith.constant 0 : index
    %c0_10 = arith.constant 0 : index
    %59 = vector.load %arg8[%c0_9, %c0_10] : memref<1x32xf32, #tpu.memory_space<vmem>>, vector<1x32xf32>
    %c0_11 = arith.constant 0 : index
    %c0_12 = arith.constant 0 : index
    %60 = vector.load %arg6[%c0_11, %c0_12] : memref<16x32xf32, #tpu.memory_space<vmem>>, vector<16x32xf32>
    %61 = vector.broadcast %59 : vector<1x32xf32> to vector<16x32xf32>
    %62 = arith.addf %61, %60 : vector<16x32xf32>
    %63 = vector.extract_strided_slice %58 {offsets = [0, 0], sizes = [16, 16], strides = [1, 1]} : vector<18x16xf32> to vector<16x16xf32>
    %c0_13 = arith.constant 0 : index
    %c0_14 = arith.constant 0 : index
    %64 = vector.load %arg7[%c0_13, %c0_14] : memref<48x32xbf16, #tpu.memory_space<vmem>>, vector<16x32xbf16>
    %65 = arith.truncf %63 : vector<16x16xf32> to vector<16x16xbf16>
    %cst = arith.constant dense<0.000000e+00> : vector<16x32xf32>
    %66 = tpu.matmul %65, %64, %cst {dimension_numbers = #tpu.dot_dimension_numbers<[1], [0], [0], [1], [0, 0, 1, 1], [], []>} : vector<16x16xbf16>, vector<16x32xbf16>, vector<16x32xf32> -> vector<16x32xf32>
    %67 = arith.addf %62, %66 : vector<16x32xf32>
    %68 = vector.extract_strided_slice %58 {offsets = [1, 0], sizes = [16, 16], strides = [1, 1]} : vector<18x16xf32> to vector<16x16xf32>
    %c16 = arith.constant 16 : index
    %c0_15 = arith.constant 0 : index
    %69 = vector.load %arg7[%c16, %c0_15] : memref<48x32xbf16, #tpu.memory_space<vmem>>, vector<16x32xbf16>
    %70 = arith.truncf %68 : vector<16x16xf32> to vector<16x16xbf16>
    %cst_16 = arith.constant dense<0.000000e+00> : vector<16x32xf32>
    %71 = tpu.matmul %70, %69, %cst_16 {dimension_numbers = #tpu.dot_dimension_numbers<[1], [0], [0], [1], [0, 0, 1, 1], [], []>} : vector<16x16xbf16>, vector<16x32xbf16>, vector<16x32xf32> -> vector<16x32xf32>
    %72 = arith.addf %67, %71 : vector<16x32xf32>
    %73 = vector.extract_strided_slice %58 {offsets = [2, 0], sizes = [16, 16], strides = [1, 1]} : vector<18x16xf32> to vector<16x16xf32>
    %c32 = arith.constant 32 : index
    %c0_17 = arith.constant 0 : index
    %74 = vector.load %arg7[%c32, %c0_17] : memref<48x32xbf16, #tpu.memory_space<vmem>>, vector<16x32xbf16>
    %75 = arith.truncf %73 : vector<16x16xf32> to vector<16x16xbf16>
    %cst_18 = arith.constant dense<0.000000e+00> : vector<16x32xf32>
    %76 = tpu.matmul %75, %74, %cst_18 {dimension_numbers = #tpu.dot_dimension_numbers<[1], [0], [0], [1], [0, 0, 1, 1], [], []>} : vector<16x16xbf16>, vector<16x32xbf16>, vector<16x32xf32> -> vector<16x32xf32>
    %77 = arith.addf %72, %76 : vector<16x32xf32>
    %c0_19 = arith.constant 0 : index
    %c0_20 = arith.constant 0 : index
    %c0_21 = arith.constant 0 : index
    %78 = vector.load %arg3[%c0_19, %c0_20, %c0_21] : memref<1x128x16xf32, #tpu.memory_space<vmem>>, vector<1x128x16xf32>
    %79 = vector.shape_cast %78 : vector<1x128x16xf32> to vector<128x16xf32>
    %c0_22 = arith.constant 0 : index
    %c0_23 = arith.constant 0 : index
    %c0_24 = arith.constant 0 : index
    %80 = vector.load %arg9[%c0_22, %c0_23, %c0_24] : memref<2x32x96xbf16, #tpu.memory_space<vmem>>, vector<1x32x96xbf16>
    %81 = vector.shape_cast %80 : vector<1x32x96xbf16> to vector<32x96xbf16>
    %82 = arith.truncf %77 : vector<16x32xf32> to vector<16x32xbf16>
    %cst_25 = arith.constant dense<0.000000e+00> : vector<16x96xf32>
    %83 = tpu.matmul %82, %81, %cst_25 {dimension_numbers = #tpu.dot_dimension_numbers<[1], [0], [0], [1], [0, 0, 1, 1], [], []>} : vector<16x32xbf16>, vector<32x96xbf16>, vector<16x96xf32> -> vector<16x96xf32>
    %c0_26 = arith.constant 0 : index
    %c0_27 = arith.constant 0 : index
    %c0_28 = arith.constant 0 : index
    %84 = vector.load %arg10[%c0_26, %c0_27, %c0_28] : memref<2x1x96xf32, #tpu.memory_space<vmem>>, vector<1x1x96xf32>
    %85 = vector.shape_cast %84 : vector<1x1x96xf32> to vector<1x96xf32>
    %86 = vector.broadcast %85 : vector<1x96xf32> to vector<16x96xf32>
    %87 = arith.addf %83, %86 : vector<16x96xf32>
    %88 = vector.extract_strided_slice %87 {offsets = [0, 0], sizes = [16, 32], strides = [1, 1]} : vector<16x96xf32> to vector<16x32xf32>
    %89 = vector.extract_strided_slice %87 {offsets = [0, 32], sizes = [16, 32], strides = [1, 1]} : vector<16x96xf32> to vector<16x32xf32>
    %90 = vector.extract_strided_slice %87 {offsets = [0, 64], sizes = [16, 32], strides = [1, 1]} : vector<16x96xf32> to vector<16x32xf32>
    %91 = vector.broadcast %7 : vector<1x32xf32> to vector<16x32xf32>
    %92 = arith.mulf %88, %91 : vector<16x32xf32>
    %93 = vector.broadcast %14 : vector<1x32xf32> to vector<16x32xf32>
    %94 = arith.mulf %88, %93 : vector<16x32xf32>
    %95 = vector.broadcast %21 : vector<1x32xf32> to vector<16x32xf32>
    %96 = arith.mulf %88, %95 : vector<16x32xf32>
    %97 = vector.broadcast %28 : vector<1x32xf32> to vector<16x32xf32>
    %98 = arith.mulf %88, %97 : vector<16x32xf32>
    %99 = vector.broadcast %35 : vector<1x32xf32> to vector<16x32xf32>
    %100 = arith.mulf %88, %99 : vector<16x32xf32>
    %101 = vector.broadcast %42 : vector<1x32xf32> to vector<16x32xf32>
    %102 = arith.mulf %88, %101 : vector<16x32xf32>
    %103 = vector.broadcast %49 : vector<1x32xf32> to vector<16x32xf32>
    %104 = arith.mulf %88, %103 : vector<16x32xf32>
    %105 = vector.broadcast %56 : vector<1x32xf32> to vector<16x32xf32>
    %106 = arith.mulf %88, %105 : vector<16x32xf32>
    %107 = tpu.concatenate %92, %94, %96, %98, %100, %102, %104, %106 in 0 : vector<16x32xf32>, vector<16x32xf32>, vector<16x32xf32>, vector<16x32xf32>, vector<16x32xf32>, vector<16x32xf32>, vector<16x32xf32>, vector<16x32xf32> -> vector<128x32xf32>
    %108 = arith.truncf %107 : vector<128x32xf32> to vector<128x32xbf16>
    %109 = arith.truncf %89 : vector<16x32xf32> to vector<16x32xbf16>
    %cst_29 = arith.constant dense<0.000000e+00> : vector<128x16xf32>
    %110 = tpu.matmul %108, %109, %cst_29 {dimension_numbers = #tpu.dot_dimension_numbers<[1], [1], [0], [0], [0, 0, 1, 0], [], []>} : vector<128x32xbf16>, vector<16x32xbf16>, vector<128x16xf32> -> vector<128x16xf32>
    %cst_30 = arith.constant 5.000000e-01 : f32
    %111 = vector.broadcast %cst_30 : f32 to vector<128x16xf32>
    %112 = arith.mulf %110, %111 : vector<128x16xf32>
    %113 = arith.addf %112, %79 : vector<128x16xf32>
    %cst_31 = arith.constant dense<0xFF800000> : vector<128xf32>
    %114 = vector.multi_reduction <maximumf>, %113, %cst_31 [1] : vector<128x16xf32> to vector<128xf32>
    %115 = vector.shape_cast %114 : vector<128xf32> to vector<128x1xf32>
    %116 = vector.broadcast %115 : vector<128x1xf32> to vector<128x16xf32>
    %117 = arith.subf %113, %116 : vector<128x16xf32>
    %118 = math.exp %117 : vector<128x16xf32>
    %cst_32 = arith.constant dense<0.000000e+00> : vector<128xf32>
    %119 = vector.multi_reduction <add>, %118, %cst_32 [1] : vector<128x16xf32> to vector<128xf32>
    %120 = vector.shape_cast %119 : vector<128xf32> to vector<128x1xf32>
    %121 = arith.truncf %118 : vector<128x16xf32> to vector<128x16xbf16>
    %122 = arith.truncf %90 : vector<16x32xf32> to vector<16x32xbf16>
    %cst_33 = arith.constant dense<0.000000e+00> : vector<128x32xf32>
    %123 = tpu.matmul %121, %122, %cst_33 {dimension_numbers = #tpu.dot_dimension_numbers<[1], [0], [0], [1], [0, 0, 1, 1], [], []>} : vector<128x16xbf16>, vector<16x32xbf16>, vector<128x32xf32> -> vector<128x32xf32>
    %124 = vector.broadcast %120 : vector<128x1xf32> to vector<128x32xf32>
    %125 = arith.divf %123, %124 : vector<128x32xf32>
    %126 = vector.extract_strided_slice %125 {offsets = [0, 0], sizes = [16, 32], strides = [1, 1]} : vector<128x32xf32> to vector<16x32xf32>
    %127 = vector.broadcast %7 : vector<1x32xf32> to vector<16x32xf32>
    %128 = arith.mulf %126, %127 : vector<16x32xf32>
    %cst_34 = arith.constant 0.000000e+00 : f32
    %129 = vector.broadcast %cst_34 : f32 to vector<16x32xf32>
    %130 = arith.addf %129, %128 : vector<16x32xf32>
    %131 = vector.extract_strided_slice %125 {offsets = [16, 0], sizes = [16, 32], strides = [1, 1]} : vector<128x32xf32> to vector<16x32xf32>
    %132 = vector.broadcast %14 : vector<1x32xf32> to vector<16x32xf32>
    %133 = arith.mulf %131, %132 : vector<16x32xf32>
    %134 = arith.addf %130, %133 : vector<16x32xf32>
    %135 = vector.extract_strided_slice %125 {offsets = [32, 0], sizes = [16, 32], strides = [1, 1]} : vector<128x32xf32> to vector<16x32xf32>
    %136 = vector.broadcast %21 : vector<1x32xf32> to vector<16x32xf32>
    %137 = arith.mulf %135, %136 : vector<16x32xf32>
    %138 = arith.addf %134, %137 : vector<16x32xf32>
    %139 = vector.extract_strided_slice %125 {offsets = [48, 0], sizes = [16, 32], strides = [1, 1]} : vector<128x32xf32> to vector<16x32xf32>
    %140 = vector.broadcast %28 : vector<1x32xf32> to vector<16x32xf32>
    %141 = arith.mulf %139, %140 : vector<16x32xf32>
    %142 = arith.addf %138, %141 : vector<16x32xf32>
    %143 = vector.extract_strided_slice %125 {offsets = [64, 0], sizes = [16, 32], strides = [1, 1]} : vector<128x32xf32> to vector<16x32xf32>
    %144 = vector.broadcast %35 : vector<1x32xf32> to vector<16x32xf32>
    %145 = arith.mulf %143, %144 : vector<16x32xf32>
    %146 = arith.addf %142, %145 : vector<16x32xf32>
    %147 = vector.extract_strided_slice %125 {offsets = [80, 0], sizes = [16, 32], strides = [1, 1]} : vector<128x32xf32> to vector<16x32xf32>
    %148 = vector.broadcast %42 : vector<1x32xf32> to vector<16x32xf32>
    %149 = arith.mulf %147, %148 : vector<16x32xf32>
    %150 = arith.addf %146, %149 : vector<16x32xf32>
    %151 = vector.extract_strided_slice %125 {offsets = [96, 0], sizes = [16, 32], strides = [1, 1]} : vector<128x32xf32> to vector<16x32xf32>
    %152 = vector.broadcast %49 : vector<1x32xf32> to vector<16x32xf32>
    %153 = arith.mulf %151, %152 : vector<16x32xf32>
    %154 = arith.addf %150, %153 : vector<16x32xf32>
    %155 = vector.extract_strided_slice %125 {offsets = [112, 0], sizes = [16, 32], strides = [1, 1]} : vector<128x32xf32> to vector<16x32xf32>
    %156 = vector.broadcast %56 : vector<1x32xf32> to vector<16x32xf32>
    %157 = arith.mulf %155, %156 : vector<16x32xf32>
    %158 = arith.addf %154, %157 : vector<16x32xf32>
    %c0_35 = arith.constant 0 : index
    %c0_36 = arith.constant 0 : index
    %c0_37 = arith.constant 0 : index
    %159 = vector.load %arg11[%c0_35, %c0_36, %c0_37] : memref<2x32x32xbf16, #tpu.memory_space<vmem>>, vector<1x32x32xbf16>
    %160 = vector.shape_cast %159 : vector<1x32x32xbf16> to vector<32x32xbf16>
    %161 = arith.truncf %158 : vector<16x32xf32> to vector<16x32xbf16>
    %cst_38 = arith.constant dense<0.000000e+00> : vector<16x32xf32>
    %162 = tpu.matmul %161, %160, %cst_38 {dimension_numbers = #tpu.dot_dimension_numbers<[1], [0], [0], [1], [0, 0, 1, 1], [], []>} : vector<16x32xbf16>, vector<32x32xbf16>, vector<16x32xf32> -> vector<16x32xf32>
    %163 = arith.addf %77, %162 : vector<16x32xf32>
    %c0_39 = arith.constant 0 : index
    %c0_40 = arith.constant 0 : index
    %c0_41 = arith.constant 0 : index
    %164 = vector.load %arg12[%c0_39, %c0_40, %c0_41] : memref<2x1x32xf32, #tpu.memory_space<vmem>>, vector<1x1x32xf32>
    %165 = vector.shape_cast %164 : vector<1x1x32xf32> to vector<1x32xf32>
    %166 = vector.broadcast %165 : vector<1x32xf32> to vector<16x32xf32>
    %167 = arith.addf %163, %166 : vector<16x32xf32>
    %c0_42 = arith.constant 0 : index
    %c0_43 = arith.constant 0 : index
    %c0_44 = arith.constant 0 : index
    %168 = vector.load %arg13[%c0_42, %c0_43, %c0_44] : memref<2x1x32xf32, #tpu.memory_space<vmem>>, vector<1x1x32xf32>
    %169 = vector.shape_cast %168 : vector<1x1x32xf32> to vector<1x32xf32>
    %c0_45 = arith.constant 0 : index
    %c0_46 = arith.constant 0 : index
    %c0_47 = arith.constant 0 : index
    %170 = vector.load %arg14[%c0_45, %c0_46, %c0_47] : memref<2x1x32xf32, #tpu.memory_space<vmem>>, vector<1x1x32xf32>
    %171 = vector.shape_cast %170 : vector<1x1x32xf32> to vector<1x32xf32>
    %cst_48 = arith.constant dense<0.000000e+00> : vector<16xf32>
    %172 = vector.multi_reduction <add>, %167, %cst_48 [1] : vector<16x32xf32> to vector<16xf32>
    %173 = vector.shape_cast %172 : vector<16xf32> to vector<16x1xf32>
    %cst_49 = arith.constant 3.200000e+01 : f32
    %174 = vector.broadcast %cst_49 : f32 to vector<16x1xf32>
    %175 = arith.divf %173, %174 : vector<16x1xf32>
    %176 = vector.broadcast %175 : vector<16x1xf32> to vector<16x32xf32>
    %177 = arith.subf %167, %176 : vector<16x32xf32>
    %178 = arith.mulf %177, %177 : vector<16x32xf32>
    %cst_50 = arith.constant dense<0.000000e+00> : vector<16xf32>
    %179 = vector.multi_reduction <add>, %178, %cst_50 [1] : vector<16x32xf32> to vector<16xf32>
    %180 = vector.shape_cast %179 : vector<16xf32> to vector<16x1xf32>
    %cst_51 = arith.constant 3.200000e+01 : f32
    %181 = vector.broadcast %cst_51 : f32 to vector<16x1xf32>
    %182 = arith.divf %180, %181 : vector<16x1xf32>
    %cst_52 = arith.constant 9.99999974E-6 : f32
    %183 = vector.broadcast %cst_52 : f32 to vector<16x1xf32>
    %184 = arith.addf %182, %183 : vector<16x1xf32>
    %185 = math.rsqrt %184 : vector<16x1xf32>
    %186 = vector.broadcast %185 : vector<16x1xf32> to vector<16x32xf32>
    %187 = arith.mulf %177, %186 : vector<16x32xf32>
    %188 = vector.broadcast %169 : vector<1x32xf32> to vector<16x32xf32>
    %189 = arith.mulf %187, %188 : vector<16x32xf32>
    %190 = vector.broadcast %171 : vector<1x32xf32> to vector<16x32xf32>
    %191 = arith.addf %189, %190 : vector<16x32xf32>
    %c0_53 = arith.constant 0 : index
    %c0_54 = arith.constant 0 : index
    %c0_55 = arith.constant 0 : index
    %192 = vector.load %arg15[%c0_53, %c0_54, %c0_55] : memref<2x32x64xbf16, #tpu.memory_space<vmem>>, vector<1x32x64xbf16>
    %193 = vector.shape_cast %192 : vector<1x32x64xbf16> to vector<32x64xbf16>
    %194 = arith.truncf %191 : vector<16x32xf32> to vector<16x32xbf16>
    %cst_56 = arith.constant dense<0.000000e+00> : vector<16x64xf32>
    %195 = tpu.matmul %194, %193, %cst_56 {dimension_numbers = #tpu.dot_dimension_numbers<[1], [0], [0], [1], [0, 0, 1, 1], [], []>} : vector<16x32xbf16>, vector<32x64xbf16>, vector<16x64xf32> -> vector<16x64xf32>
    %c0_57 = arith.constant 0 : index
    %c0_58 = arith.constant 0 : index
    %c0_59 = arith.constant 0 : index
    %196 = vector.load %arg16[%c0_57, %c0_58, %c0_59] : memref<2x1x64xf32, #tpu.memory_space<vmem>>, vector<1x1x64xf32>
    %197 = vector.shape_cast %196 : vector<1x1x64xf32> to vector<1x64xf32>
    %198 = vector.broadcast %197 : vector<1x64xf32> to vector<16x64xf32>
    %199 = arith.addf %195, %198 : vector<16x64xf32>
    %cst_60 = arith.constant 0.000000e+00 : f32
    %200 = vector.broadcast %cst_60 : f32 to vector<16x64xf32>
    %201 = arith.maximumf %199, %200 : vector<16x64xf32>
    %c0_61 = arith.constant 0 : index
    %c0_62 = arith.constant 0 : index
    %c0_63 = arith.constant 0 : index
    %202 = vector.load %arg17[%c0_61, %c0_62, %c0_63] : memref<2x64x32xbf16, #tpu.memory_space<vmem>>, vector<1x64x32xbf16>
    %203 = vector.shape_cast %202 : vector<1x64x32xbf16> to vector<64x32xbf16>
    %204 = arith.truncf %201 : vector<16x64xf32> to vector<16x64xbf16>
    %cst_64 = arith.constant dense<0.000000e+00> : vector<16x32xf32>
    %205 = tpu.matmul %204, %203, %cst_64 {dimension_numbers = #tpu.dot_dimension_numbers<[1], [0], [0], [1], [0, 0, 1, 1], [], []>} : vector<16x64xbf16>, vector<64x32xbf16>, vector<16x32xf32> -> vector<16x32xf32>
    %c0_65 = arith.constant 0 : index
    %c0_66 = arith.constant 0 : index
    %c0_67 = arith.constant 0 : index
    %206 = vector.load %arg18[%c0_65, %c0_66, %c0_67] : memref<2x1x32xf32, #tpu.memory_space<vmem>>, vector<1x1x32xf32>
    %207 = vector.shape_cast %206 : vector<1x1x32xf32> to vector<1x32xf32>
    %208 = vector.broadcast %207 : vector<1x32xf32> to vector<16x32xf32>
    %209 = arith.addf %205, %208 : vector<16x32xf32>
    %210 = arith.addf %191, %209 : vector<16x32xf32>
    %c0_68 = arith.constant 0 : index
    %c0_69 = arith.constant 0 : index
    %c0_70 = arith.constant 0 : index
    %211 = vector.load %arg19[%c0_68, %c0_69, %c0_70] : memref<2x1x32xf32, #tpu.memory_space<vmem>>, vector<1x1x32xf32>
    %212 = vector.shape_cast %211 : vector<1x1x32xf32> to vector<1x32xf32>
    %c0_71 = arith.constant 0 : index
    %c0_72 = arith.constant 0 : index
    %c0_73 = arith.constant 0 : index
    %213 = vector.load %arg20[%c0_71, %c0_72, %c0_73] : memref<2x1x32xf32, #tpu.memory_space<vmem>>, vector<1x1x32xf32>
    %214 = vector.shape_cast %213 : vector<1x1x32xf32> to vector<1x32xf32>
    %cst_74 = arith.constant dense<0.000000e+00> : vector<16xf32>
    %215 = vector.multi_reduction <add>, %210, %cst_74 [1] : vector<16x32xf32> to vector<16xf32>
    %216 = vector.shape_cast %215 : vector<16xf32> to vector<16x1xf32>
    %cst_75 = arith.constant 3.200000e+01 : f32
    %217 = vector.broadcast %cst_75 : f32 to vector<16x1xf32>
    %218 = arith.divf %216, %217 : vector<16x1xf32>
    %219 = vector.broadcast %218 : vector<16x1xf32> to vector<16x32xf32>
    %220 = arith.subf %210, %219 : vector<16x32xf32>
    %221 = arith.mulf %220, %220 : vector<16x32xf32>
    %cst_76 = arith.constant dense<0.000000e+00> : vector<16xf32>
    %222 = vector.multi_reduction <add>, %221, %cst_76 [1] : vector<16x32xf32> to vector<16xf32>
    %223 = vector.shape_cast %222 : vector<16xf32> to vector<16x1xf32>
    %cst_77 = arith.constant 3.200000e+01 : f32
    %224 = vector.broadcast %cst_77 : f32 to vector<16x1xf32>
    %225 = arith.divf %223, %224 : vector<16x1xf32>
    %cst_78 = arith.constant 9.99999974E-6 : f32
    %226 = vector.broadcast %cst_78 : f32 to vector<16x1xf32>
    %227 = arith.addf %225, %226 : vector<16x1xf32>
    %228 = math.rsqrt %227 : vector<16x1xf32>
    %229 = vector.broadcast %228 : vector<16x1xf32> to vector<16x32xf32>
    %230 = arith.mulf %220, %229 : vector<16x32xf32>
    %231 = vector.broadcast %212 : vector<1x32xf32> to vector<16x32xf32>
    %232 = arith.mulf %230, %231 : vector<16x32xf32>
    %233 = vector.broadcast %214 : vector<1x32xf32> to vector<16x32xf32>
    %234 = arith.addf %232, %233 : vector<16x32xf32>
    %c1 = arith.constant 1 : index
    %c0_79 = arith.constant 0 : index
    %c0_80 = arith.constant 0 : index
    %235 = vector.load %arg9[%c1, %c0_79, %c0_80] : memref<2x32x96xbf16, #tpu.memory_space<vmem>>, vector<1x32x96xbf16>
    %236 = vector.shape_cast %235 : vector<1x32x96xbf16> to vector<32x96xbf16>
    %237 = arith.truncf %234 : vector<16x32xf32> to vector<16x32xbf16>
    %cst_81 = arith.constant dense<0.000000e+00> : vector<16x96xf32>
    %238 = tpu.matmul %237, %236, %cst_81 {dimension_numbers = #tpu.dot_dimension_numbers<[1], [0], [0], [1], [0, 0, 1, 1], [], []>} : vector<16x32xbf16>, vector<32x96xbf16>, vector<16x96xf32> -> vector<16x96xf32>
    %c1_82 = arith.constant 1 : index
    %c0_83 = arith.constant 0 : index
    %c0_84 = arith.constant 0 : index
    %239 = vector.load %arg10[%c1_82, %c0_83, %c0_84] : memref<2x1x96xf32, #tpu.memory_space<vmem>>, vector<1x1x96xf32>
    %240 = vector.shape_cast %239 : vector<1x1x96xf32> to vector<1x96xf32>
    %241 = vector.broadcast %240 : vector<1x96xf32> to vector<16x96xf32>
    %242 = arith.addf %238, %241 : vector<16x96xf32>
    %243 = vector.extract_strided_slice %242 {offsets = [0, 0], sizes = [16, 32], strides = [1, 1]} : vector<16x96xf32> to vector<16x32xf32>
    %244 = vector.extract_strided_slice %242 {offsets = [0, 32], sizes = [16, 32], strides = [1, 1]} : vector<16x96xf32> to vector<16x32xf32>
    %245 = vector.extract_strided_slice %242 {offsets = [0, 64], sizes = [16, 32], strides = [1, 1]} : vector<16x96xf32> to vector<16x32xf32>
    %246 = vector.broadcast %7 : vector<1x32xf32> to vector<16x32xf32>
    %247 = arith.mulf %243, %246 : vector<16x32xf32>
    %248 = vector.broadcast %14 : vector<1x32xf32> to vector<16x32xf32>
    %249 = arith.mulf %243, %248 : vector<16x32xf32>
    %250 = vector.broadcast %21 : vector<1x32xf32> to vector<16x32xf32>
    %251 = arith.mulf %243, %250 : vector<16x32xf32>
    %252 = vector.broadcast %28 : vector<1x32xf32> to vector<16x32xf32>
    %253 = arith.mulf %243, %252 : vector<16x32xf32>
    %254 = vector.broadcast %35 : vector<1x32xf32> to vector<16x32xf32>
    %255 = arith.mulf %243, %254 : vector<16x32xf32>
    %256 = vector.broadcast %42 : vector<1x32xf32> to vector<16x32xf32>
    %257 = arith.mulf %243, %256 : vector<16x32xf32>
    %258 = vector.broadcast %49 : vector<1x32xf32> to vector<16x32xf32>
    %259 = arith.mulf %243, %258 : vector<16x32xf32>
    %260 = vector.broadcast %56 : vector<1x32xf32> to vector<16x32xf32>
    %261 = arith.mulf %243, %260 : vector<16x32xf32>
    %262 = tpu.concatenate %247, %249, %251, %253, %255, %257, %259, %261 in 0 : vector<16x32xf32>, vector<16x32xf32>, vector<16x32xf32>, vector<16x32xf32>, vector<16x32xf32>, vector<16x32xf32>, vector<16x32xf32>, vector<16x32xf32> -> vector<128x32xf32>
    %263 = arith.truncf %262 : vector<128x32xf32> to vector<128x32xbf16>
    %264 = arith.truncf %244 : vector<16x32xf32> to vector<16x32xbf16>
    %cst_85 = arith.constant dense<0.000000e+00> : vector<128x16xf32>
    %265 = tpu.matmul %263, %264, %cst_85 {dimension_numbers = #tpu.dot_dimension_numbers<[1], [1], [0], [0], [0, 0, 1, 0], [], []>} : vector<128x32xbf16>, vector<16x32xbf16>, vector<128x16xf32> -> vector<128x16xf32>
    %cst_86 = arith.constant 5.000000e-01 : f32
    %266 = vector.broadcast %cst_86 : f32 to vector<128x16xf32>
    %267 = arith.mulf %265, %266 : vector<128x16xf32>
    %268 = arith.addf %267, %79 : vector<128x16xf32>
    %cst_87 = arith.constant dense<0xFF800000> : vector<128xf32>
    %269 = vector.multi_reduction <maximumf>, %268, %cst_87 [1] : vector<128x16xf32> to vector<128xf32>
    %270 = vector.shape_cast %269 : vector<128xf32> to vector<128x1xf32>
    %271 = vector.broadcast %270 : vector<128x1xf32> to vector<128x16xf32>
    %272 = arith.subf %268, %271 : vector<128x16xf32>
    %273 = math.exp %272 : vector<128x16xf32>
    %cst_88 = arith.constant dense<0.000000e+00> : vector<128xf32>
    %274 = vector.multi_reduction <add>, %273, %cst_88 [1] : vector<128x16xf32> to vector<128xf32>
    %275 = vector.shape_cast %274 : vector<128xf32> to vector<128x1xf32>
    %276 = arith.truncf %273 : vector<128x16xf32> to vector<128x16xbf16>
    %277 = arith.truncf %245 : vector<16x32xf32> to vector<16x32xbf16>
    %cst_89 = arith.constant dense<0.000000e+00> : vector<128x32xf32>
    %278 = tpu.matmul %276, %277, %cst_89 {dimension_numbers = #tpu.dot_dimension_numbers<[1], [0], [0], [1], [0, 0, 1, 1], [], []>} : vector<128x16xbf16>, vector<16x32xbf16>, vector<128x32xf32> -> vector<128x32xf32>
    %279 = vector.broadcast %275 : vector<128x1xf32> to vector<128x32xf32>
    %280 = arith.divf %278, %279 : vector<128x32xf32>
    %281 = vector.extract_strided_slice %280 {offsets = [0, 0], sizes = [16, 32], strides = [1, 1]} : vector<128x32xf32> to vector<16x32xf32>
    %282 = vector.broadcast %7 : vector<1x32xf32> to vector<16x32xf32>
    %283 = arith.mulf %281, %282 : vector<16x32xf32>
    %cst_90 = arith.constant 0.000000e+00 : f32
    %284 = vector.broadcast %cst_90 : f32 to vector<16x32xf32>
    %285 = arith.addf %284, %283 : vector<16x32xf32>
    %286 = vector.extract_strided_slice %280 {offsets = [16, 0], sizes = [16, 32], strides = [1, 1]} : vector<128x32xf32> to vector<16x32xf32>
    %287 = vector.broadcast %14 : vector<1x32xf32> to vector<16x32xf32>
    %288 = arith.mulf %286, %287 : vector<16x32xf32>
    %289 = arith.addf %285, %288 : vector<16x32xf32>
    %290 = vector.extract_strided_slice %280 {offsets = [32, 0], sizes = [16, 32], strides = [1, 1]} : vector<128x32xf32> to vector<16x32xf32>
    %291 = vector.broadcast %21 : vector<1x32xf32> to vector<16x32xf32>
    %292 = arith.mulf %290, %291 : vector<16x32xf32>
    %293 = arith.addf %289, %292 : vector<16x32xf32>
    %294 = vector.extract_strided_slice %280 {offsets = [48, 0], sizes = [16, 32], strides = [1, 1]} : vector<128x32xf32> to vector<16x32xf32>
    %295 = vector.broadcast %28 : vector<1x32xf32> to vector<16x32xf32>
    %296 = arith.mulf %294, %295 : vector<16x32xf32>
    %297 = arith.addf %293, %296 : vector<16x32xf32>
    %298 = vector.extract_strided_slice %280 {offsets = [64, 0], sizes = [16, 32], strides = [1, 1]} : vector<128x32xf32> to vector<16x32xf32>
    %299 = vector.broadcast %35 : vector<1x32xf32> to vector<16x32xf32>
    %300 = arith.mulf %298, %299 : vector<16x32xf32>
    %301 = arith.addf %297, %300 : vector<16x32xf32>
    %302 = vector.extract_strided_slice %280 {offsets = [80, 0], sizes = [16, 32], strides = [1, 1]} : vector<128x32xf32> to vector<16x32xf32>
    %303 = vector.broadcast %42 : vector<1x32xf32> to vector<16x32xf32>
    %304 = arith.mulf %302, %303 : vector<16x32xf32>
    %305 = arith.addf %301, %304 : vector<16x32xf32>
    %306 = vector.extract_strided_slice %280 {offsets = [96, 0], sizes = [16, 32], strides = [1, 1]} : vector<128x32xf32> to vector<16x32xf32>
    %307 = vector.broadcast %49 : vector<1x32xf32> to vector<16x32xf32>
    %308 = arith.mulf %306, %307 : vector<16x32xf32>
    %309 = arith.addf %305, %308 : vector<16x32xf32>
    %310 = vector.extract_strided_slice %280 {offsets = [112, 0], sizes = [16, 32], strides = [1, 1]} : vector<128x32xf32> to vector<16x32xf32>
    %311 = vector.broadcast %56 : vector<1x32xf32> to vector<16x32xf32>
    %312 = arith.mulf %310, %311 : vector<16x32xf32>
    %313 = arith.addf %309, %312 : vector<16x32xf32>
    %c1_91 = arith.constant 1 : index
    %c0_92 = arith.constant 0 : index
    %c0_93 = arith.constant 0 : index
    %314 = vector.load %arg11[%c1_91, %c0_92, %c0_93] : memref<2x32x32xbf16, #tpu.memory_space<vmem>>, vector<1x32x32xbf16>
    %315 = vector.shape_cast %314 : vector<1x32x32xbf16> to vector<32x32xbf16>
    %316 = arith.truncf %313 : vector<16x32xf32> to vector<16x32xbf16>
    %cst_94 = arith.constant dense<0.000000e+00> : vector<16x32xf32>
    %317 = tpu.matmul %316, %315, %cst_94 {dimension_numbers = #tpu.dot_dimension_numbers<[1], [0], [0], [1], [0, 0, 1, 1], [], []>} : vector<16x32xbf16>, vector<32x32xbf16>, vector<16x32xf32> -> vector<16x32xf32>
    %318 = arith.addf %234, %317 : vector<16x32xf32>
    %c1_95 = arith.constant 1 : index
    %c0_96 = arith.constant 0 : index
    %c0_97 = arith.constant 0 : index
    %319 = vector.load %arg12[%c1_95, %c0_96, %c0_97] : memref<2x1x32xf32, #tpu.memory_space<vmem>>, vector<1x1x32xf32>
    %320 = vector.shape_cast %319 : vector<1x1x32xf32> to vector<1x32xf32>
    %321 = vector.broadcast %320 : vector<1x32xf32> to vector<16x32xf32>
    %322 = arith.addf %318, %321 : vector<16x32xf32>
    %c1_98 = arith.constant 1 : index
    %c0_99 = arith.constant 0 : index
    %c0_100 = arith.constant 0 : index
    %323 = vector.load %arg13[%c1_98, %c0_99, %c0_100] : memref<2x1x32xf32, #tpu.memory_space<vmem>>, vector<1x1x32xf32>
    %324 = vector.shape_cast %323 : vector<1x1x32xf32> to vector<1x32xf32>
    %c1_101 = arith.constant 1 : index
    %c0_102 = arith.constant 0 : index
    %c0_103 = arith.constant 0 : index
    %325 = vector.load %arg14[%c1_101, %c0_102, %c0_103] : memref<2x1x32xf32, #tpu.memory_space<vmem>>, vector<1x1x32xf32>
    %326 = vector.shape_cast %325 : vector<1x1x32xf32> to vector<1x32xf32>
    %cst_104 = arith.constant dense<0.000000e+00> : vector<16xf32>
    %327 = vector.multi_reduction <add>, %322, %cst_104 [1] : vector<16x32xf32> to vector<16xf32>
    %328 = vector.shape_cast %327 : vector<16xf32> to vector<16x1xf32>
    %cst_105 = arith.constant 3.200000e+01 : f32
    %329 = vector.broadcast %cst_105 : f32 to vector<16x1xf32>
    %330 = arith.divf %328, %329 : vector<16x1xf32>
    %331 = vector.broadcast %330 : vector<16x1xf32> to vector<16x32xf32>
    %332 = arith.subf %322, %331 : vector<16x32xf32>
    %333 = arith.mulf %332, %332 : vector<16x32xf32>
    %cst_106 = arith.constant dense<0.000000e+00> : vector<16xf32>
    %334 = vector.multi_reduction <add>, %333, %cst_106 [1] : vector<16x32xf32> to vector<16xf32>
    %335 = vector.shape_cast %334 : vector<16xf32> to vector<16x1xf32>
    %cst_107 = arith.constant 3.200000e+01 : f32
    %336 = vector.broadcast %cst_107 : f32 to vector<16x1xf32>
    %337 = arith.divf %335, %336 : vector<16x1xf32>
    %cst_108 = arith.constant 9.99999974E-6 : f32
    %338 = vector.broadcast %cst_108 : f32 to vector<16x1xf32>
    %339 = arith.addf %337, %338 : vector<16x1xf32>
    %340 = math.rsqrt %339 : vector<16x1xf32>
    %341 = vector.broadcast %340 : vector<16x1xf32> to vector<16x32xf32>
    %342 = arith.mulf %332, %341 : vector<16x32xf32>
    %343 = vector.broadcast %324 : vector<1x32xf32> to vector<16x32xf32>
    %344 = arith.mulf %342, %343 : vector<16x32xf32>
    %345 = vector.broadcast %326 : vector<1x32xf32> to vector<16x32xf32>
    %346 = arith.addf %344, %345 : vector<16x32xf32>
    %c1_109 = arith.constant 1 : index
    %c0_110 = arith.constant 0 : index
    %c0_111 = arith.constant 0 : index
    %347 = vector.load %arg15[%c1_109, %c0_110, %c0_111] : memref<2x32x64xbf16, #tpu.memory_space<vmem>>, vector<1x32x64xbf16>
    %348 = vector.shape_cast %347 : vector<1x32x64xbf16> to vector<32x64xbf16>
    %349 = arith.truncf %346 : vector<16x32xf32> to vector<16x32xbf16>
    %cst_112 = arith.constant dense<0.000000e+00> : vector<16x64xf32>
    %350 = tpu.matmul %349, %348, %cst_112 {dimension_numbers = #tpu.dot_dimension_numbers<[1], [0], [0], [1], [0, 0, 1, 1], [], []>} : vector<16x32xbf16>, vector<32x64xbf16>, vector<16x64xf32> -> vector<16x64xf32>
    %c1_113 = arith.constant 1 : index
    %c0_114 = arith.constant 0 : index
    %c0_115 = arith.constant 0 : index
    %351 = vector.load %arg16[%c1_113, %c0_114, %c0_115] : memref<2x1x64xf32, #tpu.memory_space<vmem>>, vector<1x1x64xf32>
    %352 = vector.shape_cast %351 : vector<1x1x64xf32> to vector<1x64xf32>
    %353 = vector.broadcast %352 : vector<1x64xf32> to vector<16x64xf32>
    %354 = arith.addf %350, %353 : vector<16x64xf32>
    %cst_116 = arith.constant 0.000000e+00 : f32
    %355 = vector.broadcast %cst_116 : f32 to vector<16x64xf32>
    %356 = arith.maximumf %354, %355 : vector<16x64xf32>
    %c1_117 = arith.constant 1 : index
    %c0_118 = arith.constant 0 : index
    %c0_119 = arith.constant 0 : index
    %357 = vector.load %arg17[%c1_117, %c0_118, %c0_119] : memref<2x64x32xbf16, #tpu.memory_space<vmem>>, vector<1x64x32xbf16>
    %358 = vector.shape_cast %357 : vector<1x64x32xbf16> to vector<64x32xbf16>
    %359 = arith.truncf %356 : vector<16x64xf32> to vector<16x64xbf16>
    %cst_120 = arith.constant dense<0.000000e+00> : vector<16x32xf32>
    %360 = tpu.matmul %359, %358, %cst_120 {dimension_numbers = #tpu.dot_dimension_numbers<[1], [0], [0], [1], [0, 0, 1, 1], [], []>} : vector<16x64xbf16>, vector<64x32xbf16>, vector<16x32xf32> -> vector<16x32xf32>
    %c1_121 = arith.constant 1 : index
    %c0_122 = arith.constant 0 : index
    %c0_123 = arith.constant 0 : index
    %361 = vector.load %arg18[%c1_121, %c0_122, %c0_123] : memref<2x1x32xf32, #tpu.memory_space<vmem>>, vector<1x1x32xf32>
    %362 = vector.shape_cast %361 : vector<1x1x32xf32> to vector<1x32xf32>
    %363 = vector.broadcast %362 : vector<1x32xf32> to vector<16x32xf32>
    %364 = arith.addf %360, %363 : vector<16x32xf32>
    %365 = arith.addf %346, %364 : vector<16x32xf32>
    %c1_124 = arith.constant 1 : index
    %c0_125 = arith.constant 0 : index
    %c0_126 = arith.constant 0 : index
    %366 = vector.load %arg19[%c1_124, %c0_125, %c0_126] : memref<2x1x32xf32, #tpu.memory_space<vmem>>, vector<1x1x32xf32>
    %367 = vector.shape_cast %366 : vector<1x1x32xf32> to vector<1x32xf32>
    %c1_127 = arith.constant 1 : index
    %c0_128 = arith.constant 0 : index
    %c0_129 = arith.constant 0 : index
    %368 = vector.load %arg20[%c1_127, %c0_128, %c0_129] : memref<2x1x32xf32, #tpu.memory_space<vmem>>, vector<1x1x32xf32>
    %369 = vector.shape_cast %368 : vector<1x1x32xf32> to vector<1x32xf32>
    %cst_130 = arith.constant dense<0.000000e+00> : vector<16xf32>
    %370 = vector.multi_reduction <add>, %365, %cst_130 [1] : vector<16x32xf32> to vector<16xf32>
    %371 = vector.shape_cast %370 : vector<16xf32> to vector<16x1xf32>
    %cst_131 = arith.constant 3.200000e+01 : f32
    %372 = vector.broadcast %cst_131 : f32 to vector<16x1xf32>
    %373 = arith.divf %371, %372 : vector<16x1xf32>
    %374 = vector.broadcast %373 : vector<16x1xf32> to vector<16x32xf32>
    %375 = arith.subf %365, %374 : vector<16x32xf32>
    %376 = arith.mulf %375, %375 : vector<16x32xf32>
    %cst_132 = arith.constant dense<0.000000e+00> : vector<16xf32>
    %377 = vector.multi_reduction <add>, %376, %cst_132 [1] : vector<16x32xf32> to vector<16xf32>
    %378 = vector.shape_cast %377 : vector<16xf32> to vector<16x1xf32>
    %cst_133 = arith.constant 3.200000e+01 : f32
    %379 = vector.broadcast %cst_133 : f32 to vector<16x1xf32>
    %380 = arith.divf %378, %379 : vector<16x1xf32>
    %cst_134 = arith.constant 9.99999974E-6 : f32
    %381 = vector.broadcast %cst_134 : f32 to vector<16x1xf32>
    %382 = arith.addf %380, %381 : vector<16x1xf32>
    %383 = math.rsqrt %382 : vector<16x1xf32>
    %384 = vector.broadcast %383 : vector<16x1xf32> to vector<16x32xf32>
    %385 = arith.mulf %375, %384 : vector<16x32xf32>
    %386 = vector.broadcast %367 : vector<1x32xf32> to vector<16x32xf32>
    %387 = arith.mulf %385, %386 : vector<16x32xf32>
    %388 = vector.broadcast %369 : vector<1x32xf32> to vector<16x32xf32>
    %389 = arith.addf %387, %388 : vector<16x32xf32>
    %c0_135 = arith.constant 0 : index
    %c0_136 = arith.constant 0 : index
    %c0_137 = arith.constant 0 : index
    %390 = vector.load %arg2[%c0_135, %c0_136, %c0_137] : memref<1x8x32xf32, #tpu.memory_space<vmem>>, vector<1x8x32xf32>
    %391 = vector.shape_cast %390 : vector<1x8x32xf32> to vector<8x32xf32>
    %c0_138 = arith.constant 0 : index
    %c0_139 = arith.constant 0 : index
    %c0_140 = arith.constant 0 : index
    %392 = vector.load %arg4[%c0_138, %c0_139, %c0_140] : memref<1x64x8xf32, #tpu.memory_space<vmem>>, vector<1x64x8xf32>
    %393 = vector.shape_cast %392 : vector<1x64x8xf32> to vector<64x8xf32>
    %c0_141 = arith.constant 0 : index
    %c0_142 = arith.constant 0 : index
    %c0_143 = arith.constant 0 : index
    %394 = vector.load %arg5[%c0_141, %c0_142, %c0_143] : memref<1x64x16xf32, #tpu.memory_space<vmem>>, vector<1x64x16xf32>
    %395 = vector.shape_cast %394 : vector<1x64x16xf32> to vector<64x16xf32>
    %c0_144 = arith.constant 0 : index
    %c0_145 = arith.constant 0 : index
    %c0_146 = arith.constant 0 : index
    %396 = vector.load %arg21[%c0_144, %c0_145, %c0_146] : memref<2x32x96xbf16, #tpu.memory_space<vmem>>, vector<1x32x96xbf16>
    %397 = vector.shape_cast %396 : vector<1x32x96xbf16> to vector<32x96xbf16>
    %398 = arith.truncf %391 : vector<8x32xf32> to vector<8x32xbf16>
    %cst_147 = arith.constant dense<0.000000e+00> : vector<8x96xf32>
    %399 = tpu.matmul %398, %397, %cst_147 {dimension_numbers = #tpu.dot_dimension_numbers<[1], [0], [0], [1], [0, 0, 1, 1], [], []>} : vector<8x32xbf16>, vector<32x96xbf16>, vector<8x96xf32> -> vector<8x96xf32>
    %c0_148 = arith.constant 0 : index
    %c0_149 = arith.constant 0 : index
    %c0_150 = arith.constant 0 : index
    %400 = vector.load %arg22[%c0_148, %c0_149, %c0_150] : memref<2x1x96xf32, #tpu.memory_space<vmem>>, vector<1x1x96xf32>
    %401 = vector.shape_cast %400 : vector<1x1x96xf32> to vector<1x96xf32>
    %402 = vector.broadcast %401 : vector<1x96xf32> to vector<8x96xf32>
    %403 = arith.addf %399, %402 : vector<8x96xf32>
    %404 = vector.extract_strided_slice %403 {offsets = [0, 0], sizes = [8, 32], strides = [1, 1]} : vector<8x96xf32> to vector<8x32xf32>
    %405 = vector.extract_strided_slice %403 {offsets = [0, 32], sizes = [8, 32], strides = [1, 1]} : vector<8x96xf32> to vector<8x32xf32>
    %406 = vector.extract_strided_slice %403 {offsets = [0, 64], sizes = [8, 32], strides = [1, 1]} : vector<8x96xf32> to vector<8x32xf32>
    %407 = vector.broadcast %7 : vector<1x32xf32> to vector<8x32xf32>
    %408 = arith.mulf %404, %407 : vector<8x32xf32>
    %409 = vector.broadcast %14 : vector<1x32xf32> to vector<8x32xf32>
    %410 = arith.mulf %404, %409 : vector<8x32xf32>
    %411 = vector.broadcast %21 : vector<1x32xf32> to vector<8x32xf32>
    %412 = arith.mulf %404, %411 : vector<8x32xf32>
    %413 = vector.broadcast %28 : vector<1x32xf32> to vector<8x32xf32>
    %414 = arith.mulf %404, %413 : vector<8x32xf32>
    %415 = vector.broadcast %35 : vector<1x32xf32> to vector<8x32xf32>
    %416 = arith.mulf %404, %415 : vector<8x32xf32>
    %417 = vector.broadcast %42 : vector<1x32xf32> to vector<8x32xf32>
    %418 = arith.mulf %404, %417 : vector<8x32xf32>
    %419 = vector.broadcast %49 : vector<1x32xf32> to vector<8x32xf32>
    %420 = arith.mulf %404, %419 : vector<8x32xf32>
    %421 = vector.broadcast %56 : vector<1x32xf32> to vector<8x32xf32>
    %422 = arith.mulf %404, %421 : vector<8x32xf32>
    %423 = tpu.concatenate %408, %410, %412, %414, %416, %418, %420, %422 in 0 : vector<8x32xf32>, vector<8x32xf32>, vector<8x32xf32>, vector<8x32xf32>, vector<8x32xf32>, vector<8x32xf32>, vector<8x32xf32>, vector<8x32xf32> -> vector<64x32xf32>
    %424 = arith.truncf %423 : vector<64x32xf32> to vector<64x32xbf16>
    %425 = arith.truncf %405 : vector<8x32xf32> to vector<8x32xbf16>
    %cst_151 = arith.constant dense<0.000000e+00> : vector<64x8xf32>
    %426 = tpu.matmul %424, %425, %cst_151 {dimension_numbers = #tpu.dot_dimension_numbers<[1], [1], [0], [0], [0, 0, 1, 0], [], []>} : vector<64x32xbf16>, vector<8x32xbf16>, vector<64x8xf32> -> vector<64x8xf32>
    %cst_152 = arith.constant 5.000000e-01 : f32
    %427 = vector.broadcast %cst_152 : f32 to vector<64x8xf32>
    %428 = arith.mulf %426, %427 : vector<64x8xf32>
    %429 = arith.addf %428, %393 : vector<64x8xf32>
    %cst_153 = arith.constant dense<0xFF800000> : vector<64xf32>
    %430 = vector.multi_reduction <maximumf>, %429, %cst_153 [1] : vector<64x8xf32> to vector<64xf32>
    %431 = vector.shape_cast %430 : vector<64xf32> to vector<64x1xf32>
    %432 = vector.broadcast %431 : vector<64x1xf32> to vector<64x8xf32>
    %433 = arith.subf %429, %432 : vector<64x8xf32>
    %434 = math.exp %433 : vector<64x8xf32>
    %cst_154 = arith.constant dense<0.000000e+00> : vector<64xf32>
    %435 = vector.multi_reduction <add>, %434, %cst_154 [1] : vector<64x8xf32> to vector<64xf32>
    %436 = vector.shape_cast %435 : vector<64xf32> to vector<64x1xf32>
    %437 = arith.truncf %434 : vector<64x8xf32> to vector<64x8xbf16>
    %438 = arith.truncf %406 : vector<8x32xf32> to vector<8x32xbf16>
    %cst_155 = arith.constant dense<0.000000e+00> : vector<64x32xf32>
    %439 = tpu.matmul %437, %438, %cst_155 {dimension_numbers = #tpu.dot_dimension_numbers<[1], [0], [0], [1], [0, 0, 1, 1], [], []>} : vector<64x8xbf16>, vector<8x32xbf16>, vector<64x32xf32> -> vector<64x32xf32>
    %440 = vector.broadcast %436 : vector<64x1xf32> to vector<64x32xf32>
    %441 = arith.divf %439, %440 : vector<64x32xf32>
    %442 = vector.extract_strided_slice %441 {offsets = [0, 0], sizes = [8, 32], strides = [1, 1]} : vector<64x32xf32> to vector<8x32xf32>
    %443 = vector.broadcast %7 : vector<1x32xf32> to vector<8x32xf32>
    %444 = arith.mulf %442, %443 : vector<8x32xf32>
    %cst_156 = arith.constant 0.000000e+00 : f32
    %445 = vector.broadcast %cst_156 : f32 to vector<8x32xf32>
    %446 = arith.addf %445, %444 : vector<8x32xf32>
    %447 = vector.extract_strided_slice %441 {offsets = [8, 0], sizes = [8, 32], strides = [1, 1]} : vector<64x32xf32> to vector<8x32xf32>
    %448 = vector.broadcast %14 : vector<1x32xf32> to vector<8x32xf32>
    %449 = arith.mulf %447, %448 : vector<8x32xf32>
    %450 = arith.addf %446, %449 : vector<8x32xf32>
    %451 = vector.extract_strided_slice %441 {offsets = [16, 0], sizes = [8, 32], strides = [1, 1]} : vector<64x32xf32> to vector<8x32xf32>
    %452 = vector.broadcast %21 : vector<1x32xf32> to vector<8x32xf32>
    %453 = arith.mulf %451, %452 : vector<8x32xf32>
    %454 = arith.addf %450, %453 : vector<8x32xf32>
    %455 = vector.extract_strided_slice %441 {offsets = [24, 0], sizes = [8, 32], strides = [1, 1]} : vector<64x32xf32> to vector<8x32xf32>
    %456 = vector.broadcast %28 : vector<1x32xf32> to vector<8x32xf32>
    %457 = arith.mulf %455, %456 : vector<8x32xf32>
    %458 = arith.addf %454, %457 : vector<8x32xf32>
    %459 = vector.extract_strided_slice %441 {offsets = [32, 0], sizes = [8, 32], strides = [1, 1]} : vector<64x32xf32> to vector<8x32xf32>
    %460 = vector.broadcast %35 : vector<1x32xf32> to vector<8x32xf32>
    %461 = arith.mulf %459, %460 : vector<8x32xf32>
    %462 = arith.addf %458, %461 : vector<8x32xf32>
    %463 = vector.extract_strided_slice %441 {offsets = [40, 0], sizes = [8, 32], strides = [1, 1]} : vector<64x32xf32> to vector<8x32xf32>
    %464 = vector.broadcast %42 : vector<1x32xf32> to vector<8x32xf32>
    %465 = arith.mulf %463, %464 : vector<8x32xf32>
    %466 = arith.addf %462, %465 : vector<8x32xf32>
    %467 = vector.extract_strided_slice %441 {offsets = [48, 0], sizes = [8, 32], strides = [1, 1]} : vector<64x32xf32> to vector<8x32xf32>
    %468 = vector.broadcast %49 : vector<1x32xf32> to vector<8x32xf32>
    %469 = arith.mulf %467, %468 : vector<8x32xf32>
    %470 = arith.addf %466, %469 : vector<8x32xf32>
    %471 = vector.extract_strided_slice %441 {offsets = [56, 0], sizes = [8, 32], strides = [1, 1]} : vector<64x32xf32> to vector<8x32xf32>
    %472 = vector.broadcast %56 : vector<1x32xf32> to vector<8x32xf32>
    %473 = arith.mulf %471, %472 : vector<8x32xf32>
    %474 = arith.addf %470, %473 : vector<8x32xf32>
    %c0_157 = arith.constant 0 : index
    %c0_158 = arith.constant 0 : index
    %c0_159 = arith.constant 0 : index
    %475 = vector.load %arg23[%c0_157, %c0_158, %c0_159] : memref<2x32x32xbf16, #tpu.memory_space<vmem>>, vector<1x32x32xbf16>
    %476 = vector.shape_cast %475 : vector<1x32x32xbf16> to vector<32x32xbf16>
    %477 = arith.truncf %474 : vector<8x32xf32> to vector<8x32xbf16>
    %cst_160 = arith.constant dense<0.000000e+00> : vector<8x32xf32>
    %478 = tpu.matmul %477, %476, %cst_160 {dimension_numbers = #tpu.dot_dimension_numbers<[1], [0], [0], [1], [0, 0, 1, 1], [], []>} : vector<8x32xbf16>, vector<32x32xbf16>, vector<8x32xf32> -> vector<8x32xf32>
    %479 = arith.addf %391, %478 : vector<8x32xf32>
    %c0_161 = arith.constant 0 : index
    %c0_162 = arith.constant 0 : index
    %c0_163 = arith.constant 0 : index
    %480 = vector.load %arg24[%c0_161, %c0_162, %c0_163] : memref<2x1x32xf32, #tpu.memory_space<vmem>>, vector<1x1x32xf32>
    %481 = vector.shape_cast %480 : vector<1x1x32xf32> to vector<1x32xf32>
    %482 = vector.broadcast %481 : vector<1x32xf32> to vector<8x32xf32>
    %483 = arith.addf %479, %482 : vector<8x32xf32>
    %c0_164 = arith.constant 0 : index
    %c0_165 = arith.constant 0 : index
    %c0_166 = arith.constant 0 : index
    %484 = vector.load %arg25[%c0_164, %c0_165, %c0_166] : memref<2x1x32xf32, #tpu.memory_space<vmem>>, vector<1x1x32xf32>
    %485 = vector.shape_cast %484 : vector<1x1x32xf32> to vector<1x32xf32>
    %c0_167 = arith.constant 0 : index
    %c0_168 = arith.constant 0 : index
    %c0_169 = arith.constant 0 : index
    %486 = vector.load %arg26[%c0_167, %c0_168, %c0_169] : memref<2x1x32xf32, #tpu.memory_space<vmem>>, vector<1x1x32xf32>
    %487 = vector.shape_cast %486 : vector<1x1x32xf32> to vector<1x32xf32>
    %cst_170 = arith.constant dense<0.000000e+00> : vector<8xf32>
    %488 = vector.multi_reduction <add>, %483, %cst_170 [1] : vector<8x32xf32> to vector<8xf32>
    %489 = vector.shape_cast %488 : vector<8xf32> to vector<8x1xf32>
    %cst_171 = arith.constant 3.200000e+01 : f32
    %490 = vector.broadcast %cst_171 : f32 to vector<8x1xf32>
    %491 = arith.divf %489, %490 : vector<8x1xf32>
    %492 = vector.broadcast %491 : vector<8x1xf32> to vector<8x32xf32>
    %493 = arith.subf %483, %492 : vector<8x32xf32>
    %494 = arith.mulf %493, %493 : vector<8x32xf32>
    %cst_172 = arith.constant dense<0.000000e+00> : vector<8xf32>
    %495 = vector.multi_reduction <add>, %494, %cst_172 [1] : vector<8x32xf32> to vector<8xf32>
    %496 = vector.shape_cast %495 : vector<8xf32> to vector<8x1xf32>
    %cst_173 = arith.constant 3.200000e+01 : f32
    %497 = vector.broadcast %cst_173 : f32 to vector<8x1xf32>
    %498 = arith.divf %496, %497 : vector<8x1xf32>
    %cst_174 = arith.constant 9.99999974E-6 : f32
    %499 = vector.broadcast %cst_174 : f32 to vector<8x1xf32>
    %500 = arith.addf %498, %499 : vector<8x1xf32>
    %501 = math.rsqrt %500 : vector<8x1xf32>
    %502 = vector.broadcast %501 : vector<8x1xf32> to vector<8x32xf32>
    %503 = arith.mulf %493, %502 : vector<8x32xf32>
    %504 = vector.broadcast %485 : vector<1x32xf32> to vector<8x32xf32>
    %505 = arith.mulf %503, %504 : vector<8x32xf32>
    %506 = vector.broadcast %487 : vector<1x32xf32> to vector<8x32xf32>
    %507 = arith.addf %505, %506 : vector<8x32xf32>
    %c0_175 = arith.constant 0 : index
    %c0_176 = arith.constant 0 : index
    %c0_177 = arith.constant 0 : index
    %508 = vector.load %arg27[%c0_175, %c0_176, %c0_177] : memref<2x32x32xbf16, #tpu.memory_space<vmem>>, vector<1x32x32xbf16>
    %509 = vector.shape_cast %508 : vector<1x32x32xbf16> to vector<32x32xbf16>
    %510 = arith.truncf %507 : vector<8x32xf32> to vector<8x32xbf16>
    %cst_178 = arith.constant dense<0.000000e+00> : vector<8x32xf32>
    %511 = tpu.matmul %510, %509, %cst_178 {dimension_numbers = #tpu.dot_dimension_numbers<[1], [0], [0], [1], [0, 0, 1, 1], [], []>} : vector<8x32xbf16>, vector<32x32xbf16>, vector<8x32xf32> -> vector<8x32xf32>
    %c0_179 = arith.constant 0 : index
    %c0_180 = arith.constant 0 : index
    %c0_181 = arith.constant 0 : index
    %512 = vector.load %arg28[%c0_179, %c0_180, %c0_181] : memref<2x1x32xf32, #tpu.memory_space<vmem>>, vector<1x1x32xf32>
    %513 = vector.shape_cast %512 : vector<1x1x32xf32> to vector<1x32xf32>
    %514 = vector.broadcast %513 : vector<1x32xf32> to vector<8x32xf32>
    %515 = arith.addf %511, %514 : vector<8x32xf32>
    %c0_182 = arith.constant 0 : index
    %c0_183 = arith.constant 0 : index
    %c0_184 = arith.constant 0 : index
    %516 = vector.load %arg29[%c0_182, %c0_183, %c0_184] : memref<2x32x64xbf16, #tpu.memory_space<vmem>>, vector<1x32x64xbf16>
    %517 = vector.shape_cast %516 : vector<1x32x64xbf16> to vector<32x64xbf16>
    %518 = arith.truncf %389 : vector<16x32xf32> to vector<16x32xbf16>
    %cst_185 = arith.constant dense<0.000000e+00> : vector<16x64xf32>
    %519 = tpu.matmul %518, %517, %cst_185 {dimension_numbers = #tpu.dot_dimension_numbers<[1], [0], [0], [1], [0, 0, 1, 1], [], []>} : vector<16x32xbf16>, vector<32x64xbf16>, vector<16x64xf32> -> vector<16x64xf32>
    %c0_186 = arith.constant 0 : index
    %c0_187 = arith.constant 0 : index
    %c0_188 = arith.constant 0 : index
    %520 = vector.load %arg30[%c0_186, %c0_187, %c0_188] : memref<2x1x64xf32, #tpu.memory_space<vmem>>, vector<1x1x64xf32>
    %521 = vector.shape_cast %520 : vector<1x1x64xf32> to vector<1x64xf32>
    %522 = vector.broadcast %521 : vector<1x64xf32> to vector<16x64xf32>
    %523 = arith.addf %519, %522 : vector<16x64xf32>
    %524 = vector.extract_strided_slice %523 {offsets = [0, 0], sizes = [16, 32], strides = [1, 1]} : vector<16x64xf32> to vector<16x32xf32>
    %525 = vector.extract_strided_slice %523 {offsets = [0, 32], sizes = [16, 32], strides = [1, 1]} : vector<16x64xf32> to vector<16x32xf32>
    %526 = vector.broadcast %7 : vector<1x32xf32> to vector<8x32xf32>
    %527 = arith.mulf %515, %526 : vector<8x32xf32>
    %528 = vector.broadcast %14 : vector<1x32xf32> to vector<8x32xf32>
    %529 = arith.mulf %515, %528 : vector<8x32xf32>
    %530 = vector.broadcast %21 : vector<1x32xf32> to vector<8x32xf32>
    %531 = arith.mulf %515, %530 : vector<8x32xf32>
    %532 = vector.broadcast %28 : vector<1x32xf32> to vector<8x32xf32>
    %533 = arith.mulf %515, %532 : vector<8x32xf32>
    %534 = vector.broadcast %35 : vector<1x32xf32> to vector<8x32xf32>
    %535 = arith.mulf %515, %534 : vector<8x32xf32>
    %536 = vector.broadcast %42 : vector<1x32xf32> to vector<8x32xf32>
    %537 = arith.mulf %515, %536 : vector<8x32xf32>
    %538 = vector.broadcast %49 : vector<1x32xf32> to vector<8x32xf32>
    %539 = arith.mulf %515, %538 : vector<8x32xf32>
    %540 = vector.broadcast %56 : vector<1x32xf32> to vector<8x32xf32>
    %541 = arith.mulf %515, %540 : vector<8x32xf32>
    %542 = tpu.concatenate %527, %529, %531, %533, %535, %537, %539, %541 in 0 : vector<8x32xf32>, vector<8x32xf32>, vector<8x32xf32>, vector<8x32xf32>, vector<8x32xf32>, vector<8x32xf32>, vector<8x32xf32>, vector<8x32xf32> -> vector<64x32xf32>
    %543 = arith.truncf %542 : vector<64x32xf32> to vector<64x32xbf16>
    %544 = arith.truncf %524 : vector<16x32xf32> to vector<16x32xbf16>
    %cst_189 = arith.constant dense<0.000000e+00> : vector<64x16xf32>
    %545 = tpu.matmul %543, %544, %cst_189 {dimension_numbers = #tpu.dot_dimension_numbers<[1], [1], [0], [0], [0, 0, 1, 0], [], []>} : vector<64x32xbf16>, vector<16x32xbf16>, vector<64x16xf32> -> vector<64x16xf32>
    %cst_190 = arith.constant 5.000000e-01 : f32
    %546 = vector.broadcast %cst_190 : f32 to vector<64x16xf32>
    %547 = arith.mulf %545, %546 : vector<64x16xf32>
    %548 = arith.addf %547, %395 : vector<64x16xf32>
    %cst_191 = arith.constant dense<0xFF800000> : vector<64xf32>
    %549 = vector.multi_reduction <maximumf>, %548, %cst_191 [1] : vector<64x16xf32> to vector<64xf32>
    %550 = vector.shape_cast %549 : vector<64xf32> to vector<64x1xf32>
    %551 = vector.broadcast %550 : vector<64x1xf32> to vector<64x16xf32>
    %552 = arith.subf %548, %551 : vector<64x16xf32>
    %553 = math.exp %552 : vector<64x16xf32>
    %cst_192 = arith.constant dense<0.000000e+00> : vector<64xf32>
    %554 = vector.multi_reduction <add>, %553, %cst_192 [1] : vector<64x16xf32> to vector<64xf32>
    %555 = vector.shape_cast %554 : vector<64xf32> to vector<64x1xf32>
    %556 = arith.truncf %553 : vector<64x16xf32> to vector<64x16xbf16>
    %557 = arith.truncf %525 : vector<16x32xf32> to vector<16x32xbf16>
    %cst_193 = arith.constant dense<0.000000e+00> : vector<64x32xf32>
    %558 = tpu.matmul %556, %557, %cst_193 {dimension_numbers = #tpu.dot_dimension_numbers<[1], [0], [0], [1], [0, 0, 1, 1], [], []>} : vector<64x16xbf16>, vector<16x32xbf16>, vector<64x32xf32> -> vector<64x32xf32>
    %559 = vector.broadcast %555 : vector<64x1xf32> to vector<64x32xf32>
    %560 = arith.divf %558, %559 : vector<64x32xf32>
    %561 = vector.extract_strided_slice %560 {offsets = [0, 0], sizes = [8, 32], strides = [1, 1]} : vector<64x32xf32> to vector<8x32xf32>
    %562 = vector.broadcast %7 : vector<1x32xf32> to vector<8x32xf32>
    %563 = arith.mulf %561, %562 : vector<8x32xf32>
    %cst_194 = arith.constant 0.000000e+00 : f32
    %564 = vector.broadcast %cst_194 : f32 to vector<8x32xf32>
    %565 = arith.addf %564, %563 : vector<8x32xf32>
    %566 = vector.extract_strided_slice %560 {offsets = [8, 0], sizes = [8, 32], strides = [1, 1]} : vector<64x32xf32> to vector<8x32xf32>
    %567 = vector.broadcast %14 : vector<1x32xf32> to vector<8x32xf32>
    %568 = arith.mulf %566, %567 : vector<8x32xf32>
    %569 = arith.addf %565, %568 : vector<8x32xf32>
    %570 = vector.extract_strided_slice %560 {offsets = [16, 0], sizes = [8, 32], strides = [1, 1]} : vector<64x32xf32> to vector<8x32xf32>
    %571 = vector.broadcast %21 : vector<1x32xf32> to vector<8x32xf32>
    %572 = arith.mulf %570, %571 : vector<8x32xf32>
    %573 = arith.addf %569, %572 : vector<8x32xf32>
    %574 = vector.extract_strided_slice %560 {offsets = [24, 0], sizes = [8, 32], strides = [1, 1]} : vector<64x32xf32> to vector<8x32xf32>
    %575 = vector.broadcast %28 : vector<1x32xf32> to vector<8x32xf32>
    %576 = arith.mulf %574, %575 : vector<8x32xf32>
    %577 = arith.addf %573, %576 : vector<8x32xf32>
    %578 = vector.extract_strided_slice %560 {offsets = [32, 0], sizes = [8, 32], strides = [1, 1]} : vector<64x32xf32> to vector<8x32xf32>
    %579 = vector.broadcast %35 : vector<1x32xf32> to vector<8x32xf32>
    %580 = arith.mulf %578, %579 : vector<8x32xf32>
    %581 = arith.addf %577, %580 : vector<8x32xf32>
    %582 = vector.extract_strided_slice %560 {offsets = [40, 0], sizes = [8, 32], strides = [1, 1]} : vector<64x32xf32> to vector<8x32xf32>
    %583 = vector.broadcast %42 : vector<1x32xf32> to vector<8x32xf32>
    %584 = arith.mulf %582, %583 : vector<8x32xf32>
    %585 = arith.addf %581, %584 : vector<8x32xf32>
    %586 = vector.extract_strided_slice %560 {offsets = [48, 0], sizes = [8, 32], strides = [1, 1]} : vector<64x32xf32> to vector<8x32xf32>
    %587 = vector.broadcast %49 : vector<1x32xf32> to vector<8x32xf32>
    %588 = arith.mulf %586, %587 : vector<8x32xf32>
    %589 = arith.addf %585, %588 : vector<8x32xf32>
    %590 = vector.extract_strided_slice %560 {offsets = [56, 0], sizes = [8, 32], strides = [1, 1]} : vector<64x32xf32> to vector<8x32xf32>
    %591 = vector.broadcast %56 : vector<1x32xf32> to vector<8x32xf32>
    %592 = arith.mulf %590, %591 : vector<8x32xf32>
    %593 = arith.addf %589, %592 : vector<8x32xf32>
    %c0_195 = arith.constant 0 : index
    %c0_196 = arith.constant 0 : index
    %c0_197 = arith.constant 0 : index
    %594 = vector.load %arg31[%c0_195, %c0_196, %c0_197] : memref<2x32x32xbf16, #tpu.memory_space<vmem>>, vector<1x32x32xbf16>
    %595 = vector.shape_cast %594 : vector<1x32x32xbf16> to vector<32x32xbf16>
    %596 = arith.truncf %593 : vector<8x32xf32> to vector<8x32xbf16>
    %cst_198 = arith.constant dense<0.000000e+00> : vector<8x32xf32>
    %597 = tpu.matmul %596, %595, %cst_198 {dimension_numbers = #tpu.dot_dimension_numbers<[1], [0], [0], [1], [0, 0, 1, 1], [], []>} : vector<8x32xbf16>, vector<32x32xbf16>, vector<8x32xf32> -> vector<8x32xf32>
    %598 = arith.addf %507, %597 : vector<8x32xf32>
    %c0_199 = arith.constant 0 : index
    %c0_200 = arith.constant 0 : index
    %c0_201 = arith.constant 0 : index
    %599 = vector.load %arg32[%c0_199, %c0_200, %c0_201] : memref<2x1x32xf32, #tpu.memory_space<vmem>>, vector<1x1x32xf32>
    %600 = vector.shape_cast %599 : vector<1x1x32xf32> to vector<1x32xf32>
    %601 = vector.broadcast %600 : vector<1x32xf32> to vector<8x32xf32>
    %602 = arith.addf %598, %601 : vector<8x32xf32>
    %c0_202 = arith.constant 0 : index
    %c0_203 = arith.constant 0 : index
    %c0_204 = arith.constant 0 : index
    %603 = vector.load %arg33[%c0_202, %c0_203, %c0_204] : memref<2x1x32xf32, #tpu.memory_space<vmem>>, vector<1x1x32xf32>
    %604 = vector.shape_cast %603 : vector<1x1x32xf32> to vector<1x32xf32>
    %c0_205 = arith.constant 0 : index
    %c0_206 = arith.constant 0 : index
    %c0_207 = arith.constant 0 : index
    %605 = vector.load %arg34[%c0_205, %c0_206, %c0_207] : memref<2x1x32xf32, #tpu.memory_space<vmem>>, vector<1x1x32xf32>
    %606 = vector.shape_cast %605 : vector<1x1x32xf32> to vector<1x32xf32>
    %cst_208 = arith.constant dense<0.000000e+00> : vector<8xf32>
    %607 = vector.multi_reduction <add>, %602, %cst_208 [1] : vector<8x32xf32> to vector<8xf32>
    %608 = vector.shape_cast %607 : vector<8xf32> to vector<8x1xf32>
    %cst_209 = arith.constant 3.200000e+01 : f32
    %609 = vector.broadcast %cst_209 : f32 to vector<8x1xf32>
    %610 = arith.divf %608, %609 : vector<8x1xf32>
    %611 = vector.broadcast %610 : vector<8x1xf32> to vector<8x32xf32>
    %612 = arith.subf %602, %611 : vector<8x32xf32>
    %613 = arith.mulf %612, %612 : vector<8x32xf32>
    %cst_210 = arith.constant dense<0.000000e+00> : vector<8xf32>
    %614 = vector.multi_reduction <add>, %613, %cst_210 [1] : vector<8x32xf32> to vector<8xf32>
    %615 = vector.shape_cast %614 : vector<8xf32> to vector<8x1xf32>
    %cst_211 = arith.constant 3.200000e+01 : f32
    %616 = vector.broadcast %cst_211 : f32 to vector<8x1xf32>
    %617 = arith.divf %615, %616 : vector<8x1xf32>
    %cst_212 = arith.constant 9.99999974E-6 : f32
    %618 = vector.broadcast %cst_212 : f32 to vector<8x1xf32>
    %619 = arith.addf %617, %618 : vector<8x1xf32>
    %620 = math.rsqrt %619 : vector<8x1xf32>
    %621 = vector.broadcast %620 : vector<8x1xf32> to vector<8x32xf32>
    %622 = arith.mulf %612, %621 : vector<8x32xf32>
    %623 = vector.broadcast %604 : vector<1x32xf32> to vector<8x32xf32>
    %624 = arith.mulf %622, %623 : vector<8x32xf32>
    %625 = vector.broadcast %606 : vector<1x32xf32> to vector<8x32xf32>
    %626 = arith.addf %624, %625 : vector<8x32xf32>
    %c0_213 = arith.constant 0 : index
    %c0_214 = arith.constant 0 : index
    %c0_215 = arith.constant 0 : index
    %627 = vector.load %arg35[%c0_213, %c0_214, %c0_215] : memref<2x32x64xbf16, #tpu.memory_space<vmem>>, vector<1x32x64xbf16>
    %628 = vector.shape_cast %627 : vector<1x32x64xbf16> to vector<32x64xbf16>
    %629 = arith.truncf %626 : vector<8x32xf32> to vector<8x32xbf16>
    %cst_216 = arith.constant dense<0.000000e+00> : vector<8x64xf32>
    %630 = tpu.matmul %629, %628, %cst_216 {dimension_numbers = #tpu.dot_dimension_numbers<[1], [0], [0], [1], [0, 0, 1, 1], [], []>} : vector<8x32xbf16>, vector<32x64xbf16>, vector<8x64xf32> -> vector<8x64xf32>
    %c0_217 = arith.constant 0 : index
    %c0_218 = arith.constant 0 : index
    %c0_219 = arith.constant 0 : index
    %631 = vector.load %arg36[%c0_217, %c0_218, %c0_219] : memref<2x1x64xf32, #tpu.memory_space<vmem>>, vector<1x1x64xf32>
    %632 = vector.shape_cast %631 : vector<1x1x64xf32> to vector<1x64xf32>
    %633 = vector.broadcast %632 : vector<1x64xf32> to vector<8x64xf32>
    %634 = arith.addf %630, %633 : vector<8x64xf32>
    %cst_220 = arith.constant 0.000000e+00 : f32
    %635 = vector.broadcast %cst_220 : f32 to vector<8x64xf32>
    %636 = arith.maximumf %634, %635 : vector<8x64xf32>
    %c0_221 = arith.constant 0 : index
    %c0_222 = arith.constant 0 : index
    %c0_223 = arith.constant 0 : index
    %637 = vector.load %arg37[%c0_221, %c0_222, %c0_223] : memref<2x64x32xbf16, #tpu.memory_space<vmem>>, vector<1x64x32xbf16>
    %638 = vector.shape_cast %637 : vector<1x64x32xbf16> to vector<64x32xbf16>
    %639 = arith.truncf %636 : vector<8x64xf32> to vector<8x64xbf16>
    %cst_224 = arith.constant dense<0.000000e+00> : vector<8x32xf32>
    %640 = tpu.matmul %639, %638, %cst_224 {dimension_numbers = #tpu.dot_dimension_numbers<[1], [0], [0], [1], [0, 0, 1, 1], [], []>} : vector<8x64xbf16>, vector<64x32xbf16>, vector<8x32xf32> -> vector<8x32xf32>
    %c0_225 = arith.constant 0 : index
    %c0_226 = arith.constant 0 : index
    %c0_227 = arith.constant 0 : index
    %641 = vector.load %arg38[%c0_225, %c0_226, %c0_227] : memref<2x1x32xf32, #tpu.memory_space<vmem>>, vector<1x1x32xf32>
    %642 = vector.shape_cast %641 : vector<1x1x32xf32> to vector<1x32xf32>
    %643 = vector.broadcast %642 : vector<1x32xf32> to vector<8x32xf32>
    %644 = arith.addf %640, %643 : vector<8x32xf32>
    %645 = arith.addf %626, %644 : vector<8x32xf32>
    %c0_228 = arith.constant 0 : index
    %c0_229 = arith.constant 0 : index
    %c0_230 = arith.constant 0 : index
    %646 = vector.load %arg39[%c0_228, %c0_229, %c0_230] : memref<2x1x32xf32, #tpu.memory_space<vmem>>, vector<1x1x32xf32>
    %647 = vector.shape_cast %646 : vector<1x1x32xf32> to vector<1x32xf32>
    %c0_231 = arith.constant 0 : index
    %c0_232 = arith.constant 0 : index
    %c0_233 = arith.constant 0 : index
    %648 = vector.load %arg40[%c0_231, %c0_232, %c0_233] : memref<2x1x32xf32, #tpu.memory_space<vmem>>, vector<1x1x32xf32>
    %649 = vector.shape_cast %648 : vector<1x1x32xf32> to vector<1x32xf32>
    %cst_234 = arith.constant dense<0.000000e+00> : vector<8xf32>
    %650 = vector.multi_reduction <add>, %645, %cst_234 [1] : vector<8x32xf32> to vector<8xf32>
    %651 = vector.shape_cast %650 : vector<8xf32> to vector<8x1xf32>
    %cst_235 = arith.constant 3.200000e+01 : f32
    %652 = vector.broadcast %cst_235 : f32 to vector<8x1xf32>
    %653 = arith.divf %651, %652 : vector<8x1xf32>
    %654 = vector.broadcast %653 : vector<8x1xf32> to vector<8x32xf32>
    %655 = arith.subf %645, %654 : vector<8x32xf32>
    %656 = arith.mulf %655, %655 : vector<8x32xf32>
    %cst_236 = arith.constant dense<0.000000e+00> : vector<8xf32>
    %657 = vector.multi_reduction <add>, %656, %cst_236 [1] : vector<8x32xf32> to vector<8xf32>
    %658 = vector.shape_cast %657 : vector<8xf32> to vector<8x1xf32>
    %cst_237 = arith.constant 3.200000e+01 : f32
    %659 = vector.broadcast %cst_237 : f32 to vector<8x1xf32>
    %660 = arith.divf %658, %659 : vector<8x1xf32>
    %cst_238 = arith.constant 9.99999974E-6 : f32
    %661 = vector.broadcast %cst_238 : f32 to vector<8x1xf32>
    %662 = arith.addf %660, %661 : vector<8x1xf32>
    %663 = math.rsqrt %662 : vector<8x1xf32>
    %664 = vector.broadcast %663 : vector<8x1xf32> to vector<8x32xf32>
    %665 = arith.mulf %655, %664 : vector<8x32xf32>
    %666 = vector.broadcast %647 : vector<1x32xf32> to vector<8x32xf32>
    %667 = arith.mulf %665, %666 : vector<8x32xf32>
    %668 = vector.broadcast %649 : vector<1x32xf32> to vector<8x32xf32>
    %669 = arith.addf %667, %668 : vector<8x32xf32>
    %c1_239 = arith.constant 1 : index
    %c0_240 = arith.constant 0 : index
    %c0_241 = arith.constant 0 : index
    %670 = vector.load %arg21[%c1_239, %c0_240, %c0_241] : memref<2x32x96xbf16, #tpu.memory_space<vmem>>, vector<1x32x96xbf16>
    %671 = vector.shape_cast %670 : vector<1x32x96xbf16> to vector<32x96xbf16>
    %672 = arith.truncf %669 : vector<8x32xf32> to vector<8x32xbf16>
    %cst_242 = arith.constant dense<0.000000e+00> : vector<8x96xf32>
    %673 = tpu.matmul %672, %671, %cst_242 {dimension_numbers = #tpu.dot_dimension_numbers<[1], [0], [0], [1], [0, 0, 1, 1], [], []>} : vector<8x32xbf16>, vector<32x96xbf16>, vector<8x96xf32> -> vector<8x96xf32>
    %c1_243 = arith.constant 1 : index
    %c0_244 = arith.constant 0 : index
    %c0_245 = arith.constant 0 : index
    %674 = vector.load %arg22[%c1_243, %c0_244, %c0_245] : memref<2x1x96xf32, #tpu.memory_space<vmem>>, vector<1x1x96xf32>
    %675 = vector.shape_cast %674 : vector<1x1x96xf32> to vector<1x96xf32>
    %676 = vector.broadcast %675 : vector<1x96xf32> to vector<8x96xf32>
    %677 = arith.addf %673, %676 : vector<8x96xf32>
    %678 = vector.extract_strided_slice %677 {offsets = [0, 0], sizes = [8, 32], strides = [1, 1]} : vector<8x96xf32> to vector<8x32xf32>
    %679 = vector.extract_strided_slice %677 {offsets = [0, 32], sizes = [8, 32], strides = [1, 1]} : vector<8x96xf32> to vector<8x32xf32>
    %680 = vector.extract_strided_slice %677 {offsets = [0, 64], sizes = [8, 32], strides = [1, 1]} : vector<8x96xf32> to vector<8x32xf32>
    %681 = vector.broadcast %7 : vector<1x32xf32> to vector<8x32xf32>
    %682 = arith.mulf %678, %681 : vector<8x32xf32>
    %683 = vector.broadcast %14 : vector<1x32xf32> to vector<8x32xf32>
    %684 = arith.mulf %678, %683 : vector<8x32xf32>
    %685 = vector.broadcast %21 : vector<1x32xf32> to vector<8x32xf32>
    %686 = arith.mulf %678, %685 : vector<8x32xf32>
    %687 = vector.broadcast %28 : vector<1x32xf32> to vector<8x32xf32>
    %688 = arith.mulf %678, %687 : vector<8x32xf32>
    %689 = vector.broadcast %35 : vector<1x32xf32> to vector<8x32xf32>
    %690 = arith.mulf %678, %689 : vector<8x32xf32>
    %691 = vector.broadcast %42 : vector<1x32xf32> to vector<8x32xf32>
    %692 = arith.mulf %678, %691 : vector<8x32xf32>
    %693 = vector.broadcast %49 : vector<1x32xf32> to vector<8x32xf32>
    %694 = arith.mulf %678, %693 : vector<8x32xf32>
    %695 = vector.broadcast %56 : vector<1x32xf32> to vector<8x32xf32>
    %696 = arith.mulf %678, %695 : vector<8x32xf32>
    %697 = tpu.concatenate %682, %684, %686, %688, %690, %692, %694, %696 in 0 : vector<8x32xf32>, vector<8x32xf32>, vector<8x32xf32>, vector<8x32xf32>, vector<8x32xf32>, vector<8x32xf32>, vector<8x32xf32>, vector<8x32xf32> -> vector<64x32xf32>
    %698 = arith.truncf %697 : vector<64x32xf32> to vector<64x32xbf16>
    %699 = arith.truncf %679 : vector<8x32xf32> to vector<8x32xbf16>
    %cst_246 = arith.constant dense<0.000000e+00> : vector<64x8xf32>
    %700 = tpu.matmul %698, %699, %cst_246 {dimension_numbers = #tpu.dot_dimension_numbers<[1], [1], [0], [0], [0, 0, 1, 0], [], []>} : vector<64x32xbf16>, vector<8x32xbf16>, vector<64x8xf32> -> vector<64x8xf32>
    %cst_247 = arith.constant 5.000000e-01 : f32
    %701 = vector.broadcast %cst_247 : f32 to vector<64x8xf32>
    %702 = arith.mulf %700, %701 : vector<64x8xf32>
    %703 = arith.addf %702, %393 : vector<64x8xf32>
    %cst_248 = arith.constant dense<0xFF800000> : vector<64xf32>
    %704 = vector.multi_reduction <maximumf>, %703, %cst_248 [1] : vector<64x8xf32> to vector<64xf32>
    %705 = vector.shape_cast %704 : vector<64xf32> to vector<64x1xf32>
    %706 = vector.broadcast %705 : vector<64x1xf32> to vector<64x8xf32>
    %707 = arith.subf %703, %706 : vector<64x8xf32>
    %708 = math.exp %707 : vector<64x8xf32>
    %cst_249 = arith.constant dense<0.000000e+00> : vector<64xf32>
    %709 = vector.multi_reduction <add>, %708, %cst_249 [1] : vector<64x8xf32> to vector<64xf32>
    %710 = vector.shape_cast %709 : vector<64xf32> to vector<64x1xf32>
    %711 = arith.truncf %708 : vector<64x8xf32> to vector<64x8xbf16>
    %712 = arith.truncf %680 : vector<8x32xf32> to vector<8x32xbf16>
    %cst_250 = arith.constant dense<0.000000e+00> : vector<64x32xf32>
    %713 = tpu.matmul %711, %712, %cst_250 {dimension_numbers = #tpu.dot_dimension_numbers<[1], [0], [0], [1], [0, 0, 1, 1], [], []>} : vector<64x8xbf16>, vector<8x32xbf16>, vector<64x32xf32> -> vector<64x32xf32>
    %714 = vector.broadcast %710 : vector<64x1xf32> to vector<64x32xf32>
    %715 = arith.divf %713, %714 : vector<64x32xf32>
    %716 = vector.extract_strided_slice %715 {offsets = [0, 0], sizes = [8, 32], strides = [1, 1]} : vector<64x32xf32> to vector<8x32xf32>
    %717 = vector.broadcast %7 : vector<1x32xf32> to vector<8x32xf32>
    %718 = arith.mulf %716, %717 : vector<8x32xf32>
    %cst_251 = arith.constant 0.000000e+00 : f32
    %719 = vector.broadcast %cst_251 : f32 to vector<8x32xf32>
    %720 = arith.addf %719, %718 : vector<8x32xf32>
    %721 = vector.extract_strided_slice %715 {offsets = [8, 0], sizes = [8, 32], strides = [1, 1]} : vector<64x32xf32> to vector<8x32xf32>
    %722 = vector.broadcast %14 : vector<1x32xf32> to vector<8x32xf32>
    %723 = arith.mulf %721, %722 : vector<8x32xf32>
    %724 = arith.addf %720, %723 : vector<8x32xf32>
    %725 = vector.extract_strided_slice %715 {offsets = [16, 0], sizes = [8, 32], strides = [1, 1]} : vector<64x32xf32> to vector<8x32xf32>
    %726 = vector.broadcast %21 : vector<1x32xf32> to vector<8x32xf32>
    %727 = arith.mulf %725, %726 : vector<8x32xf32>
    %728 = arith.addf %724, %727 : vector<8x32xf32>
    %729 = vector.extract_strided_slice %715 {offsets = [24, 0], sizes = [8, 32], strides = [1, 1]} : vector<64x32xf32> to vector<8x32xf32>
    %730 = vector.broadcast %28 : vector<1x32xf32> to vector<8x32xf32>
    %731 = arith.mulf %729, %730 : vector<8x32xf32>
    %732 = arith.addf %728, %731 : vector<8x32xf32>
    %733 = vector.extract_strided_slice %715 {offsets = [32, 0], sizes = [8, 32], strides = [1, 1]} : vector<64x32xf32> to vector<8x32xf32>
    %734 = vector.broadcast %35 : vector<1x32xf32> to vector<8x32xf32>
    %735 = arith.mulf %733, %734 : vector<8x32xf32>
    %736 = arith.addf %732, %735 : vector<8x32xf32>
    %737 = vector.extract_strided_slice %715 {offsets = [40, 0], sizes = [8, 32], strides = [1, 1]} : vector<64x32xf32> to vector<8x32xf32>
    %738 = vector.broadcast %42 : vector<1x32xf32> to vector<8x32xf32>
    %739 = arith.mulf %737, %738 : vector<8x32xf32>
    %740 = arith.addf %736, %739 : vector<8x32xf32>
    %741 = vector.extract_strided_slice %715 {offsets = [48, 0], sizes = [8, 32], strides = [1, 1]} : vector<64x32xf32> to vector<8x32xf32>
    %742 = vector.broadcast %49 : vector<1x32xf32> to vector<8x32xf32>
    %743 = arith.mulf %741, %742 : vector<8x32xf32>
    %744 = arith.addf %740, %743 : vector<8x32xf32>
    %745 = vector.extract_strided_slice %715 {offsets = [56, 0], sizes = [8, 32], strides = [1, 1]} : vector<64x32xf32> to vector<8x32xf32>
    %746 = vector.broadcast %56 : vector<1x32xf32> to vector<8x32xf32>
    %747 = arith.mulf %745, %746 : vector<8x32xf32>
    %748 = arith.addf %744, %747 : vector<8x32xf32>
    %c1_252 = arith.constant 1 : index
    %c0_253 = arith.constant 0 : index
    %c0_254 = arith.constant 0 : index
    %749 = vector.load %arg23[%c1_252, %c0_253, %c0_254] : memref<2x32x32xbf16, #tpu.memory_space<vmem>>, vector<1x32x32xbf16>
    %750 = vector.shape_cast %749 : vector<1x32x32xbf16> to vector<32x32xbf16>
    %751 = arith.truncf %748 : vector<8x32xf32> to vector<8x32xbf16>
    %cst_255 = arith.constant dense<0.000000e+00> : vector<8x32xf32>
    %752 = tpu.matmul %751, %750, %cst_255 {dimension_numbers = #tpu.dot_dimension_numbers<[1], [0], [0], [1], [0, 0, 1, 1], [], []>} : vector<8x32xbf16>, vector<32x32xbf16>, vector<8x32xf32> -> vector<8x32xf32>
    %753 = arith.addf %669, %752 : vector<8x32xf32>
    %c1_256 = arith.constant 1 : index
    %c0_257 = arith.constant 0 : index
    %c0_258 = arith.constant 0 : index
    %754 = vector.load %arg24[%c1_256, %c0_257, %c0_258] : memref<2x1x32xf32, #tpu.memory_space<vmem>>, vector<1x1x32xf32>
    %755 = vector.shape_cast %754 : vector<1x1x32xf32> to vector<1x32xf32>
    %756 = vector.broadcast %755 : vector<1x32xf32> to vector<8x32xf32>
    %757 = arith.addf %753, %756 : vector<8x32xf32>
    %c1_259 = arith.constant 1 : index
    %c0_260 = arith.constant 0 : index
    %c0_261 = arith.constant 0 : index
    %758 = vector.load %arg25[%c1_259, %c0_260, %c0_261] : memref<2x1x32xf32, #tpu.memory_space<vmem>>, vector<1x1x32xf32>
    %759 = vector.shape_cast %758 : vector<1x1x32xf32> to vector<1x32xf32>
    %c1_262 = arith.constant 1 : index
    %c0_263 = arith.constant 0 : index
    %c0_264 = arith.constant 0 : index
    %760 = vector.load %arg26[%c1_262, %c0_263, %c0_264] : memref<2x1x32xf32, #tpu.memory_space<vmem>>, vector<1x1x32xf32>
    %761 = vector.shape_cast %760 : vector<1x1x32xf32> to vector<1x32xf32>
    %cst_265 = arith.constant dense<0.000000e+00> : vector<8xf32>
    %762 = vector.multi_reduction <add>, %757, %cst_265 [1] : vector<8x32xf32> to vector<8xf32>
    %763 = vector.shape_cast %762 : vector<8xf32> to vector<8x1xf32>
    %cst_266 = arith.constant 3.200000e+01 : f32
    %764 = vector.broadcast %cst_266 : f32 to vector<8x1xf32>
    %765 = arith.divf %763, %764 : vector<8x1xf32>
    %766 = vector.broadcast %765 : vector<8x1xf32> to vector<8x32xf32>
    %767 = arith.subf %757, %766 : vector<8x32xf32>
    %768 = arith.mulf %767, %767 : vector<8x32xf32>
    %cst_267 = arith.constant dense<0.000000e+00> : vector<8xf32>
    %769 = vector.multi_reduction <add>, %768, %cst_267 [1] : vector<8x32xf32> to vector<8xf32>
    %770 = vector.shape_cast %769 : vector<8xf32> to vector<8x1xf32>
    %cst_268 = arith.constant 3.200000e+01 : f32
    %771 = vector.broadcast %cst_268 : f32 to vector<8x1xf32>
    %772 = arith.divf %770, %771 : vector<8x1xf32>
    %cst_269 = arith.constant 9.99999974E-6 : f32
    %773 = vector.broadcast %cst_269 : f32 to vector<8x1xf32>
    %774 = arith.addf %772, %773 : vector<8x1xf32>
    %775 = math.rsqrt %774 : vector<8x1xf32>
    %776 = vector.broadcast %775 : vector<8x1xf32> to vector<8x32xf32>
    %777 = arith.mulf %767, %776 : vector<8x32xf32>
    %778 = vector.broadcast %759 : vector<1x32xf32> to vector<8x32xf32>
    %779 = arith.mulf %777, %778 : vector<8x32xf32>
    %780 = vector.broadcast %761 : vector<1x32xf32> to vector<8x32xf32>
    %781 = arith.addf %779, %780 : vector<8x32xf32>
    %c1_270 = arith.constant 1 : index
    %c0_271 = arith.constant 0 : index
    %c0_272 = arith.constant 0 : index
    %782 = vector.load %arg27[%c1_270, %c0_271, %c0_272] : memref<2x32x32xbf16, #tpu.memory_space<vmem>>, vector<1x32x32xbf16>
    %783 = vector.shape_cast %782 : vector<1x32x32xbf16> to vector<32x32xbf16>
    %784 = arith.truncf %781 : vector<8x32xf32> to vector<8x32xbf16>
    %cst_273 = arith.constant dense<0.000000e+00> : vector<8x32xf32>
    %785 = tpu.matmul %784, %783, %cst_273 {dimension_numbers = #tpu.dot_dimension_numbers<[1], [0], [0], [1], [0, 0, 1, 1], [], []>} : vector<8x32xbf16>, vector<32x32xbf16>, vector<8x32xf32> -> vector<8x32xf32>
    %c1_274 = arith.constant 1 : index
    %c0_275 = arith.constant 0 : index
    %c0_276 = arith.constant 0 : index
    %786 = vector.load %arg28[%c1_274, %c0_275, %c0_276] : memref<2x1x32xf32, #tpu.memory_space<vmem>>, vector<1x1x32xf32>
    %787 = vector.shape_cast %786 : vector<1x1x32xf32> to vector<1x32xf32>
    %788 = vector.broadcast %787 : vector<1x32xf32> to vector<8x32xf32>
    %789 = arith.addf %785, %788 : vector<8x32xf32>
    %c1_277 = arith.constant 1 : index
    %c0_278 = arith.constant 0 : index
    %c0_279 = arith.constant 0 : index
    %790 = vector.load %arg29[%c1_277, %c0_278, %c0_279] : memref<2x32x64xbf16, #tpu.memory_space<vmem>>, vector<1x32x64xbf16>
    %791 = vector.shape_cast %790 : vector<1x32x64xbf16> to vector<32x64xbf16>
    %792 = arith.truncf %389 : vector<16x32xf32> to vector<16x32xbf16>
    %cst_280 = arith.constant dense<0.000000e+00> : vector<16x64xf32>
    %793 = tpu.matmul %792, %791, %cst_280 {dimension_numbers = #tpu.dot_dimension_numbers<[1], [0], [0], [1], [0, 0, 1, 1], [], []>} : vector<16x32xbf16>, vector<32x64xbf16>, vector<16x64xf32> -> vector<16x64xf32>
    %c1_281 = arith.constant 1 : index
    %c0_282 = arith.constant 0 : index
    %c0_283 = arith.constant 0 : index
    %794 = vector.load %arg30[%c1_281, %c0_282, %c0_283] : memref<2x1x64xf32, #tpu.memory_space<vmem>>, vector<1x1x64xf32>
    %795 = vector.shape_cast %794 : vector<1x1x64xf32> to vector<1x64xf32>
    %796 = vector.broadcast %795 : vector<1x64xf32> to vector<16x64xf32>
    %797 = arith.addf %793, %796 : vector<16x64xf32>
    %798 = vector.extract_strided_slice %797 {offsets = [0, 0], sizes = [16, 32], strides = [1, 1]} : vector<16x64xf32> to vector<16x32xf32>
    %799 = vector.extract_strided_slice %797 {offsets = [0, 32], sizes = [16, 32], strides = [1, 1]} : vector<16x64xf32> to vector<16x32xf32>
    %800 = vector.broadcast %7 : vector<1x32xf32> to vector<8x32xf32>
    %801 = arith.mulf %789, %800 : vector<8x32xf32>
    %802 = vector.broadcast %14 : vector<1x32xf32> to vector<8x32xf32>
    %803 = arith.mulf %789, %802 : vector<8x32xf32>
    %804 = vector.broadcast %21 : vector<1x32xf32> to vector<8x32xf32>
    %805 = arith.mulf %789, %804 : vector<8x32xf32>
    %806 = vector.broadcast %28 : vector<1x32xf32> to vector<8x32xf32>
    %807 = arith.mulf %789, %806 : vector<8x32xf32>
    %808 = vector.broadcast %35 : vector<1x32xf32> to vector<8x32xf32>
    %809 = arith.mulf %789, %808 : vector<8x32xf32>
    %810 = vector.broadcast %42 : vector<1x32xf32> to vector<8x32xf32>
    %811 = arith.mulf %789, %810 : vector<8x32xf32>
    %812 = vector.broadcast %49 : vector<1x32xf32> to vector<8x32xf32>
    %813 = arith.mulf %789, %812 : vector<8x32xf32>
    %814 = vector.broadcast %56 : vector<1x32xf32> to vector<8x32xf32>
    %815 = arith.mulf %789, %814 : vector<8x32xf32>
    %816 = tpu.concatenate %801, %803, %805, %807, %809, %811, %813, %815 in 0 : vector<8x32xf32>, vector<8x32xf32>, vector<8x32xf32>, vector<8x32xf32>, vector<8x32xf32>, vector<8x32xf32>, vector<8x32xf32>, vector<8x32xf32> -> vector<64x32xf32>
    %817 = arith.truncf %816 : vector<64x32xf32> to vector<64x32xbf16>
    %818 = arith.truncf %798 : vector<16x32xf32> to vector<16x32xbf16>
    %cst_284 = arith.constant dense<0.000000e+00> : vector<64x16xf32>
    %819 = tpu.matmul %817, %818, %cst_284 {dimension_numbers = #tpu.dot_dimension_numbers<[1], [1], [0], [0], [0, 0, 1, 0], [], []>} : vector<64x32xbf16>, vector<16x32xbf16>, vector<64x16xf32> -> vector<64x16xf32>
    %cst_285 = arith.constant 5.000000e-01 : f32
    %820 = vector.broadcast %cst_285 : f32 to vector<64x16xf32>
    %821 = arith.mulf %819, %820 : vector<64x16xf32>
    %822 = arith.addf %821, %395 : vector<64x16xf32>
    %cst_286 = arith.constant dense<0xFF800000> : vector<64xf32>
    %823 = vector.multi_reduction <maximumf>, %822, %cst_286 [1] : vector<64x16xf32> to vector<64xf32>
    %824 = vector.shape_cast %823 : vector<64xf32> to vector<64x1xf32>
    %825 = vector.broadcast %824 : vector<64x1xf32> to vector<64x16xf32>
    %826 = arith.subf %822, %825 : vector<64x16xf32>
    %827 = math.exp %826 : vector<64x16xf32>
    %cst_287 = arith.constant dense<0.000000e+00> : vector<64xf32>
    %828 = vector.multi_reduction <add>, %827, %cst_287 [1] : vector<64x16xf32> to vector<64xf32>
    %829 = vector.shape_cast %828 : vector<64xf32> to vector<64x1xf32>
    %830 = arith.truncf %827 : vector<64x16xf32> to vector<64x16xbf16>
    %831 = arith.truncf %799 : vector<16x32xf32> to vector<16x32xbf16>
    %cst_288 = arith.constant dense<0.000000e+00> : vector<64x32xf32>
    %832 = tpu.matmul %830, %831, %cst_288 {dimension_numbers = #tpu.dot_dimension_numbers<[1], [0], [0], [1], [0, 0, 1, 1], [], []>} : vector<64x16xbf16>, vector<16x32xbf16>, vector<64x32xf32> -> vector<64x32xf32>
    %833 = vector.broadcast %829 : vector<64x1xf32> to vector<64x32xf32>
    %834 = arith.divf %832, %833 : vector<64x32xf32>
    %835 = vector.extract_strided_slice %834 {offsets = [0, 0], sizes = [8, 32], strides = [1, 1]} : vector<64x32xf32> to vector<8x32xf32>
    %836 = vector.broadcast %7 : vector<1x32xf32> to vector<8x32xf32>
    %837 = arith.mulf %835, %836 : vector<8x32xf32>
    %cst_289 = arith.constant 0.000000e+00 : f32
    %838 = vector.broadcast %cst_289 : f32 to vector<8x32xf32>
    %839 = arith.addf %838, %837 : vector<8x32xf32>
    %840 = vector.extract_strided_slice %834 {offsets = [8, 0], sizes = [8, 32], strides = [1, 1]} : vector<64x32xf32> to vector<8x32xf32>
    %841 = vector.broadcast %14 : vector<1x32xf32> to vector<8x32xf32>
    %842 = arith.mulf %840, %841 : vector<8x32xf32>
    %843 = arith.addf %839, %842 : vector<8x32xf32>
    %844 = vector.extract_strided_slice %834 {offsets = [16, 0], sizes = [8, 32], strides = [1, 1]} : vector<64x32xf32> to vector<8x32xf32>
    %845 = vector.broadcast %21 : vector<1x32xf32> to vector<8x32xf32>
    %846 = arith.mulf %844, %845 : vector<8x32xf32>
    %847 = arith.addf %843, %846 : vector<8x32xf32>
    %848 = vector.extract_strided_slice %834 {offsets = [24, 0], sizes = [8, 32], strides = [1, 1]} : vector<64x32xf32> to vector<8x32xf32>
    %849 = vector.broadcast %28 : vector<1x32xf32> to vector<8x32xf32>
    %850 = arith.mulf %848, %849 : vector<8x32xf32>
    %851 = arith.addf %847, %850 : vector<8x32xf32>
    %852 = vector.extract_strided_slice %834 {offsets = [32, 0], sizes = [8, 32], strides = [1, 1]} : vector<64x32xf32> to vector<8x32xf32>
    %853 = vector.broadcast %35 : vector<1x32xf32> to vector<8x32xf32>
    %854 = arith.mulf %852, %853 : vector<8x32xf32>
    %855 = arith.addf %851, %854 : vector<8x32xf32>
    %856 = vector.extract_strided_slice %834 {offsets = [40, 0], sizes = [8, 32], strides = [1, 1]} : vector<64x32xf32> to vector<8x32xf32>
    %857 = vector.broadcast %42 : vector<1x32xf32> to vector<8x32xf32>
    %858 = arith.mulf %856, %857 : vector<8x32xf32>
    %859 = arith.addf %855, %858 : vector<8x32xf32>
    %860 = vector.extract_strided_slice %834 {offsets = [48, 0], sizes = [8, 32], strides = [1, 1]} : vector<64x32xf32> to vector<8x32xf32>
    %861 = vector.broadcast %49 : vector<1x32xf32> to vector<8x32xf32>
    %862 = arith.mulf %860, %861 : vector<8x32xf32>
    %863 = arith.addf %859, %862 : vector<8x32xf32>
    %864 = vector.extract_strided_slice %834 {offsets = [56, 0], sizes = [8, 32], strides = [1, 1]} : vector<64x32xf32> to vector<8x32xf32>
    %865 = vector.broadcast %56 : vector<1x32xf32> to vector<8x32xf32>
    %866 = arith.mulf %864, %865 : vector<8x32xf32>
    %867 = arith.addf %863, %866 : vector<8x32xf32>
    %c1_290 = arith.constant 1 : index
    %c0_291 = arith.constant 0 : index
    %c0_292 = arith.constant 0 : index
    %868 = vector.load %arg31[%c1_290, %c0_291, %c0_292] : memref<2x32x32xbf16, #tpu.memory_space<vmem>>, vector<1x32x32xbf16>
    %869 = vector.shape_cast %868 : vector<1x32x32xbf16> to vector<32x32xbf16>
    %870 = arith.truncf %867 : vector<8x32xf32> to vector<8x32xbf16>
    %cst_293 = arith.constant dense<0.000000e+00> : vector<8x32xf32>
    %871 = tpu.matmul %870, %869, %cst_293 {dimension_numbers = #tpu.dot_dimension_numbers<[1], [0], [0], [1], [0, 0, 1, 1], [], []>} : vector<8x32xbf16>, vector<32x32xbf16>, vector<8x32xf32> -> vector<8x32xf32>
    %872 = arith.addf %781, %871 : vector<8x32xf32>
    %c1_294 = arith.constant 1 : index
    %c0_295 = arith.constant 0 : index
    %c0_296 = arith.constant 0 : index
    %873 = vector.load %arg32[%c1_294, %c0_295, %c0_296] : memref<2x1x32xf32, #tpu.memory_space<vmem>>, vector<1x1x32xf32>
    %874 = vector.shape_cast %873 : vector<1x1x32xf32> to vector<1x32xf32>
    %875 = vector.broadcast %874 : vector<1x32xf32> to vector<8x32xf32>
    %876 = arith.addf %872, %875 : vector<8x32xf32>
    %c1_297 = arith.constant 1 : index
    %c0_298 = arith.constant 0 : index
    %c0_299 = arith.constant 0 : index
    %877 = vector.load %arg33[%c1_297, %c0_298, %c0_299] : memref<2x1x32xf32, #tpu.memory_space<vmem>>, vector<1x1x32xf32>
    %878 = vector.shape_cast %877 : vector<1x1x32xf32> to vector<1x32xf32>
    %c1_300 = arith.constant 1 : index
    %c0_301 = arith.constant 0 : index
    %c0_302 = arith.constant 0 : index
    %879 = vector.load %arg34[%c1_300, %c0_301, %c0_302] : memref<2x1x32xf32, #tpu.memory_space<vmem>>, vector<1x1x32xf32>
    %880 = vector.shape_cast %879 : vector<1x1x32xf32> to vector<1x32xf32>
    %cst_303 = arith.constant dense<0.000000e+00> : vector<8xf32>
    %881 = vector.multi_reduction <add>, %876, %cst_303 [1] : vector<8x32xf32> to vector<8xf32>
    %882 = vector.shape_cast %881 : vector<8xf32> to vector<8x1xf32>
    %cst_304 = arith.constant 3.200000e+01 : f32
    %883 = vector.broadcast %cst_304 : f32 to vector<8x1xf32>
    %884 = arith.divf %882, %883 : vector<8x1xf32>
    %885 = vector.broadcast %884 : vector<8x1xf32> to vector<8x32xf32>
    %886 = arith.subf %876, %885 : vector<8x32xf32>
    %887 = arith.mulf %886, %886 : vector<8x32xf32>
    %cst_305 = arith.constant dense<0.000000e+00> : vector<8xf32>
    %888 = vector.multi_reduction <add>, %887, %cst_305 [1] : vector<8x32xf32> to vector<8xf32>
    %889 = vector.shape_cast %888 : vector<8xf32> to vector<8x1xf32>
    %cst_306 = arith.constant 3.200000e+01 : f32
    %890 = vector.broadcast %cst_306 : f32 to vector<8x1xf32>
    %891 = arith.divf %889, %890 : vector<8x1xf32>
    %cst_307 = arith.constant 9.99999974E-6 : f32
    %892 = vector.broadcast %cst_307 : f32 to vector<8x1xf32>
    %893 = arith.addf %891, %892 : vector<8x1xf32>
    %894 = math.rsqrt %893 : vector<8x1xf32>
    %895 = vector.broadcast %894 : vector<8x1xf32> to vector<8x32xf32>
    %896 = arith.mulf %886, %895 : vector<8x32xf32>
    %897 = vector.broadcast %878 : vector<1x32xf32> to vector<8x32xf32>
    %898 = arith.mulf %896, %897 : vector<8x32xf32>
    %899 = vector.broadcast %880 : vector<1x32xf32> to vector<8x32xf32>
    %900 = arith.addf %898, %899 : vector<8x32xf32>
    %c1_308 = arith.constant 1 : index
    %c0_309 = arith.constant 0 : index
    %c0_310 = arith.constant 0 : index
    %901 = vector.load %arg35[%c1_308, %c0_309, %c0_310] : memref<2x32x64xbf16, #tpu.memory_space<vmem>>, vector<1x32x64xbf16>
    %902 = vector.shape_cast %901 : vector<1x32x64xbf16> to vector<32x64xbf16>
    %903 = arith.truncf %900 : vector<8x32xf32> to vector<8x32xbf16>
    %cst_311 = arith.constant dense<0.000000e+00> : vector<8x64xf32>
    %904 = tpu.matmul %903, %902, %cst_311 {dimension_numbers = #tpu.dot_dimension_numbers<[1], [0], [0], [1], [0, 0, 1, 1], [], []>} : vector<8x32xbf16>, vector<32x64xbf16>, vector<8x64xf32> -> vector<8x64xf32>
    %c1_312 = arith.constant 1 : index
    %c0_313 = arith.constant 0 : index
    %c0_314 = arith.constant 0 : index
    %905 = vector.load %arg36[%c1_312, %c0_313, %c0_314] : memref<2x1x64xf32, #tpu.memory_space<vmem>>, vector<1x1x64xf32>
    %906 = vector.shape_cast %905 : vector<1x1x64xf32> to vector<1x64xf32>
    %907 = vector.broadcast %906 : vector<1x64xf32> to vector<8x64xf32>
    %908 = arith.addf %904, %907 : vector<8x64xf32>
    %cst_315 = arith.constant 0.000000e+00 : f32
    %909 = vector.broadcast %cst_315 : f32 to vector<8x64xf32>
    %910 = arith.maximumf %908, %909 : vector<8x64xf32>
    %c1_316 = arith.constant 1 : index
    %c0_317 = arith.constant 0 : index
    %c0_318 = arith.constant 0 : index
    %911 = vector.load %arg37[%c1_316, %c0_317, %c0_318] : memref<2x64x32xbf16, #tpu.memory_space<vmem>>, vector<1x64x32xbf16>
    %912 = vector.shape_cast %911 : vector<1x64x32xbf16> to vector<64x32xbf16>
    %913 = arith.truncf %910 : vector<8x64xf32> to vector<8x64xbf16>
    %cst_319 = arith.constant dense<0.000000e+00> : vector<8x32xf32>
    %914 = tpu.matmul %913, %912, %cst_319 {dimension_numbers = #tpu.dot_dimension_numbers<[1], [0], [0], [1], [0, 0, 1, 1], [], []>} : vector<8x64xbf16>, vector<64x32xbf16>, vector<8x32xf32> -> vector<8x32xf32>
    %c1_320 = arith.constant 1 : index
    %c0_321 = arith.constant 0 : index
    %c0_322 = arith.constant 0 : index
    %915 = vector.load %arg38[%c1_320, %c0_321, %c0_322] : memref<2x1x32xf32, #tpu.memory_space<vmem>>, vector<1x1x32xf32>
    %916 = vector.shape_cast %915 : vector<1x1x32xf32> to vector<1x32xf32>
    %917 = vector.broadcast %916 : vector<1x32xf32> to vector<8x32xf32>
    %918 = arith.addf %914, %917 : vector<8x32xf32>
    %919 = arith.addf %900, %918 : vector<8x32xf32>
    %c1_323 = arith.constant 1 : index
    %c0_324 = arith.constant 0 : index
    %c0_325 = arith.constant 0 : index
    %920 = vector.load %arg39[%c1_323, %c0_324, %c0_325] : memref<2x1x32xf32, #tpu.memory_space<vmem>>, vector<1x1x32xf32>
    %921 = vector.shape_cast %920 : vector<1x1x32xf32> to vector<1x32xf32>
    %c1_326 = arith.constant 1 : index
    %c0_327 = arith.constant 0 : index
    %c0_328 = arith.constant 0 : index
    %922 = vector.load %arg40[%c1_326, %c0_327, %c0_328] : memref<2x1x32xf32, #tpu.memory_space<vmem>>, vector<1x1x32xf32>
    %923 = vector.shape_cast %922 : vector<1x1x32xf32> to vector<1x32xf32>
    %cst_329 = arith.constant dense<0.000000e+00> : vector<8xf32>
    %924 = vector.multi_reduction <add>, %919, %cst_329 [1] : vector<8x32xf32> to vector<8xf32>
    %925 = vector.shape_cast %924 : vector<8xf32> to vector<8x1xf32>
    %cst_330 = arith.constant 3.200000e+01 : f32
    %926 = vector.broadcast %cst_330 : f32 to vector<8x1xf32>
    %927 = arith.divf %925, %926 : vector<8x1xf32>
    %928 = vector.broadcast %927 : vector<8x1xf32> to vector<8x32xf32>
    %929 = arith.subf %919, %928 : vector<8x32xf32>
    %930 = arith.mulf %929, %929 : vector<8x32xf32>
    %cst_331 = arith.constant dense<0.000000e+00> : vector<8xf32>
    %931 = vector.multi_reduction <add>, %930, %cst_331 [1] : vector<8x32xf32> to vector<8xf32>
    %932 = vector.shape_cast %931 : vector<8xf32> to vector<8x1xf32>
    %cst_332 = arith.constant 3.200000e+01 : f32
    %933 = vector.broadcast %cst_332 : f32 to vector<8x1xf32>
    %934 = arith.divf %932, %933 : vector<8x1xf32>
    %cst_333 = arith.constant 9.99999974E-6 : f32
    %935 = vector.broadcast %cst_333 : f32 to vector<8x1xf32>
    %936 = arith.addf %934, %935 : vector<8x1xf32>
    %937 = math.rsqrt %936 : vector<8x1xf32>
    %938 = vector.broadcast %937 : vector<8x1xf32> to vector<8x32xf32>
    %939 = arith.mulf %929, %938 : vector<8x32xf32>
    %940 = vector.broadcast %921 : vector<1x32xf32> to vector<8x32xf32>
    %941 = arith.mulf %939, %940 : vector<8x32xf32>
    %942 = vector.broadcast %923 : vector<1x32xf32> to vector<8x32xf32>
    %943 = arith.addf %941, %942 : vector<8x32xf32>
    %c0_334 = arith.constant 0 : index
    %c0_335 = arith.constant 0 : index
    %944 = vector.load %arg41[%c0_334, %c0_335] : memref<32x128xbf16, #tpu.memory_space<vmem>>, vector<32x128xbf16>
    %945 = arith.truncf %943 : vector<8x32xf32> to vector<8x32xbf16>
    %cst_336 = arith.constant dense<0.000000e+00> : vector<8x128xf32>
    %946 = tpu.matmul %945, %944, %cst_336 {dimension_numbers = #tpu.dot_dimension_numbers<[1], [0], [0], [1], [0, 0, 1, 1], [], []>} : vector<8x32xbf16>, vector<32x128xbf16>, vector<8x128xf32> -> vector<8x128xf32>
    %c0_337 = arith.constant 0 : index
    %c0_338 = arith.constant 0 : index
    %947 = vector.load %arg42[%c0_337, %c0_338] : memref<1x128xf32, #tpu.memory_space<vmem>>, vector<1x128xf32>
    %948 = vector.broadcast %947 : vector<1x128xf32> to vector<8x128xf32>
    %949 = arith.addf %946, %948 : vector<8x128xf32>
    %c0_339 = arith.constant 0 : index
    %c0_340 = arith.constant 0 : index
    %c0_341 = arith.constant 0 : index
    %950 = vector.load %arg43[%c0_339, %c0_340, %c0_341] : memref<1x8x128xf32, #tpu.memory_space<vmem>>, vector<1x8x128xf32>
    %951 = vector.shape_cast %950 : vector<1x8x128xf32> to vector<8x128xf32>
    %952 = vector.shape_cast %949 : vector<8x128xf32> to vector<1x8x128xf32>
    tpu.vector_store %arg43[%c0_339, %c0_340, %c0_341], %952 {strides = array<i32>} : memref<1x8x128xf32, #tpu.memory_space<vmem>>, vector<1x8x128xf32>,
    return
  }
  func.func @transform_0(%arg0: i32) -> (i32, i32, i32) {
    %c0_i32 = arith.constant 0 : i32
    %c0_i32_0 = arith.constant 0 : i32
    %c0_i32_1 = arith.constant 0 : i32
    return %arg0, %c0_i32, %c0_i32_0 : i32, i32, i32
  }
  func.func @transform_1(%arg0: i32) -> (i32, i32, i32) {
    %c0_i32 = arith.constant 0 : i32
    %c0_i32_0 = arith.constant 0 : i32
    %c0_i32_1 = arith.constant 0 : i32
    return %arg0, %c0_i32, %c0_i32_0 : i32, i32, i32
  }
  func.func @transform_2(%arg0: i32) -> (i32, i32, i32) {
    %c0_i32 = arith.constant 0 : i32
    %c0_i32_0 = arith.constant 0 : i32
    %c0_i32_1 = arith.constant 0 : i32
    return %arg0, %c0_i32, %c0_i32_0 : i32, i32, i32
  }
  func.func @transform_3(%arg0: i32) -> (i32, i32, i32) {
    %c0_i32 = arith.constant 0 : i32
    %c0_i32_0 = arith.constant 0 : i32
    %c0_i32_1 = arith.constant 0 : i32
    return %arg0, %c0_i32, %c0_i32_0 : i32, i32, i32
  }
  func.func @transform_4(%arg0: i32) -> (i32, i32, i32) {
    %c0_i32 = arith.constant 0 : i32
    %c0_i32_0 = arith.constant 0 : i32
    %c0_i32_1 = arith.constant 0 : i32
    return %arg0, %c0_i32, %c0_i32_0 : i32, i32, i32
  }
  func.func @transform_5(%arg0: i32) -> (i32, i32) {
    %c0_i32 = arith.constant 0 : i32
    %c0_i32_0 = arith.constant 0 : i32
    %c0_i32_1 = arith.constant 0 : i32
    return %c0_i32, %c0_i32_0 : i32, i32
  }
  func.func @transform_6(%arg0: i32) -> (i32, i32) {
    %c0_i32 = arith.constant 0 : i32
    %c0_i32_0 = arith.constant 0 : i32
    %c0_i32_1 = arith.constant 0 : i32
    return %c0_i32, %c0_i32_0 : i32, i32
  }
  func.func @transform_7(%arg0: i32) -> (i32, i32) {
    %c0_i32 = arith.constant 0 : i32
    %c0_i32_0 = arith.constant 0 : i32
    %c0_i32_1 = arith.constant 0 : i32
    return %c0_i32, %c0_i32_0 : i32, i32
  }
  func.func @transform_8(%arg0: i32) -> (i32, i32, i32) {
    %c0_i32 = arith.constant 0 : i32
    %c0_i32_0 = arith.constant 0 : i32
    %c0_i32_1 = arith.constant 0 : i32
    %c0_i32_2 = arith.constant 0 : i32
    return %c0_i32, %c0_i32_0, %c0_i32_1 : i32, i32, i32
  }
  func.func @transform_9(%arg0: i32) -> (i32, i32, i32) {
    %c0_i32 = arith.constant 0 : i32
    %c0_i32_0 = arith.constant 0 : i32
    %c0_i32_1 = arith.constant 0 : i32
    %c0_i32_2 = arith.constant 0 : i32
    return %c0_i32, %c0_i32_0, %c0_i32_1 : i32, i32, i32
  }
  func.func @transform_10(%arg0: i32) -> (i32, i32, i32) {
    %c0_i32 = arith.constant 0 : i32
    %c0_i32_0 = arith.constant 0 : i32
    %c0_i32_1 = arith.constant 0 : i32
    %c0_i32_2 = arith.constant 0 : i32
    return %c0_i32, %c0_i32_0, %c0_i32_1 : i32, i32, i32
  }
  func.func @transform_11(%arg0: i32) -> (i32, i32, i32) {
    %c0_i32 = arith.constant 0 : i32
    %c0_i32_0 = arith.constant 0 : i32
    %c0_i32_1 = arith.constant 0 : i32
    %c0_i32_2 = arith.constant 0 : i32
    return %c0_i32, %c0_i32_0, %c0_i32_1 : i32, i32, i32
  }
  func.func @transform_12(%arg0: i32) -> (i32, i32, i32) {
    %c0_i32 = arith.constant 0 : i32
    %c0_i32_0 = arith.constant 0 : i32
    %c0_i32_1 = arith.constant 0 : i32
    %c0_i32_2 = arith.constant 0 : i32
    return %c0_i32, %c0_i32_0, %c0_i32_1 : i32, i32, i32
  }
  func.func @transform_13(%arg0: i32) -> (i32, i32, i32) {
    %c0_i32 = arith.constant 0 : i32
    %c0_i32_0 = arith.constant 0 : i32
    %c0_i32_1 = arith.constant 0 : i32
    %c0_i32_2 = arith.constant 0 : i32
    return %c0_i32, %c0_i32_0, %c0_i32_1 : i32, i32, i32
  }
  func.func @transform_14(%arg0: i32) -> (i32, i32, i32) {
    %c0_i32 = arith.constant 0 : i32
    %c0_i32_0 = arith.constant 0 : i32
    %c0_i32_1 = arith.constant 0 : i32
    %c0_i32_2 = arith.constant 0 : i32
    return %c0_i32, %c0_i32_0, %c0_i32_1 : i32, i32, i32
  }
  func.func @transform_15(%arg0: i32) -> (i32, i32, i32) {
    %c0_i32 = arith.constant 0 : i32
    %c0_i32_0 = arith.constant 0 : i32
    %c0_i32_1 = arith.constant 0 : i32
    %c0_i32_2 = arith.constant 0 : i32
    return %c0_i32, %c0_i32_0, %c0_i32_1 : i32, i32, i32
  }
  func.func @transform_16(%arg0: i32) -> (i32, i32, i32) {
    %c0_i32 = arith.constant 0 : i32
    %c0_i32_0 = arith.constant 0 : i32
    %c0_i32_1 = arith.constant 0 : i32
    %c0_i32_2 = arith.constant 0 : i32
    return %c0_i32, %c0_i32_0, %c0_i32_1 : i32, i32, i32
  }
  func.func @transform_17(%arg0: i32) -> (i32, i32, i32) {
    %c0_i32 = arith.constant 0 : i32
    %c0_i32_0 = arith.constant 0 : i32
    %c0_i32_1 = arith.constant 0 : i32
    %c0_i32_2 = arith.constant 0 : i32
    return %c0_i32, %c0_i32_0, %c0_i32_1 : i32, i32, i32
  }
  func.func @transform_18(%arg0: i32) -> (i32, i32, i32) {
    %c0_i32 = arith.constant 0 : i32
    %c0_i32_0 = arith.constant 0 : i32
    %c0_i32_1 = arith.constant 0 : i32
    %c0_i32_2 = arith.constant 0 : i32
    return %c0_i32, %c0_i32_0, %c0_i32_1 : i32, i32, i32
  }
  func.func @transform_19(%arg0: i32) -> (i32, i32, i32) {
    %c0_i32 = arith.constant 0 : i32
    %c0_i32_0 = arith.constant 0 : i32
    %c0_i32_1 = arith.constant 0 : i32
    %c0_i32_2 = arith.constant 0 : i32
    return %c0_i32, %c0_i32_0, %c0_i32_1 : i32, i32, i32
  }
  func.func @transform_20(%arg0: i32) -> (i32, i32, i32) {
    %c0_i32 = arith.constant 0 : i32
    %c0_i32_0 = arith.constant 0 : i32
    %c0_i32_1 = arith.constant 0 : i32
    %c0_i32_2 = arith.constant 0 : i32
    return %c0_i32, %c0_i32_0, %c0_i32_1 : i32, i32, i32
  }
  func.func @transform_21(%arg0: i32) -> (i32, i32, i32) {
    %c0_i32 = arith.constant 0 : i32
    %c0_i32_0 = arith.constant 0 : i32
    %c0_i32_1 = arith.constant 0 : i32
    %c0_i32_2 = arith.constant 0 : i32
    return %c0_i32, %c0_i32_0, %c0_i32_1 : i32, i32, i32
  }
  func.func @transform_22(%arg0: i32) -> (i32, i32, i32) {
    %c0_i32 = arith.constant 0 : i32
    %c0_i32_0 = arith.constant 0 : i32
    %c0_i32_1 = arith.constant 0 : i32
    %c0_i32_2 = arith.constant 0 : i32
    return %c0_i32, %c0_i32_0, %c0_i32_1 : i32, i32, i32
  }
  func.func @transform_23(%arg0: i32) -> (i32, i32, i32) {
    %c0_i32 = arith.constant 0 : i32
    %c0_i32_0 = arith.constant 0 : i32
    %c0_i32_1 = arith.constant 0 : i32
    %c0_i32_2 = arith.constant 0 : i32
    return %c0_i32, %c0_i32_0, %c0_i32_1 : i32, i32, i32
  }
  func.func @transform_24(%arg0: i32) -> (i32, i32, i32) {
    %c0_i32 = arith.constant 0 : i32
    %c0_i32_0 = arith.constant 0 : i32
    %c0_i32_1 = arith.constant 0 : i32
    %c0_i32_2 = arith.constant 0 : i32
    return %c0_i32, %c0_i32_0, %c0_i32_1 : i32, i32, i32
  }
  func.func @transform_25(%arg0: i32) -> (i32, i32, i32) {
    %c0_i32 = arith.constant 0 : i32
    %c0_i32_0 = arith.constant 0 : i32
    %c0_i32_1 = arith.constant 0 : i32
    %c0_i32_2 = arith.constant 0 : i32
    return %c0_i32, %c0_i32_0, %c0_i32_1 : i32, i32, i32
  }
  func.func @transform_26(%arg0: i32) -> (i32, i32, i32) {
    %c0_i32 = arith.constant 0 : i32
    %c0_i32_0 = arith.constant 0 : i32
    %c0_i32_1 = arith.constant 0 : i32
    %c0_i32_2 = arith.constant 0 : i32
    return %c0_i32, %c0_i32_0, %c0_i32_1 : i32, i32, i32
  }
  func.func @transform_27(%arg0: i32) -> (i32, i32, i32) {
    %c0_i32 = arith.constant 0 : i32
    %c0_i32_0 = arith.constant 0 : i32
    %c0_i32_1 = arith.constant 0 : i32
    %c0_i32_2 = arith.constant 0 : i32
    return %c0_i32, %c0_i32_0, %c0_i32_1 : i32, i32, i32
  }
  func.func @transform_28(%arg0: i32) -> (i32, i32, i32) {
    %c0_i32 = arith.constant 0 : i32
    %c0_i32_0 = arith.constant 0 : i32
    %c0_i32_1 = arith.constant 0 : i32
    %c0_i32_2 = arith.constant 0 : i32
    return %c0_i32, %c0_i32_0, %c0_i32_1 : i32, i32, i32
  }
  func.func @transform_29(%arg0: i32) -> (i32, i32, i32) {
    %c0_i32 = arith.constant 0 : i32
    %c0_i32_0 = arith.constant 0 : i32
    %c0_i32_1 = arith.constant 0 : i32
    %c0_i32_2 = arith.constant 0 : i32
    return %c0_i32, %c0_i32_0, %c0_i32_1 : i32, i32, i32
  }
  func.func @transform_30(%arg0: i32) -> (i32, i32, i32) {
    %c0_i32 = arith.constant 0 : i32
    %c0_i32_0 = arith.constant 0 : i32
    %c0_i32_1 = arith.constant 0 : i32
    %c0_i32_2 = arith.constant 0 : i32
    return %c0_i32, %c0_i32_0, %c0_i32_1 : i32, i32, i32
  }
  func.func @transform_31(%arg0: i32) -> (i32, i32, i32) {
    %c0_i32 = arith.constant 0 : i32
    %c0_i32_0 = arith.constant 0 : i32
    %c0_i32_1 = arith.constant 0 : i32
    %c0_i32_2 = arith.constant 0 : i32
    return %c0_i32, %c0_i32_0, %c0_i32_1 : i32, i32, i32
  }
  func.func @transform_32(%arg0: i32) -> (i32, i32, i32) {
    %c0_i32 = arith.constant 0 : i32
    %c0_i32_0 = arith.constant 0 : i32
    %c0_i32_1 = arith.constant 0 : i32
    %c0_i32_2 = arith.constant 0 : i32
    return %c0_i32, %c0_i32_0, %c0_i32_1 : i32, i32, i32
  }
  func.func @transform_33(%arg0: i32) -> (i32, i32, i32) {
    %c0_i32 = arith.constant 0 : i32
    %c0_i32_0 = arith.constant 0 : i32
    %c0_i32_1 = arith.constant 0 : i32
    %c0_i32_2 = arith.constant 0 : i32
    return %c0_i32, %c0_i32_0, %c0_i32_1 : i32, i32, i32
  }
  func.func @transform_34(%arg0: i32) -> (i32, i32, i32) {
    %c0_i32 = arith.constant 0 : i32
    %c0_i32_0 = arith.constant 0 : i32
    %c0_i32_1 = arith.constant 0 : i32
    %c0_i32_2 = arith.constant 0 : i32
    return %c0_i32, %c0_i32_0, %c0_i32_1 : i32, i32, i32
  }
  func.func @transform_35(%arg0: i32) -> (i32, i32, i32) {
    %c0_i32 = arith.constant 0 : i32
    %c0_i32_0 = arith.constant 0 : i32
    %c0_i32_1 = arith.constant 0 : i32
    %c0_i32_2 = arith.constant 0 : i32
    return %c0_i32, %c0_i32_0, %c0_i32_1 : i32, i32, i32
  }
  func.func @transform_36(%arg0: i32) -> (i32, i32, i32) {
    %c0_i32 = arith.constant 0 : i32
    %c0_i32_0 = arith.constant 0 : i32
    %c0_i32_1 = arith.constant 0 : i32
    %c0_i32_2 = arith.constant 0 : i32
    return %c0_i32, %c0_i32_0, %c0_i32_1 : i32, i32, i32
  }
  func.func @transform_37(%arg0: i32) -> (i32, i32, i32) {
    %c0_i32 = arith.constant 0 : i32
    %c0_i32_0 = arith.constant 0 : i32
    %c0_i32_1 = arith.constant 0 : i32
    %c0_i32_2 = arith.constant 0 : i32
    return %c0_i32, %c0_i32_0, %c0_i32_1 : i32, i32, i32
  }
  func.func @transform_38(%arg0: i32) -> (i32, i32, i32) {
    %c0_i32 = arith.constant 0 : i32
    %c0_i32_0 = arith.constant 0 : i32
    %c0_i32_1 = arith.constant 0 : i32
    %c0_i32_2 = arith.constant 0 : i32
    return %c0_i32, %c0_i32_0, %c0_i32_1 : i32, i32, i32
  }
  func.func @transform_39(%arg0: i32) -> (i32, i32, i32) {
    %c0_i32 = arith.constant 0 : i32
    %c0_i32_0 = arith.constant 0 : i32
    %c0_i32_1 = arith.constant 0 : i32
    %c0_i32_2 = arith.constant 0 : i32
    return %c0_i32, %c0_i32_0, %c0_i32_1 : i32, i32, i32
  }
  func.func @transform_40(%arg0: i32) -> (i32, i32) {
    %c0_i32 = arith.constant 0 : i32
    %c0_i32_0 = arith.constant 0 : i32
    %c0_i32_1 = arith.constant 0 : i32
    return %c0_i32, %c0_i32_0 : i32, i32
  }
  func.func @transform_41(%arg0: i32) -> (i32, i32) {
    %c0_i32 = arith.constant 0 : i32
    %c0_i32_0 = arith.constant 0 : i32
    %c0_i32_1 = arith.constant 0 : i32
    return %c0_i32, %c0_i32_0 : i32, i32
  }
  func.func @transform_42(%arg0: i32) -> (i32, i32, i32) {
    %c0_i32 = arith.constant 0 : i32
    %c0_i32_0 = arith.constant 0 : i32
    %c0_i32_1 = arith.constant 0 : i32
    return %arg0, %c0_i32, %c0_i32_0 : i32, i32, i32
  }
}

</mosaic_0001>

<bundles_post_ra>
// kernel: fwd.1
= control target key start
LH: loop header
LB: loop body
LE: loop exit
PB: predicated region body
PF: predicated region fallthrough
CT: control target
= control target key end

     0   :  { %s6583_s6 = smov 1   ;;  %s6584_s10 = smov 2   ;;  %s8973_s0 = inlined_call_operand.smem [shape: u32[43], index: -1, kind: input, shape index: {}] }
   0x1   :  { %s6637_s5 = sld [smem:[%s8973_s0]]   ;;  %s6585_s14 = smov 3  }
   0x2   :  { %s6642_s9 = sld [smem:[%s8973_s0 + %s6583_s6]]   ;;  %s6586_s18 = smov 4  }
   0x3   :  { %s6647_s13 = sld [smem:[%s8973_s0 + %s6584_s10]]   ;;  %s6587_s22 = smov 5  }
   0x4   :  { %s6652_s17 = sld [smem:[%s8973_s0 + %s6585_s14]]   ;;  %s6588_s26 = smov 6  }
   0x5   :  { %s6657_s21 = sld [smem:[%s8973_s0 + %s6586_s18]]   ;;  %s6589_s30 = smov 7  }
   0x6   :  { %s6662_s25 = sld [smem:[%s8973_s0 + %s6587_s22]]   ;;  %s6590_s4 = smov 8  }
   0x7   :  { %9015 = sst [smem:[#allocation2_spill]] %s6637_s5  ;;  %s6591_s10 = smov 9  }
   0x8   :  { %9016 = sst [smem:[#allocation3_spill]] %s6642_s9  ;;  %s6592_s15 = smov 10  }
   0x9   :  { %9017 = sst [smem:[#allocation4_spill]] %s6647_s13  ;;  %s6593_s20 = smov 11  }
   0xa   :  { %9018 = sst [smem:[#allocation5_spill]] %s6652_s17  ;;  %s6595_s1 = smov 13  }
   0xb   :  { %9019 = sst [smem:[#allocation6_spill]] %s6657_s21  ;;  %s6596_s7 = smov 14  }
   0xc   :  { %9020 = sst [smem:[#allocation7_spill]] %s6662_s25  ;;  %s6598_s22 = smov 16  }
   0xd   :  { %s6667_s29 = sld [smem:[%s8973_s0 + %s6588_s26]]   ;;  %s6594_s26 = smov 12  }
   0xe   :  { %s6672_s3 = sld [smem:[%s8973_s0 + %s6589_s30]]   ;;  %s6599_s28 = smov 17  }
   0xf   :  { %s6677_s8 = sld [smem:[%s8973_s0 + %s6590_s4]]  }
  0x10   :  { %s6682_s14 = sld [smem:[%s8973_s0 + %s6591_s10]]  }
  0x11   :  { %s6687_s19 = sld [smem:[%s8973_s0 + %s6592_s15]]   ;;  %s6597_s15 = smov 15  }
  0x12   :  { %s6692_s24 = sld [smem:[%s8973_s0 + %s6593_s20]]  }
  0x13   :  { %s6697_s30 = sld [smem:[%s8973_s0 + %s6594_s26]]  }
  0x14   :  { %9021 = sst [smem:[#allocation8_spill]] %s6672_s3 }
  0x15   :  { %9022 = sst [smem:[#allocation9_spill]] %s6677_s8 }
  0x16   :  { %9023 = sst [smem:[#allocation10_spill]] %s6682_s14 }
  0x17   :  { %9024 = sst [smem:[#allocation11_spill]] %s6687_s19 }
  0x18   :  { %9025 = sst [smem:[#allocation12_spill]] %s6692_s24 }
  0x19   :  { %s6702_s6 = sld [smem:[%s8973_s0 + %s6595_s1]]  }
  0x1a   :  { %s6707_s12 = sld [smem:[%s8973_s0 + %s6596_s7]]   ;;  %s6600_s7 = smov 18  }
  0x1b   :  { %s6712_s20 = sld [smem:[%s8973_s0 + %s6597_s15]]   ;;  %s6601_s15 = smov 19  }
  0x1c   :  { %s6717_s27 = sld [smem:[%s8973_s0 + %s6598_s22]]   ;;  %s6602_s22 = smov 20  }
  0x1d   :  { %s6722_s4 = sld [smem:[%s8973_s0 + %s6599_s28]]   ;;  %s6603_s28 = smov 21  }
  0x1e   :  { %s6727_s21 = sld [smem:[%s8973_s0 + %s6600_s7]]   ;;  %s6604_s7 = smov 22  }
  0x1f   :  { %9026 = sst [smem:[#allocation13_spill]] %s6702_s6 }
  0x20   :  { %9027 = sst [smem:[#allocation14_spill]] %s6707_s12 }
  0x21   :  { %9028 = sst [smem:[#allocation15_spill]] %s6712_s20 }
  0x22   :  { %s6732_s17 = sld [smem:[%s8973_s0 + %s6601_s15]]   ;;  %s6605_s15 = smov 23  }
  0x23   :  { %9029 = sst [smem:[#allocation16_spill]] %s6722_s4 }
  0x24   :  { %9030 = sst [smem:[#allocation17_spill]] %s6727_s21 }
  0x25   :  { %s6737_s9 = sld [smem:[%s8973_s0 + %s6602_s22]]   ;;  %s6606_s22 = smov 24  }
  0x26   :  { %s6742_s4 = sld [smem:[%s8973_s0 + %s6603_s28]]   ;;  %s6607_s28 = smov 25  }
  0x27   :  { %s6747_s21 = sld [smem:[%s8973_s0 + %s6604_s7]]   ;;  %s6608_s7 = smov 26  }
  0x28   :  { %9031 = sst [smem:[#allocation18_spill]] %s6732_s17 }
  0x29   :  { %s6752_s17 = sld [smem:[%s8973_s0 + %s6605_s15]]   ;;  %s6609_s15 = smov 27  }
  0x2b   :  { %9032 = sst [smem:[#allocation19_spill]] %s6737_s9 }
  0x2c   :  { %9033 = sst [smem:[#allocation20_spill]] %s6742_s4 }
  0x2d   :  { %9034 = sst [smem:[#allocation21_spill]] %s6747_s21 }
  0x2e   :  { %s6757_s9 = sld [smem:[%s8973_s0 + %s6606_s22]]   ;;  %s6610_s22 = smov 28  }
  0x2f   :  { %9035 = sst [smem:[#allocation22_spill]] %s6752_s17 }
  0x30   :  { %s6762_s4 = sld [smem:[%s8973_s0 + %s6607_s28]]   ;;  %s6611_s28 = smov 29  }
  0x31   :  { %s6767_s21 = sld [smem:[%s8973_s0 + %s6608_s7]]   ;;  %s6612_s7 = smov 30  }
  0x32   :  { %s6772_s17 = sld [smem:[%s8973_s0 + %s6609_s15]]   ;;  %s6613_s15 = smov 31  }
  0x34   :  { %9036 = sst [smem:[#allocation23_spill]] %s6757_s9 }
  0x35   :  { %s6777_s9 = sld [smem:[%s8973_s0 + %s6610_s22]]   ;;  %s6614_s22 = smov 32  }
  0x36   :  { %9037 = sst [smem:[#allocation24_spill]] %s6762_s4 }
  0x37   :  { %9038 = sst [smem:[#allocation25_spill]] %s6767_s21 }
  0x38   :  { %9039 = sst [smem:[#allocation26_spill]] %s6772_s17 }
  0x39   :  { %s6782_s4 = sld [smem:[%s8973_s0 + %s6611_s28]]   ;;  %s6615_s28 = smov 33  }
  0x3a   :  { %s6787_s21 = sld [smem:[%s8973_s0 + %s6612_s7]]   ;;  %s6616_s7 = smov 34  }
  0x3b   :  { %9040 = sst [smem:[#allocation27_spill]] %s6777_s9 }
  0x3c   :  { %s6792_s17 = sld [smem:[%s8973_s0 + %s6613_s15]]   ;;  %s6617_s15 = smov 35  }
  0x3d   :  { %s6797_s9 = sld [smem:[%s8973_s0 + %s6614_s22]]   ;;  %s6618_s22 = smov 36  }
  0x3f   :  { %9041 = sst [smem:[#allocation28_spill]] %s6782_s4 }
  0x40   :  { %9042 = sst [smem:[#allocation29_spill]] %s6787_s21 }
  0x41   :  { %s6802_s4 = sld [smem:[%s8973_s0 + %s6615_s28]]   ;;  %s6619_s28 = smov 37  }
  0x42   :  { %9043 = sst [smem:[#allocation30_spill]] %s6792_s17 }
  0x43   :  { %9044 = sst [smem:[#allocation31_spill]] %s6797_s9 }
  0x44   :  { %s6807_s21 = sld [smem:[%s8973_s0 + %s6616_s7]]   ;;  %s6620_s7 = smov 38  }
  0x45   :  { %s6812_s17 = sld [smem:[%s8973_s0 + %s6617_s15]]   ;;  %s6621_s15 = smov 39  }
  0x46   :  { %s6817_s9 = sld [smem:[%s8973_s0 + %s6618_s22]]   ;;  %s6622_s22 = smov 40  }
  0x47   :  { %9045 = sst [smem:[#allocation32_spill]] %s6802_s4 }
  0x48   :  { %s6822_s4 = sld [smem:[%s8973_s0 + %s6619_s28]]   ;;  %s6623_s28 = smov 41  }
  0x4a   :  { %9046 = sst [smem:[#allocation33_spill]] %s6807_s21 }
  0x4b   :  { %9047 = sst [smem:[#allocation34_spill]] %s6812_s17 }
  0x4c   :  { %9048 = sst [smem:[#allocation35_spill]] %s6817_s9 }
  0x4d   :  { %s6827_s21 = sld [smem:[%s8973_s0 + %s6620_s7]]   ;;  %s6624_s7 = smov 42  }
  0x4e   :  { %9049 = sst [smem:[#allocation36_spill]] %s6822_s4 }
  0x4f   :  { %s6832_s17 = sld [smem:[%s8973_s0 + %s6621_s15]]   ;;  %s6849_s15 = smov 0  }
  0x50   :  { %s6837_s9 = sld [smem:[%s8973_s0 + %s6622_s22]]  }
  0x51   :  { %s6842_s4 = sld [smem:[%s8973_s0 + %s6623_s28]]  }
  0x53   :  { %9050 = sst [smem:[#allocation37_spill]] %s6827_s21 }
  0x54   :  { %s6847_s21 = sld [smem:[%s8973_s0 + %s6624_s7]]  }
  0x55 LB: > { %s9051_s25 = sld [smem:[#allocation7_spill]]  ;;  %s5683_s16 = sadd.s32 4294967295, %s6581_s15   ;;  %s6581_s15 = sphi %s6849_s15, %s95_s15  }
  0x56   : > { %s9052_s24 = sld [smem:[#allocation12_spill]]  ;;  %p5687_p0 = scmp.ge.s32.totalorder %s6581_s15, 1 }
  0x57   : > { %s9053_s20 = sld [smem:[#allocation15_spill]]  ;;  %p1194_p1 = scmp.lt.s32.totalorder %s6581_s15, 3 }
  0x58   : > { %s9054_s19 = sld [smem:[#allocation11_spill]] }
  0x59   : > { %s9055_s14 = sld [smem:[#allocation10_spill]]  ;;  %p1195_p2 = pnand %p5687_p0, %p1194_p1 }
  0x5a   : > { %s9056_s12 = sld [smem:[#allocation14_spill]]  ;;  %p1314_p3 = scmp.lt.s32.totalorder (!%p1195_p2), %s5683_s16, 1 }
  0x5b   : > { %s9057_s8 = sld [smem:[#allocation9_spill]]  ;;  %1198 = sbr.rel (%p1195_p2) target bundleno = 8740 (0x2224), region = 188 }
  0x5c   : > { %s9058_s6 = sld [smem:[#allocation13_spill]]  ;;  %s9001_s22 = smov (!%p1195_p2), 96  }
  0x5d   : > { %s9059_s5 = sld [smem:[#allocation2_spill]] (!%p1195_p2)  ;;  %s8999_s28 = smov (!%p1195_p2), 64  }
  0x5e   : > { %s9060_s3 = sld [smem:[#allocation8_spill]] (!%p1195_p2) }
  0x5f   : > { %s9061_s13 = sld [smem:[#allocation4_spill]] (!%p1195_p2) }
  0x60   : > { %v6101_v0 = vld [vmem:[%s6667_s29] sm:$0xff]  ;;  %v6103_v1 = vld [vmem:[%s6667_s29 + $0x10] sm:$0xff]  ;;  %v6102_v2 = vld [vmem:[%s6667_s29 + $0x8] sm:$0xff]  ;;  %s9430_s16 = smov (!%p1314_p3, %s5683_s16), 1  ;;  %vm8996_vm0 = vcmask 130048   ;;  %vm1469_vm1 = vcmask 1046528   ;;  %v1343_v38 = vlaneseq }
  0x61   : > { %1416 = vmatpush.bf16.msra.mxu0 %v6101_v0  ;;  %1489 = vmatpush.bf16.msra.mxu2 %v6103_v1  ;;  %s6158_s0 = smul.u32 24, %s9430_s16  ;;  %vm1428_vm2 = vsmask.f32 7424  ;;  %v6105_v18 = vld [vmem:[%s9057_s8 + $0x8] sm:$0xff]  ;;  %v6104_v19 = vld [vmem:[%s9057_s8] sm:$0xff]  ;;  %vm8997_vm3 = vcmask 261120  }
  0x62   : > { %1456 = vmatpush.bf16.msra.mxu1 %v6102_v2  ;;  %1545 = vmatpush.bf16.msra.mxu3 %v6105_v18  ;;  %v1389_v22 = vld [vmem:[%s9051_s25] sm:$0xff]  ;;  %v1390_v25 = vld [vmem:[%s9051_s25 + $0x8] sm:$0xff]  ;;  %v1344_v39 = vand.u32 127, %v1343_v38  ;;  %v6625_v40 = vmov 0.0   ;;  %s6098_s23 = sshll.u32 %s9430_s16, 7  ;;  %s9145_s1 = sld [smem:[#allocation16_spill]] }
  0x63   : > { %s1318_s18 = scalar_lea.vmem %s9059_s5, %s6158_s0  ;;  %v6214_v45 = vld [vmem:[%s9055_s14] ss:$0 sm:$0xff]  ;;  %s9150_s2 = sld [smem:[#allocation17_spill]] }
  0x64   : > { %v1385_v3 = vld [vmem:[%s1318_s18] sm:$0xff]  ;;  %v1386_v4 = vld [vmem:[%s1318_s18 + $0x8] sm:$0xff]  ;;  %v1387_v5 = vld [vmem:[%s1318_s18 + $0x10] sm:$0x3]  ;;  %vm1365_vm4 = vcmp.ge.s32.totalorder %v1344_v39, 16  ;;  %vm1366_vm5 = vcmp.lt.s32.totalorder %v1344_v39, 20 }
  0x65   : > { %v1398_v6 = vpack.c.bf16 %v1386_v4, %v1385_v3  ;;  %v1427_v7 = vpack.c.bf16 %v1387_v5, %v1387_v5  ;;  %v6213_v21 = vld [vmem:[%s9060_s3] ss:$0 sm:$0xff]  ;;  %vm1370_vm6 = vcmp.ge.s32.totalorder %v1344_v39, 20  ;;  %vm1371_vm7 = vcmp.lt.s32.totalorder %v1344_v39, 24  ;;  %vm1367_vm9 = vmand %vm1365_vm4, %vm1366_vm5  ;;  %s6924_s26 = scalar_lea.vmem %s9061_s13, %s6098_s23  ;;  %s9151_s7 = sld [smem:[#allocation18_spill]] }
  0x66   : > { %1546 = vmatpush.bf16.msra.mxu3 %v6104_v19  ;;  %v1394_v23 = vadd.f32 %v6213_v21, %v1389_v22  ;;  %v1395_v28 = vadd.f32 %v6213_v21, %v1390_v25  ;;  %vm1375_vm8 = vcmp.ge.s32.totalorder %v1344_v39, 24  ;;  %vm1376_vm10 = vcmp.lt.s32.totalorder %v1344_v39, 28  ;;  %vm1372_vm13 = vmand %vm1370_vm6, %vm1371_vm7  ;;  %v1498_v18 = vld [vmem:[%s6924_s26] sm:$0xff]  ;;  %s9235_s10 = sld [smem:[#allocation19_spill]]  ;;  %s8998_s0 = sshll.u32 %s9430_s16, 3 }
  0x67   : > { %5709 = vmatmul.msk.bf16.vlgmr.msra.gmra.mxu0 %vm8996_vm0, %v1398_v6  ;;  %v1470_v8 = vrot.slane %v1398_v6, 1  ;;  %v1471_v9 = vrot.slane %v1427_v7, 1  ;;  %v1429_v10 = vshrl.u32 %v1398_v6, 16  ;;  %v1431_v11 = vshll.u32 %v1398_v6, 16  ;;  %vm1377_vm14 = vmand %vm1375_vm8, %vm1376_vm10  ;;  %s9238_s11 = sld [smem:[#allocation3_spill]] }
  0x68   : > { %v1436_v12 = vshll.u32 %v1427_v7, 16  ;;  %vm1380_vm11 = vcmp.ge.s32.totalorder %v1344_v39, 28  ;;  %vm1381_vm12 = vcmp.lt.s32.totalorder %v1344_v39, 32  ;;  %v6879_v41 = vsel %vm1367_vm9, 1.0, %v6625_v40  ;;  %s9241_s23 = sld [smem:[#allocation20_spill]] }
  0x69   : > { %v1472_v13 = vsel %vm1469_vm1, %v1470_v8, %v1471_v9  ;;  %v1433_v14 = vrot.slane %v1431_v11, 1  ;;  %v6881_v42 = vsel %vm1372_vm13, 1.0, %v6625_v40  ;;  %v6883_v43 = vsel %vm1377_vm14, 1.0, %v6625_v40  ;;  %vm1382_vm15 = vmand %vm1380_vm11, %vm1381_vm12  ;;  %s9281_s3 = sld [smem:[#allocation24_spill]] }
  0x6a   : > { %5719 = vmatmul.msk.bf16.vlgmr.msra.gmra.mxu2 %vm8996_vm0, %v1472_v13  ;;  %v1438_v15 = vrot.slane %v1436_v12, 1  ;;  %v6885_v44 = vsel %vm1382_vm15, 1.0, %v6625_v40  ;;  %vm1350_vm1 = vcmp.ge.s32.totalorder %v1344_v39, 4  ;;  %vm1356_vm4 = vcmp.lt.s32.totalorder %v1344_v39, 12  ;;  %s9282_s5 = sld [smem:[#allocation26_spill]] }
  0x6b   : > { %v1434_v16 = vor.u32 %v1433_v14, %v1429_v10  ;;  %vm1360_vm5 = vcmp.ge.s32.totalorder %v1344_v39, 12  ;;  %vm1346_vm6 = vcmp.lt.s32.totalorder %v1344_v39, 4  ;;  %s9335_s13 = sld [smem:[#allocation35_spill]] }
  0x6c   : > { %v6888_v48 = vsel %vm1346_vm6, 1.0, %v6625_v40  ;;  %s9345_s25 = sld [smem:[#allocation37_spill]] }
  0x6d   : > { %v1439_v17 = vsel %vm1428_vm2, %v1434_v16, %v1438_v15  ;;  %vm1351_vm2 = vcmp.lt.s32.totalorder %v1344_v39, 8  ;;  %s1322_s18 = scalar_lea.vmem %s9238_s11, %s8998_s0  ;;  %s9000_s11 = sshll.u32 %s9430_s16, 6 }
  0x6e   : > { %5714 = vmatmul.msk.bf16.vlgmr.msra.gmra.mxu1 %vm8996_vm0, %v1439_v17  ;;  %vm1355_vm0 = vcmp.ge.s32.totalorder %v1344_v39, 8  ;;  %vm1352_vm9 = vmand %vm1350_vm1, %vm1351_vm2  ;;  %vm9071_vm2 = vcmask 130048   ;;  %s9271_s0 = sld [smem:[#allocation27_spill]] }
  0x6f   : > { %vm1357_vm7 = vmand %vm1355_vm0, %vm1356_vm4  ;;  %v6890_v49 = vsel %vm1352_vm9, 1.0, %v6625_v40  ;;  %vm9062_vm0 = vcmask 261120  }
  0x70   : > { %v6892_v50 = vsel %vm1357_vm7, 1.0, %v6625_v40  ;;  %vm9064_vm8 = vmmov %vm9062_vm0 }
  0x71   : > { %vm9065_vm10 = vmmov %vm9062_vm0 }
  0x72   : > { %vm9066_vm11 = vmmov %vm9062_vm0 }
  0x73   : > { %vm9067_vm12 = vmmov %vm9062_vm0 }
  0x74   : > { %vm9068_vm14 = vmmov %vm9062_vm0 }
  0x75   : > { %vm9069_vm15 = vmmov %vm9062_vm0 }
  0x76   : > { %vm9070_vm1 = vmmov %vm9062_vm0 }
  0x77   : > { %vm9072_vm4 = vmmov %vm9071_vm2 }
  0x78   : > { %vm9074_vm9 = vmmov %vm9071_vm2 }
  0x79   : > { %vm9075_vm6 = vmmov %vm9071_vm2 }
  0x7a   : > { %vm9076_vm7 = vmmov %vm9071_vm2 }
  0xe4   : > { %v1418_v20 = vpop.f32.mrf.mxu0 }
  0xe5   : > { %v1423_v27 = vadd.f32 %v1418_v20, %v1394_v23  ;;  %v1499_v23 = vld [vmem:[%s6924_s26 + $0x8] sm:$0xff] }
  0xeb   : > { %v1458_v24 = vpop.f32.mrf.mxu1 }
  0xec   : > { %v1420_v29 = vpop.f32.mrf.mxu0  ;;  %v1463_v30 = vadd.f32 %v1458_v24, %v1423_v27 }
  0xed   : > { %v1491_v26 = vpop.f32.mrf.mxu2  ;;  %v1424_v31 = vadd.f32 %v1420_v29, %v1395_v28  ;;  %v1500_v28 = vld [vmem:[%s6924_s26 + $0x10] sm:$0xff] }
  0xee   : > { %v6872_v35 = vadd.f32 %v1491_v26, %v1463_v30 }
  0xf3   : > { %v1460_v32 = vpop.f32.mrf.mxu1 }
  0xf4   : > { %v1464_v33 = vadd.f32 %v1460_v32, %v1424_v31 }
  0xf5   : > { %v1493_v34 = vpop.f32.mrf.mxu2 }
  0xf6   : > { %v6874_v36 = vadd.f32 %v1493_v34, %v1464_v33  ;;  %v1501_v33 = vld [vmem:[%s6924_s26 + $0x18] sm:$0xff] }
  0xf8   : > { %v1518_v37 = vpack.c.bf16 %v6874_v36, %v6872_v35 }
  0xfa   : > { %5728 = vmatmul.msk.bf16.vlgmr.msra.gmra.mxu3 %vm8997_vm3, %v1518_v37  ;;  %vm1361_vm3 = vcmp.lt.s32.totalorder %v1344_v39, 16 }
  0xfb   : > { %vm1362_vm13 = vmand %vm1360_vm5, %vm1361_vm3 }
  0xfc   : > { %v6894_v51 = vsel %vm1362_vm13, 1.0, %v6625_v40  ;;  %vm9063_vm3 = vmmov %vm9062_vm0  ;;  %v1502_v40 = vld [vmem:[%s6924_s26 + $0x20] sm:$0xff] }
  0xfd   : > { %vm9073_vm5 = vmmov %vm9071_vm2 }
  0xfe   : > { %vm9077_vm13 = vmmov %vm9071_vm2 }
 0x17d   : > { %v1548_v46 = vpop.f32.mrf.mxu3 }
 0x17e   : > { %v1549_v47 = vadd.f32 %v6214_v45, %v1548_v46 }
 0x180   : > { %v1553_v53 = vmul.f32 %v6888_v48, %v1549_v47  ;;  %v1555_v55 = vmul.f32 %v6890_v49, %v1549_v47  ;;  %v1557_v56 = vmul.f32 %v6892_v50, %v1549_v47  ;;  %v1559_v57 = vmul.f32 %v6894_v51, %v1549_v47 }
 0x181   : > { %v1561_v58 = vmul.f32 %v6879_v41, %v1549_v47  ;;  %v1563_v59 = vmul.f32 %v6881_v42, %v1549_v47  ;;  %v1565_v60 = vmul.f32 %v6883_v43, %v1549_v47  ;;  %v1567_v61 = vmul.f32 %v6885_v44, %v1549_v47 }
 0x185   : > { %v1550_v52 = vpop.f32.mrf.mxu3 }
 0x186   : > { %v1551_v54 = vadd.f32 %v6214_v45, %v1550_v52 }
 0x188   : > { %v1577_v62 = vpack.c.bf16 %v1551_v54, %v1549_v47  ;;  %v1554_v63 = vmul.f32 %v6888_v48, %v1551_v54  ;;  %v1556_v0 = vmul.f32 %v6890_v49, %v1551_v54  ;;  %v1558_v1 = vmul.f32 %v6892_v50, %v1551_v54 }
 0x189   : > { %v1560_v2 = vmul.f32 %v6894_v51, %v1551_v54  ;;  %v1562_v3 = vmul.f32 %v6879_v41, %v1551_v54  ;;  %v1564_v4 = vmul.f32 %v6881_v42, %v1551_v54  ;;  %v1566_v5 = vmul.f32 %v6883_v43, %v1551_v54 }
 0x18a   : > { %1579 = vrot.lane.b32.xlu0 %v1577_v62, %s9001_s22  ;;  %v1569_v6 = vpack.c.bf16 %v1554_v63, %v1553_v53  ;;  %v1570_v7 = vpack.c.bf16 %v1556_v0, %v1555_v55  ;;  %v1571_v8 = vpack.c.bf16 %v1558_v1, %v1557_v56  ;;  %v1568_v9 = vmul.f32 %v6885_v44, %v1551_v54  ;;  %v1503_v53 = vld [vmem:[%s6924_s26 + $0x28] sm:$0xff]  ;;  %v1506_v0 = vld [vmem:[%s6924_s26 + $0x40] sm:$0xff] }
 0x18b   : > { %v1572_v10 = vpack.c.bf16 %v1560_v2, %v1559_v57  ;;  %v1573_v11 = vpack.c.bf16 %v1562_v3, %v1561_v58  ;;  %v1574_v12 = vpack.c.bf16 %v1564_v4, %v1563_v59  ;;  %v1575_v13 = vpack.c.bf16 %v1566_v5, %v1565_v60  ;;  %v1504_v58 = vld [vmem:[%s6924_s26 + $0x30] sm:$0xff] }
 0x18c   : > { %v1576_v14 = vpack.c.bf16 %v1568_v9, %v1567_v61 }
 0x1fc   : > { %v1580_v15 = vpop.permute.xlu0 %1579 }
 0x1fd   : > { %v1606_v16 = vsel %vm9062_vm0, %v1580_v15, 0  ;;  %vm9078_vm0 = vmmov %vm9071_vm2 }
 0x1fe   : > { %1615 = vmatpush.bf16.xpose.msrb.mxu0 %v1606_v16 }
 0x205   : > { %5729 = vmatmul.msk.bf16.vlgmr.msrb.gmra.mxu0 %vm9063_vm3, %v1569_v6  ;;  %v1507_v6 = vld [vmem:[%s6924_s26 + $0x48] sm:$0xff]  ;;  %vm9079_vm3 = vmmov %vm9078_vm0 }
 0x215   : > { %5730 = vmatmul.msk.bf16.gmra.mxu0 %vm9064_vm8, %v1570_v7  ;;  %vm9080_vm8 = vmmov %vm9078_vm0 }
 0x225   : > { %5731 = vmatmul.msk.bf16.gmra.mxu0 %vm9065_vm10, %v1571_v8  ;;  %v1505_v8 = vld [vmem:[%s6924_s26 + $0x38] sm:$0xff]  ;;  %vm9081_vm10 = vmmov %vm9078_vm0 }
 0x235   : > { %5732 = vmatmul.msk.bf16.gmra.mxu0 %vm9066_vm11, %v1572_v10  ;;  %vm9082_vm11 = vmmov %vm9078_vm0 }
 0x245   : > { %5733 = vmatmul.msk.bf16.gmra.mxu0 %vm9067_vm12, %v1573_v11  ;;  %vm9083_vm12 = vmmov %vm9078_vm0 }
 0x255   : > { %5734 = vmatmul.msk.bf16.gmra.mxu0 %vm9068_vm14, %v1574_v12  ;;  %vm9084_vm14 = vmmov %vm9078_vm0 }
 0x265   : > { %5735 = vmatmul.msk.bf16.gmra.mxu0 %vm9069_vm15, %v1575_v13  ;;  %vm9085_vm15 = vmmov %vm9078_vm0 }
 0x275   : > { %5736 = vmatmul.msk.bf16.gmra.mxu0 %vm9070_vm1, %v1576_v14  ;;  %v1508_v14 = vld [vmem:[%s6924_s26 + $0x50] sm:$0xff]  ;;  %vm9086_vm1 = vmmov %vm9078_vm0 }
 0x282   : > { %v1617_v17 = vpop.f32.mrf.mxu0 }
 0x283   : > { %v1657_v19 = vmul.f32 0.5, %v1617_v17 }
 0x285   : > { %v6927_v20 = vadd.f32 %v1657_v19, %v1498_v18  ;;  %v1509_v19 = vld [vmem:[%s6924_s26 + $0x58] sm:$0xff] }
 0x287   : > { %v1689_v21 = vsel %vm9071_vm2, %v6927_v20, -inf  ;;  %vm9087_vm2 = vmmov %vm9078_vm0 }
 0x288   : > { %1690 = vmax.xlane.f32.xlu0 %v1689_v21 }
 0x28a   : > { %v1619_v22 = vpop.f32.mrf.mxu0 }
 0x28b   : > { %v1658_v24 = vmul.f32 0.5, %v1619_v22 }
 0x28d   : > { %v6932_v25 = vadd.f32 %v1658_v24, %v1499_v23 }
 0x28f   : > { %v1692_v26 = vsel %vm9072_vm4, %v6932_v25, -inf  ;;  %vm9088_vm4 = vmmov %vm9078_vm0 }
 0x290   : > { %1693 = vmax.xlane.f32.xlu1 %v1692_v26  ;;  %v1510_v26 = vld [vmem:[%s6924_s26 + $0x60] sm:$0xff] }
 0x292   : > { %v1622_v27 = vpop.f32.mrf.mxu0 }
 0x293   : > { %v1659_v29 = vmul.f32 0.5, %v1622_v27 }
 0x295   : > { %v6937_v30 = vadd.f32 %v1659_v29, %v1500_v28 }
 0x297   : > { %v1695_v31 = vsel %vm9073_vm5, %v6937_v30, -inf  ;;  %vm9089_vm5 = vmmov %vm9078_vm0 }
 0x298   : > { %1696 = vmax.xlane.f32.xlu2 %v1695_v31 }
 0x29a   : > { %v1624_v32 = vpop.f32.mrf.mxu0 }
 0x29b   : > { %v1660_v34 = vmul.f32 0.5, %v1624_v32  ;;  %v1511_v32 = vld [vmem:[%s6924_s26 + $0x68] sm:$0xff] }
 0x29d   : > { %v6942_v37 = vadd.f32 %v1660_v34, %v1501_v33 }
 0x29f   : > { %v1698_v38 = vsel %vm9074_vm9, %v6942_v37, -inf  ;;  %vm9090_vm9 = vmmov %vm9078_vm0 }
 0x2a0   : > { %1699 = vmax.xlane.f32.xlu2 %v1698_v38 }
 0x2a2   : > { %v1627_v39 = vpop.f32.mrf.mxu0 }
 0x2a3   : > { %v1661_v45 = vmul.f32 0.5, %v1627_v39 }
 0x2a5   : > { %v6947_v46 = vadd.f32 %v1661_v45, %v1502_v40  ;;  %v1512_v40 = vld [vmem:[%s6924_s26 + $0x70] sm:$0xff] }
 0x2a7   : > { %v1701_v47 = vsel %vm9075_vm6, %v6947_v46, -inf  ;;  %vm9091_vm6 = vmmov %vm9078_vm0 }
 0x2a8   : > { %1702 = vmax.xlane.f32.xlu2 %v1701_v47 }
 0x2a9   : > { %1841 = vrot.lane.b32.xlu1 %v1577_v62, %s8999_s28 }
 0x2aa   : > { %v1629_v52 = vpop.f32.mrf.mxu0 }
 0x2ab   : > { %v1662_v54 = vmul.f32 0.5, %v1629_v52 }
 0x2ad   : > { %v6953_v55 = vadd.f32 %v1662_v54, %v1503_v53  ;;  %v1513_v54 = vld [vmem:[%s6924_s26 + $0x78] sm:$0xff] }
 0x2af   : > { %v1704_v56 = vsel %vm9076_vm7, %v6953_v55, -inf  ;;  %vm9092_vm7 = vmmov %vm9078_vm0 }
 0x2b0   : > { %1705 = vmax.xlane.f32.xlu2 %v1704_v56 }
 0x2b2   : > { %v1632_v57 = vpop.f32.mrf.mxu0 }
 0x2b3   : > { %v1663_v59 = vmul.f32 0.5, %v1632_v57 }
 0x2b5   : > { %v6958_v60 = vadd.f32 %v1663_v59, %v1504_v58 }
 0x2b7   : > { %v1707_v61 = vsel %vm9077_vm13, %v6958_v60, -inf  ;;  %vm9093_vm13 = vmmov %vm9078_vm0 }
 0x2b8   : > { %1708 = vmax.xlane.f32.xlu2 %v1707_v61 }
 0x2ba   : > { %v1634_v62 = vpop.f32.mrf.mxu0 }
 0x2bb   : > { %v1664_v4 = vmul.f32 0.5, %v1634_v62 }
 0x2bd   : > { %v6971_v10 = vadd.f32 %v1664_v4, %v1505_v8 }
 0x2bf   : > { %v1710_v13 = vsel %vm9080_vm8, %v6971_v10, -inf  ;;  %vm9095_vm8 = vmmov %vm9078_vm0 }
 0x2c2   : > { %v1637_v63 = vpop.f32.mrf.mxu0 }
 0x2c3   : > { %v1665_v1 = vmul.f32 0.5, %v1637_v63 }
 0x2c5   : > { %v6963_v2 = vadd.f32 %v1665_v1, %v1506_v0 }
 0x2c7   : > { %v1713_v3 = vsel %vm9078_vm0, %v6963_v2, -inf }
 0x2c8   : > { %1714 = vmax.xlane.f32.xlu2 %v1713_v3 }
 0x2ca   : > { %v1639_v5 = vpop.f32.mrf.mxu0 }
 0x2cb   : > { %v1666_v7 = vmul.f32 0.5, %v1639_v5 }
 0x2cd   : > { %v6969_v9 = vadd.f32 %v1666_v7, %v1507_v6 }
 0x2cf   : > { %v1716_v11 = vsel %vm9079_vm3, %v6969_v9, -inf  ;;  %vm9094_vm3 = vmmov %vm9078_vm0 }
 0x2d0   : > { %1717 = vmax.xlane.f32.xlu2 %v1716_v11 }
 0x2d2   : > { %v1642_v12 = vpop.f32.mrf.mxu0 }
 0x2d3   : > { %v1667_v15 = vmul.f32 0.5, %v1642_v12  ;;  %1711 = vmax.xlane.f32.xlu1 %v1710_v13 }
 0x2d5   : > { %v6978_v16 = vadd.f32 %v1667_v15, %v1508_v14 }
 0x2d7   : > { %v1719_v17 = vsel %vm9081_vm10, %v6978_v16, -inf  ;;  %vm9096_vm10 = vmmov %vm9078_vm0 }
 0x2d8   : > { %1720 = vmax.xlane.f32.xlu0 %v1719_v17 }
 0x2da   : > { %v1644_v18 = vpop.f32.mrf.mxu0 }
 0x2db   : > { %v1668_v21 = vmul.f32 0.5, %v1644_v18 }
 0x2dd   : > { %v6983_v22 = vadd.f32 %v1668_v21, %v1509_v19 }
 0x2df   : > { %v1722_v23 = vsel %vm9082_vm11, %v6983_v22, -inf  ;;  %vm9097_vm11 = vmmov %vm9078_vm0 }
 0x2e0   : > { %1723 = vmax.xlane.f32.xlu2 %v1722_v23 }
 0x2e2   : > { %v1647_v24 = vpop.f32.mrf.mxu0 }
 0x2e3   : > { %v1669_v27 = vmul.f32 0.5, %v1647_v24 }
 0x2e5   : > { %v6988_v28 = vadd.f32 %v1669_v27, %v1510_v26 }
 0x2e7   : > { %v1725_v29 = vsel %vm9083_vm12, %v6988_v28, -inf  ;;  %vm9098_vm12 = vmmov %vm9078_vm0 }
 0x2e8   : > { %1726 = vmax.xlane.f32.xlu0 %v1725_v29 }
 0x2ea   : > { %v1649_v31 = vpop.f32.mrf.mxu0 }
 0x2eb   : > { %v1670_v33 = vmul.f32 0.5, %v1649_v31 }
 0x2ed   : > { %v6993_v34 = vadd.f32 %v1670_v33, %v1511_v32 }
 0x2ef   : > { %v1728_v38 = vsel %vm9084_vm14, %v6993_v34, -inf  ;;  %vm9099_vm14 = vmmov %vm9078_vm0 }
 0x2f0   : > { %1729 = vmax.xlane.f32.xlu2 %v1728_v38 }
 0x2f2   : > { %v1652_v39 = vpop.f32.mrf.mxu0 }
 0x2f3   : > { %v1671_v45 = vmul.f32 0.5, %v1652_v39 }
 0x2f5   : > { %v6998_v47 = vadd.f32 %v1671_v45, %v1512_v40 }
 0x2f7   : > { %v1731_v52 = vsel %vm9085_vm15, %v6998_v47, -inf  ;;  %vm9100_vm15 = vmmov %vm9078_vm0 }
 0x2f8   : > { %1732 = vmax.xlane.f32.xlu0 %v1731_v52 }
 0x2fa   : > { %v1654_v53 = vpop.f32.mrf.mxu0 }
 0x2fb   : > { %v1672_v56 = vmul.f32 0.5, %v1654_v53  ;;  %v1691_v57 = vpop.xlane.xlu0 %1690 }
 0x2fc   : > { %v1737_v58 = vsub.f32 %v6927_v20, %v1691_v57 }
 0x2fd   : > { %v7004_v59 = vadd.f32 %v1672_v56, %v1513_v54 }
 0x2fe   : > { %v1753_v61 = vmul.f32 1.442695, %v1737_v58 }
 0x2ff   : > { %v1734_v62 = vsel %vm9086_vm1, %v7004_v59, -inf  ;;  %vm9101_vm1 = vmmov %vm9078_vm0 }
 0x300   : > { %6257 = vpow2.f32 %v1753_v61  ;;  %1735 = vmax.xlane.f32.xlu2 %v1734_v62 }
 0x303   : > { %v1694_v63 = vpop.xlane.xlu1 %1693 }
 0x304   : > { %v1738_v0 = vsub.f32 %v6932_v25, %v1694_v63 }
 0x306   : > { %v6258_v1 = vpop.eup %6257  ;;  %v1755_v3 = vmul.f32 1.442695, %v1738_v0 }
 0x307   : > { %v1785_v4 = vsel %vm9087_vm2, %v6258_v1, 0.0  ;;  %vm9102_vm2 = vmmov %vm9078_vm0 }
 0x308   : > { %6259 = vpow2.f32 %v1755_v3  ;;  %1786 = vadd.xlane.f32.xlu0 %v1785_v4 }
 0x30b   : > { %v1697_v5 = vpop.xlane.xlu2 %1696 }
 0x30c   : > { %v1739_v20 = vsub.f32 %v6937_v30, %v1697_v5 }
 0x30e   : > { %v6260_v6 = vpop.eup %6259  ;;  %v1757_v7 = vmul.f32 1.442695, %v1739_v20 }
 0x30f   : > { %v1788_v8 = vsel %vm9088_vm4, %v6260_v6, 0.0  ;;  %v1833_v30 = vpack.c.bf16 %v6260_v6, %v6258_v1  ;;  %vm9103_vm4 = vmmov %vm9078_vm0 }
 0x310   : > { %6261 = vpow2.f32 %v1757_v7  ;;  %1789 = vadd.xlane.f32.xlu1 %v1788_v8 }
 0x313   : > { %v1700_v11 = vpop.xlane.xlu2 %1699 }
 0x314   : > { %v1740_v12 = vsub.f32 %v6942_v37, %v1700_v11 }
 0x316   : > { %v6262_v13 = vpop.eup %6261  ;;  %v1759_v25 = vmul.f32 1.442695, %v1740_v12 }
 0x317   : > { %v1791_v14 = vsel %vm9089_vm5, %v6262_v13, 0.0  ;;  %vm9104_vm5 = vmmov %vm9078_vm0 }
 0x318   : > { %6263 = vpow2.f32 %v1759_v25  ;;  %1792 = vadd.xlane.f32.xlu2 %v1791_v14 }
 0x31b   : > { %v1842_v15 = vpop.permute.xlu1 %1841  ;;  %v1703_v17 = vpop.xlane.xlu2 %1702 }
 0x31c   : > { %v1741_v18 = vsub.f32 %v6947_v46, %v1703_v17  ;;  %1875 = vmatpush.bf16.msrb.mxu1 %v1842_v15 }
 0x31e   : > { %v6264_v19 = vpop.eup %6263  ;;  %v1761_v21 = vmul.f32 1.442695, %v1741_v18 }
 0x31f   : > { %5737 = vmatmul.msk.bf16.vlgmr.msrb.gmra.mxu1 %vm9090_vm9, %v1833_v30  ;;  %v1794_v23 = vsel %vm9091_vm6, %v6264_v19, 0.0  ;;  %v1834_v32 = vpack.c.bf16 %v6264_v19, %v6262_v13  ;;  %vm9105_vm9 = vmmov %vm9078_vm0 }
 0x320   : > { %6265 = vpow2.f32 %v1761_v21  ;;  %1795 = vadd.xlane.f32.xlu0 %v1794_v23  ;;  %vm9106_vm6 = vmmov %vm9078_vm0 }
 0x323   : > { %v1706_v37 = vpop.xlane.xlu2 %1705 }
 0x324   : > { %v1742_v24 = vsub.f32 %v6953_v55, %v1706_v37 }
 0x326   : > { %v6266_v26 = vpop.eup %6265  ;;  %v1763_v27 = vmul.f32 1.442695, %v1742_v24 }
 0x327   : > { %v1797_v29 = vsel %vm9092_vm7, %v6266_v26, 0.0  ;;  %vm9107_vm7 = vmmov %vm9078_vm0 }
 0x328   : > { %6267 = vpow2.f32 %v1763_v27  ;;  %1798 = vadd.xlane.f32.xlu1 %v1797_v29 }
 0x32b   : > { %v1709_v46 = vpop.xlane.xlu2 %1708 }
 0x32c   : > { %v1743_v31 = vsub.f32 %v6958_v60, %v1709_v46 }
 0x32e   : > { %v6268_v33 = vpop.eup %6267  ;;  %v1765_v38 = vmul.f32 1.442695, %v1743_v31 }
 0x32f   : > { %5738 = vmatmul.msk.bf16.gmra.mxu1 %vm9093_vm13, %v1834_v32  ;;  %v1800_v39 = vsel %vm9078_vm0, %v6268_v33, 0.0  ;;  %v1835_v53 = vpack.c.bf16 %v6268_v33, %v6266_v26  ;;  %vm9108_vm13 = vmmov %vm9078_vm0 }
 0x330   : > { %6269 = vpow2.f32 %v1765_v38  ;;  %1801 = vadd.xlane.f32.xlu2 %v1800_v39 }
 0x336   : > { %v6270_v40 = vpop.eup %6269 }
 0x337   : > { %v1803_v55 = vsel %vm9094_vm3, %v6270_v40, 0.0 }
 0x338   : > { %1804 = vadd.xlane.f32.xlu0 %v1803_v55 }
 0x33b   : > { %v1715_v45 = vpop.xlane.xlu2 %1714 }
 0x33c   : > { %v1745_v52 = vsub.f32 %v6963_v2, %v1715_v45 }
 0x33e   : > { %v1769_v54 = vmul.f32 1.442695, %v1745_v52 }
 0x33f   : > { %5739 = vmatmul.msk.bf16.gmra.mxu1 %vm9095_vm8, %v1835_v53 }
 0x340   : > { %6271 = vpow2.f32 %v1769_v54 }
 0x343   : > { %v1718_v60 = vpop.xlane.xlu2 %1717 }
 0x344   : > { %v1746_v56 = vsub.f32 %v6969_v9, %v1718_v60 }
 0x346   : > { %v6272_v57 = vpop.eup %6271  ;;  %v1771_v58 = vmul.f32 1.442695, %v1746_v56  ;;  %v1712_v61 = vpop.xlane.xlu1 %1711 }
 0x347   : > { %v1744_v62 = vsub.f32 %v6971_v10, %v1712_v61  ;;  %v1809_v63 = vsel %vm9096_vm10, %v6272_v57, 0.0 }
 0x348   : > { %6273 = vpow2.f32 %v1771_v58  ;;  %1810 = vadd.xlane.f32.xlu2 %v1809_v63 }
 0x349   : > { %v1767_v0 = vmul.f32 1.442695, %v1744_v62 }
 0x34b   : > { %6275 = vpow2.f32 %v1767_v0  ;;  %v1721_v2 = vpop.xlane.xlu0 %1720 }
 0x34c   : > { %v1747_v1 = vsub.f32 %v6978_v16, %v1721_v2 }
 0x34e   : > { %v6274_v3 = vpop.eup %6273  ;;  %v1773_v4 = vmul.f32 1.442695, %v1747_v1 }
 0x34f   : > { %v1812_v5 = vsel %vm9097_vm11, %v6274_v3, 0.0  ;;  %v1837_v17 = vpack.c.bf16 %v6274_v3, %v6272_v57 }
 0x350   : > { %1813 = vadd.xlane.f32.xlu0 %v1812_v5  ;;  %6277 = vpow2.f32 %v1773_v4 }
 0x351   : > { %v6276_v9 = vpop.eup %6275 }
 0x352   : > { %v1806_v20 = vsel %vm9098_vm12, %v6276_v9, 0.0  ;;  %v1836_v6 = vpack.c.bf16 %v6276_v9, %v6270_v40 }
 0x353   : > { %1807 = vadd.xlane.f32.xlu1 %v1806_v20  ;;  %v1724_v10 = vpop.xlane.xlu2 %1723 }
 0x354   : > { %v1748_v7 = vsub.f32 %v6983_v22, %v1724_v10  ;;  %5740 = vmatmul.msk.bf16.gmra.mxu1 %vm9099_vm14, %v1836_v6 }
 0x356   : > { %v1775_v8 = vmul.f32 1.442695, %v1748_v7  ;;  %v6278_v11 = vpop.eup %6277 }
 0x357   : > { %v1815_v16 = vsel %vm9100_vm15, %v6278_v11, 0.0 }
 0x358   : > { %6279 = vpow2.f32 %v1775_v8 }
 0x35b   : > { %1816 = vadd.xlane.f32.xlu1 %v1815_v16  ;;  %v1727_v12 = vpop.xlane.xlu0 %1726 }
 0x35c   : > { %v1749_v13 = vsub.f32 %v6988_v28, %v1727_v12 }
 0x35e   : > { %v6280_v25 = vpop.eup %6279  ;;  %v1777_v14 = vmul.f32 1.442695, %v1749_v13 }
 0x35f   : > { %v1818_v15 = vsel %vm9101_vm1, %v6280_v25, 0.0  ;;  %v1838_v27 = vpack.c.bf16 %v6280_v25, %v6278_v11 }
 0x360   : > { %6281 = vpow2.f32 %v1777_v14  ;;  %1819 = vadd.xlane.f32.xlu2 %v1818_v15 }
 0x363   : > { %v1730_v18 = vpop.xlane.xlu2 %1729 }
 0x364   : > { %v1750_v22 = vsub.f32 %v6993_v34, %v1730_v18  ;;  %5741 = vmatmul.msk.bf16.gmra.mxu1 %vm9102_vm2, %v1837_v17 }
 0x366   : > { %v6282_v30 = vpop.eup %6281  ;;  %v1779_v19 = vmul.f32 1.442695, %v1750_v22 }
 0x367   : > { %v1821_v21 = vsel %vm9103_vm4, %v6282_v30, 0.0 }
 0x368   : > { %6283 = vpow2.f32 %v1779_v19  ;;  %1822 = vadd.xlane.f32.xlu0 %v1821_v21 }
 0x36b   : > { %v1733_v23 = vpop.xlane.xlu0 %1732 }
 0x36c   : > { %v1751_v28 = vsub.f32 %v6998_v47, %v1733_v23 }
 0x36e   : > { %v6284_v37 = vpop.eup %6283  ;;  %v1781_v24 = vmul.f32 1.442695, %v1751_v28 }
 0x36f   : > { %v1824_v26 = vsel %vm9104_vm5, %v6284_v37, 0.0  ;;  %v1839_v38 = vpack.c.bf16 %v6284_v37, %v6282_v30 }
 0x370   : > { %6285 = vpow2.f32 %v1781_v24  ;;  %1825 = vadd.xlane.f32.xlu1 %v1824_v26 }
 0x373   : > { %v1736_v29 = vpop.xlane.xlu2 %1735 }
 0x374   : > { %v1752_v34 = vsub.f32 %v7004_v59, %v1736_v29  ;;  %5742 = vmatmul.msk.bf16.gmra.mxu1 %vm9105_vm9, %v1838_v27 }
 0x376   : > { %v6286_v46 = vpop.eup %6285  ;;  %v1783_v31 = vmul.f32 1.442695, %v1752_v34 }
 0x377   : > { %v1827_v32 = vsel %vm9106_vm6, %v6286_v46, 0.0 }
 0x378   : > { %6287 = vpow2.f32 %v1783_v31  ;;  %1828 = vadd.xlane.f32.xlu2 %v1827_v32 }
 0x37b   : > { %v1787_v39 = vpop.xlane.xlu0 %1786 }
 0x37c   : > { %6289 = vrcp.f32 %v1787_v39  ;;  %v1928_v0 = vand.u32 2147483648, %v1787_v39  ;;  %vm1922_vm8 = vweird.f32 %v1787_v39  ;;  %v1926_v1 = vand.u32 2147483647, %v1787_v39 }
 0x37e   : > { %v6288_v33 = vpop.eup %6287  ;;  %v1929_v6 = vor.u32 1.1754944e-38, %v1928_v0  ;;  %vm1927_vm15 = vcmp.eq.f32.partialorder %v1926_v1, 8.507059e+37 }
 0x37f   : > { %v1830_v47 = vsel %vm9107_vm7, %v6288_v33, 0.0  ;;  %v1840_v59 = vpack.c.bf16 %v6288_v33, %v6286_v46 }
 0x380   : > { %1831 = vadd.xlane.f32.xlu0 %v1830_v47 }
 0x382   : > { %v6290_v55 = vpop.eup %6289 }
 0x383   : > { %v7047_v45 = vpop.xlane.xlu1 %1789  ;;  %v1918_v53 = vmul.f32 %v6290_v55, %v1787_v39  ;;  %vm1923_vm3 = vweird.f32 %v6290_v55 }
 0x384   : > { %5743 = vmatmul.msk.bf16.gmra.mxu1 %vm9108_vm13, %v1839_v38  ;;  %vm1924_vm11 = vmor %vm1922_vm8, %vm1923_vm3 }
 0x385   : > { %v1919_v60 = vsub.f32 1.0, %v1918_v53 }
 0x387   : > { %v1920_v61 = vmul.f32 %v6290_v55, %v1919_v60 }
 0x389   : > { %v1921_v63 = vadd.f32 %v6290_v55, %v1920_v61 }
 0x38b   : > { %v1793_v40 = vpop.xlane.xlu2 %1792  ;;  %v1925_v9 = vsel %vm1924_vm11, %v6290_v55, %v1921_v63 }
 0x38c   : > { %6291 = vrcp.f32 %v1793_v40  ;;  %v1958_v5 = vand.u32 2147483648, %v1793_v40  ;;  %vm1952_vm12 = vweird.f32 %v1793_v40  ;;  %v1956_v20 = vand.u32 2147483647, %v1793_v40 }
 0x38d   : > { %v1930_v11 = vsel %vm1927_vm15, %v1929_v6, %v1925_v9 }
 0x38e   : > { %v1959_v16 = vor.u32 1.1754944e-38, %v1958_v5  ;;  %vm1957_vm1 = vcmp.eq.f32.partialorder %v1956_v20, 8.507059e+37 }
 0x392   : > { %v6292_v52 = vpop.eup %6291 }
 0x393   : > { %v1948_v54 = vmul.f32 %v6292_v52, %v1793_v40  ;;  %vm1953_vm10 = vweird.f32 %v6292_v52  ;;  %v7051_v8 = vpop.xlane.xlu0 %1795 }
 0x394   : > { %5744 = vmatmul.msk.bf16.gmra.mxu1 %vm9078_vm0, %v1840_v59  ;;  %vm1954_vm14 = vmor %vm1952_vm12, %vm1953_vm10  ;;  %vm1967_vm10 = vweird.f32 %v7051_v8  ;;  %vm1937_vm12 = vweird.f32 %v7047_v45 }
 0x395   : > { %v1949_v57 = vsub.f32 1.0, %v1948_v54 }
 0x397   : > { %v1950_v62 = vmul.f32 %v6292_v52, %v1949_v57 }
 0x399   : > { %v1951_v3 = vadd.f32 %v6292_v52, %v1950_v62 }
 0x39b   : > { %v1799_v58 = vpop.xlane.xlu1 %1798  ;;  %v1955_v7 = vsel %vm1954_vm14, %v6292_v52, %v1951_v3 }
 0x39c   : > { %v1877_v56 = vpop.f32.mrf.mxu1  ;;  %6293 = vrcp.f32 %v1799_v58  ;;  %v1960_v25 = vsel %vm1957_vm1, %v1959_v16, %v1955_v7  ;;  %v1988_v28 = vand.u32 2147483648, %v1799_v58  ;;  %vm1982_vm4 = vweird.f32 %v1799_v58 }
 0x39d   : > { %v1931_v12 = vmul.f32 %v1930_v11, %v1877_v56  ;;  %v1986_v37 = vand.u32 2147483647, %v1799_v58 }
 0x39e   : > { %v1989_v26 = vor.u32 1.1754944e-38, %v1988_v28 }
 0x39f   : > { %v2157_v17 = vmul.f32 %v6888_v48, %v1931_v12  ;;  %vm1987_vm9 = vcmp.eq.f32.partialorder %v1986_v37, 8.507059e+37 }
 0x3a2   : > { %v6294_v4 = vpop.eup %6293 }
 0x3a3   : > { %v1978_v10 = vmul.f32 %v6294_v4, %v1799_v58  ;;  %vm1983_vm2 = vweird.f32 %v6294_v4  ;;  %v7065_v61 = vpop.xlane.xlu2 %1801 }
 0x3a4   : > { %v7049_v2 = vpop.f32.mrf.mxu1  ;;  %vm1984_vm5 = vmor %vm1982_vm4, %vm1983_vm2  ;;  %vm1997_vm4 = vweird.f32 %v7065_v61 }
 0x3a5   : > { %v1979_v15 = vsub.f32 1.0, %v1978_v10 }
 0x3a7   : > { %v1980_v30 = vmul.f32 %v6294_v4, %v1979_v15  ;;  %v1941_v15 = vand.u32 2147483647, %v7047_v45 }
 0x3a9   : > { %v1981_v23 = vadd.f32 %v6294_v4, %v1980_v30  ;;  %v1971_v30 = vand.u32 2147483647, %v7051_v8  ;;  %vm7115_vm15 = vcmp.eq.f32.partialorder %v1941_v15, 8.507059e+37 }
 0x3ab   : > { %v1805_v19 = vpop.xlane.xlu0 %1804  ;;  %v1985_v24 = vsel %vm1984_vm5, %v6294_v4, %v1981_v23  ;;  %v1943_v23 = vand.u32 2147483648, %v7047_v45  ;;  %vm1972_vm1 = vcmp.eq.f32.partialorder %v1971_v30, 8.507059e+37 }
 0x3ac   : > { %v1882_v13 = vpop.f32.mrf.mxu1  ;;  %6295 = vrcp.f32 %v1805_v19  ;;  %v1990_v34 = vsel %vm1987_vm9, %v1989_v26, %v1985_v24  ;;  %v2018_v59 = vand.u32 2147483648, %v1805_v19  ;;  %vm2012_vm7 = vweird.f32 %v1805_v19 }
 0x3ad   : > { %v1961_v14 = vmul.f32 %v1960_v25, %v1882_v13  ;;  %v2016_v55 = vand.u32 2147483647, %v1805_v19  ;;  %6297 = vrcp.f32 %v7051_v8 }
 0x3ae   : > { %v2019_v53 = vor.u32 1.1754944e-38, %v2018_v59  ;;  %6299 = vrcp.f32 %v7047_v45 }
 0x3af   : > { %v2161_v18 = vmul.f32 %v6890_v49, %v1961_v14  ;;  %vm2017_vm0 = vcmp.eq.f32.partialorder %v2016_v55, 8.507059e+37  ;;  %6301 = vrcp.f32 %v7065_v61 }
 0x3b1   : > { %v2163_v22 = vadd.f32 %v2161_v18, %v2157_v17  ;;  %v1973_v17 = vand.u32 2147483648, %v7051_v8 }
 0x3b2   : > { %v6296_v27 = vpop.eup %6295 }
 0x3b3   : > { %v2008_v31 = vmul.f32 %v6296_v27, %v1805_v19  ;;  %vm2013_vm6 = vweird.f32 %v6296_v27  ;;  %v6298_v63 = vpop.eup %6297 }
 0x3b4   : > { %v7055_v21 = vpop.f32.mrf.mxu1  ;;  %vm2014_vm13 = vmor %vm2012_vm7, %vm2013_vm6  ;;  %v6300_v0 = vpop.eup %6299  ;;  %v1963_v1 = vmul.f32 %v6298_v63, %v7051_v8  ;;  %vm1968_vm3 = vweird.f32 %v6298_v63  ;;  %v6107_v8 = vld [vmem:[%s9054_s19 + $0x8] sm:$0xff] }
 0x3b5   : > { %v2009_v47 = vsub.f32 1.0, %v2008_v31  ;;  %v1933_v3 = vmul.f32 %v6300_v0, %v7047_v45  ;;  %v7072_v4 = vpop.eup %6301  ;;  %vm1938_vm8 = vweird.f32 %v6300_v0  ;;  %vm7097_vm11 = vmor %vm1967_vm10, %vm1968_vm3  ;;  %2215 = vmatpush.bf16.msrb.mxu2 %v6107_v8 }
 0x3b6   : > { %v1964_v9 = vsub.f32 1.0, %v1963_v1  ;;  %v1993_v10 = vmul.f32 %v7072_v4, %v7065_v61  ;;  %vm7111_vm14 = vmor %vm1937_vm12, %vm1938_vm8  ;;  %vm1998_vm2 = vweird.f32 %v7072_v4 }
 0x3b7   : > { %v2010_v38 = vmul.f32 %v6296_v27, %v2009_v47  ;;  %v1934_v6 = vsub.f32 1.0, %v1933_v3  ;;  %v2003_v47 = vand.u32 2147483648, %v7065_v61  ;;  %vm1999_vm5 = vmor %vm1997_vm4, %vm1998_vm2 }
 0x3b8   : > { %v1965_v7 = vmul.f32 %v6298_v63, %v1964_v9  ;;  %v1994_v12 = vsub.f32 1.0, %v1993_v10 }
 0x3b9   : > { %v2011_v40 = vadd.f32 %v6296_v27, %v2010_v38  ;;  %v1935_v13 = vmul.f32 %v6300_v0, %v1934_v6 }
 0x3ba   : > { %v1966_v14 = vadd.f32 %v6298_v63, %v1965_v7  ;;  %v1995_v18 = vmul.f32 %v7072_v4, %v1994_v12 }
 0x3bb   : > { %v2015_v52 = vsel %vm2014_vm13, %v6296_v27, %v2011_v40  ;;  %v7080_v11 = vpop.xlane.xlu2 %1810 }
 0x3bc   : > { %v1887_v29 = vpop.f32.mrf.mxu1  ;;  %v2020_v60 = vsel %vm2017_vm0, %v2019_v53, %v2015_v52  ;;  %v1970_v24 = vsel %vm7097_vm11, %v6298_v63, %v1966_v14  ;;  %v1996_v31 = vadd.f32 %v7072_v4, %v1995_v18  ;;  %v2001_v52 = vand.u32 2147483647, %v7065_v61 }
 0x3bd   : > { %v1991_v46 = vmul.f32 %v1990_v34, %v1887_v29  ;;  %v1974_v34 = vor.u32 1.1754944e-38, %v1973_v17  ;;  %v2004_v61 = vor.u32 1.1754944e-38, %v2003_v47  ;;  %vm2042_vm6 = vweird.f32 %v7080_v11 }
 0x3be   : > { %vm2002_vm9 = vcmp.eq.f32.partialorder %v2001_v52, 8.507059e+37 }
 0x3bf   : > { %v2165_v32 = vmul.f32 %v6892_v50, %v1991_v46 }
 0x3c1   : > { %v2167_v33 = vadd.f32 %v2165_v32, %v2163_v22  ;;  %v1936_v22 = vadd.f32 %v6300_v0, %v1935_v13  ;;  %v1944_v32 = vor.u32 1.1754944e-38, %v1943_v23  ;;  %v2046_v13 = vand.u32 2147483647, %v7080_v11 }
 0x3c3   : > { %v7082_v16 = vpop.xlane.xlu0 %1813  ;;  %v1940_v46 = vsel %vm7111_vm14, %v6300_v0, %v1936_v22  ;;  %vm7177_vm7 = vcmp.eq.f32.partialorder %v2046_v13, 8.507059e+37 }
 0x3c4   : > { %v7058_v39 = vpop.f32.mrf.mxu1  ;;  %vm2057_vm8 = vweird.f32 %v7082_v16 }
 0x3c6   : > { %v7076_v20 = vpop.xlane.xlu1 %1807 }
 0x3c7   : > { %6303 = vrcp.f32 %v7076_v20  ;;  %vm2027_vm3 = vweird.f32 %v7076_v20 }
 0x3c8   : > { %6305 = vrcp.f32 %v7080_v11 }
 0x3c9   : > { %6307 = vrcp.f32 %v7082_v16 }
 0x3cd   : > { %v7101_v37 = vpop.eup %6303 }
 0x3ce   : > { %v7094_v19 = vpop.xlane.xlu1 %1816  ;;  %v7108_v27 = vpop.eup %6305  ;;  %v2023_v38 = vmul.f32 %v7101_v37, %v7076_v20  ;;  %vm2028_vm13 = vweird.f32 %v7101_v37 }
 0x3cf   : > { %6309 = vrcp.f32 %v7094_v19  ;;  %v7120_v45 = vpop.eup %6307  ;;  %v2038_v55 = vmul.f32 %v7108_v27, %v7080_v11  ;;  %vm2043_vm0 = vweird.f32 %v7108_v27  ;;  %vm7201_vm11 = vmor %vm2027_vm3, %vm2028_vm13  ;;  %vm2072_vm4 = vweird.f32 %v7094_v19 }
 0x3d0   : > { %v2024_v0 = vsub.f32 1.0, %v2023_v38  ;;  %vm2058_vm10 = vweird.f32 %v7120_v45 }
 0x3d1   : > { %v1892_v54 = vpop.f32.mrf.mxu1  ;;  %v2039_v3 = vsub.f32 1.0, %v2038_v55 }
 0x3d2   : > { %v2021_v56 = vmul.f32 %v2020_v60, %v1892_v54  ;;  %v1945_v54 = vsel %vm7115_vm15, %v1944_v32, %v1940_v46  ;;  %v2053_v60 = vmul.f32 %v7120_v45, %v7082_v16  ;;  %v2025_v14 = vmul.f32 %v7101_v37, %v2024_v0  ;;  %vm7221_vm15 = vmor %vm2042_vm6, %vm2043_vm0 }
 0x3d3   : > { %v7106_v26 = vpop.xlane.xlu2 %1819  ;;  %v2040_v22 = vmul.f32 %v7108_v27, %v2039_v3 }
 0x3d4   : > { %v2169_v57 = vmul.f32 %v6894_v51, %v2021_v56  ;;  %v1946_v56 = vmul.f32 %v1945_v54, %v7049_v2  ;;  %6311 = vrcp.f32 %v7106_v26  ;;  %v2054_v6 = vsub.f32 1.0, %v2053_v60  ;;  %v6106_v54 = vld [vmem:[%s9054_s19] sm:$0xff] }
 0x3d5   : > { %v7147_v63 = vpop.eup %6309  ;;  %v2026_v38 = vadd.f32 %v7101_v37, %v2025_v14  ;;  %v2041_v52 = vadd.f32 %v7108_v27, %v2040_v22  ;;  %2216 = vmatpush.bf16.msrb.mxu2 %v6106_v54  ;;  %v2076_v22 = vand.u32 2147483647, %v7094_v19  ;;  %vm2087_vm6 = vweird.f32 %v7106_v26 }
 0x3d6   : > { %v7062_v58 = vadd.f32 %v2169_v57, %v2167_v33  ;;  %v1975_v33 = vsel %vm1972_vm1, %v1974_v34, %v1970_v24  ;;  %v2158_v10 = vmul.f32 %v6888_v48, %v1946_v56  ;;  %v2068_v12 = vmul.f32 %v7147_v63, %v7094_v19  ;;  %vm7234_vm1 = vmor %vm2057_vm8, %vm2058_vm10 }
 0x3d7   : > { %v1976_v59 = vmul.f32 %v1975_v33, %v7055_v21  ;;  %v2000_v21 = vsel %vm1999_vm5, %v7072_v4, %v1996_v31  ;;  %v2048_v4 = vand.u32 2147483648, %v7080_v11  ;;  %v2061_v24 = vand.u32 2147483647, %v7082_v16 }
 0x3d8   : > { %v2005_v2 = vsel %vm2002_vm9, %v2004_v61, %v2000_v21  ;;  %v2031_v34 = vand.u32 2147483647, %v7076_v20  ;;  %v2063_v31 = vand.u32 2147483648, %v7082_v16  ;;  %v2069_v32 = vsub.f32 1.0, %v2068_v12 }
 0x3d9   : > { %v7067_v62 = vpop.f32.mrf.mxu1  ;;  %v2162_v1 = vmul.f32 %v6890_v49, %v1976_v59  ;;  %v2006_v7 = vmul.f32 %v2005_v2, %v7058_v39  ;;  %v2055_v39 = vmul.f32 %v7120_v45, %v2054_v6  ;;  %v2049_v28 = vor.u32 1.1754944e-38, %v2048_v4 }
 0x3da   : > { %v7164_v17 = vpop.eup %6311  ;;  %v2033_v59 = vand.u32 2147483648, %v7076_v20  ;;  %vm7207_vm12 = vcmp.eq.f32.partialorder %v2061_v24, 8.507059e+37  ;;  %v2070_v20 = vmul.f32 %v7147_v63, %v2069_v32  ;;  %v2030_v2 = vsel %vm7201_vm11, %v7101_v37, %v2026_v38 }
 0x3db   : > { %v7136_v53 = vpop.xlane.xlu0 %1822  ;;  %v2164_v18 = vadd.f32 %v2162_v1, %v2158_v10  ;;  %v2166_v29 = vmul.f32 %v6892_v50, %v2006_v7  ;;  %v2083_v47 = vmul.f32 %v7164_v17, %v7106_v26  ;;  %v2056_v56 = vadd.f32 %v7120_v45, %v2055_v39 }
 0x3dc   : > { %6313 = vrcp.f32 %v7136_v53  ;;  %v2064_v1 = vor.u32 1.1754944e-38, %v2063_v31  ;;  %vm2032_vm14 = vcmp.eq.f32.partialorder %v2031_v34, 8.507059e+37  ;;  %v2034_v7 = vor.u32 1.1754944e-38, %v2033_v59 }
 0x3dd   : > { %v7212_v3 = vadd.f32 %v2166_v29, %v2164_v18  ;;  %v2084_v6 = vsub.f32 1.0, %v2083_v47  ;;  %v2045_v13 = vsel %vm7221_vm15, %v7108_v27, %v2041_v52  ;;  %v2060_v18 = vsel %vm7234_vm1, %v7120_v45, %v2056_v56 }
 0x3de   : > { %v2078_v27 = vand.u32 2147483648, %v7094_v19  ;;  %v2091_v39 = vand.u32 2147483647, %v7106_v26  ;;  %v2035_v16 = vsel %vm2032_vm14, %v2034_v7, %v2030_v2  ;;  %v2071_v8 = vadd.f32 %v7147_v63, %v2070_v20 }
 0x3df   : > { %vm2073_vm2 = vweird.f32 %v7147_v63  ;;  %v2085_v29 = vmul.f32 %v7164_v17, %v2084_v6  ;;  %v2036_v34 = vmul.f32 %v2035_v16, %v7067_v62  ;;  %v2050_v31 = vsel %vm7177_vm7, %v2049_v28, %v2045_v13 }
 0x3e0   : > { %v2093_v45 = vand.u32 2147483648, %v7106_v26  ;;  %v2065_v59 = vsel %vm7207_vm12, %v2064_v1, %v2060_v18  ;;  %vm7261_vm5 = vmor %vm2072_vm4, %vm2073_vm2  ;;  %vm7265_vm9 = vcmp.eq.f32.partialorder %v2076_v22, 8.507059e+37  ;;  %v2079_v28 = vor.u32 1.1754944e-38, %v2078_v27 }
 0x3e1   : > { %v7074_v5 = vpop.f32.mrf.mxu1  ;;  %v2075_v46 = vsel %vm7261_vm5, %v7147_v63, %v2071_v8  ;;  %vm7274_vm7 = vcmp.eq.f32.partialorder %v2091_v39, 8.507059e+37  ;;  %v2106_v54 = vand.u32 2147483647, %v7136_v53  ;;  %v2170_v56 = vmul.f32 %v6894_v51, %v2036_v34 }
 0x3e2   : > { %v7169_v23 = vpop.eup %6313  ;;  %v2086_v21 = vadd.f32 %v7164_v17, %v2085_v29  ;;  %vm2088_vm13 = vweird.f32 %v7164_v17  ;;  %v2051_v6 = vmul.f32 %v2050_v31, %v7074_v5  ;;  %v2080_v2 = vsel %vm7265_vm9, %v2079_v28, %v2075_v46 }
 0x3e3   : > { %v7145_v57 = vpop.xlane.xlu1 %1825  ;;  %v2098_v55 = vmul.f32 %v7169_v23, %v7136_v53  ;;  %vm2103_vm0 = vweird.f32 %v7169_v23  ;;  %vm2102_vm3 = vweird.f32 %v7136_v53  ;;  %v2108_v4 = vand.u32 2147483648, %v7136_v53  ;;  %vm7292_vm8 = vmor %vm2087_vm6, %vm2088_vm13 }
 0x3e4   : > { %6315 = vrcp.f32 %v7145_v57  ;;  %vm7296_vm10 = vcmp.eq.f32.partialorder %v2106_v54, 8.507059e+37  ;;  %v2121_v5 = vand.u32 2147483647, %v7145_v57  ;;  %v2090_v26 = vsel %vm7292_vm8, %v7164_v17, %v2086_v21  ;;  %vm7307_vm12 = vmor %vm2102_vm3, %vm2103_vm0 }
 0x3e5   : > { %v2099_v12 = vsub.f32 1.0, %v2098_v55  ;;  %vm2117_vm14 = vweird.f32 %v7145_v57  ;;  %v2173_v17 = vmul.f32 %v6879_v41, %v2051_v6  ;;  %v2109_v27 = vor.u32 1.1754944e-38, %v2108_v4 }
 0x3e6   : > { %vm2122_vm2 = vcmp.eq.f32.partialorder %v2121_v5, 8.507059e+37  ;;  %vm9139_vm3 = vcmask 261120  }
 0x3e7   : > { %v2100_v38 = vmul.f32 %v7169_v23, %v2099_v12  ;;  %v2175_v54 = vadd.f32 %v2173_v17, %v7062_v58  ;;  %v6215_v12 = vld [vmem:[%s9052_s24] ss:$0 sm:$0xff]  ;;  %vm9140_vm8 = vmmov %vm9139_vm3 }
 0x3e9   : > { %v7086_v25 = vpop.f32.mrf.mxu1  ;;  %v2101_v20 = vadd.f32 %v7169_v23, %v2100_v38 }
 0x3ea   : > { %v7182_v33 = vpop.eup %6315  ;;  %v2066_v37 = vmul.f32 %v2065_v59, %v7086_v25 }
 0x3eb   : > { %v7151_v9 = vpop.xlane.xlu2 %1828  ;;  %v2113_v61 = vmul.f32 %v7182_v33, %v7145_v57  ;;  %vm2118_vm11 = vweird.f32 %v7182_v33  ;;  %v2105_v22 = vsel %vm7307_vm12, %v7169_v23, %v2101_v20  ;;  %vm9142_vm12 = vmmov %vm9139_vm3 }
 0x3ec   : > { %6317 = vrcp.f32 %v7151_v9  ;;  %vm7320_vm1 = vmor %vm2117_vm14, %vm2118_vm11  ;;  %v2136_v16 = vand.u32 2147483647, %v7151_v9  ;;  %vm2132_vm4 = vweird.f32 %v7151_v9  ;;  %v2174_v8 = vmul.f32 %v6879_v41, %v2066_v37 }
 0x3ed   : > { %v2114_v24 = vsub.f32 1.0, %v2113_v61  ;;  %v2094_v61 = vor.u32 1.1754944e-38, %v2093_v45  ;;  %v2110_v34 = vsel %vm7296_vm10, %v2109_v27, %v2105_v22  ;;  %vm9141_vm10 = vmmov %vm9139_vm3 }
 0x3ee   : > { %vm2137_vm6 = vcmp.eq.f32.partialorder %v2136_v16, 8.507059e+37  ;;  %vm9143_vm14 = vmmov %vm9139_vm3 }
 0x3ef   : > { %v2115_v19 = vmul.f32 %v7182_v33, %v2114_v24  ;;  %v2095_v24 = vsel %vm7274_vm7, %v2094_v61, %v2090_v26 }
 0x3f1   : > { %v7129_v40 = vpop.f32.mrf.mxu1  ;;  %v2116_v13 = vadd.f32 %v7182_v33, %v2115_v19 }
 0x3f2   : > { %v7195_v60 = vpop.eup %6317  ;;  %v2081_v29 = vmul.f32 %v2080_v2, %v7129_v40 }
 0x3f3   : > { %v7167_v30 = vpop.xlane.xlu0 %1831  ;;  %v2128_v11 = vmul.f32 %v7195_v60, %v7151_v9  ;;  %vm2133_vm15 = vweird.f32 %v7195_v60  ;;  %v2120_v23 = vsel %vm7320_vm1, %v7182_v33, %v2116_v13 }
 0x3f4   : > { %6319 = vrcp.f32 %v7167_v30  ;;  %vm2134_vm5 = vmor %vm2132_vm4, %vm2133_vm15  ;;  %v2153_v40 = vand.u32 2147483648, %v7167_v30  ;;  %vm2147_vm7 = vweird.f32 %v7167_v30  ;;  %v2151_v62 = vand.u32 2147483647, %v7167_v30 }
 0x3f5   : > { %v2129_v32 = vsub.f32 1.0, %v2128_v11  ;;  %v2123_v11 = vand.u32 2147483648, %v7145_v57  ;;  %v2138_v57 = vand.u32 2147483648, %v7151_v9 }
 0x3f6   : > { %v2154_v21 = vor.u32 1.1754944e-38, %v2153_v40  ;;  %vm2152_vm0 = vcmp.eq.f32.partialorder %v2151_v62, 8.507059e+37  ;;  %v6108_v40 = vld [vmem:[%s9056_s12] sm:$0xff] }
 0x3f7   : > { %v2130_v63 = vmul.f32 %v7195_v60, %v2129_v32  ;;  %v2124_v31 = vor.u32 1.1754944e-38, %v2123_v11  ;;  %v2139_v38 = vor.u32 1.1754944e-38, %v2138_v57 }
 0x3f9   : > { %v7162_v15 = vpop.f32.mrf.mxu1  ;;  %v2131_v25 = vadd.f32 %v7195_v60, %v2130_v63  ;;  %v2125_v9 = vsel %vm2122_vm2, %v2124_v31, %v2120_v23 }
 0x3fa   : > { %v7240_v14 = vpop.eup %6319  ;;  %v2096_v32 = vmul.f32 %v2095_v24, %v7162_v15  ;;  %v2172_v15 = vadd.f32 %v2170_v56, %v7212_v3 }
 0x3fb   : > { %v2143_v47 = vmul.f32 %v7240_v14, %v7167_v30  ;;  %vm2148_vm9 = vweird.f32 %v7240_v14 }
 0x3fc   : > { %vm2149_vm13 = vmor %vm2147_vm7, %vm2148_vm9  ;;  %v2178_v19 = vmul.f32 %v6881_v42, %v2096_v32  ;;  %vm2371_vm7 = vcmask 523264  }
 0x3fd   : > { %v2144_v1 = vsub.f32 1.0, %v2143_v47  ;;  %v2135_v47 = vsel %vm2134_vm5, %v7195_v60, %v2131_v25  ;;  %v2177_v60 = vmul.f32 %v6881_v42, %v2081_v29  ;;  %v6628_v25 = vmov 32.0  }
 0x3fe   : > { %v2140_v28 = vsel %vm2137_vm6, %v2139_v38, %v2135_v47  ;;  %6321 = vrcp.f32 %v6628_v25  ;;  %vm9144_vm6 = vmmov %vm9139_vm3 }
 0x3ff   : > { %v2145_v18 = vmul.f32 %v7240_v14, %v2144_v1 }
 0x401   : > { %v7225_v10 = vpop.f32.mrf.mxu1  ;;  %v2146_v33 = vadd.f32 %v7240_v14, %v2145_v18 }
 0x402   : > { %v2111_v59 = vmul.f32 %v2110_v34, %v7225_v10  ;;  %v2176_v10 = vadd.f32 %v2174_v8, %v2172_v15 }
 0x403   : > { %v2150_v52 = vsel %vm2149_vm13, %v7240_v14, %v2146_v33  ;;  %v6109_v33 = vld [vmem:[%s9056_s12 + $0x8] sm:$0xff]  ;;  %vm9146_vm13 = vmmov %vm9139_vm3 }
 0x404   : > { %v2181_v61 = vmul.f32 %v6883_v43, %v2111_v59  ;;  %v2155_v56 = vsel %vm2152_vm0, %v2154_v21, %v2150_v52  ;;  %v2180_v1 = vadd.f32 %v2178_v19, %v2176_v10  ;;  %v6322_v17 = vpop.eup %6321  ;;  %2324 = vmatpush.bf16.msrb.mxu3 %v6109_v33  ;;  %vm9147_vm0 = vmmov %vm9139_vm3 }
 0x405   : > { %v2240_v27 = vmul.f32 32.0, %v6322_v17  ;;  %vm2244_vm11 = vweird.f32 %v6322_v17 }
 0x407   : > { %v2241_v39 = vsub.f32 1.0, %v2240_v27 }
 0x408   : > { %2325 = vmatpush.bf16.msrb.mxu3 %v6108_v40 }
 0x409   : > { %v1909_v0 = vpop.f32.mrf.mxu1  ;;  %v2242_v16 = vmul.f32 %v6322_v17, %v2241_v39 }
 0x40a   : > { %v2126_v55 = vmul.f32 %v2125_v9, %v1909_v0  ;;  %v2179_v0 = vadd.f32 %v2177_v60, %v2175_v54 }
 0x40b   : > { %v2243_v57 = vadd.f32 %v6322_v17, %v2242_v16  ;;  %v6219_v16 = vld [vmem:[%s9145_s1] ss:$0 sm:$0xff] }
 0x40c   : > { %v2182_v30 = vmul.f32 %v6883_v43, %v2126_v55  ;;  %v2183_v6 = vadd.f32 %v2181_v61, %v2179_v0 }
 0x40e   : > { %v2184_v2 = vadd.f32 %v2182_v30, %v2180_v1  ;;  %v6216_v1 = vld [vmem:[%s6697_s30] ss:$0 sm:$0xff] }
 0x411   : > { %v1912_v45 = vpop.f32.mrf.mxu1 }
 0x412   : > { %v2141_v46 = vmul.f32 %v2140_v28, %v1912_v45 }
 0x414   : > { %v2185_v20 = vmul.f32 %v6885_v44, %v2141_v46 }
 0x416   : > { %v2187_v58 = vadd.f32 %v2185_v20, %v2183_v6 }
 0x419   : > { %v1914_v3 = vpop.f32.mrf.mxu1 }
 0x41a   : > { %v2156_v63 = vmul.f32 %v2155_v56, %v1914_v3 }
 0x41c   : > { %v2186_v14 = vmul.f32 %v6885_v44, %v2156_v63 }
 0x41e   : > { %v2188_v4 = vadd.f32 %v2186_v14, %v2184_v2  ;;  %v6217_v14 = vld [vmem:[%s9058_s6] ss:$0 sm:$0xff] }
 0x420   : > { %v2193_v7 = vpack.c.bf16 %v2188_v4, %v2187_v58 }
 0x422   : > { %5753 = vmatmul.msk.bf16.vlgmr.msrb.gmra.mxu2 %vm9139_vm3, %v2193_v7  ;;  %vm9148_vm3 = vmmov %vm9147_vm0 }
 0x4a5   : > { %v2218_v13 = vpop.f32.mrf.mxu2 }
 0x4a6   : > { %v2223_v5 = vadd.f32 %v2218_v13, %v6872_v35  ;;  %v7361_v35 = vsel %vm2244_vm11, %v6322_v17, %v2243_v57  ;;  %v6113_v13 = vld [vmem:[%s6717_s27 + $0x18] sm:$0xff] }
 0x4a7   : > { %2379 = vmatpush.bf16.msra.mxu2 %v6113_v13  ;;  %v6221_v13 = vld [vmem:[%s9151_s7] ss:$0 sm:$0xff] }
 0x4a8   : > { %v2229_v37 = vadd.f32 %v6215_v12, %v2223_v5  ;;  %v6112_v5 = vld [vmem:[%s6717_s27 + $0x10] sm:$0xff] }
 0x4aa   : > { %v2233_v26 = vsel %vm9140_vm8, %v2229_v37, 0.0  ;;  %vm9149_vm8 = vmmov %vm9147_vm0 }
 0x4ab   : > { %2234 = vadd.xlane.f32.xlu1 %v2233_v26  ;;  %2380 = vmatpush.bf16.msra.mxu2 %v6112_v5  ;;  %v6110_v26 = vld [vmem:[%s6717_s27] sm:$0xff] }
 0x4ad   : > { %v2220_v53 = vpop.f32.mrf.mxu2 }
 0x4ae   : > { %v2224_v11 = vadd.f32 %v2220_v53, %v6874_v36 }
 0x4b0   : > { %v2230_v18 = vadd.f32 %v6215_v12, %v2224_v11  ;;  %v6218_v11 = vld [vmem:[%s9053_s20] ss:$0 sm:$0xff] }
 0x4b2   : > { %v2236_v22 = vsel %vm9141_vm10, %v2230_v18, 0.0 }
 0x4b3   : > { %2237 = vadd.xlane.f32.xlu2 %v2236_v22 }
 0x51e   : > { %v2235_v24 = vpop.xlane.xlu1 %2234 }
 0x51f   : > { %v2246_v23 = vmul.f32 %v7361_v35, %v2235_v24 }
 0x521   : > { %v2248_v36 = vsub.f32 %v2229_v37, %v2246_v23  ;;  %v6111_v37 = vld [vmem:[%s6717_s27 + $0x8] sm:$0xff] }
 0x522   : > { %2381 = vmatpush.bf16.msra.mxu2 %v6111_v37 }
 0x523   : > { %v2250_v8 = vmul.f32 %v2248_v36, %v2248_v36 }
 0x525   : > { %v2252_v29 = vsel %vm9142_vm12, %v2250_v8, 0.0 }
 0x526   : > { %2253 = vadd.xlane.f32.xlu0 %v2252_v29  ;;  %v2238_v34 = vpop.xlane.xlu2 %2237  ;;  %2382 = vmatpush.bf16.msra.mxu2 %v6110_v26 }
 0x527   : > { %v2247_v31 = vmul.f32 %v7361_v35, %v2238_v34 }
 0x529   : > { %v2249_v45 = vsub.f32 %v2230_v18, %v2247_v31 }
 0x52b   : > { %v2251_v32 = vmul.f32 %v2249_v45, %v2249_v45 }
 0x52d   : > { %v2255_v47 = vsel %vm9143_vm14, %v2251_v32, 0.0 }
 0x52e   : > { %2256 = vadd.xlane.f32.xlu1 %v2255_v47 }
 0x599   : > { %v2254_v9 = vpop.xlane.xlu0 %2253 }
 0x59a   : > { %v2258_v38 = vmul.f32 %v2254_v9, %v7361_v35 }
 0x59c   : > { %v2260_v59 = vadd.f32 1e-05, %v2258_v38 }
 0x59e   : > { %6323 = vrsqrt.f32 %v2260_v59  ;;  %vm2268_vm1 = vweird.f32 %v2260_v59 }
 0x5a1   : > { %v2257_v55 = vpop.xlane.xlu1 %2256 }
 0x5a2   : > { %v2259_v62 = vmul.f32 %v2257_v55, %v7361_v35 }
 0x5a4   : > { %v6324_v15 = vpop.eup %6323  ;;  %v2261_v28 = vadd.f32 1e-05, %v2259_v62 }
 0x5a5   : > { %v2263_v60 = vmul.f32 %v6324_v15, %v2260_v59  ;;  %vm2269_vm15 = vweird.f32 %v6324_v15 }
 0x5a6   : > { %6325 = vrsqrt.f32 %v2261_v28  ;;  %vm2270_vm2 = vmor %vm2268_vm1, %vm2269_vm15  ;;  %vm2278_vm5 = vweird.f32 %v2261_v28 }
 0x5a7   : > { %v2264_v19 = vmul.f32 %v6324_v15, %v2263_v60 }
 0x5a9   : > { %v2265_v46 = vmul.f32 0.5, %v2264_v19 }
 0x5ab   : > { %v2266_v52 = vsub.f32 1.5, %v2265_v46  ;;  %v6114_v46 = vld [vmem:[%s9057_s8 + $0x10] sm:$0xff] }
 0x5ac   : > { %v6326_v54 = vpop.eup %6325 }
 0x5ad   : > { %v2267_v21 = vmul.f32 %v6324_v15, %v2266_v52  ;;  %v2273_v10 = vmul.f32 %v6326_v54, %v2261_v28  ;;  %vm2279_vm4 = vweird.f32 %v6326_v54  ;;  %v6115_v28 = vld [vmem:[%s9057_s8 + $0x18] sm:$0xff] }
 0x5ae   : > { %vm2280_vm9 = vmor %vm2278_vm5, %vm2279_vm4  ;;  %2479 = vmatpush.bf16.msra.mxu3 %v6115_v28 }
 0x5af   : > { %v2274_v61 = vmul.f32 %v6326_v54, %v2273_v10  ;;  %v2271_v30 = vsel %vm2270_vm2, %v6324_v15, %v2267_v21  ;;  %vm9152_vm2 = vmmov %vm9147_vm0 }
 0x5b0   : > { %v2282_v0 = vmul.f32 %v2271_v30, %v2248_v36  ;;  %vm9153_vm4 = vmmov %vm9147_vm0 }
 0x5b1   : > { %v2275_v3 = vmul.f32 0.5, %v2274_v61  ;;  %vm9154_vm5 = vmmov %vm9147_vm0 }
 0x5b2   : > { %v2287_v2 = vmul.f32 %v6216_v1, %v2282_v0  ;;  %2480 = vmatpush.bf16.msra.mxu3 %v6114_v46 }
 0x5b3   : > { %v2276_v56 = vsub.f32 1.5, %v2275_v3 }
 0x5b4   : > { %v2292_v4 = vadd.f32 %v6217_v14, %v2287_v2 }
 0x5b5   : > { %v2277_v20 = vmul.f32 %v6326_v54, %v2276_v56 }
 0x5b7   : > { %v2281_v63 = vsel %vm2280_vm9, %v6326_v54, %v2277_v20  ;;  %vm9155_vm9 = vmmov %vm9147_vm0 }
 0x5b8   : > { %v2283_v6 = vmul.f32 %v2281_v63, %v2249_v45 }
 0x5ba   : > { %v2288_v58 = vmul.f32 %v6216_v1, %v2283_v6 }
 0x5bc   : > { %v2293_v7 = vadd.f32 %v6217_v14, %v2288_v58  ;;  %v6220_v58 = vld [vmem:[%s9150_s2] ss:$0 sm:$0xff] }
 0x5be   : > { %v2298_v12 = vpack.c.bf16 %v2293_v7, %v2292_v4 }
 0x5c0   : > { %5762 = vmatmul.msk.bf16.vlgmr.msrb.gmra.mxu3 %vm9144_vm6, %v2298_v12  ;;  %vm9156_vm6 = vmmov %vm9147_vm0 }
 0x643   : > { %v2327_v53 = vpop.f32.mrf.mxu3 }
 0x644   : > { %v2328_v18 = vadd.f32 %v6218_v11, %v2327_v53 }
 0x646   : > { %v2332_v17 = vmax.f32 %v2328_v18, 0.0 }
 0x64b   : > { %v2329_v22 = vpop.f32.mrf.mxu3 }
 0x64c   : > { %v2330_v25 = vadd.f32 %v6218_v11, %v2329_v22  ;;  %v6222_v22 = vld [vmem:[%s9055_s14 + $0x1] ss:$0 sm:$0xff]  ;;  %s9338_s14 = sld [smem:[#allocation31_spill]] }
 0x64e   : > { %v2333_v27 = vmax.f32 %v2330_v25, 0.0 }
 0x650   : > { %v2342_v39 = vpack.c.bf16 %v2333_v27, %v2332_v17 }
 0x652   : > { %5779 = vmatmul.msk.bf16.vlgmr.msra.gmra.mxu2 %vm2371_vm7, %v2342_v39 }
 0x6d5   : > { %v2384_v57 = vpop.f32.mrf.mxu2 }
 0x6d6   : > { %v2385_v24 = vadd.f32 %v6219_v16, %v2384_v57 }
 0x6d8   : > { %v2389_v23 = vadd.f32 %v2385_v24, %v2292_v4 }
 0x6da   : > { %v2393_v36 = vsel %vm9146_vm13, %v2389_v23, 0.0  ;;  %vm9157_vm13 = vmmov %vm9147_vm0 }
 0x6db   : > { %2394 = vadd.xlane.f32.xlu2 %v2393_v36 }
 0x6dd   : > { %v2386_v8 = vpop.f32.mrf.mxu2 }
 0x6de   : > { %v2387_v29 = vadd.f32 %v6219_v16, %v2386_v8 }
 0x6e0   : > { %v2390_v34 = vadd.f32 %v2387_v29, %v2293_v7 }
 0x6e2   : > { %v2396_v31 = vsel %vm9147_vm0, %v2390_v34, 0.0 }
 0x6e3   : > { %2397 = vadd.xlane.f32.xlu0 %v2396_v31 }
 0x74e   : > { %v2395_v45 = vpop.xlane.xlu2 %2394 }
 0x74f   : > { %v2399_v32 = vmul.f32 %v2395_v45, %v7361_v35 }
 0x751   : > { %v2401_v47 = vsub.f32 %v2389_v23, %v2399_v32 }
 0x753   : > { %v2403_v33 = vmul.f32 %v2401_v47, %v2401_v47 }
 0x755   : > { %v2405_v9 = vsel %vm9148_vm3, %v2403_v33, 0.0  ;;  %vm9158_vm3 = vmmov %vm9147_vm0 }
 0x756   : > { %v2398_v38 = vpop.xlane.xlu0 %2397  ;;  %2406 = vadd.xlane.f32.xlu1 %v2405_v9 }
 0x757   : > { %v2400_v40 = vmul.f32 %v2398_v38, %v7361_v35 }
 0x759   : > { %v2402_v59 = vsub.f32 %v2390_v34, %v2400_v40 }
 0x75b   : > { %v2404_v55 = vmul.f32 %v2402_v59, %v2402_v59 }
 0x75d   : > { %v2408_v62 = vsel %vm9149_vm8, %v2404_v55, 0.0  ;;  %vm9159_vm8 = vmmov %vm9147_vm0 }
 0x75e   : > { %2409 = vadd.xlane.f32.xlu2 %v2408_v62 }
 0x7c9   : > { %v2407_v15 = vpop.xlane.xlu1 %2406 }
 0x7ca   : > { %v2411_v60 = vmul.f32 %v2407_v15, %v7361_v35 }
 0x7cc   : > { %v2413_v19 = vadd.f32 1e-05, %v2411_v60 }
 0x7ce   : > { %6327 = vrsqrt.f32 %v2413_v19  ;;  %vm2421_vm11 = vweird.f32 %v2413_v19 }
 0x7d1   : > { %v2410_v52 = vpop.xlane.xlu2 %2409 }
 0x7d2   : > { %v2412_v54 = vmul.f32 %v2410_v52, %v7361_v35 }
 0x7d4   : > { %v6328_v21 = vpop.eup %6327  ;;  %v2414_v10 = vadd.f32 1e-05, %v2412_v54 }
 0x7d5   : > { %v2416_v61 = vmul.f32 %v6328_v21, %v2413_v19  ;;  %vm2422_vm10 = vweird.f32 %v6328_v21 }
 0x7d6   : > { %6329 = vrsqrt.f32 %v2414_v10  ;;  %vm2423_vm12 = vmor %vm2421_vm11, %vm2422_vm10  ;;  %vm2431_vm15 = vweird.f32 %v2414_v10  ;;  %vm9161_vm11 = vcmask 130048  }
 0x7d7   : > { %v2417_v30 = vmul.f32 %v6328_v21, %v2416_v61  ;;  %vm9160_vm10 = vmmov %vm9147_vm0 }
 0x7d9   : > { %v2418_v3 = vmul.f32 0.5, %v2417_v30  ;;  %v6543_v30 = vld [vmem:[%s6924_s26] sm:$0xff] }
 0x7db   : > { %v2419_v56 = vsub.f32 1.5, %v2418_v3 }
 0x7dc   : > { %v6330_v0 = vpop.eup %6329 }
 0x7dd   : > { %v2420_v1 = vmul.f32 %v6328_v21, %v2419_v56  ;;  %v2426_v20 = vmul.f32 %v6330_v0, %v2414_v10  ;;  %vm2432_vm14 = vweird.f32 %v6330_v0 }
 0x7de   : > { %vm2433_vm1 = vmor %vm2431_vm15, %vm2432_vm14 }
 0x7df   : > { %v2427_v63 = vmul.f32 %v6330_v0, %v2426_v20  ;;  %v2424_v6 = vsel %vm2423_vm12, %v6328_v21, %v2420_v1  ;;  %v6544_v20 = vld [vmem:[%s6924_s26 + $0x8] sm:$0xff]  ;;  %vm9162_vm12 = vmmov %vm9161_vm11 }
 0x7e0   : > { %v2435_v4 = vmul.f32 %v2424_v6, %v2401_v47  ;;  %vm9163_vm14 = vmmov %vm9161_vm11 }
 0x7e1   : > { %v2428_v2 = vmul.f32 0.5, %v2427_v63  ;;  %vm9164_vm15 = vmmov %vm9161_vm11 }
 0x7e2   : > { %v2440_v5 = vmul.f32 %v6220_v58, %v2435_v4 }
 0x7e3   : > { %v2429_v14 = vsub.f32 1.5, %v2428_v2 }
 0x7e4   : > { %v7393_v53 = vadd.f32 %v6221_v13, %v2440_v5  ;;  %v6546_v5 = vld [vmem:[%s6924_s26 + $0x18] sm:$0xff] }
 0x7e5   : > { %v2430_v7 = vmul.f32 %v6330_v0, %v2429_v14 }
 0x7e7   : > { %v2434_v12 = vsel %vm2433_vm1, %v6330_v0, %v2430_v7  ;;  %vm9165_vm1 = vmmov %vm9161_vm11 }
 0x7e8   : > { %v2436_v37 = vmul.f32 %v2434_v12, %v2402_v59 }
 0x7ea   : > { %v2441_v26 = vmul.f32 %v6220_v58, %v2436_v37  ;;  %v6545_v58 = vld [vmem:[%s6924_s26 + $0x10] sm:$0xff] }
 0x7ec   : > { %v7395_v11 = vadd.f32 %v6221_v13, %v2441_v26 }
 0x7ee   : > { %v2452_v18 = vpack.c.bf16 %v7395_v11, %v7393_v53 }
 0x7f0   : > { %5793 = vmatmul.msk.bf16.vlgmr.msra.gmra.mxu3 %vm9152_vm2, %v2452_v18  ;;  %vm9166_vm2 = vmmov %vm9165_vm1 }
 0x873   : > { %v2482_v25 = vpop.f32.mrf.mxu3 }
 0x874   : > { %v2483_v17 = vadd.f32 %v6222_v22, %v2482_v25  ;;  %v6547_v25 = vld [vmem:[%s6924_s26 + $0x20] sm:$0xff] }
 0x876   : > { %v2487_v39 = vmul.f32 %v6888_v48, %v2483_v17  ;;  %v2489_v57 = vmul.f32 %v6890_v49, %v2483_v17  ;;  %v2491_v24 = vmul.f32 %v6892_v50, %v2483_v17  ;;  %v2493_v23 = vmul.f32 %v6894_v51, %v2483_v17 }
 0x877   : > { %v2495_v36 = vmul.f32 %v6879_v41, %v2483_v17  ;;  %v2497_v8 = vmul.f32 %v6881_v42, %v2483_v17  ;;  %v2499_v29 = vmul.f32 %v6883_v43, %v2483_v17  ;;  %v2501_v34 = vmul.f32 %v6885_v44, %v2483_v17 }
 0x87b   : > { %v2484_v27 = vpop.f32.mrf.mxu3 }
 0x87c   : > { %v2485_v16 = vadd.f32 %v6222_v22, %v2484_v27 }
 0x87e   : > { %v2511_v31 = vpack.c.bf16 %v2485_v16, %v2483_v17  ;;  %v2488_v45 = vmul.f32 %v6888_v48, %v2485_v16  ;;  %v2490_v32 = vmul.f32 %v6890_v49, %v2485_v16  ;;  %v2492_v47 = vmul.f32 %v6892_v50, %v2485_v16 }
 0x87f   : > { %v2494_v33 = vmul.f32 %v6894_v51, %v2485_v16  ;;  %v2496_v9 = vmul.f32 %v6879_v41, %v2485_v16  ;;  %v2498_v38 = vmul.f32 %v6881_v42, %v2485_v16  ;;  %v2500_v40 = vmul.f32 %v6883_v43, %v2485_v16 }
 0x880   : > { %2513 = vrot.lane.b32.xlu0 %v2511_v31, %s9001_s22  ;;  %v2503_v59 = vpack.c.bf16 %v2488_v45, %v2487_v39  ;;  %v2504_v55 = vpack.c.bf16 %v2490_v32, %v2489_v57  ;;  %v2505_v62 = vpack.c.bf16 %v2492_v47, %v2491_v24  ;;  %v2502_v15 = vmul.f32 %v6885_v44, %v2485_v16  ;;  %v6548_v57 = vld [vmem:[%s6924_s26 + $0x28] sm:$0xff] }
 0x881   : > { %v2506_v28 = vpack.c.bf16 %v2494_v33, %v2493_v23  ;;  %v2507_v60 = vpack.c.bf16 %v2496_v9, %v2495_v36  ;;  %v2508_v19 = vpack.c.bf16 %v2498_v38, %v2497_v8  ;;  %v2509_v46 = vpack.c.bf16 %v2500_v40, %v2499_v29  ;;  %v6550_v9 = vld [vmem:[%s6924_s26 + $0x40] sm:$0xff]  ;;  %v6551_v40 = vld [vmem:[%s6924_s26 + $0x30] sm:$0xff] }
 0x882   : > { %v2510_v52 = vpack.c.bf16 %v2502_v15, %v2501_v34  ;;  %v6549_v34 = vld [vmem:[%s6924_s26 + $0x38] sm:$0xff] }
 0x8f2   : > { %v2514_v54 = vpop.permute.xlu0 %2513 }
 0x8f3   : > { %v2540_v21 = vsel %vm9153_vm4, %v2514_v54, 0  ;;  %vm9167_vm4 = vmmov %vm9165_vm1 }
 0x8f4   : > { %2549 = vmatpush.bf16.xpose.msrb.mxu2 %v2540_v21  ;;  %v6553_v21 = vld [vmem:[%s6924_s26 + $0x50] sm:$0xff] }
 0x8fb   : > { %5794 = vmatmul.msk.bf16.vlgmr.msrb.gmra.mxu2 %vm9154_vm5, %v2503_v59  ;;  %vm9168_vm5 = vmmov %vm9165_vm1 }
 0x90b   : > { %5795 = vmatmul.msk.bf16.gmra.mxu2 %vm9155_vm9, %v2504_v55  ;;  %vm9169_vm9 = vmmov %vm9165_vm1 }
 0x91b   : > { %5796 = vmatmul.msk.bf16.gmra.mxu2 %vm9156_vm6, %v2505_v62  ;;  %vm9170_vm6 = vmmov %vm9165_vm1 }
 0x92b   : > { %5797 = vmatmul.msk.bf16.gmra.mxu2 %vm9157_vm13, %v2506_v28  ;;  %vm9171_vm13 = vmmov %vm9165_vm1 }
 0x93b   : > { %5798 = vmatmul.msk.bf16.gmra.mxu2 %vm9147_vm0, %v2507_v60  ;;  %v6552_v60 = vld [vmem:[%s6924_s26 + $0x48] sm:$0xff]  ;;  %vm9172_vm0 = vmmov %vm9165_vm1 }
 0x94b   : > { %5799 = vmatmul.msk.bf16.gmra.mxu2 %vm9158_vm3, %v2508_v19  ;;  %vm9173_vm3 = vmmov %vm9172_vm0 }
 0x95b   : > { %5800 = vmatmul.msk.bf16.gmra.mxu2 %vm9159_vm8, %v2509_v46  ;;  %vm9174_vm8 = vmmov %vm9172_vm0 }
 0x96b   : > { %5801 = vmatmul.msk.bf16.gmra.mxu2 %vm9160_vm10, %v2510_v52  ;;  %vm9175_vm10 = vmmov %vm9172_vm0 }
 0x97e   : > { %v2551_v10 = vpop.f32.mrf.mxu2 }
 0x97f   : > { %v2591_v61 = vmul.f32 0.5, %v2551_v10 }
 0x981   : > { %v7428_v3 = vadd.f32 %v6543_v30, %v2591_v61 }
 0x983   : > { %v2623_v56 = vsel %vm9161_vm11, %v7428_v3, -inf  ;;  %vm9176_vm11 = vmmov %vm9172_vm0 }
 0x984   : > { %2624 = vmax.xlane.f32.xlu1 %v2623_v56 }
 0x986   : > { %v2553_v0 = vpop.f32.mrf.mxu2 }
 0x987   : > { %v2592_v1 = vmul.f32 0.5, %v2553_v0  ;;  %v6554_v0 = vld [vmem:[%s6924_s26 + $0x58] sm:$0xff] }
 0x989   : > { %v7433_v63 = vadd.f32 %v6544_v20, %v2592_v1 }
 0x98b   : > { %v2626_v6 = vsel %vm9162_vm12, %v7433_v63, -inf  ;;  %vm9177_vm12 = vmmov %vm9172_vm0 }
 0x98c   : > { %2627 = vmax.xlane.f32.xlu2 %v2626_v6 }
 0x98e   : > { %v2556_v2 = vpop.f32.mrf.mxu2 }
 0x98f   : > { %v2593_v14 = vmul.f32 0.5, %v2556_v2 }
 0x991   : > { %v7438_v4 = vadd.f32 %v6545_v58, %v2593_v14  ;;  %v6555_v14 = vld [vmem:[%s6924_s26 + $0x60] sm:$0xff] }
 0x993   : > { %v2629_v7 = vsel %vm9163_vm14, %v7438_v4, -inf  ;;  %vm9178_vm14 = vmmov %vm9172_vm0 }
 0x994   : > { %2630 = vmax.xlane.f32.xlu2 %v2629_v7 }
 0x996   : > { %v2558_v12 = vpop.f32.mrf.mxu2 }
 0x997   : > { %v2594_v13 = vmul.f32 0.5, %v2558_v12 }
 0x999   : > { %v7443_v37 = vadd.f32 %v6546_v5, %v2594_v13  ;;  %v6556_v5 = vld [vmem:[%s6924_s26 + $0x68] sm:$0xff] }
 0x99b   : > { %v2632_v26 = vsel %vm9164_vm15, %v7443_v37, -inf  ;;  %vm9179_vm15 = vmmov %vm9172_vm0 }
 0x99c   : > { %2633 = vmax.xlane.f32.xlu0 %v2632_v26 }
 0x99d   : > { %2775 = vrot.lane.b32.xlu1 %v2511_v31, %s8999_s28 }
 0x99e   : > { %v2561_v18 = vpop.f32.mrf.mxu2 }
 0x99f   : > { %v2595_v22 = vmul.f32 0.5, %v2561_v18 }
 0x9a1   : > { %v7449_v17 = vadd.f32 %v6547_v25, %v2595_v22 }
 0x9a3   : > { %v2635_v27 = vsel %vm9165_vm1, %v7449_v17, -inf  ;;  %vm9180_vm1 = vmmov %vm9172_vm0 }
 0x9a4   : > { %2636 = vmax.xlane.f32.xlu2 %v2635_v27  ;;  %v6557_v27 = vld [vmem:[%s6924_s26 + $0x70] sm:$0xff] }
 0x9a6   : > { %v2563_v39 = vpop.f32.mrf.mxu2 }
 0x9a7   : > { %v2596_v16 = vmul.f32 0.5, %v2563_v39 }
 0x9a9   : > { %v7454_v24 = vadd.f32 %v6548_v57, %v2596_v16 }
 0x9ab   : > { %v2638_v23 = vsel %vm9166_vm2, %v7454_v24, -inf  ;;  %vm9181_vm2 = vmmov %vm9172_vm0 }
 0x9ac   : > { %2639 = vmax.xlane.f32.xlu2 %v2638_v23 }
 0x9ae   : > { %v2566_v36 = vpop.f32.mrf.mxu2 }
 0x9af   : > { %v2597_v32 = vmul.f32 0.5, %v2566_v36 }
 0x9b1   : > { %v7467_v59 = vadd.f32 %v6551_v40, %v2597_v32 }
 0x9b3   : > { %v2641_v15 = vsel %vm9169_vm9, %v7467_v59, -inf  ;;  %vm9184_vm9 = vmmov %vm9172_vm0 }
 0x9b6   : > { %v2568_v8 = vpop.f32.mrf.mxu2 }
 0x9b7   : > { %v2598_v29 = vmul.f32 0.5, %v2568_v8 }
 0x9b9   : > { %v7459_v31 = vadd.f32 %v6549_v34, %v2598_v29  ;;  %v6558_v29 = vld [vmem:[%s6924_s26 + $0x78] sm:$0xff]  ;;  %s9244_s26 = sld [smem:[#allocation5_spill]] }
 0x9bb   : > { %v2644_v45 = vsel %vm9167_vm4, %v7459_v31, -inf  ;;  %vm9182_vm4 = vmmov %vm9172_vm0 }
 0x9bc   : > { %2645 = vmax.xlane.f32.xlu2 %v2644_v45 }
 0x9be   : > { %v2571_v47 = vpop.f32.mrf.mxu2 }
 0x9bf   : > { %v2599_v33 = vmul.f32 0.5, %v2571_v47 }
 0x9c1   : > { %v7464_v38 = vadd.f32 %v6550_v9, %v2599_v33 }
 0x9c3   : > { %v2647_v55 = vsel %vm9168_vm5, %v7464_v38, -inf  ;;  %vm9183_vm5 = vmmov %vm9172_vm0 }
 0x9c4   : > { %2648 = vmax.xlane.f32.xlu2 %v2647_v55 }
 0x9c6   : > { %v2573_v62 = vpop.f32.mrf.mxu2 }
 0x9c7   : > { %v2600_v28 = vmul.f32 0.5, %v2573_v62  ;;  %2642 = vmax.xlane.f32.xlu1 %v2641_v15 }
 0x9c9   : > { %v7474_v19 = vadd.f32 %v6552_v60, %v2600_v28 }
 0x9cb   : > { %v2650_v46 = vsel %vm9170_vm6, %v7474_v19, -inf  ;;  %vm9185_vm6 = vmmov %vm9172_vm0 }
 0x9cc   : > { %2651 = vmax.xlane.f32.xlu2 %v2650_v46 }
 0x9ce   : > { %v2576_v52 = vpop.f32.mrf.mxu2 }
 0x9cf   : > { %v2601_v54 = vmul.f32 0.5, %v2576_v52 }
 0x9d1   : > { %v7479_v10 = vadd.f32 %v6553_v21, %v2601_v54 }
 0x9d3   : > { %v2653_v61 = vsel %vm9171_vm13, %v7479_v10, -inf  ;;  %vm9186_vm13 = vmmov %vm9172_vm0 }
 0x9d4   : > { %2654 = vmax.xlane.f32.xlu0 %v2653_v61 }
 0x9d6   : > { %v2578_v30 = vpop.f32.mrf.mxu2 }
 0x9d7   : > { %v2602_v56 = vmul.f32 0.5, %v2578_v30 }
 0x9d9   : > { %v7484_v1 = vadd.f32 %v6554_v0, %v2602_v56 }
 0x9db   : > { %v2656_v20 = vsel %vm9172_vm0, %v7484_v1, -inf }
 0x9dc   : > { %2657 = vmax.xlane.f32.xlu2 %v2656_v20 }
 0x9de   : > { %v2581_v6 = vpop.f32.mrf.mxu2 }
 0x9df   : > { %v2603_v2 = vmul.f32 0.5, %v2581_v6 }
 0x9e1   : > { %v7489_v58 = vadd.f32 %v6555_v14, %v2603_v2 }
 0x9e3   : > { %v2659_v7 = vsel %vm9173_vm3, %v7489_v58, -inf  ;;  %vm9187_vm3 = vmmov %vm9172_vm0 }
 0x9e4   : > { %2660 = vmax.xlane.f32.xlu0 %v2659_v7 }
 0x9e6   : > { %v2583_v12 = vpop.f32.mrf.mxu2 }
 0x9e7   : > { %v2604_v13 = vmul.f32 0.5, %v2583_v12 }
 0x9e9   : > { %v7494_v26 = vadd.f32 %v6556_v5, %v2604_v13 }
 0x9eb   : > { %v2662_v18 = vsel %vm9174_vm8, %v7494_v26, -inf  ;;  %vm9188_vm8 = vmmov %vm9172_vm0 }
 0x9ec   : > { %2663 = vmax.xlane.f32.xlu2 %v2662_v18 }
 0x9ee   : > { %v2586_v22 = vpop.f32.mrf.mxu2 }
 0x9ef   : > { %v2605_v25 = vmul.f32 0.5, %v2586_v22 }
 0x9f1   : > { %v7499_v39 = vadd.f32 %v6557_v27, %v2605_v25 }
 0x9f3   : > { %v2665_v16 = vsel %vm9175_vm10, %v7499_v39, -inf  ;;  %vm9189_vm10 = vmmov %vm9172_vm0 }
 0x9f4   : > { %2666 = vmax.xlane.f32.xlu1 %v2665_v16 }
 0x9f6   : > { %v2588_v57 = vpop.f32.mrf.mxu2 }
 0x9f7   : > { %v2606_v23 = vmul.f32 0.5, %v2588_v57  ;;  %v2625_v36 = vpop.xlane.xlu1 %2624 }
 0x9f8   : > { %v2671_v8 = vsub.f32 %v7428_v3, %v2625_v36 }
 0x9f9   : > { %v7505_v34 = vadd.f32 %v6558_v29, %v2606_v23 }
 0x9fa   : > { %v2687_v45 = vmul.f32 1.442695, %v2671_v8 }
 0x9fb   : > { %v2668_v32 = vsel %vm9176_vm11, %v7505_v34, -inf  ;;  %vm9190_vm11 = vmmov %vm9172_vm0 }
 0x9fc   : > { %6331 = vpow2.f32 %v2687_v45  ;;  %2669 = vmax.xlane.f32.xlu0 %v2668_v32 }
 0x9ff   : > { %v2628_v47 = vpop.xlane.xlu2 %2627 }
 0xa00   : > { %v2672_v33 = vsub.f32 %v7433_v63, %v2628_v47 }
 0xa02   : > { %v6332_v9 = vpop.eup %6331  ;;  %v2689_v40 = vmul.f32 1.442695, %v2672_v33 }
 0xa03   : > { %v2719_v55 = vsel %vm9177_vm12, %v6332_v9, 0.0  ;;  %vm9191_vm12 = vmmov %vm9172_vm0 }
 0xa04   : > { %6333 = vpow2.f32 %v2689_v40  ;;  %2720 = vadd.xlane.f32.xlu2 %v2719_v55 }
 0xa07   : > { %v2631_v62 = vpop.xlane.xlu2 %2630 }
 0xa08   : > { %v2673_v3 = vsub.f32 %v7438_v4, %v2631_v62 }
 0xa0a   : > { %v6334_v15 = vpop.eup %6333  ;;  %v2691_v28 = vmul.f32 1.442695, %v2673_v3 }
 0xa0b   : > { %v2722_v60 = vsel %vm9178_vm14, %v6334_v15, 0.0  ;;  %v2767_v63 = vpack.c.bf16 %v6334_v15, %v6332_v9  ;;  %vm9192_vm14 = vmmov %vm9172_vm0 }
 0xa0c   : > { %6335 = vpow2.f32 %v2691_v28  ;;  %2723 = vadd.xlane.f32.xlu1 %v2722_v60 }
 0xa0f   : > { %v2776_v46 = vpop.permute.xlu1 %2775  ;;  %v2634_v52 = vpop.xlane.xlu0 %2633 }
 0xa10   : > { %v2674_v54 = vsub.f32 %v7443_v37, %v2634_v52  ;;  %2809 = vmatpush.bf16.msrb.mxu3 %v2776_v46 }
 0xa12   : > { %v6336_v21 = vpop.eup %6335  ;;  %v2693_v61 = vmul.f32 1.442695, %v2674_v54 }
 0xa13   : > { %5802 = vmatmul.msk.bf16.vlgmr.msrb.gmra.mxu3 %vm9179_vm15, %v2767_v63  ;;  %v2725_v30 = vsel %vm9180_vm1, %v6336_v21, 0.0  ;;  %vm9193_vm15 = vmmov %vm9172_vm0 }
 0xa14   : > { %6337 = vpow2.f32 %v2693_v61  ;;  %2726 = vadd.xlane.f32.xlu0 %v2725_v30  ;;  %vm9194_vm1 = vmmov %vm9172_vm0 }
 0xa17   : > { %v2637_v4 = vpop.xlane.xlu2 %2636 }
 0xa18   : > { %v2675_v56 = vsub.f32 %v7449_v17, %v2637_v4 }
 0xa1a   : > { %v6338_v0 = vpop.eup %6337  ;;  %v2695_v20 = vmul.f32 1.442695, %v2675_v56 }
 0xa1b   : > { %v2728_v6 = vsel %vm9181_vm2, %v6338_v0, 0.0  ;;  %v2768_v14 = vpack.c.bf16 %v6338_v0, %v6336_v21  ;;  %vm9195_vm2 = vmmov %vm9172_vm0 }
 0xa1c   : > { %6339 = vpow2.f32 %v2695_v20  ;;  %2729 = vadd.xlane.f32.xlu2 %v2728_v6 }
 0xa1f   : > { %v2640_v37 = vpop.xlane.xlu2 %2639 }
 0xa20   : > { %v2676_v2 = vsub.f32 %v7454_v24, %v2640_v37 }
 0xa22   : > { %v6340_v7 = vpop.eup %6339  ;;  %v2697_v12 = vmul.f32 1.442695, %v2676_v2 }
 0xa23   : > { %5803 = vmatmul.msk.bf16.gmra.mxu3 %vm9182_vm4, %v2768_v14  ;;  %v2731_v13 = vsel %vm9183_vm5, %v6340_v7, 0.0  ;;  %vm9196_vm4 = vmmov %vm9172_vm0 }
 0xa24   : > { %6341 = vpow2.f32 %v2697_v12  ;;  %2732 = vadd.xlane.f32.xlu1 %v2731_v13  ;;  %vm9197_vm5 = vmmov %vm9172_vm0 }
 0xa2a   : > { %v6342_v5 = vpop.eup %6341 }
 0xa2b   : > { %v2734_v17 = vsel %vm9184_vm9, %v6342_v5, 0.0  ;;  %v2769_v25 = vpack.c.bf16 %v6342_v5, %v6340_v7  ;;  %vm9198_vm9 = vmmov %vm9172_vm0 }
 0xa2c   : > { %2735 = vadd.xlane.f32.xlu0 %v2734_v17 }
 0xa2f   : > { %v2646_v18 = vpop.xlane.xlu2 %2645 }
 0xa30   : > { %v2678_v22 = vsub.f32 %v7459_v31, %v2646_v18 }
 0xa32   : > { %v2701_v27 = vmul.f32 1.442695, %v2678_v22 }
 0xa33   : > { %5804 = vmatmul.msk.bf16.gmra.mxu3 %vm9185_vm6, %v2769_v25  ;;  %vm9199_vm6 = vmmov %vm9172_vm0 }
 0xa34   : > { %6343 = vpow2.f32 %v2701_v27 }
 0xa37   : > { %v2649_v24 = vpop.xlane.xlu2 %2648 }
 0xa38   : > { %v2679_v16 = vsub.f32 %v7464_v38, %v2649_v24 }
 0xa3a   : > { %v6344_v57 = vpop.eup %6343  ;;  %v2703_v23 = vmul.f32 1.442695, %v2679_v16  ;;  %v2643_v36 = vpop.xlane.xlu1 %2642 }
 0xa3b   : > { %v2677_v8 = vsub.f32 %v7467_v59, %v2643_v36  ;;  %v2740_v29 = vsel %vm9186_vm13, %v6344_v57, 0.0 }
 0xa3c   : > { %6345 = vpow2.f32 %v2703_v23  ;;  %2741 = vadd.xlane.f32.xlu1 %v2740_v29 }
 0xa3d   : > { %v2699_v45 = vmul.f32 1.442695, %v2677_v8 }
 0xa3f   : > { %6347 = vpow2.f32 %v2699_v45  ;;  %v2652_v31 = vpop.xlane.xlu2 %2651 }
 0xa40   : > { %v2680_v32 = vsub.f32 %v7474_v19, %v2652_v31 }
 0xa42   : > { %v6346_v47 = vpop.eup %6345  ;;  %v2705_v33 = vmul.f32 1.442695, %v2680_v32 }
 0xa43   : > { %v2743_v9 = vsel %vm9172_vm0, %v6346_v47, 0.0 }
 0xa44   : > { %2744 = vadd.xlane.f32.xlu0 %v2743_v9  ;;  %6349 = vpow2.f32 %v2705_v33 }
 0xa45   : > { %v6348_v38 = vpop.eup %6347 }
 0xa46   : > { %v2737_v40 = vsel %vm9187_vm3, %v6348_v38, 0.0  ;;  %v2770_v55 = vpack.c.bf16 %v6344_v57, %v6348_v38 }
 0xa47   : > { %v2655_v59 = vpop.xlane.xlu0 %2654  ;;  %2738 = vadd.xlane.f32.xlu2 %v2737_v40 }
 0xa48   : > { %v2681_v62 = vsub.f32 %v7479_v10, %v2655_v59  ;;  %5805 = vmatmul.msk.bf16.gmra.mxu3 %vm9188_vm8, %v2770_v55 }
 0xa4a   : > { %v2707_v3 = vmul.f32 1.442695, %v2681_v62  ;;  %v6350_v15 = vpop.eup %6349 }
 0xa4b   : > { %v2746_v19 = vsel %vm9189_vm10, %v6350_v15, 0.0  ;;  %v2771_v63 = vpack.c.bf16 %v6350_v15, %v6346_v47 }
 0xa4c   : > { %6351 = vpow2.f32 %v2707_v3 }
 0xa4f   : > { %v2658_v28 = vpop.xlane.xlu2 %2657  ;;  %2747 = vadd.xlane.f32.xlu2 %v2746_v19 }
 0xa50   : > { %v2682_v60 = vsub.f32 %v7484_v1, %v2658_v28 }
 0xa52   : > { %v6352_v46 = vpop.eup %6351  ;;  %v2709_v52 = vmul.f32 1.442695, %v2682_v60 }
 0xa53   : > { %v2749_v54 = vsel %vm9190_vm11, %v6352_v46, 0.0 }
 0xa54   : > { %6353 = vpow2.f32 %v2709_v52  ;;  %2750 = vadd.xlane.f32.xlu1 %v2749_v54 }
 0xa57   : > { %v2661_v21 = vpop.xlane.xlu0 %2660 }
 0xa58   : > { %v2683_v10 = vsub.f32 %v7489_v58, %v2661_v21  ;;  %5806 = vmatmul.msk.bf16.gmra.mxu3 %vm9191_vm12, %v2771_v63 }
 0xa5a   : > { %v6354_v61 = vpop.eup %6353  ;;  %v2711_v30 = vmul.f32 1.442695, %v2683_v10 }
 0xa5b   : > { %v2752_v4 = vsel %vm9192_vm14, %v6354_v61, 0.0  ;;  %v2772_v37 = vpack.c.bf16 %v6354_v61, %v6352_v46 }
 0xa5c   : > { %6355 = vpow2.f32 %v2711_v30  ;;  %2753 = vadd.xlane.f32.xlu0 %v2752_v4 }
 0xa5f   : > { %v2664_v56 = vpop.xlane.xlu2 %2663 }
 0xa60   : > { %v2684_v1 = vsub.f32 %v7494_v26, %v2664_v56 }
 0xa62   : > { %v6356_v0 = vpop.eup %6355  ;;  %v2713_v20 = vmul.f32 1.442695, %v2684_v1 }
 0xa63   : > { %v2755_v6 = vsel %vm9193_vm15, %v6356_v0, 0.0 }
 0xa64   : > { %6357 = vpow2.f32 %v2713_v20  ;;  %2756 = vadd.xlane.f32.xlu2 %v2755_v6 }
 0xa67   : > { %v2667_v2 = vpop.xlane.xlu1 %2666 }
 0xa68   : > { %v2685_v58 = vsub.f32 %v7499_v39, %v2667_v2  ;;  %5807 = vmatmul.msk.bf16.gmra.mxu3 %vm9194_vm1, %v2772_v37 }
 0xa6a   : > { %v6358_v14 = vpop.eup %6357  ;;  %v2715_v7 = vmul.f32 1.442695, %v2685_v58 }
 0xa6b   : > { %v2758_v12 = vsel %vm9195_vm2, %v6358_v14, 0.0  ;;  %v2773_v22 = vpack.c.bf16 %v6358_v14, %v6356_v0 }
 0xa6c   : > { %6359 = vpow2.f32 %v2715_v7  ;;  %2759 = vadd.xlane.f32.xlu1 %v2758_v12 }
 0xa6f   : > { %v2670_v13 = vpop.xlane.xlu0 %2669 }
 0xa70   : > { %v2686_v26 = vsub.f32 %v7505_v34, %v2670_v13 }
 0xa72   : > { %v6360_v5 = vpop.eup %6359  ;;  %v2717_v17 = vmul.f32 1.442695, %v2686_v26 }
 0xa73   : > { %v2761_v18 = vsel %vm9196_vm4, %v6360_v5, 0.0 }
 0xa74   : > { %6361 = vpow2.f32 %v2717_v17  ;;  %2762 = vadd.xlane.f32.xlu0 %v2761_v18 }
 0xa77   : > { %v2721_v27 = vpop.xlane.xlu2 %2720 }
 0xa78   : > { %5808 = vmatmul.msk.bf16.gmra.mxu3 %vm9197_vm5, %v2773_v22  ;;  %6363 = vrcp.f32 %v2721_v27  ;;  %v2862_v38 = vand.u32 2147483648, %v2721_v27  ;;  %vm2856_vm0 = vweird.f32 %v2721_v27  ;;  %v2860_v55 = vand.u32 2147483647, %v2721_v27  ;;  %v6117_v22 = vld [vmem:[%s9054_s19 + $0x18] sm:$0xff] }
 0xa79   : > { %3150 = vmatpush.bf16.msra.mxu0 %v6117_v22 }
 0xa7a   : > { %v6362_v39 = vpop.eup %6361  ;;  %v2863_v28 = vor.u32 1.1754944e-38, %v2862_v38  ;;  %vm2861_vm12 = vcmp.eq.f32.partialorder %v2860_v55, 8.507059e+37 }
 0xa7b   : > { %v2764_v25 = vsel %vm9198_vm9, %v6362_v39, 0.0  ;;  %v2774_v24 = vpack.c.bf16 %v6362_v39, %v6360_v5 }
 0xa7c   : > { %2765 = vadd.xlane.f32.xlu2 %v2764_v25 }
 0xa7e   : > { %v6364_v34 = vpop.eup %6363 }
 0xa7f   : > { %v7548_v57 = vpop.xlane.xlu1 %2723  ;;  %v2852_v36 = vmul.f32 %v6364_v34, %v2721_v27  ;;  %vm2857_vm13 = vweird.f32 %v6364_v34 }
 0xa80   : > { %vm2858_vm8 = vmor %vm2856_vm0, %vm2857_vm13 }
 0xa81   : > { %v2853_v29 = vsub.f32 1.0, %v2852_v36 }
 0xa83   : > { %v2854_v47 = vmul.f32 %v6364_v34, %v2853_v29 }
 0xa85   : > { %v2855_v9 = vadd.f32 %v6364_v34, %v2854_v47 }
 0xa87   : > { %v2727_v16 = vpop.xlane.xlu0 %2726  ;;  %v2859_v15 = vsel %vm2858_vm8, %v6364_v34, %v2855_v9 }
 0xa88   : > { %5809 = vmatmul.msk.bf16.gmra.mxu3 %vm9199_vm6, %v2774_v24  ;;  %6365 = vrcp.f32 %v2727_v16  ;;  %v2892_v3 = vand.u32 2147483648, %v2727_v16  ;;  %vm2886_vm10 = vweird.f32 %v2727_v16  ;;  %v2890_v19 = vand.u32 2147483647, %v2727_v16 }
 0xa89   : > { %v2864_v52 = vsel %vm2861_vm12, %v2863_v28, %v2859_v15 }
 0xa8a   : > { %v2893_v54 = vor.u32 1.1754944e-38, %v2892_v3  ;;  %vm2891_vm14 = vcmp.eq.f32.partialorder %v2890_v19, 8.507059e+37 }
 0xa8e   : > { %v6366_v23 = vpop.eup %6365 }
 0xa8f   : > { %v2882_v8 = vmul.f32 %v6366_v23, %v2727_v16  ;;  %vm2887_vm3 = vweird.f32 %v6366_v23  ;;  %v7556_v58 = vpop.xlane.xlu2 %2729 }
 0xa90   : > { %vm2888_vm11 = vmor %vm2886_vm10, %vm2887_vm3  ;;  %vm2901_vm8 = vweird.f32 %v7556_v58  ;;  %vm2871_vm10 = vweird.f32 %v7548_v57 }
 0xa91   : > { %v2883_v31 = vsub.f32 1.0, %v2882_v8 }
 0xa93   : > { %v2884_v33 = vmul.f32 %v6366_v23, %v2883_v31 }
 0xa95   : > { %v2885_v59 = vadd.f32 %v6366_v23, %v2884_v33 }
 0xa96   : > { %v2811_v45 = vpop.f32.mrf.mxu3 }
 0xa97   : > { %v2733_v32 = vpop.xlane.xlu1 %2732  ;;  %v2889_v46 = vsel %vm2888_vm11, %v6366_v23, %v2885_v59  ;;  %v2865_v63 = vmul.f32 %v2864_v52, %v2811_v45 }
 0xa98   : > { %6367 = vrcp.f32 %v2733_v32  ;;  %v2894_v10 = vsel %vm2891_vm14, %v2893_v54, %v2889_v46  ;;  %v2922_v37 = vand.u32 2147483648, %v2733_v32  ;;  %vm2916_vm1 = vweird.f32 %v2733_v32 }
 0xa99   : > { %v3091_v4 = vmul.f32 %v6888_v48, %v2865_v63  ;;  %v2920_v2 = vand.u32 2147483647, %v2733_v32 }
 0xa9a   : > { %v2923_v7 = vor.u32 1.1754944e-38, %v2922_v37  ;;  %v2907_v37 = vand.u32 2147483648, %v7556_v58 }
 0xa9b   : > { %vm2921_vm4 = vcmp.eq.f32.partialorder %v2920_v2, 8.507059e+37 }
 0xa9e   : > { %v7550_v40 = vpop.f32.mrf.mxu3  ;;  %v6368_v62 = vpop.eup %6367 }
 0xa9f   : > { %v2912_v60 = vmul.f32 %v6368_v62, %v2733_v32  ;;  %vm2917_vm15 = vweird.f32 %v6368_v62  ;;  %v7567_v9 = vpop.xlane.xlu0 %2735 }
 0xaa0   : > { %vm2918_vm2 = vmor %vm2916_vm1, %vm2917_vm15  ;;  %vm2931_vm1 = vweird.f32 %v7567_v9 }
 0xaa1   : > { %v2913_v61 = vsub.f32 1.0, %v2912_v60 }
 0xaa3   : > { %v2914_v0 = vmul.f32 %v6368_v62, %v2913_v61 }
 0xaa5   : > { %v2915_v6 = vadd.f32 %v6368_v62, %v2914_v0 }
 0xaa6   : > { %v2816_v21 = vpop.f32.mrf.mxu3 }
 0xaa7   : > { %v2895_v30 = vmul.f32 %v2894_v10, %v2816_v21  ;;  %v2919_v14 = vsel %vm2918_vm2, %v6368_v62, %v2915_v6 }
 0xaa8   : > { %v2924_v13 = vsel %vm2921_vm4, %v2923_v7, %v2919_v14  ;;  %v2905_v14 = vand.u32 2147483647, %v7556_v58 }
 0xaa9   : > { %v3095_v56 = vmul.f32 %v6890_v49, %v2895_v30 }
 0xaaa   : > { %vm2906_vm15 = vcmp.eq.f32.partialorder %v2905_v14, 8.507059e+37 }
 0xaab   : > { %v3097_v1 = vadd.f32 %v3095_v56, %v3091_v4 }
 0xaae   : > { %v7554_v20 = vpop.f32.mrf.mxu3 }
 0xaaf   : > { %v7579_v19 = vpop.xlane.xlu1 %2741 }
 0xab6   : > { %v2821_v12 = vpop.f32.mrf.mxu3 }
 0xab7   : > { %v2925_v26 = vmul.f32 %v2924_v13, %v2821_v12  ;;  %v7586_v54 = vpop.xlane.xlu0 %2744  ;;  %v2875_v13 = vand.u32 2147483647, %v7548_v57 }
 0xab9   : > { %v3099_v5 = vmul.f32 %v6892_v50, %v2925_v26  ;;  %v2877_v26 = vand.u32 2147483648, %v7548_v57  ;;  %vm2876_vm2 = vcmp.eq.f32.partialorder %v2875_v13, 8.507059e+37 }
 0xaba   : > { %v2739_v17 = vpop.xlane.xlu2 %2738 }
 0xabb   : > { %v3101_v18 = vadd.f32 %v3099_v5, %v3097_v1  ;;  %6369 = vrcp.f32 %v2739_v17  ;;  %v2952_v16 = vand.u32 2147483648, %v2739_v17  ;;  %v2950_v23 = vand.u32 2147483647, %v2739_v17 }
 0xabc   : > { %vm2946_vm9 = vweird.f32 %v2739_v17  ;;  %6371 = vrcp.f32 %v7556_v58  ;;  %v2980_v5 = vand.u32 2147483647, %v7586_v54 }
 0xabd   : > { %v2953_v8 = vor.u32 1.1754944e-38, %v2952_v16  ;;  %vm2951_vm13 = vcmp.eq.f32.partialorder %v2950_v23, 8.507059e+37  ;;  %6373 = vrcp.f32 %v7548_v57  ;;  %v2935_v23 = vand.u32 2147483647, %v7567_v9 }
 0xabe   : > { %v7560_v27 = vpop.f32.mrf.mxu3  ;;  %6375 = vrcp.f32 %v7567_v9 }
 0xabf   : > { %6377 = vrcp.f32 %v7579_v19 }
 0xac0   : > { %6379 = vrcp.f32 %v7586_v54 }
 0xac1   : > { %v6370_v39 = vpop.eup %6369 }
 0xac2   : > { %v2942_v25 = vmul.f32 %v6370_v39, %v2739_v17  ;;  %vm2947_vm5 = vweird.f32 %v6370_v39  ;;  %v6372_v55 = vpop.eup %6371  ;;  %v7588_v10 = vpop.xlane.xlu2 %2747  ;;  %v2982_v17 = vand.u32 2147483648, %v7586_v54 }
 0xac3   : > { %vm2948_vm6 = vmor %vm2946_vm9, %vm2947_vm5  ;;  %v7572_v59 = vpop.eup %6373  ;;  %v2897_v62 = vmul.f32 %v6372_v55, %v7556_v58  ;;  %6381 = vrcp.f32 %v7588_v10  ;;  %vm2902_vm0 = vweird.f32 %v6372_v55  ;;  %vm2936_vm5 = vcmp.eq.f32.partialorder %v2935_v23, 8.507059e+37 }
 0xac4   : > { %v2943_v24 = vsub.f32 1.0, %v2942_v25  ;;  %v7575_v3 = vpop.eup %6375  ;;  %v2867_v15 = vmul.f32 %v7572_v59, %v7548_v57  ;;  %vm2872_vm3 = vweird.f32 %v7572_v59  ;;  %vm7614_vm11 = vmor %vm2901_vm8, %vm2902_vm0  ;;  %vm2976_vm8 = vweird.f32 %v7586_v54 }
 0xac5   : > { %v2898_v60 = vsub.f32 1.0, %v2897_v62  ;;  %v2927_v46 = vmul.f32 %v7575_v3, %v7567_v9  ;;  %v7594_v4 = vpop.eup %6377  ;;  %vm7619_vm12 = vmor %vm2871_vm10, %vm2872_vm3  ;;  %vm2932_vm14 = vweird.f32 %v7575_v3  ;;  %vm7714_vm10 = vcmp.eq.f32.partialorder %v2980_v5, 8.507059e+37 }
 0xac6   : > { %v2944_v34 = vmul.f32 %v6370_v39, %v2943_v24  ;;  %v2868_v52 = vsub.f32 1.0, %v2867_v15  ;;  %v2957_v2 = vmul.f32 %v7594_v4, %v7579_v19  ;;  %v7609_v12 = vpop.eup %6379  ;;  %v2937_v24 = vand.u32 2147483648, %v7567_v9  ;;  %vm7643_vm4 = vmor %vm2931_vm1, %vm2932_vm14 }
 0xac7   : > { %v2899_v63 = vmul.f32 %v6372_v55, %v2898_v60  ;;  %v2928_v21 = vsub.f32 1.0, %v2927_v46  ;;  %v7598_v0 = vpop.xlane.xlu1 %2750  ;;  %vm2962_vm9 = vweird.f32 %v7594_v4  ;;  %vm2977_vm3 = vweird.f32 %v7609_v12 }
 0xac8   : > { %v2945_v36 = vadd.f32 %v6370_v39, %v2944_v34  ;;  %v2869_v61 = vmul.f32 %v7572_v59, %v2868_v52  ;;  %6383 = vrcp.f32 %v7598_v0  ;;  %v2958_v25 = vsub.f32 1.0, %v2957_v2 }
 0xac9   : > { %v2929_v56 = vmul.f32 %v7575_v3, %v2928_v21  ;;  %v2900_v1 = vadd.f32 %v6372_v55, %v2899_v63  ;;  %v7627_v22 = vpop.eup %6381  ;;  %v2972_v34 = vmul.f32 %v7609_v12, %v7586_v54  ;;  %v2938_v15 = vor.u32 1.1754944e-38, %v2937_v24 }
 0xaca   : > { %v2949_v29 = vsel %vm2948_vm6, %v6370_v39, %v2945_v36  ;;  %v2870_v6 = vadd.f32 %v7572_v59, %v2869_v61  ;;  %v2908_v39 = vor.u32 1.1754944e-38, %v2907_v37  ;;  %v2959_v62 = vmul.f32 %v7594_v4, %v2958_v25 }
 0xacb   : > { %v2826_v45 = vpop.f32.mrf.mxu3  ;;  %v2954_v31 = vsel %vm2951_vm13, %v2953_v8, %v2949_v29  ;;  %v2904_v58 = vsel %vm7614_vm11, %v6372_v55, %v2900_v1  ;;  %v2878_v8 = vor.u32 1.1754944e-38, %v2877_v26  ;;  %v2973_v60 = vsub.f32 1.0, %v2972_v34 }
 0xacc   : > { %v2955_v32 = vmul.f32 %v2954_v31, %v2826_v45  ;;  %v2874_v57 = vsel %vm7619_vm12, %v7572_v59, %v2870_v6  ;;  %v2909_v29 = vsel %vm2906_vm15, %v2908_v39, %v2904_v58  ;;  %v2965_v52 = vand.u32 2147483647, %v7579_v19  ;;  %vm7731_vm12 = vmor %vm2976_vm8, %vm2977_vm3 }
 0xacd   : > { %v2910_v31 = vmul.f32 %v2909_v29, %v7554_v20  ;;  %v2879_v59 = vsel %vm2876_vm2, %v2878_v8, %v2874_v57  ;;  %v2974_v14 = vmul.f32 %v7609_v12, %v2973_v60  ;;  %vm2961_vm6 = vweird.f32 %v7579_v19 }
 0xace   : > { %v3103_v47 = vmul.f32 %v6894_v51, %v2955_v32  ;;  %v7656_v55 = vpop.eup %6383  ;;  %v2880_v20 = vmul.f32 %v2879_v59, %v7550_v40  ;;  %v2960_v40 = vadd.f32 %v7594_v4, %v2959_v62  ;;  %vm7684_vm13 = vcmp.eq.f32.partialorder %v2965_v52, 8.507059e+37  ;;  %vm7693_vm0 = vmor %vm2961_vm6, %vm2962_vm9  ;;  %v6116_v59 = vld [vmem:[%s9054_s19 + $0x10] sm:$0xff]  ;;  %s9339_s19 = sld [smem:[#allocation32_spill]] }
 0xacf   : > { %v7607_v7 = vpop.xlane.xlu0 %2753  ;;  %v3096_v63 = vmul.f32 %v6890_v49, %v2910_v31  ;;  %v3002_v61 = vmul.f32 %v7656_v55, %v7598_v0  ;;  %v2975_v29 = vadd.f32 %v7609_v12, %v2974_v14  ;;  %v2995_v45 = vand.u32 2147483647, %v7588_v10  ;;  %3151 = vmatpush.bf16.msra.mxu0 %v6116_v59 }
 0xad0   : > { %v7563_v33 = vadd.f32 %v3103_v47, %v3101_v18  ;;  %v2930_v18 = vadd.f32 %v7575_v3, %v2929_v56  ;;  %v2987_v47 = vmul.f32 %v7627_v22, %v7588_v10  ;;  %6385 = vrcp.f32 %v7607_v7 }
 0xad1   : > { %v2967_v56 = vand.u32 2147483648, %v7579_v19  ;;  %v3092_v2 = vmul.f32 %v6888_v48, %v2880_v20  ;;  %v3003_v57 = vsub.f32 1.0, %v3002_v61  ;;  %v2964_v23 = vsel %vm7693_vm0, %v7594_v4, %v2960_v40 }
 0xad2   : > { %v2934_v32 = vsel %vm7643_vm4, %v7575_v3, %v2930_v18  ;;  %v2988_v21 = vsub.f32 1.0, %v2987_v47  ;;  %v2983_v4 = vor.u32 1.1754944e-38, %v2982_v17  ;;  %v2997_v47 = vand.u32 2147483648, %v7588_v10 }
 0xad3   : > { %v7569_v38 = vpop.f32.mrf.mxu3  ;;  %v2939_v46 = vsel %vm2936_vm5, %v2938_v15, %v2934_v32  ;;  %v3098_v58 = vadd.f32 %v3096_v63, %v3092_v2  ;;  %v2968_v19 = vor.u32 1.1754944e-38, %v2967_v56  ;;  %vm2992_vm11 = vweird.f32 %v7627_v22 }
 0xad4   : > { %v2940_v1 = vmul.f32 %v2939_v46, %v7560_v27  ;;  %v2989_v18 = vmul.f32 %v7627_v22, %v2988_v21  ;;  %v3004_v20 = vmul.f32 %v7656_v55, %v3003_v57  ;;  %vm2991_vm14 = vweird.f32 %v7588_v10 }
 0xad5   : > { %v2969_v46 = vsel %vm7684_vm13, %v2968_v19, %v2964_v23  ;;  %v2979_v61 = vsel %vm7731_vm12, %v7609_v12, %v2975_v29  ;;  %vm7741_vm15 = vcmp.eq.f32.partialorder %v2995_v45, 8.507059e+37  ;;  %vm7749_vm1 = vmor %vm2991_vm14, %vm2992_vm11  ;;  %v2998_v10 = vor.u32 1.1754944e-38, %v2997_v47 }
 0xad6   : > { %v7675_v37 = vpop.eup %6385  ;;  %v3100_v24 = vmul.f32 %v6892_v50, %v2940_v1  ;;  %v2990_v15 = vadd.f32 %v7627_v22, %v2989_v18  ;;  %vm3007_vm2 = vweird.f32 %v7656_v55  ;;  %v3010_v14 = vand.u32 2147483647, %v7598_v0 }
 0xad7   : > { %v7639_v36 = vpop.xlane.xlu2 %2756  ;;  %v3017_v34 = vmul.f32 %v7675_v37, %v7607_v7  ;;  %v3012_v12 = vand.u32 2147483648, %v7598_v0  ;;  %v3005_v17 = vadd.f32 %v7656_v55, %v3004_v20  ;;  %v2970_v57 = vmul.f32 %v2969_v46, %v7569_v38 }
 0xad8   : > { %6387 = vrcp.f32 %v7639_v36  ;;  %v7725_v60 = vadd.f32 %v3100_v24, %v3098_v58  ;;  %v2994_v5 = vsel %vm7749_vm1, %v7627_v22, %v2990_v15  ;;  %v3025_v58 = vand.u32 2147483647, %v7607_v7 }
 0xad9   : > { %v3018_v54 = vsub.f32 1.0, %v3017_v34  ;;  %v2984_v39 = vsel %vm7714_vm10, %v2983_v4, %v2979_v61  ;;  %v3027_v19 = vand.u32 2147483648, %v7607_v7  ;;  %vm3006_vm4 = vweird.f32 %v7598_v0 }
 0xada   : > { %v2999_v23 = vsel %vm7741_vm15, %v2998_v10, %v2994_v5  ;;  %vm7774_vm5 = vmor %vm3006_vm4, %vm3007_vm2  ;;  %vm7778_vm9 = vcmp.eq.f32.partialorder %v3010_v14, 8.507059e+37  ;;  %v3013_v29 = vor.u32 1.1754944e-38, %v3012_v12  ;;  %vm3021_vm6 = vweird.f32 %v7607_v7 }
 0xadb   : > { %v7581_v28 = vpop.f32.mrf.mxu3  ;;  %v3019_v18 = vmul.f32 %v7675_v37, %v3018_v54  ;;  %v3009_v45 = vsel %vm7774_vm5, %v7656_v55, %v3005_v17  ;;  %vm7787_vm13 = vcmp.eq.f32.partialorder %v3025_v58, 8.507059e+37  ;;  %v3040_v4 = vand.u32 2147483647, %v7639_v36 }
 0xadc   : > { %v3104_v47 = vmul.f32 %v6894_v51, %v2970_v57  ;;  %vm3022_vm0 = vweird.f32 %v7675_v37  ;;  %v2985_v46 = vmul.f32 %v2984_v39, %v7581_v28  ;;  %v3014_v52 = vsel %vm7778_vm9, %v3013_v29, %v3009_v45 }
 0xadd   : > { %v3020_v59 = vadd.f32 %v7675_v37, %v3019_v18  ;;  %vm3036_vm8 = vweird.f32 %v7639_v36  ;;  %vm7805_vm10 = vmor %vm3021_vm6, %vm3022_vm0  ;;  %vm7809_vm11 = vcmp.eq.f32.partialorder %v3040_v4, 8.507059e+37 }
 0xade   : > { %v7681_v26 = vpop.eup %6387 }
 0xadf   : > { %v7654_v9 = vpop.xlane.xlu1 %2759  ;;  %v3032_v8 = vmul.f32 %v7681_v26, %v7639_v36  ;;  %vm3037_vm3 = vweird.f32 %v7681_v26  ;;  %v3024_v7 = vsel %vm7805_vm10, %v7675_v37, %v3020_v59  ;;  %v3107_v37 = vmul.f32 %v6879_v41, %v2985_v46 }
 0xae0   : > { %6389 = vrcp.f32 %v7654_v9  ;;  %v3055_v28 = vand.u32 2147483647, %v7654_v9  ;;  %vm7820_vm14 = vmor %vm3036_vm8, %vm3037_vm3  ;;  %vm3051_vm15 = vweird.f32 %v7654_v9  ;;  %v3057_v10 = vand.u32 2147483648, %v7654_v9 }
 0xae1   : > { %v3033_v21 = vsub.f32 1.0, %v3032_v8  ;;  %v3109_v59 = vadd.f32 %v3107_v37, %v7563_v33  ;;  %vm9232_vm10 = vcmask 261120   ;;  %v6119_v37 = vld [vmem:[%s9056_s12 + $0x18] sm:$0xff] }
 0xae2   : > { %vm3056_vm4 = vcmp.eq.f32.partialorder %v3055_v28, 8.507059e+37  ;;  %3257 = vmatpush.bf16.msra.mxu1 %v6119_v37 }
 0xae3   : > { %v7592_v30 = vpop.f32.mrf.mxu3  ;;  %v3034_v22 = vmul.f32 %v7681_v26, %v3033_v21  ;;  %v3042_v21 = vand.u32 2147483648, %v7639_v36 }
 0xae4   : > { %v3000_v2 = vmul.f32 %v2999_v23, %v7592_v30 }
 0xae5   : > { %v3035_v54 = vadd.f32 %v7681_v26, %v3034_v22 }
 0xae6   : > { %v7697_v25 = vpop.eup %6389  ;;  %v3108_v18 = vmul.f32 %v6879_v41, %v3000_v2 }
 0xae7   : > { %v7661_v3 = vpop.xlane.xlu0 %2762  ;;  %v3047_v62 = vmul.f32 %v7697_v25, %v7654_v9  ;;  %vm3052_vm12 = vweird.f32 %v7697_v25  ;;  %v3039_v14 = vsel %vm7820_vm14, %v7681_v26, %v3035_v54  ;;  %vm9236_vm14 = vmmov %vm9232_vm10 }
 0xae8   : > { %6391 = vrcp.f32 %v7661_v3  ;;  %vm7833_vm2 = vmor %vm3051_vm15, %vm3052_vm12  ;;  %v3070_v17 = vand.u32 2147483647, %v7661_v3  ;;  %v3072_v9 = vand.u32 2147483648, %v7661_v3  ;;  %vm3066_vm5 = vweird.f32 %v7661_v3 }
 0xae9   : > { %v3048_v27 = vsub.f32 1.0, %v3047_v62  ;;  %v3028_v62 = vor.u32 1.1754944e-38, %v3027_v19  ;;  %v3058_v19 = vor.u32 1.1754944e-38, %v3057_v10  ;;  %vm9234_vm12 = vmmov %vm9232_vm10 }
 0xaea   : > { %v3073_v23 = vor.u32 1.1754944e-38, %v3072_v9  ;;  %vm9237_vm15 = vmmov %vm9232_vm10 }
 0xaeb   : > { %v7633_v16 = vpop.f32.mrf.mxu3  ;;  %v3049_v0 = vmul.f32 %v7697_v25, %v3048_v27  ;;  %v3043_v27 = vor.u32 1.1754944e-38, %v3042_v21  ;;  %v3029_v26 = vsel %vm7787_vm13, %v3028_v62, %v3024_v7  ;;  %vm3071_vm13 = vcmp.eq.f32.partialorder %v3070_v17, 8.507059e+37 }
 0xaec   : > { %v3015_v57 = vmul.f32 %v3014_v52, %v7633_v16 }
 0xaed   : > { %v3044_v39 = vsel %vm7809_vm11, %v3043_v27, %v3039_v14  ;;  %vm9233_vm11 = vmmov %vm9232_vm10 }
 0xaee   : > { %v7711_v31 = vpop.eup %6391 }
 0xaef   : > { %v7679_v13 = vpop.xlane.xlu2 %2765  ;;  %v3062_v1 = vmul.f32 %v7711_v31, %v7661_v3  ;;  %vm3067_vm1 = vweird.f32 %v7711_v31 }
 0xaf0   : > { %6393 = vrcp.f32 %v7679_v13  ;;  %vm3068_vm9 = vmor %vm3066_vm5, %vm3067_vm1  ;;  %v3087_v16 = vand.u32 2147483648, %v7679_v13  ;;  %vm3081_vm0 = vweird.f32 %v7679_v13  ;;  %v3085_v29 = vand.u32 2147483647, %v7679_v13 }
 0xaf1   : > { %v3063_v24 = vsub.f32 1.0, %v3062_v1  ;;  %v3050_v1 = vadd.f32 %v7697_v25, %v3049_v0 }
 0xaf2   : > { %v3088_v62 = vor.u32 1.1754944e-38, %v3087_v16  ;;  %vm3086_vm8 = vcmp.eq.f32.partialorder %v3085_v29, 8.507059e+37 }
 0xaf3   : > { %v7673_v6 = vpop.f32.mrf.mxu3  ;;  %v3064_v55 = vmul.f32 %v7711_v31, %v3063_v24  ;;  %v3054_v58 = vsel %vm7833_vm2, %v7697_v25, %v3050_v1  ;;  %v6223_v1 = vld [vmem:[%s9052_s24 + $0x1] ss:$0 sm:$0xff]  ;;  %s9341_s24 = sld [smem:[#allocation36_spill]] }
 0xaf4   : > { %v3059_v3 = vsel %vm3056_vm4, %v3058_v19, %v3054_v58 }
 0xaf5   : > { %v3065_v12 = vadd.f32 %v7711_v31, %v3064_v55 }
 0xaf6   : > { %v7747_v40 = vpop.eup %6393 }
 0xaf7   : > { %v3077_v34 = vmul.f32 %v7747_v40, %v7679_v13  ;;  %v3069_v22 = vsel %vm3068_vm9, %v7711_v31, %v3065_v12  ;;  %vm3082_vm6 = vweird.f32 %v7747_v40  ;;  %v3111_v31 = vmul.f32 %v6881_v42, %v3015_v57 }
 0xaf8   : > { %v3074_v0 = vsel %vm3071_vm13, %v3073_v23, %v3069_v22  ;;  %vm3083_vm3 = vmor %vm3081_vm0, %vm3082_vm6  ;;  %v6125_v22 = vld [vmem:[%s9235_s10 + $0x8] sm:$0xff]  ;;  %v6124_v23 = vld [vmem:[%s9235_s10] sm:$0xff] }
 0xaf9   : > { %v3078_v20 = vsub.f32 1.0, %v3077_v34  ;;  %v3030_v34 = vmul.f32 %v3029_v26, %v7673_v6  ;;  %v3106_v6 = vadd.f32 %v3104_v47, %v7725_v60  ;;  %vm9239_vm13 = vmmov %vm9232_vm10 }
 0xafa   : > { %vm9240_vm0 = vmmov %vm9232_vm10 }
 0xafb   : > { %v7736_v63 = vpop.f32.mrf.mxu3  ;;  %v3079_v30 = vmul.f32 %v7747_v40, %v3078_v20  ;;  %v3112_v45 = vmul.f32 %v6881_v42, %v3030_v34  ;;  %v3113_v20 = vadd.f32 %v3111_v31, %v3109_v59  ;;  %v6118_v34 = vld [vmem:[%s9056_s12 + $0x10] sm:$0xff]  ;;  %s9333_s12 = sld [smem:[#allocation33_spill]] }
 0xafc   : > { %v3045_v38 = vmul.f32 %v3044_v39, %v7736_v63  ;;  %v3110_v63 = vadd.f32 %v3108_v18, %v3106_v6  ;;  %3258 = vmatpush.bf16.msra.mxu1 %v6118_v34 }
 0xafd   : > { %v3080_v25 = vadd.f32 %v7747_v40, %v3079_v30 }
 0xafe   : > { %v3114_v54 = vadd.f32 %v3112_v45, %v3110_v63 }
 0xaff   : > { %v3084_v4 = vsel %vm3083_vm3, %v7747_v40, %v3080_v25  ;;  %vm9242_vm3 = vmmov %vm9240_vm0 }
 0xb00   : > { %v3089_v47 = vsel %vm3086_vm8, %v3088_v62, %v3084_v4  ;;  %3430 = vmatpush.bf16.msrb.mxu1 %v6125_v22  ;;  %vm9243_vm8 = vmmov %vm9240_vm0 }
 0xb03   : > { %v2843_v15 = vpop.f32.mrf.mxu3 }
 0xb04   : > { %v3060_v8 = vmul.f32 %v3059_v3, %v2843_v15  ;;  %v3115_v15 = vmul.f32 %v6883_v43, %v3045_v38  ;;  %3431 = vmatpush.bf16.msrb.mxu1 %v6124_v23 }
 0xb06   : > { %v3116_v13 = vmul.f32 %v6883_v43, %v3060_v8  ;;  %v3117_v52 = vadd.f32 %v3115_v15, %v3113_v20  ;;  %v6224_v15 = vld [vmem:[%s6697_s30 + $0x1] ss:$0 sm:$0xff] }
 0xb07   : > { %v6225_v20 = vld [vmem:[%s9058_s6 + $0x1] ss:$0 sm:$0xff]  ;;  %s9284_s6 = sld [smem:[#allocation6_spill]] }
 0xb08   : > { %v3118_v21 = vadd.f32 %v3116_v13, %v3114_v54 }
 0xb0b   : > { %v2846_v24 = vpop.f32.mrf.mxu3 }
 0xb0c   : > { %v3075_v32 = vmul.f32 %v3074_v0, %v2846_v24 }
 0xb0e   : > { %v3119_v55 = vmul.f32 %v6885_v44, %v3075_v32 }
 0xb10   : > { %v3121_v33 = vadd.f32 %v3119_v55, %v3117_v52 }
 0xb13   : > { %v2848_v60 = vpop.f32.mrf.mxu3 }
 0xb14   : > { %v3090_v46 = vmul.f32 %v3089_v47, %v2848_v60 }
 0xb16   : > { %v3120_v40 = vmul.f32 %v6885_v44, %v3090_v46 }
 0xb18   : > { %v3122_v61 = vadd.f32 %v3120_v40, %v3118_v21 }
 0xb1a   : > { %v3128_v56 = vpack.c.bf16 %v3122_v61, %v3121_v33  ;;  %v7897_v33 = vld [vmem:[%s1322_s18] sm:$0xff]  ;;  %s7931_s18 = scalar_lea.vmem %s9244_s26, %s9000_s11  ;;  %s9249_s26 = sld [smem:[#allocation21_spill]] }
 0xb1b   : > { %v3404_v61 = vpack.c.bf16 %v7897_v33, %v7897_v33  ;;  %s9274_s11 = sld [smem:[#allocation25_spill]] }
 0xb1c   : > { %5822 = vmatmul.msk.bf16.vlgmr.msra.gmra.mxu0 %vm9232_vm10, %v3128_v56  ;;  %v6123_v56 = vld [vmem:[%s6717_s27 + $0x38] sm:$0xff]  ;;  %vm9245_vm10 = vmmov %vm9240_vm0 }
 0xb1d   : > { %3313 = vmatpush.bf16.msrb.mxu0 %v6123_v56 }
 0xb99   : > { %v3153_v28 = vpop.f32.mrf.mxu0 }
 0xb9a   : > { %v3158_v2 = vadd.f32 %v3153_v28, %v7393_v53  ;;  %v6121_v28 = vld [vmem:[%s6717_s27 + $0x28] sm:$0xff] }
 0xb9c   : > { %v3165_v7 = vadd.f32 %v6223_v1, %v3158_v2  ;;  %v6120_v2 = vld [vmem:[%s6717_s27 + $0x20] sm:$0xff] }
 0xb9e   : > { %v3171_v36 = vsel %vm9233_vm11, %v3165_v7, 0.0  ;;  %vm9246_vm11 = vmmov %vm9240_vm0 }
 0xb9f   : > { %3172 = vadd.xlane.f32.xlu1 %v3171_v36  ;;  %v6226_v36 = vld [vmem:[%s9053_s20 + $0x1] ss:$0 sm:$0xff]  ;;  %s9340_s20 = sld [smem:[#allocation34_spill]] }
 0xba1   : > { %v3155_v10 = vpop.f32.mrf.mxu0 }
 0xba2   : > { %v3159_v14 = vadd.f32 %v3155_v10, %v7395_v11 }
 0xba4   : > { %v3166_v12 = vadd.f32 %v6223_v1, %v3159_v14  ;;  %v6122_v1 = vld [vmem:[%s6717_s27 + $0x30] sm:$0xff] }
 0xba5   : > { %3314 = vmatpush.bf16.msrb.mxu0 %v6122_v1 }
 0xba6   : > { %v3174_v30 = vsel %vm9234_vm12, %v3166_v12, 0.0  ;;  %vm9247_vm12 = vmmov %vm9240_vm0 }
 0xba7   : > { %3175 = vadd.xlane.f32.xlu0 %v3174_v30 }
 0xba9   : > { %3315 = vmatpush.bf16.msrb.mxu0 %v6121_v28  ;;  %v3388_v28 = vld [vmem:[%s7931_s18 + $0x20] sm:$0xff] }
 0xbad   : > { %3316 = vmatpush.bf16.msrb.mxu0 %v6120_v2 }
 0xc12   : > { %v3173_v27 = vpop.xlane.xlu1 %3172 }
 0xc13   : > { %v3177_v5 = vmul.f32 %v3173_v27, %v7361_v35 }
 0xc15   : > { %v3179_v17 = vsub.f32 %v3165_v7, %v3177_v5  ;;  %v6227_v5 = vld [vmem:[%s9241_s23] ss:$0 sm:$0xff] }
 0xc17   : > { %v3181_v53 = vmul.f32 %v3179_v17, %v3179_v17 }
 0xc19   : > { %v3183_v9 = vsel %vm9236_vm14, %v3181_v53, 0.0  ;;  %vm3513_vm14 = vcmask 64512  }
 0xc1a   : > { %3184 = vadd.xlane.f32.xlu2 %v3183_v9  ;;  %v3176_v26 = vpop.xlane.xlu0 %3175 }
 0xc1b   : > { %v3178_v11 = vmul.f32 %v3176_v26, %v7361_v35 }
 0xc1d   : > { %v3180_v58 = vsub.f32 %v3166_v12, %v3178_v11 }
 0xc1f   : > { %v3182_v18 = vmul.f32 %v3180_v58, %v3180_v58 }
 0xc21   : > { %v3186_v57 = vsel %vm9237_vm15, %v3182_v18, 0.0  ;;  %vm3604_vm15 = vcmask 1043456  }
 0xc22   : > { %3187 = vadd.xlane.f32.xlu1 %v3186_v57 }
 0xc8d   : > { %v3185_v39 = vpop.xlane.xlu2 %3184 }
 0xc8e   : > { %v3189_v19 = vmul.f32 %v3185_v39, %v7361_v35 }
 0xc90   : > { %v3191_v24 = vadd.f32 1e-05, %v3189_v19 }
 0xc92   : > { %6395 = vrsqrt.f32 %v3191_v24  ;;  %vm3199_vm2 = vweird.f32 %v3191_v24 }
 0xc95   : > { %v3188_v25 = vpop.xlane.xlu1 %3187 }
 0xc96   : > { %v3190_v3 = vmul.f32 %v3188_v25, %v7361_v35 }
 0xc98   : > { %v6396_v16 = vpop.eup %6395  ;;  %v3192_v38 = vadd.f32 1e-05, %v3190_v3 }
 0xc99   : > { %v3194_v8 = vmul.f32 %v6396_v16, %v3191_v24  ;;  %vm3200_vm1 = vweird.f32 %v6396_v16 }
 0xc9a   : > { %6397 = vrsqrt.f32 %v3192_v38  ;;  %vm3201_vm4 = vmor %vm3199_vm2, %vm3200_vm1  ;;  %vm3209_vm9 = vweird.f32 %v3192_v38 }
 0xc9b   : > { %v3195_v29 = vmul.f32 %v6396_v16, %v3194_v8  ;;  %vm9248_vm1 = vmmov %vm9240_vm0 }
 0xc9c   : > { %vm9250_vm2 = vmmov %vm9240_vm0 }
 0xc9d   : > { %v3196_v6 = vmul.f32 0.5, %v3195_v29 }
 0xc9f   : > { %v3197_v0 = vsub.f32 1.5, %v3196_v6 }
 0xca0   : > { %v6398_v31 = vpop.eup %6397 }
 0xca1   : > { %v3198_v45 = vmul.f32 %v6396_v16, %v3197_v0  ;;  %v3204_v32 = vmul.f32 %v6398_v31, %v3192_v38  ;;  %vm3210_vm5 = vweird.f32 %v6398_v31  ;;  %v3384_v0 = vld [vmem:[%s7931_s18] sm:$0xff] }
 0xca2   : > { %vm3211_vm6 = vmor %vm3209_vm9, %vm3210_vm5 }
 0xca3   : > { %v3205_v4 = vmul.f32 %v6398_v31, %v3204_v32  ;;  %v3202_v59 = vsel %vm3201_vm4, %v6396_v16, %v3198_v45 }
 0xca4   : > { %v3213_v13 = vmul.f32 %v3202_v59, %v3179_v17  ;;  %v3385_v59 = vld [vmem:[%s7931_s18 + $0x8] sm:$0xff] }
 0xca5   : > { %v3206_v62 = vmul.f32 0.5, %v3205_v4 }
 0xca6   : > { %v3218_v54 = vmul.f32 %v6224_v15, %v3213_v13 }
 0xca7   : > { %v3207_v63 = vsub.f32 1.5, %v3206_v62 }
 0xca8   : > { %v7886_v52 = vadd.f32 %v6225_v20, %v3218_v54 }
 0xca9   : > { %v3208_v60 = vmul.f32 %v6398_v31, %v3207_v63 }
 0xcab   : > { %v3212_v47 = vsel %vm3211_vm6, %v6398_v31, %v3208_v60  ;;  %v3386_v60 = vld [vmem:[%s7931_s18 + $0x10] sm:$0xff]  ;;  %vm9251_vm6 = vmmov %vm9240_vm0 }
 0xcac   : > { %v3214_v55 = vmul.f32 %v3212_v47, %v3180_v58 }
 0xcae   : > { %v3219_v46 = vmul.f32 %v6224_v15, %v3214_v55 }
 0xcb0   : > { %v7888_v21 = vadd.f32 %v6225_v20, %v3219_v46  ;;  %v3387_v46 = vld [vmem:[%s7931_s18 + $0x18] sm:$0xff] }
 0xcb2   : > { %v3230_v40 = vpack.c.bf16 %v7888_v21, %v7886_v52 }
 0xcb4   : > { %5839 = vmatmul.msk.bf16.vlgmr.msra.gmra.mxu1 %vm9239_vm13, %v3230_v40 }
 0xcc4   : > { %5876 = vmatmul.msk.bf16.vlgmr.msrb.gmra.mxu1 %vm9240_vm0, %v3404_v61 }
 0xd31   : > { %v3260_v7 = vpop.f32.mrf.mxu1 }
 0xd32   : > { %v3261_v10 = vadd.f32 %v6226_v36, %v3260_v7 }
 0xd34   : > { %v3265_v30 = vmax.f32 %v3261_v10, 0.0 }
 0xd39   : > { %v3262_v14 = vpop.f32.mrf.mxu1 }
 0xd3a   : > { %v3263_v12 = vadd.f32 %v6226_v36, %v3262_v14  ;;  %v3389_v14 = vld [vmem:[%s7931_s18 + $0x28] sm:$0xff] }
 0xd3c   : > { %v3266_v37 = vmax.f32 %v3263_v12, 0.0 }
 0xd3e   : > { %v3276_v27 = vpack.c.bf16 %v3266_v37, %v3265_v30 }
 0xd40   : > { %5865 = vmatmul.msk.bf16.vlgmr.msrb.gmra.mxu0 %vm2371_vm7, %v3276_v27 }
 0xd41   : > { %v3433_v17 = vpop.f32.mrf.mxu1 }
 0xd42   : > { %v3434_v53 = vadd.f32 %v6227_v5, %v3433_v17  ;;  %v3391_v17 = vld [vmem:[%s7931_s18 + $0x38] sm:$0xff] }
 0xd44   : > { %v3449_v9 = vpack.c.bf16 %v3434_v53, %v3434_v53  ;;  %v3437_v18 = vmul.f32 %v6888_v48, %v3434_v53  ;;  %v3438_v57 = vmul.f32 %v6890_v49, %v3434_v53  ;;  %v3439_v19 = vmul.f32 %v6892_v50, %v3434_v53 }
 0xd45   : > { %v3440_v24 = vmul.f32 %v6894_v51, %v3434_v53  ;;  %v3441_v22 = vmul.f32 %v6879_v41, %v3434_v53  ;;  %v3442_v25 = vmul.f32 %v6881_v42, %v3434_v53  ;;  %v3443_v23 = vmul.f32 %v6883_v43, %v3434_v53 }
 0xd46   : > { %3451 = vrot.lane.b32.xlu0 %v3449_v9, %s9001_s22  ;;  %v3445_v39 = vpack.c.bf16 %v3438_v57, %v3437_v18  ;;  %v3444_v16 = vmul.f32 %v6885_v44, %v3434_v53  ;;  %s9276_s22 = sld [smem:[#allocation28_spill]] }
 0xd47   : > { %v3446_v34 = vpack.c.bf16 %v3440_v24, %v3439_v19  ;;  %v3447_v3 = vpack.c.bf16 %v3442_v25, %v3441_v22 }
 0xd48   : > { %v3448_v38 = vpack.c.bf16 %v3444_v16, %v3443_v23 }
 0xd49   : > { %v3435_v26 = vpop.f32.mrf.mxu1 }
 0xdb8   : > { %v3452_v11 = vpop.permute.xlu0 %3451 }
 0xdb9   : > { %v3466_v58 = vsel %vm9242_vm3, %v3452_v11, 0 }
 0xdba   : > { %3475 = vmatpush.bf16.xpose.msra.mxu0 %v3466_v58  ;;  %v3390_v58 = vld [vmem:[%s7931_s18 + $0x30] sm:$0xff] }
 0xdbd   : > { %v7923_v8 = vpop.f32.mrf.mxu0 }
 0xdc1   : > { %5877 = vmatmul.msk.bf16.vlgmr.msra.gmra.mxu0 %vm9243_vm8, %v3445_v39 }
 0xdc5   : > { %v7925_v29 = vpop.f32.mrf.mxu0 }
 0xdd1   : > { %5878 = vmatmul.msk.bf16.gmra.mxu0 %vm9245_vm10, %v3446_v34 }
 0xde1   : > { %5879 = vmatmul.msk.bf16.gmra.mxu0 %vm9246_vm11, %v3447_v3 }
 0xdf1   : > { %5880 = vmatmul.msk.bf16.gmra.mxu0 %vm9247_vm12, %v3448_v38 }
 0xe3e   : > { %v3477_v6 = vpop.f32.mrf.mxu0 }
 0xe3f   : > { %v3497_v31 = vmul.f32 0.5, %v3477_v6 }
 0xe41   : > { %v3505_v45 = vadd.f32 %v3497_v31, %v3384_v0 }
 0xe43   : > { %v3514_v32 = vsel %vm3513_vm14, %v3505_v45, -inf }
 0xe44   : > { %3515 = vmax.xlane.f32.xlu2 %v3514_v32 }
 0xe46   : > { %v3479_v4 = vpop.f32.mrf.mxu0 }
 0xe47   : > { %v3498_v62 = vmul.f32 0.5, %v3479_v4 }
 0xe49   : > { %v3506_v63 = vadd.f32 %v3498_v62, %v3385_v59 }
 0xe4b   : > { %v3517_v15 = vsel %vm3513_vm14, %v3506_v63, -inf }
 0xe4c   : > { %3518 = vmax.xlane.f32.xlu1 %v3517_v15 }
 0xe4e   : > { %v3482_v13 = vpop.f32.mrf.mxu0 }
 0xe4f   : > { %v3499_v47 = vmul.f32 0.5, %v3482_v13 }
 0xe51   : > { %v3507_v20 = vadd.f32 %v3499_v47, %v3386_v60 }
 0xe53   : > { %v3520_v54 = vsel %vm3513_vm14, %v3507_v20, -inf }
 0xe54   : > { %3521 = vmax.xlane.f32.xlu1 %v3520_v54 }
 0xe56   : > { %v3484_v55 = vpop.f32.mrf.mxu0 }
 0xe57   : > { %v3500_v40 = vmul.f32 0.5, %v3484_v55 }
 0xe59   : > { %v3508_v61 = vadd.f32 %v3500_v40, %v3387_v46 }
 0xe5b   : > { %v3523_v56 = vsel %vm3513_vm14, %v3508_v61, -inf }
 0xe5c   : > { %3590 = vrot.lane.b32.xlu2 %v3449_v9, %s8999_s28  ;;  %3524 = vmax.xlane.f32.xlu0 %v3523_v56  ;;  %s9273_s28 = sld [smem:[#allocation22_spill]] }
 0xe5e   : > { %v3487_v1 = vpop.f32.mrf.mxu0 }
 0xe5f   : > { %v3501_v2 = vmul.f32 0.5, %v3487_v1 }
 0xe61   : > { %v3509_v7 = vadd.f32 %v3501_v2, %v3388_v28  ;;  %v6228_v2 = vld [vmem:[%s9145_s1 + $0x1] ss:$0 sm:$0xff]  ;;  %s9279_s1 = smov 96  }
 0xe63   : > { %v3526_v36 = vsel %vm3513_vm14, %v3509_v7, -inf }
 0xe64   : > { %3527 = vmax.xlane.f32.xlu1 %v3526_v36 }
 0xe66   : > { %v3489_v10 = vpop.f32.mrf.mxu0 }
 0xe67   : > { %v3502_v12 = vmul.f32 0.5, %v3489_v10 }
 0xe69   : > { %v3510_v30 = vadd.f32 %v3502_v12, %v3389_v14 }
 0xe6b   : > { %v3529_v37 = vsel %vm3513_vm14, %v3510_v30, -inf }
 0xe6c   : > { %3530 = vmax.xlane.f32.xlu1 %v3529_v37 }
 0xe6e   : > { %v3492_v27 = vpop.f32.mrf.mxu0 }
 0xe6f   : > { %v3503_v11 = vmul.f32 0.5, %v3492_v27 }
 0xe71   : > { %v7952_v18 = vadd.f32 %v3503_v11, %v3390_v58 }
 0xe73   : > { %v3532_v57 = vsel %vm3513_vm14, %v7952_v18, -inf }
 0xe76   : > { %v3494_v5 = vpop.f32.mrf.mxu0 }
 0xe77   : > { %v3504_v53 = vmul.f32 0.5, %v3494_v5 }
 0xe79   : > { %v7947_v9 = vadd.f32 %v3504_v53, %v3391_v17 }
 0xe7b   : > { %v3535_v26 = vsel %vm3513_vm14, %v7947_v9, -inf }
 0xe7c   : > { %3536 = vmax.xlane.f32.xlu1 %v3535_v26 }
 0xe85   : > { %3533 = vmax.xlane.f32.xlu2 %v3532_v57 }
 0xeb7   : > { %v3516_v39 = vpop.xlane.xlu2 %3515 }
 0xeb8   : > { %v3538_v19 = vsub.f32 %v3505_v45, %v3516_v39 }
 0xeba   : > { %v3546_v24 = vmul.f32 1.442695, %v3538_v19  ;;  %v6127_v19 = vld [vmem:[%s9249_s26 + $0x8] sm:$0xff] }
 0xebb   : > { %3799 = vmatpush.bf16.msra.mxu2 %v6127_v19 }
 0xebc   : > { %6399 = vpow2.f32 %v3546_v24 }
 0xebf   : > { %v3591_v34 = vpop.permute.xlu2 %3590  ;;  %v3519_v22 = vpop.xlane.xlu1 %3518 }
 0xec0   : > { %v3606_v25 = vsel %vm3604_vm15, %v3591_v34, 0  ;;  %v3539_v3 = vsub.f32 %v3506_v63, %v3519_v22 }
 0xec1   : > { %3615 = vmatpush.bf16.msra.mxu1 %v3606_v25 }
 0xec2   : > { %v6400_v23 = vpop.eup %6399  ;;  %v3548_v16 = vmul.f32 1.442695, %v3539_v3 }
 0xec3   : > { %v3562_v38 = vsel %vm3513_vm14, %v6400_v23, 0.0 }
 0xec4   : > { %6401 = vpow2.f32 %v3548_v16  ;;  %3563 = vadd.xlane.f32.xlu1 %v3562_v38 }
 0xec7   : > { %v3522_v6 = vpop.xlane.xlu1 %3521 }
 0xec8   : > { %v3540_v0 = vsub.f32 %v3507_v20, %v3522_v6 }
 0xeca   : > { %v6402_v31 = vpop.eup %6401  ;;  %v3550_v32 = vmul.f32 1.442695, %v3540_v0 }
 0xecb   : > { %v3586_v45 = vpack.c.bf16 %v6402_v31, %v6400_v23  ;;  %v3565_v4 = vsel %vm3513_vm14, %v6402_v31, 0.0 }
 0xecc   : > { %6403 = vpow2.f32 %v3550_v32  ;;  %3566 = vadd.xlane.f32.xlu1 %v3565_v4 }
 0xecd   : > { %5881 = vmatmul.msk.bf16.vlgmr.msra.gmra.mxu1 %vm3513_vm14, %v3586_v45 }
 0xecf   : > { %v3525_v59 = vpop.xlane.xlu0 %3524 }
 0xed0   : > { %v3541_v62 = vsub.f32 %v3508_v61, %v3525_v59 }
 0xed2   : > { %v6404_v63 = vpop.eup %6403  ;;  %v3552_v15 = vmul.f32 1.442695, %v3541_v62 }
 0xed3   : > { %v3568_v13 = vsel %vm3513_vm14, %v6404_v63, 0.0 }
 0xed4   : > { %6405 = vpow2.f32 %v3552_v15  ;;  %3569 = vadd.xlane.f32.xlu0 %v3568_v13 }
 0xed7   : > { %v3528_v60 = vpop.xlane.xlu1 %3527 }
 0xed8   : > { %v3542_v47 = vsub.f32 %v3509_v7, %v3528_v60  ;;  %v3319_v7 = vadd.f32 %v6228_v2, %v7923_v8 }
 0xeda   : > { %v6406_v20 = vpop.eup %6405  ;;  %v3554_v54 = vmul.f32 1.442695, %v3542_v47  ;;  %v3323_v37 = vadd.f32 %v3319_v7, %v7886_v52  ;;  %v3321_v52 = vadd.f32 %v6228_v2, %v7925_v29 }
 0xedb   : > { %v3571_v55 = vsel %vm3513_vm14, %v6406_v20, 0.0  ;;  %v3587_v46 = vpack.c.bf16 %v6406_v20, %v6404_v63 }
 0xedc   : > { %6407 = vpow2.f32 %v3554_v54  ;;  %3572 = vadd.xlane.f32.xlu1 %v3571_v55  ;;  %v3329_v5 = vsel %vm9248_vm1, %v3323_v37, 0.0  ;;  %v7977_v39 = vadd.f32 %v3321_v52, %v7888_v21 }
 0xedd   : > { %5882 = vmatmul.msk.bf16.gmra.mxu1 %vm3513_vm14, %v3587_v46 }
 0xedf   : > { %v3531_v40 = vpop.xlane.xlu1 %3530 }
 0xee0   : > { %v3543_v61 = vsub.f32 %v3510_v30, %v3531_v40 }
 0xee2   : > { %v6408_v56 = vpop.eup %6407  ;;  %v3556_v1 = vmul.f32 1.442695, %v3543_v61 }
 0xee3   : > { %v3574_v28 = vsel %vm3513_vm14, %v6408_v56, 0.0 }
 0xee4   : > { %6409 = vpow2.f32 %v3556_v1  ;;  %3575 = vadd.xlane.f32.xlu0 %v3574_v28 }
 0xeea   : > { %v6410_v36 = vpop.eup %6409 }
 0xeeb   : > { %v3577_v10 = vsel %vm3513_vm14, %v6410_v36, 0.0  ;;  %v3588_v14 = vpack.c.bf16 %v6410_v36, %v6408_v56 }
 0xeec   : > { %3578 = vadd.xlane.f32.xlu1 %v3577_v10 }
 0xeed   : > { %5883 = vmatmul.msk.bf16.gmra.mxu1 %vm3513_vm14, %v3588_v14 }
 0xeef   : > { %v3537_v12 = vpop.xlane.xlu1 %3536 }
 0xef0   : > { %v3545_v30 = vsub.f32 %v7947_v9, %v3537_v12 }
 0xef2   : > { %v3560_v27 = vmul.f32 1.442695, %v3545_v30 }
 0xef4   : > { %6411 = vpow2.f32 %v3560_v27  ;;  %3330 = vadd.xlane.f32.xlu1 %v3329_v5 }
 0xef8   : > { %v3534_v17 = vpop.xlane.xlu2 %3533 }
 0xef9   : > { %v3544_v8 = vsub.f32 %v7952_v18, %v3534_v17  ;;  %v3332_v18 = vsel %vm9250_vm2, %v7977_v39, 0.0 }
 0xefa   : > { %v6412_v53 = vpop.eup %6411 }
 0xefb   : > { %v3558_v26 = vmul.f32 1.442695, %v3544_v8  ;;  %v3583_v11 = vsel %vm3513_vm14, %v6412_v53, 0.0 }
 0xefc   : > { %3584 = vadd.xlane.f32.xlu0 %v3583_v11  ;;  %v6126_v11 = vld [vmem:[%s9249_s26] sm:$0xff] }
 0xefd   : > { %6413 = vpow2.f32 %v3558_v26  ;;  %3800 = vmatpush.bf16.msra.mxu2 %v6126_v11 }
 0xf03   : > { %v6414_v58 = vpop.eup %6413 }
 0xf04   : > { %v3580_v9 = vsel %vm3513_vm14, %v6414_v58, 0.0  ;;  %v3589_v57 = vpack.c.bf16 %v6412_v53, %v6414_v58 }
 0xf05   : > { %3581 = vadd.xlane.f32.xlu2 %v3580_v9 }
 0xf06   : > { %5884 = vmatmul.msk.bf16.gmra.mxu1 %vm3513_vm14, %v3589_v57 }
 0xf0d   : > { %3333 = vadd.xlane.f32.xlu2 %v3332_v18 }
 0xf37   : > { %v3564_v24 = vpop.xlane.xlu1 %3563 }
 0xf38   : > { %6415 = vrcp.f32 %v3564_v24  ;;  %vm3642_vm4 = vweird.f32 %v3564_v24  ;;  %v3646_v1 = vand.u32 2147483647, %v3564_v24  ;;  %v3648_v28 = vand.u32 2147483648, %v3564_v24 }
 0xf3a   : > { %vm3647_vm3 = vcmp.eq.f32.partialorder %v3646_v1, 8.507059e+37  ;;  %v3649_v8 = vor.u32 1.1754944e-38, %v3648_v28 }
 0xf3e   : > { %v6416_v3 = vpop.eup %6415 }
 0xf3f   : > { %v7984_v22 = vpop.xlane.xlu1 %3566  ;;  %v3638_v6 = vmul.f32 %v6416_v3, %v3564_v24  ;;  %vm3643_vm5 = vweird.f32 %v6416_v3 }
 0xf40   : > { %6417 = vrcp.f32 %v7984_v22  ;;  %v3661_v2 = vand.u32 2147483647, %v7984_v22  ;;  %vm8033_vm13 = vmor %vm3642_vm4, %vm3643_vm5  ;;  %vm3657_vm0 = vweird.f32 %v7984_v22 }
 0xf41   : > { %v3639_v32 = vsub.f32 1.0, %v3638_v6 }
 0xf42   : > { %vm3662_vm10 = vcmp.eq.f32.partialorder %v3661_v2, 8.507059e+37 }
 0xf43   : > { %v3640_v13 = vmul.f32 %v6416_v3, %v3639_v32 }
 0xf45   : > { %v3641_v61 = vadd.f32 %v6416_v3, %v3640_v13 }
 0xf46   : > { %v7995_v16 = vpop.eup %6417 }
 0xf47   : > { %v7991_v21 = vpop.xlane.xlu0 %3569  ;;  %v3653_v0 = vmul.f32 %v7995_v16, %v7984_v22  ;;  %vm3658_vm9 = vweird.f32 %v7995_v16  ;;  %v3645_v5 = vsel %vm8033_vm13, %v6416_v3, %v3641_v61 }
 0xf48   : > { %6419 = vrcp.f32 %v7991_v21  ;;  %vm8049_vm8 = vmor %vm3657_vm0, %vm3658_vm9  ;;  %v3650_v57 = vsel %vm3647_vm3, %v3649_v8, %v3645_v5  ;;  %v3676_v19 = vand.u32 2147483647, %v7991_v21  ;;  %vm3672_vm11 = vweird.f32 %v7991_v21 }
 0xf49   : > { %v3654_v4 = vsub.f32 1.0, %v3653_v0  ;;  %v3678_v3 = vand.u32 2147483648, %v7991_v21 }
 0xf4a   : > { %v7982_v34 = vpop.f32.mrf.mxu1  ;;  %vm8078_vm4 = vcmp.eq.f32.partialorder %v3676_v19, 8.507059e+37 }
 0xf4b   : > { %v3655_v20 = vmul.f32 %v7995_v16, %v3654_v4 }
 0xf4d   : > { %v3656_v7 = vadd.f32 %v7995_v16, %v3655_v20 }
 0xf4e   : > { %v8005_v45 = vpop.eup %6419 }
 0xf4f   : > { %v7988_v25 = vpop.xlane.xlu1 %3572  ;;  %v3668_v15 = vmul.f32 %v8005_v45, %v7991_v21  ;;  %v3660_v58 = vsel %vm8049_vm8, %v7995_v16, %v3656_v7  ;;  %vm3673_vm12 = vweird.f32 %v8005_v45  ;;  %v3651_v16 = vmul.f32 %v3650_v57, %v7982_v34 }
 0xf50   : > { %6421 = vrcp.f32 %v7988_v25  ;;  %v3691_v0 = vand.u32 2147483647, %v7988_v25  ;;  %v3693_v32 = vand.u32 2147483648, %v7988_v25  ;;  %vm8074_vm2 = vmor %vm3672_vm11, %vm3673_vm12  ;;  %vm3687_vm5 = vweird.f32 %v7988_v25 }
 0xf51   : > { %v3669_v40 = vsub.f32 1.0, %v3668_v15  ;;  %v3757_v61 = vmul.f32 %v6888_v48, %v3651_v16 }
 0xf52   : > { %v7986_v29 = vpop.f32.mrf.mxu1  ;;  %v3694_v28 = vor.u32 1.1754944e-38, %v3693_v32 }
 0xf53   : > { %v3670_v17 = vmul.f32 %v8005_v45, %v3669_v40 }
 0xf56   : > { %v8009_v59 = vpop.eup %6421 }
 0xf57   : > { %v8003_v31 = vpop.xlane.xlu0 %3575  ;;  %v3683_v47 = vmul.f32 %v8009_v59, %v7988_v25  ;;  %vm3688_vm1 = vweird.f32 %v8009_v59 }
 0xf58   : > { %6423 = vrcp.f32 %v8003_v31  ;;  %vm8092_vm9 = vmor %vm3687_vm5, %vm3688_vm1  ;;  %v3708_v7 = vand.u32 2147483648, %v8003_v31  ;;  %vm3702_vm3 = vweird.f32 %v8003_v31  ;;  %v3706_v12 = vand.u32 2147483647, %v8003_v31 }
 0xf59   : > { %v3684_v36 = vsub.f32 1.0, %v3683_v47  ;;  %v3679_v47 = vor.u32 1.1754944e-38, %v3678_v3 }
 0xf5a   : > { %v7993_v23 = vpop.f32.mrf.mxu1  ;;  %vm3707_vm12 = vcmp.eq.f32.partialorder %v3706_v12, 8.507059e+37 }
 0xf5b   : > { %v3685_v9 = vmul.f32 %v8009_v59, %v3684_v36 }
 0xf5d   : > { %v3686_v15 = vadd.f32 %v8009_v59, %v3685_v9 }
 0xf5e   : > { %v8021_v55 = vpop.eup %6423 }
 0xf5f   : > { %v7998_v38 = vpop.xlane.xlu1 %3578  ;;  %v3698_v10 = vmul.f32 %v8021_v55, %v8003_v31  ;;  %vm3703_vm13 = vweird.f32 %v8021_v55 }
 0xf60   : > { %6425 = vrcp.f32 %v7998_v38  ;;  %vm8118_vm8 = vmor %vm3702_vm3, %vm3703_vm13  ;;  %v3721_v8 = vand.u32 2147483647, %v7998_v38 }
 0xf61   : > { %v3699_v52 = vsub.f32 1.0, %v3698_v10 }
 0xf62   : > { %v8011_v62 = vpop.f32.mrf.mxu1  ;;  %vm3722_vm1 = vcmp.eq.f32.partialorder %v3721_v8, 8.507059e+37 }
 0xf63   : > { %v3700_v13 = vmul.f32 %v8021_v55, %v3699_v52  ;;  %v3709_v52 = vor.u32 1.1754944e-38, %v3708_v7 }
 0xf65   : > { %v3701_v2 = vadd.f32 %v8021_v55, %v3700_v13 }
 0xf66   : > { %v8023_v46 = vpop.eup %6425 }
 0xf67   : > { %v3331_v63 = vpop.xlane.xlu1 %3330  ;;  %v3713_v30 = vmul.f32 %v8023_v46, %v7998_v38  ;;  %vm3718_vm0 = vweird.f32 %v8023_v46  ;;  %v3705_v31 = vsel %vm8118_vm8, %v8021_v55, %v3701_v2 }
 0xf68   : > { %v3335_v60 = vmul.f32 %v3331_v63, %v7361_v35  ;;  %v3710_v19 = vsel %vm3707_vm12, %v3709_v52, %v3705_v31  ;;  %v6131_v31 = vld [vmem:[%s9271_s0 + $0x8] sm:$0xff] }
 0xf69   : > { %v3714_v24 = vsub.f32 1.0, %v3713_v30  ;;  %3911 = vmatpush.bf16.msrb.mxu2 %v6131_v31 }
 0xf6a   : > { %v8019_v54 = vsub.f32 %v3323_v37, %v3335_v60  ;;  %v3663_v37 = vand.u32 2147483648, %v7984_v22  ;;  %v8053_v26 = vpop.f32.mrf.mxu1  ;;  %v3671_v22 = vadd.f32 %v8005_v45, %v3670_v17 }
 0xf6b   : > { %v3715_v21 = vmul.f32 %v8023_v46, %v3714_v24  ;;  %v3711_v3 = vmul.f32 %v3710_v19, %v8053_v26 }
 0xf6c   : > { %v3339_v56 = vmul.f32 %v8019_v54, %v8019_v54  ;;  %v3664_v18 = vor.u32 1.1754944e-38, %v3663_v37 }
 0xf6e   : > { %v3341_v14 = vsel %vm9251_vm6, %v3339_v56, 0.0  ;;  %v3665_v6 = vsel %vm3662_vm10, %v3664_v18, %v3660_v58  ;;  %vm8096_vm6 = vcmp.eq.f32.partialorder %v3691_v0, 8.507059e+37  ;;  %vm3717_vm10 = vweird.f32 %v7998_v38 }
 0xf6f   : > { %v8040_v27 = vpop.xlane.xlu0 %3584  ;;  %3342 = vadd.xlane.f32.xlu1 %v3341_v14  ;;  %v3666_v63 = vmul.f32 %v3665_v6, %v7986_v29  ;;  %v3675_v29 = vsel %vm8074_vm2, %v8005_v45, %v3671_v22  ;;  %v3690_v45 = vsel %vm8092_vm9, %v8009_v59, %v3686_v15  ;;  %v3716_v14 = vadd.f32 %v8023_v46, %v3715_v21  ;;  %vm8128_vm11 = vmor %vm3717_vm10, %vm3718_vm0 }
 0xf70   : > { %6427 = vrcp.f32 %v8040_v27  ;;  %v3680_v36 = vsel %vm8078_vm4, %v3679_v47, %v3675_v29  ;;  %v3723_v59 = vand.u32 2147483648, %v7998_v38  ;;  %v3695_v5 = vsel %vm8096_vm6, %v3694_v28, %v3690_v45 }
 0xf71   : > { %v3759_v25 = vmul.f32 %v6890_v49, %v3666_v63  ;;  %v3681_v30 = vmul.f32 %v3680_v36, %v7993_v23  ;;  %v3696_v53 = vmul.f32 %v3695_v5, %v8011_v62  ;;  %v3720_v9 = vsel %vm8128_vm11, %v8023_v46, %v3716_v14 }
 0xf72   : > { %v3629_v10 = vpop.f32.mrf.mxu1  ;;  %v3724_v57 = vor.u32 1.1754944e-38, %v3723_v59  ;;  %vm3747_vm5 = vweird.f32 %v8040_v27  ;;  %v3765_v21 = vmul.f32 %v6879_v41, %v3711_v3  ;;  %vm9270_vm0 = vcmask 261120  }
 0xf73   : > { %v3760_v58 = vadd.f32 %v3759_v25, %v3757_v61  ;;  %v3761_v55 = vmul.f32 %v6892_v50, %v3681_v30  ;;  %v3763_v22 = vmul.f32 %v6894_v51, %v3696_v53  ;;  %vm9272_vm10 = vmmov %vm9270_vm0 }
 0xf74   : > { %v3725_v16 = vsel %vm3722_vm1, %v3724_v57, %v3720_v9 }
 0xf75   : > { %v3726_v46 = vmul.f32 %v3725_v16, %v3629_v10  ;;  %v3762_v34 = vadd.f32 %v3761_v55, %v3760_v58  ;;  %v6130_v58 = vld [vmem:[%s9271_s0] sm:$0xff] }
 0xf76   : > { %v8068_v4 = vpop.eup %6427  ;;  %3912 = vmatpush.bf16.msrb.mxu2 %v6130_v58 }
 0xf77   : > { %v3743_v20 = vmul.f32 %v8068_v4, %v8040_v27  ;;  %vm3748_vm2 = vweird.f32 %v8068_v4  ;;  %v3764_v61 = vadd.f32 %v3763_v22, %v3762_v34  ;;  %v3767_v28 = vmul.f32 %v6881_v42, %v3726_v46  ;;  %v6229_v46 = vld [vmem:[%s9150_s2 + $0x1] ss:$0 sm:$0xff]  ;;  %s9280_s2 = sld [smem:[#allocation23_spill]] }
 0xf78   : > { %v8089_v40 = vpop.xlane.xlu2 %3581  ;;  %vm8154_vm6 = vmor %vm3747_vm5, %vm3748_vm2 }
 0xf79   : > { %6429 = vrcp.f32 %v8089_v40  ;;  %v3744_v37 = vsub.f32 1.0, %v3743_v20  ;;  %v3738_v63 = vand.u32 2147483648, %v8089_v40  ;;  %v3736_v13 = vand.u32 2147483647, %v8089_v40 }
 0xf7a   : > { %vm3732_vm9 = vweird.f32 %v8089_v40  ;;  %v3751_v20 = vand.u32 2147483647, %v8040_v27  ;;  %v3766_v36 = vadd.f32 %v3765_v21, %v3764_v61 }
 0xf7b   : > { %v3745_v18 = vmul.f32 %v8068_v4, %v3744_v37  ;;  %v3739_v56 = vor.u32 1.1754944e-38, %v3738_v63  ;;  %vm3737_vm3 = vcmp.eq.f32.partialorder %v3736_v13, 8.507059e+37  ;;  %v6230_v13 = vld [vmem:[%s9151_s7 + $0x1] ss:$0 sm:$0xff]  ;;  %s9289_s7 = sshll.u32 %s9430_s16, 6 }
 0xf7c   : > { %vm3752_vm8 = vcmp.eq.f32.partialorder %v3751_v20, 8.507059e+37  ;;  %v3768_v14 = vadd.f32 %v3767_v28, %v3766_v36  ;;  %v6129_v28 = vld [vmem:[%s9274_s11 + $0x8] sm:$0xff]  ;;  %s8213_s8 = scalar_lea.vmem %s9284_s6, %s9289_s7  ;;  %s9309_s6 = sld [smem:[#allocation29_spill]] }
 0xf7d   : > { %v3746_v60 = vadd.f32 %v8068_v4, %v3745_v18  ;;  %3874 = vmatpush.bf16.msra.mxu3 %v6129_v28  ;;  %v6233_v58 = vld [vmem:[%s9280_s2] ss:$0 sm:$0xff]  ;;  %s9332_s7 = sld [smem:[#allocation30_spill]] }
 0xf7f   : > { %v6430_v23 = vpop.eup %6429 }
 0xf80   : > { %v3728_v38 = vmul.f32 %v6430_v23, %v8089_v40  ;;  %v3334_v62 = vpop.xlane.xlu2 %3333  ;;  %vm3733_vm4 = vweird.f32 %v6430_v23  ;;  %v3750_v40 = vsel %vm8154_vm6, %v8068_v4, %v3746_v60  ;;  %vm9277_vm6 = vmmov %vm9270_vm0 }
 0xf81   : > { %v3336_v24 = vmul.f32 %v3334_v62, %v7361_v35  ;;  %vm3734_vm13 = vmor %vm3732_vm9, %vm3733_vm4 }
 0xf82   : > { %v3729_v6 = vsub.f32 1.0, %v3728_v38  ;;  %vm9275_vm9 = vmmov %vm9270_vm0 }
 0xf83   : > { %v8142_v0 = vsub.f32 %v7977_v39, %v3336_v24  ;;  %v3632_v32 = vpop.f32.mrf.mxu1  ;;  %v3753_v39 = vand.u32 2147483648, %v8040_v27 }
 0xf84   : > { %v3730_v15 = vmul.f32 %v6430_v23, %v3729_v6 }
 0xf85   : > { %v3340_v26 = vmul.f32 %v8142_v0, %v8142_v0  ;;  %v3754_v2 = vor.u32 1.1754944e-38, %v3753_v39 }
 0xf86   : > { %v3731_v29 = vadd.f32 %v6430_v23, %v3730_v15 }
 0xf87   : > { %v3344_v1 = vsel %vm9270_vm0, %v3340_v26, 0.0  ;;  %v3755_v10 = vsel %vm3752_vm8, %v3754_v2, %v3750_v40 }
 0xf88   : > { %v3735_v25 = vsel %vm3734_vm13, %v6430_v23, %v3731_v29  ;;  %3345 = vadd.xlane.f32.xlu2 %v3344_v1  ;;  %v6231_v29 = vld [vmem:[%s9273_s28] ss:$0 sm:$0xff]  ;;  %vm9278_vm13 = vmmov %vm9270_vm0 }
 0xf89   : > { %v3740_v45 = vsel %vm3737_vm3, %v3739_v56, %v3735_v25 }
 0xf8a   : > { %v3741_v7 = vmul.f32 %v3740_v45, %v3632_v32 }
 0xf8b   : > { %v3634_v27 = vpop.f32.mrf.mxu1 }
 0xf8c   : > { %v3769_v12 = vmul.f32 %v6883_v43, %v3741_v7  ;;  %v3756_v37 = vmul.f32 %v3755_v10, %v3634_v27  ;;  %v6232_v7 = vld [vmem:[%s9276_s22] ss:$0 sm:$0xff] }
 0xf8e   : > { %v3770_v59 = vadd.f32 %v3769_v12, %v3768_v14  ;;  %v3771_v30 = vmul.f32 %v6885_v44, %v3756_v37 }
 0xf90   : > { %v3772_v5 = vadd.f32 %v3771_v30, %v3770_v59 }
 0xf92   : > { %v3777_v17 = vpack.c.bf16 %v3772_v5, %v3772_v5 }
 0xf94   : > { %5893 = vmatmul.msk.bf16.vlgmr.msra.gmra.mxu2 %vm9272_vm10, %v3777_v17 }
 0xfe2   : > { %v3343_v4 = vpop.xlane.xlu1 %3342 }
 0xfe3   : > { %v3347_v8 = vmul.f32 %v3343_v4, %v7361_v35 }
 0xfe5   : > { %v3349_v53 = vadd.f32 1e-05, %v3347_v8 }
 0xfe7   : > { %6431 = vrsqrt.f32 %v3349_v53  ;;  %vm3357_vm12 = vweird.f32 %v3349_v53 }
 0xfed   : > { %v6432_v11 = vpop.eup %6431 }
 0xfee   : > { %v3352_v23 = vmul.f32 %v6432_v11, %v3349_v53  ;;  %vm3358_vm11 = vweird.f32 %v6432_v11 }
 0xfef   : > { %vm3359_vm1 = vmor %vm3357_vm12, %vm3358_vm11 }
 0xff0   : > { %v3353_v52 = vmul.f32 %v6432_v11, %v3352_v23  ;;  %vm9283_vm11 = vmmov %vm9270_vm0 }
 0xff1   : > { %vm9285_vm12 = vmmov %vm9270_vm0 }
 0xff2   : > { %v3354_v62 = vmul.f32 0.5, %v3353_v52 }
 0xff4   : > { %v3355_v18 = vsub.f32 1.5, %v3354_v62 }
 0xff6   : > { %v3356_v19 = vmul.f32 %v6432_v11, %v3355_v18 }
 0xff8   : > { %v3360_v3 = vsel %vm3359_vm1, %v6432_v11, %v3356_v19  ;;  %vm9286_vm1 = vmmov %vm9270_vm0 }
 0xff9   : > { %v3371_v32 = vmul.f32 %v3360_v3, %v8019_v54 }
 0xffb   : > { %v3346_v9 = vpop.xlane.xlu2 %3345  ;;  %v3376_v60 = vmul.f32 %v6229_v46, %v3371_v32 }
 0xffc   : > { %v3348_v57 = vmul.f32 %v3346_v9, %v7361_v35  ;;  %v6234_v9 = vld [vmem:[%s9281_s3] ss:$0 sm:$0xff] }
 0xffd   : > { %v3381_v39 = vadd.f32 %v6230_v13, %v3376_v60 }
 0xffe   : > { %v3350_v38 = vadd.f32 1e-05, %v3348_v57 }
0x1000   : > { %6433 = vrsqrt.f32 %v3350_v38  ;;  %vm3367_vm4 = vweird.f32 %v3350_v38 }
0x1006   : > { %v6434_v55 = vpop.eup %6433 }
0x1007   : > { %v3362_v24 = vmul.f32 %v6434_v55, %v3350_v38  ;;  %vm3368_vm2 = vweird.f32 %v6434_v55 }
0x1008   : > { %vm3369_vm5 = vmor %vm3367_vm4, %vm3368_vm2 }
0x1009   : > { %v3363_v22 = vmul.f32 %v6434_v55, %v3362_v24  ;;  %vm9287_vm2 = vmmov %vm9270_vm0 }
0x100a   : > { %vm9288_vm4 = vmmov %vm9270_vm0 }
0x100b   : > { %v3364_v16 = vmul.f32 0.5, %v3363_v22 }
0x100d   : > { %v3365_v6 = vsub.f32 1.5, %v3364_v16 }
0x100f   : > { %v3366_v63 = vmul.f32 %v6434_v55, %v3365_v6 }
0x1011   : > { %v3370_v15 = vsel %vm3369_vm5, %v6434_v55, %v3366_v63  ;;  %v6235_v55 = vld [vmem:[%s9282_s5] ss:$0 sm:$0xff]  ;;  %vm9290_vm5 = vcmask 130048  }
0x1012   : > { %v3372_v34 = vmul.f32 %v3370_v15, %v8142_v0  ;;  %v6128_v0 = vld [vmem:[%s9274_s11] sm:$0xff] }
0x1013   : > { %3875 = vmatpush.bf16.msra.mxu3 %v6128_v0 }
0x1014   : > { %v3377_v26 = vmul.f32 %v6229_v46, %v3372_v34 }
0x1016   : > { %v3382_v21 = vadd.f32 %v6230_v13, %v3377_v26 }
0x1017   : > { %v3802_v47 = vpop.f32.mrf.mxu2 }
0x1018   : > { %v8176_v20 = vpack.c.bf16 %v3382_v21, %v3381_v39  ;;  %v3806_v61 = vadd.f32 %v3802_v47, %v7897_v33 }
0x101a   : > { %5911 = vmatmul.msk.bf16.vlgmr.msrb.gmra.mxu2 %vm9275_vm9, %v8176_v20  ;;  %v3811_v54 = vadd.f32 %v6231_v29, %v3806_v61  ;;  %v3392_v29 = vld [vmem:[%s8213_s8] sm:$0xff]  ;;  %vm9291_vm9 = vmmov %vm9290_vm5 }
0x101c   : > { %v3814_v56 = vsel %vm9277_vm6, %v3811_v54, 0.0  ;;  %vm9292_vm6 = vmmov %vm9290_vm5 }
0x101d   : > { %3815 = vadd.xlane.f32.xlu0 %v3814_v56 }
0x101f   : > { %v3804_v1 = vpop.f32.mrf.mxu2 }
0x1020   : > { %v3393_v1 = vld [vmem:[%s8213_s8 + $0x8] sm:$0xff] }
0x1090   : > { %v3816_v25 = vpop.xlane.xlu0 %3815 }
0x1091   : > { %v3817_v40 = vmul.f32 %v3816_v25, %v7361_v35 }
0x1093   : > { %v3818_v45 = vsub.f32 %v3811_v54, %v3817_v40 }
0x1095   : > { %v3819_v2 = vmul.f32 %v3818_v45, %v3818_v45 }
0x1097   : > { %v3820_v33 = vsel %vm9278_vm13, %v3819_v2, 0.0  ;;  %vm9293_vm13 = vmmov %vm9290_vm5 }
0x1098   : > { %3821 = vadd.xlane.f32.xlu0 %v3820_v33 }
0x109d   : > { %v3914_v36 = vpop.f32.mrf.mxu2 }
0x109e   : > { %v3915_v10 = vadd.f32 %v6232_v7, %v3914_v36 }
0x10a5   : > { %v3916_v27 = vpop.f32.mrf.mxu2 }
0x10a6   : > { %v3917_v14 = vadd.f32 %v6232_v7, %v3916_v27  ;;  %v3395_v27 = vld [vmem:[%s8213_s8 + $0x18] sm:$0xff] }
0x10a8   : > { %v3931_v12 = vpack.c.bf16 %v3917_v14, %v3915_v10 }
0x10aa   : > { %v3945_v37 = vsel %vm9270_vm0, %v3931_v12, 0  ;;  %vm9294_vm0 = vmmov %vm9290_vm5 }
0x10ab   : > { %3954 = vmatpush.bf16.xpose.msrb.mxu3 %v3945_v37 }
0x10ac   : > { %4069 = vrot.lane.b32.xlu0 %v3931_v12, %s9279_s1 }
0x110b   : > { %v3822_v59 = vpop.xlane.xlu0 %3821 }
0x110c   : > { %v3823_v30 = vmul.f32 %v3822_v59, %v7361_v35  ;;  %v3396_v59 = vld [vmem:[%s8213_s8 + $0x20] sm:$0xff] }
0x110e   : > { %v3824_v5 = vadd.f32 1e-05, %v3823_v30 }
0x1110   : > { %6435 = vrsqrt.f32 %v3824_v5  ;;  %vm3831_vm8 = vweird.f32 %v3824_v5 }
0x1116   : > { %v6436_v17 = vpop.eup %6435 }
0x1117   : > { %v3826_v4 = vmul.f32 %v6436_v17, %v3824_v5  ;;  %vm3832_vm3 = vweird.f32 %v6436_v17 }
0x1118   : > { %vm3833_vm10 = vmor %vm3831_vm8, %vm3832_vm3 }
0x1119   : > { %v3827_v8 = vmul.f32 %v6436_v17, %v3826_v4  ;;  %vm9295_vm3 = vmmov %vm9294_vm0 }
0x111a   : > { %vm9296_vm8 = vmmov %vm9294_vm0 }
0x111b   : > { %v3828_v53 = vmul.f32 0.5, %v3827_v8  ;;  %v3397_v8 = vld [vmem:[%s8213_s8 + $0x28] sm:$0xff] }
0x111d   : > { %v3829_v31 = vsub.f32 1.5, %v3828_v53 }
0x111e   : > { %v4070_v11 = vpop.permute.xlu0 %4069 }
0x111f   : > { %v3830_v23 = vmul.f32 %v6436_v17, %v3829_v31  ;;  %4091 = vmatpush.bf16.msra.mxu2 %v4070_v11 }
0x1121   : > { %v3834_v52 = vsel %vm3833_vm10, %v6436_v17, %v3830_v23  ;;  %vm9297_vm10 = vmmov %vm9294_vm0 }
0x1122   : > { %v3835_v57 = vmul.f32 %v3834_v52, %v3818_v45  ;;  %v3394_v45 = vld [vmem:[%s8213_s8 + $0x10] sm:$0xff] }
0x1124   : > { %v3839_v38 = vmul.f32 %v6233_v58, %v3835_v57  ;;  %v3398_v58 = vld [vmem:[%s8213_s8 + $0x30] sm:$0xff] }
0x1126   : > { %v8192_v62 = vadd.f32 %v6234_v9, %v3839_v38 }
0x1128   : > { %v3848_v18 = vpack.c.bf16 %v8192_v62, %v8192_v62 }
0x112a   : > { %5902 = vmatmul.msk.bf16.vlgmr.msra.gmra.mxu3 %vm9283_vm11, %v3848_v18  ;;  %v3399_v18 = vld [vmem:[%s8213_s8 + $0x38] sm:$0xff]  ;;  %vm9298_vm11 = vmmov %vm9294_vm0 }
0x11ad   : > { %v3877_v19 = vpop.f32.mrf.mxu3 }
0x11ae   : > { %v3878_v24 = vadd.f32 %v6235_v55, %v3877_v19 }
0x11b0   : > { %v3919_v22 = vmul.f32 %v6888_v48, %v3878_v24  ;;  %v3920_v3 = vmul.f32 %v6890_v49, %v3878_v24  ;;  %v3921_v46 = vmul.f32 %v6892_v50, %v3878_v24  ;;  %v3922_v32 = vmul.f32 %v6894_v51, %v3878_v24 }
0x11b1   : > { %v3923_v15 = vmul.f32 %v6879_v41, %v3878_v24  ;;  %v3924_v13 = vmul.f32 %v6881_v42, %v3878_v24  ;;  %v3925_v34 = vmul.f32 %v6883_v43, %v3878_v24  ;;  %v3926_v26 = vmul.f32 %v6885_v44, %v3878_v24 }
0x11b2   : > { %v3927_v16 = vpack.c.bf16 %v3920_v3, %v3919_v22  ;;  %v3928_v63 = vpack.c.bf16 %v3922_v32, %v3921_v46 }
0x11b3   : > { %v3929_v60 = vpack.c.bf16 %v3924_v13, %v3923_v15  ;;  %v3930_v39 = vpack.c.bf16 %v3926_v26, %v3925_v34 }
0x11b4   : > { %5912 = vmatmul.msk.bf16.vlgmr.msrb.gmra.mxu3 %vm9285_vm12, %v3927_v16  ;;  %vm9299_vm12 = vmmov %vm9294_vm0 }
0x11b5   : > { %v3879_v6 = vpop.f32.mrf.mxu3 }
0x11c4   : > { %5913 = vmatmul.msk.bf16.gmra.mxu3 %vm9286_vm1, %v3928_v63  ;;  %vm9300_vm1 = vmmov %vm9294_vm0 }
0x11d4   : > { %5914 = vmatmul.msk.bf16.gmra.mxu3 %vm9287_vm2, %v3929_v60  ;;  %vm9301_vm2 = vmmov %vm9294_vm0 }
0x11e4   : > { %5915 = vmatmul.msk.bf16.gmra.mxu3 %vm9288_vm4, %v3930_v39  ;;  %vm9302_vm4 = vmmov %vm9294_vm0 }
0x1237   : > { %v3956_v21 = vpop.f32.mrf.mxu3 }
0x1238   : > { %v3976_v47 = vmul.f32 0.5, %v3956_v21 }
0x123a   : > { %v3984_v61 = vadd.f32 %v3976_v47, %v3392_v29 }
0x123c   : > { %v3992_v54 = vsel %vm9290_vm5, %v3984_v61, -inf  ;;  %vm9303_vm5 = vmmov %vm9294_vm0 }
0x123d   : > { %3993 = vmax.xlane.f32.xlu1 %v3992_v54 }
0x123f   : > { %v3958_v56 = vpop.f32.mrf.mxu3 }
0x1240   : > { %v3977_v28 = vmul.f32 0.5, %v3958_v56 }
0x1242   : > { %v3985_v0 = vadd.f32 %v3977_v28, %v3393_v1 }
0x1244   : > { %v3995_v25 = vsel %vm9291_vm9, %v3985_v0, -inf  ;;  %vm9304_vm9 = vmmov %vm9294_vm0 }
0x1245   : > { %3996 = vmax.xlane.f32.xlu2 %v3995_v25 }
0x1247   : > { %v3961_v40 = vpop.f32.mrf.mxu3 }
0x1248   : > { %v3978_v2 = vmul.f32 0.5, %v3961_v40 }
0x124a   : > { %v3986_v33 = vadd.f32 %v3978_v2, %v3394_v45 }
0x124c   : > { %v3998_v36 = vsel %vm9292_vm6, %v3986_v33, -inf  ;;  %vm9305_vm6 = vmmov %vm9294_vm0 }
0x124d   : > { %3999 = vmax.xlane.f32.xlu1 %v3998_v36 }
0x124f   : > { %v3963_v7 = vpop.f32.mrf.mxu3 }
0x1250   : > { %v3979_v10 = vmul.f32 0.5, %v3963_v7 }
0x1252   : > { %v3987_v14 = vadd.f32 %v3979_v10, %v3395_v27 }
0x1254   : > { %v4001_v12 = vsel %vm9293_vm13, %v3987_v14, -inf  ;;  %vm9306_vm13 = vmmov %vm9294_vm0 }
0x1255   : > { %4002 = vmax.xlane.f32.xlu2 %v4001_v12 }
0x1257   : > { %v3966_v37 = vpop.f32.mrf.mxu3 }
0x1258   : > { %v3980_v30 = vmul.f32 0.5, %v3966_v37 }
0x125a   : > { %v3988_v5 = vadd.f32 %v3980_v30, %v3396_v59 }
0x125c   : > { %v4004_v17 = vsel %vm9294_vm0, %v3988_v5, -inf }
0x125d   : > { %4005 = vmax.xlane.f32.xlu1 %v4004_v17 }
0x125f   : > { %v3968_v4 = vpop.f32.mrf.mxu3 }
0x1260   : > { %v3981_v53 = vmul.f32 0.5, %v3968_v4 }
0x1262   : > { %v3989_v31 = vadd.f32 %v3981_v53, %v3397_v8 }
0x1264   : > { %v4007_v11 = vsel %vm9295_vm3, %v3989_v31, -inf  ;;  %vm9307_vm3 = vmmov %vm9294_vm0 }
0x1265   : > { %4008 = vmax.xlane.f32.xlu2 %v4007_v11 }
0x1267   : > { %v3971_v23 = vpop.f32.mrf.mxu3 }
0x1268   : > { %v3982_v52 = vmul.f32 0.5, %v3971_v23 }
0x126a   : > { %v3990_v9 = vadd.f32 %v3982_v52, %v3398_v58 }
0x126c   : > { %v4010_v57 = vsel %vm9296_vm8, %v3990_v9, -inf  ;;  %vm9308_vm8 = vmmov %vm9294_vm0 }
0x126d   : > { %4011 = vmax.xlane.f32.xlu1 %v4010_v57 }
0x126f   : > { %v3973_v38 = vpop.f32.mrf.mxu3 }
0x1270   : > { %v3983_v55 = vmul.f32 0.5, %v3973_v38 }
0x1272   : > { %v3991_v19 = vadd.f32 %v3983_v55, %v3399_v18 }
0x1274   : > { %v4013_v24 = vsel %vm9297_vm10, %v3991_v19, -inf }
0x1275   : > { %4014 = vmax.xlane.f32.xlu2 %v4013_v24 }
0x12b0   : > { %v3994_v22 = vpop.xlane.xlu1 %3993 }
0x12b1   : > { %v4016_v3 = vsub.f32 %v3984_v61, %v3994_v22 }
0x12b3   : > { %v4024_v16 = vmul.f32 1.442695, %v4016_v3 }
0x12b5   : > { %6437 = vpow2.f32 %v4024_v16 }
0x12b8   : > { %v3997_v6 = vpop.xlane.xlu2 %3996 }
0x12b9   : > { %v4017_v46 = vsub.f32 %v3985_v0, %v3997_v6 }
0x12bb   : > { %v6438_v32 = vpop.eup %6437  ;;  %v4026_v63 = vmul.f32 1.442695, %v4017_v46 }
0x12bc   : > { %v4040_v15 = vsel %vm9298_vm11, %v6438_v32, 0.0 }
0x12bd   : > { %6439 = vpow2.f32 %v4026_v63  ;;  %4041 = vadd.xlane.f32.xlu0 %v4040_v15 }
0x12c0   : > { %v4000_v13 = vpop.xlane.xlu1 %3999 }
0x12c1   : > { %v4018_v60 = vsub.f32 %v3986_v33, %v4000_v13 }
0x12c3   : > { %v6440_v34 = vpop.eup %6439  ;;  %v4028_v26 = vmul.f32 1.442695, %v4018_v60 }
0x12c4   : > { %v4064_v39 = vpack.c.bf16 %v6440_v34, %v6438_v32  ;;  %v4043_v21 = vsel %vm9299_vm12, %v6440_v34, 0.0 }
0x12c5   : > { %6441 = vpow2.f32 %v4028_v26  ;;  %4044 = vadd.xlane.f32.xlu1 %v4043_v21 }
0x12c6   : > { %5916 = vmatmul.msk.bf16.vlgmr.msra.gmra.mxu2 %vm9300_vm1, %v4064_v39 }
0x12c8   : > { %v4003_v29 = vpop.xlane.xlu2 %4002 }
0x12c9   : > { %v4019_v47 = vsub.f32 %v3987_v14, %v4003_v29 }
0x12cb   : > { %v6442_v61 = vpop.eup %6441  ;;  %v4030_v54 = vmul.f32 1.442695, %v4019_v47 }
0x12cc   : > { %v4046_v56 = vsel %vm9301_vm2, %v6442_v61, 0.0 }
0x12cd   : > { %6443 = vpow2.f32 %v4030_v54  ;;  %4047 = vadd.xlane.f32.xlu2 %v4046_v56 }
0x12d0   : > { %v4006_v1 = vpop.xlane.xlu1 %4005 }
0x12d1   : > { %v4020_v28 = vsub.f32 %v3988_v5, %v4006_v1  ;;  %v6133_v1 = vld [vmem:[%s9309_s6 + $0x8] sm:$0xff] }
0x12d2   : > { %4275 = vmatpush.bf16.msrb.mxu0 %v6133_v1 }
0x12d3   : > { %v6444_v0 = vpop.eup %6443  ;;  %v4032_v25 = vmul.f32 1.442695, %v4020_v28 }
0x12d4   : > { %v4049_v40 = vsel %vm9302_vm4, %v6444_v0, 0.0  ;;  %v4065_v45 = vpack.c.bf16 %v6444_v0, %v6442_v61 }
0x12d5   : > { %6445 = vpow2.f32 %v4032_v25  ;;  %4050 = vadd.xlane.f32.xlu1 %v4049_v40 }
0x12d6   : > { %5917 = vmatmul.msk.bf16.gmra.mxu2 %vm9303_vm5, %v4065_v45 }
0x12d8   : > { %v4009_v2 = vpop.xlane.xlu2 %4008 }
0x12d9   : > { %v4021_v33 = vsub.f32 %v3989_v31, %v4009_v2 }
0x12db   : > { %v6446_v36 = vpop.eup %6445  ;;  %v4034_v7 = vmul.f32 1.442695, %v4021_v33 }
0x12dc   : > { %v4052_v27 = vsel %vm9304_vm9, %v6446_v36, 0.0 }
0x12dd   : > { %6447 = vpow2.f32 %v4034_v7  ;;  %4053 = vadd.xlane.f32.xlu2 %v4052_v27 }
0x12e0   : > { %v4012_v10 = vpop.xlane.xlu1 %4011 }
0x12e1   : > { %v4022_v14 = vsub.f32 %v3990_v9, %v4012_v10 }
0x12e3   : > { %v6448_v12 = vpop.eup %6447  ;;  %v4036_v37 = vmul.f32 1.442695, %v4022_v14 }
0x12e4   : > { %v4055_v59 = vsel %vm9305_vm6, %v6448_v12, 0.0  ;;  %v4066_v30 = vpack.c.bf16 %v6448_v12, %v6446_v36  ;;  %v6132_v12 = vld [vmem:[%s9309_s6] sm:$0xff] }
0x12e5   : > { %6449 = vpow2.f32 %v4036_v37  ;;  %4056 = vadd.xlane.f32.xlu1 %v4055_v59  ;;  %4276 = vmatpush.bf16.msrb.mxu0 %v6132_v12 }
0x12e6   : > { %5918 = vmatmul.msk.bf16.gmra.mxu2 %vm9306_vm13, %v4066_v30 }
0x12e8   : > { %v4015_v5 = vpop.xlane.xlu2 %4014 }
0x12e9   : > { %v4023_v17 = vsub.f32 %v3991_v19, %v4015_v5 }
0x12eb   : > { %v6450_v4 = vpop.eup %6449  ;;  %v4038_v8 = vmul.f32 1.442695, %v4023_v17 }
0x12ec   : > { %v4058_v53 = vsel %vm9294_vm0, %v6450_v4, 0.0 }
0x12ed   : > { %6451 = vpow2.f32 %v4038_v8  ;;  %4059 = vadd.xlane.f32.xlu2 %v4058_v53 }
0x12f3   : > { %v6452_v31 = vpop.eup %6451 }
0x12f4   : > { %v4061_v11 = vsel %vm9307_vm3, %v6452_v31, 0.0  ;;  %v4067_v23 = vpack.c.bf16 %v6452_v31, %v6450_v4 }
0x12f5   : > { %4062 = vadd.xlane.f32.xlu1 %v4061_v11 }
0x12f6   : > { %5919 = vmatmul.msk.bf16.gmra.mxu2 %vm9308_vm8, %v4067_v23 }
0x1330   : > { %v4042_v9 = vpop.xlane.xlu0 %4041 }
0x1331   : > { %6453 = vrcp.f32 %v4042_v9  ;;  %v4122_v54 = vand.u32 2147483647, %v4042_v9  ;;  %v4124_v56 = vand.u32 2147483648, %v4042_v9  ;;  %vm4118_vm12 = vweird.f32 %v4042_v9 }
0x1333   : > { %vm8307_vm2 = vcmp.eq.f32.partialorder %v4122_v54, 8.507059e+37  ;;  %v4125_v10 = vor.u32 1.1754944e-38, %v4124_v56 }
0x1337   : > { %v8254_v55 = vpop.eup %6453 }
0x1338   : > { %v8245_v52 = vpop.xlane.xlu1 %4044  ;;  %v4114_v24 = vmul.f32 %v8254_v55, %v4042_v9  ;;  %vm4119_vm10 = vweird.f32 %v8254_v55 }
0x1339   : > { %6455 = vrcp.f32 %v8245_v52  ;;  %v4137_v40 = vand.u32 2147483647, %v8245_v52  ;;  %vm8303_vm1 = vmor %vm4118_vm12, %vm4119_vm10  ;;  %vm4133_vm4 = vweird.f32 %v8245_v52  ;;  %v4139_v14 = vand.u32 2147483648, %v8245_v52 }
0x133a   : > { %v4115_v32 = vsub.f32 1.0, %v4114_v24 }
0x133b   : > { %vm8331_vm9 = vcmp.eq.f32.partialorder %v4137_v40, 8.507059e+37 }
0x133c   : > { %v4116_v60 = vmul.f32 %v8254_v55, %v4115_v32 }
0x133e   : > { %v4117_v28 = vadd.f32 %v8254_v55, %v4116_v60 }
0x133f   : > { %v8257_v19 = vpop.eup %6455 }
0x1340   : > { %v8248_v57 = vpop.xlane.xlu2 %4047  ;;  %v4129_v3 = vmul.f32 %v8257_v19, %v8245_v52  ;;  %vm4134_vm11 = vweird.f32 %v8257_v19  ;;  %v4121_v37 = vsel %vm8303_vm1, %v8254_v55, %v4117_v28 }
0x1341   : > { %6457 = vrcp.f32 %v8248_v57  ;;  %vm8319_vm5 = vmor %vm4133_vm4, %vm4134_vm11  ;;  %v4152_v5 = vand.u32 2147483647, %v8248_v57  ;;  %v4154_v31 = vand.u32 2147483648, %v8248_v57  ;;  %v4126_v55 = vsel %vm8307_vm2, %v4125_v10, %v4121_v37 }
0x1342   : > { %v4130_v63 = vsub.f32 1.0, %v4129_v3  ;;  %vm4148_vm13 = vweird.f32 %v8248_v57 }
0x1343   : > { %vm8347_vm0 = vcmp.eq.f32.partialorder %v4152_v5, 8.507059e+37 }
0x1344   : > { %v4131_v39 = vmul.f32 %v8257_v19, %v4130_v63 }
0x1346   : > { %v4132_v25 = vadd.f32 %v8257_v19, %v4131_v39 }
0x1347   : > { %v8269_v46 = vpop.eup %6457 }
0x1348   : > { %v8252_v18 = vpop.xlane.xlu1 %4050  ;;  %v4144_v15 = vmul.f32 %v8269_v46, %v8248_v57  ;;  %v4136_v8 = vsel %vm8319_vm5, %v8257_v19, %v4132_v25  ;;  %vm4149_vm6 = vweird.f32 %v8269_v46  ;;  %v4140_v19 = vor.u32 1.1754944e-38, %v4139_v14 }
0x1349   : > { %v8243_v58 = vpop.f32.mrf.mxu2  ;;  %6459 = vrcp.f32 %v8252_v18  ;;  %v4167_v24 = vand.u32 2147483647, %v8252_v18  ;;  %v4169_v3 = vand.u32 2147483648, %v8252_v18  ;;  %vm8354_vm3 = vmor %vm4148_vm13, %vm4149_vm6  ;;  %vm4163_vm8 = vweird.f32 %v8252_v18 }
0x134a   : > { %v4145_v29 = vsub.f32 1.0, %v4144_v15  ;;  %v4141_v60 = vsel %vm8331_vm9, %v4140_v19, %v4136_v8  ;;  %v4127_v28 = vmul.f32 %v4126_v55, %v8243_v58 }
0x134b   : > { %vm8370_vm11 = vcmp.eq.f32.partialorder %v4167_v24, 8.507059e+37  ;;  %v4170_v40 = vor.u32 1.1754944e-38, %v4169_v3 }
0x134c   : > { %v4146_v33 = vmul.f32 %v8269_v46, %v4145_v29  ;;  %v4155_v29 = vor.u32 1.1754944e-38, %v4154_v31 }
0x134e   : > { %v4147_v52 = vadd.f32 %v8269_v46, %v4146_v33 }
0x134f   : > { %v8275_v13 = vpop.eup %6459 }
0x1350   : > { %v8260_v22 = vpop.xlane.xlu2 %4053  ;;  %v4159_v47 = vmul.f32 %v8275_v13, %v8252_v18  ;;  %v4151_v57 = vsel %vm8354_vm3, %v8269_v46, %v4147_v52  ;;  %vm4164_vm10 = vweird.f32 %v8275_v13  ;;  %v4233_v52 = vmul.f32 %v6888_v48, %v4127_v28 }
0x1351   : > { %v8250_v38 = vpop.f32.mrf.mxu2  ;;  %6461 = vrcp.f32 %v8260_v22  ;;  %v4156_v33 = vsel %vm8347_vm0, %v4155_v29, %v4151_v57  ;;  %vm8383_vm1 = vmor %vm4163_vm8, %vm4164_vm10  ;;  %vm4178_vm2 = vweird.f32 %v8260_v22  ;;  %v4184_v7 = vand.u32 2147483648, %v8260_v22 }
0x1352   : > { %v4160_v45 = vsub.f32 1.0, %v4159_v47  ;;  %v4182_v47 = vand.u32 2147483647, %v8260_v22 }
0x1354   : > { %v4161_v9 = vmul.f32 %v8275_v13, %v4160_v45  ;;  %vm8388_vm4 = vcmp.eq.f32.partialorder %v4182_v47, 8.507059e+37 }
0x1356   : > { %v4162_v54 = vadd.f32 %v8275_v13, %v4161_v9 }
0x1357   : > { %v8280_v26 = vpop.eup %6461 }
0x1358   : > { %v8267_v6 = vpop.xlane.xlu1 %4056  ;;  %v4174_v0 = vmul.f32 %v8280_v26, %v8260_v22  ;;  %vm4179_vm12 = vweird.f32 %v8280_v26  ;;  %v4166_v10 = vsel %vm8383_vm1, %v8275_v13, %v4162_v54 }
0x1359   : > { %v8265_v16 = vpop.f32.mrf.mxu2  ;;  %6463 = vrcp.f32 %v8267_v6  ;;  %vm8400_vm9 = vmor %vm4178_vm2, %vm4179_vm12  ;;  %vm4193_vm6 = vweird.f32 %v8267_v6  ;;  %v4199_v22 = vand.u32 2147483648, %v8267_v6  ;;  %v4197_v30 = vand.u32 2147483647, %v8267_v6 }
0x135a   : > { %v4175_v59 = vsub.f32 1.0, %v4174_v0  ;;  %v4142_v0 = vmul.f32 %v4141_v60, %v8250_v38  ;;  %v4157_v37 = vmul.f32 %v4156_v33, %v8265_v16  ;;  %v4171_v16 = vsel %vm8370_vm11, %v4170_v40, %v4166_v10 }
0x135b   : > { %v4200_v19 = vor.u32 1.1754944e-38, %v4199_v22  ;;  %vm4198_vm10 = vcmp.eq.f32.partialorder %v4197_v30, 8.507059e+37 }
0x135c   : > { %v4176_v15 = vmul.f32 %v8280_v26, %v4175_v59  ;;  %v4235_v12 = vmul.f32 %v6890_v49, %v4142_v0  ;;  %v4237_v9 = vmul.f32 %v6892_v50, %v4157_v37 }
0x135e   : > { %v4177_v45 = vadd.f32 %v8280_v26, %v4176_v15  ;;  %v4236_v3 = vadd.f32 %v4235_v12, %v4233_v52 }
0x135f   : > { %v8288_v61 = vpop.eup %6463 }
0x1360   : > { %v8278_v34 = vpop.xlane.xlu2 %4059  ;;  %v4189_v2 = vmul.f32 %v8288_v61, %v8267_v6  ;;  %vm4194_vm5 = vweird.f32 %v8288_v61  ;;  %v4181_v13 = vsel %vm8400_vm9, %v8280_v26, %v4177_v45  ;;  %v4238_v39 = vadd.f32 %v4237_v9, %v4236_v3 }
0x1361   : > { %6465 = vrcp.f32 %v8278_v34  ;;  %v8284_v21 = vpop.f32.mrf.mxu2  ;;  %vm8414_vm0 = vmor %vm4193_vm6, %vm4194_vm5  ;;  %v4212_v53 = vand.u32 2147483647, %v8278_v34  ;;  %v4214_v31 = vand.u32 2147483648, %v8278_v34  ;;  %vm4208_vm3 = vweird.f32 %v8278_v34 }
0x1362   : > { %v4190_v23 = vsub.f32 1.0, %v4189_v2  ;;  %v4172_v26 = vmul.f32 %v4171_v16, %v8284_v21  ;;  %vm9334_vm5 = vcmask 261120   ;;  %v6134_v16 = vld [vmem:[%s9333_s12] sm:$0xff] }
0x1363   : > { %vm4213_vm11 = vcmp.eq.f32.partialorder %v4212_v53, 8.507059e+37  ;;  %vm9336_vm9 = vmmov %vm9334_vm5  ;;  %v6138_v53 = vld [vmem:[%s9335_s13 + $0x10] sm:$0xff] }
0x1364   : > { %v4191_v56 = vmul.f32 %v8288_v61, %v4190_v23  ;;  %vm9337_vm6 = vmmov %vm9334_vm5 }
0x1366   : > { %v4192_v18 = vadd.f32 %v8288_v61, %v4191_v56 }
0x1367   : > { %v8301_v36 = vpop.eup %6465 }
0x1368   : > { %v4204_v17 = vmul.f32 %v8301_v36, %v8278_v34  ;;  %v8326_v4 = vpop.xlane.xlu1 %4062  ;;  %vm4209_vm13 = vweird.f32 %v8301_v36  ;;  %v4196_v6 = vsel %vm8414_vm0, %v8288_v61, %v4192_v18  ;;  %v4215_v34 = vor.u32 1.1754944e-38, %v4214_v31 }
0x1369   : > { %6467 = vrcp.f32 %v8326_v4  ;;  %v8337_v11 = vpop.f32.mrf.mxu2  ;;  %vm4210_vm8 = vmor %vm4208_vm3, %vm4209_vm13  ;;  %v4201_v61 = vsel %vm4198_vm10, %v4200_v19, %v4196_v6  ;;  %v4229_v47 = vand.u32 2147483648, %v8326_v4  ;;  %vm4223_vm1 = vweird.f32 %v8326_v4  ;;  %v6237_v19 = vld [vmem:[%s9338_s14] ss:$0 sm:$0xff] }
0x136a   : > { %v4205_v63 = vsub.f32 1.0, %v4204_v17  ;;  %v4185_v17 = vor.u32 1.1754944e-38, %v4184_v7  ;;  %vm9343_vm10 = vmmov %vm9334_vm5 }
0x136b   : > { %v4230_v0 = vor.u32 1.1754944e-38, %v4229_v47 }
0x136c   : > { %v4206_v2 = vmul.f32 %v8301_v36, %v4205_v63  ;;  %v4186_v55 = vsel %vm8388_vm4, %v4185_v17, %v4181_v13  ;;  %v4239_v63 = vmul.f32 %v6894_v51, %v4172_v26  ;;  %v6139_v17 = vld [vmem:[%s9335_s13 + $0x18] sm:$0xff] }
0x136d   : > { %v4187_v24 = vmul.f32 %v4186_v55, %v8337_v11  ;;  %4402 = vmatpush.bf16.msra.mxu0 %v6139_v17 }
0x136e   : > { %v4207_v5 = vadd.f32 %v8301_v36, %v4206_v2  ;;  %v4240_v54 = vadd.f32 %v4239_v63, %v4238_v39  ;;  %v6137_v63 = vld [vmem:[%s9335_s13 + $0x8] sm:$0xff] }
0x136f   : > { %v8366_v1 = vpop.eup %6467  ;;  %v4241_v11 = vmul.f32 %v6879_v41, %v4187_v24 }
0x1370   : > { %v4219_v46 = vmul.f32 %v8366_v1, %v8326_v4  ;;  %v4211_v21 = vsel %vm4210_vm8, %v8301_v36, %v4207_v5  ;;  %vm4224_vm12 = vweird.f32 %v8366_v1  ;;  %v4227_v36 = vand.u32 2147483647, %v8326_v4  ;;  %v6135_v5 = vld [vmem:[%s9333_s12 + $0x8] sm:$0xff]  ;;  %vm9342_vm8 = vmmov %vm9334_vm5 }
0x1371   : > { %v4105_v27 = vpop.f32.mrf.mxu2  ;;  %v4216_v29 = vsel %vm4213_vm11, %v4215_v34, %v4211_v21  ;;  %vm4225_vm2 = vmor %vm4223_vm1, %vm4224_vm12  ;;  %v4242_v25 = vadd.f32 %v4241_v11, %v4240_v54  ;;  %4350 = vmatpush.bf16.msrb.mxu1 %v6135_v5  ;;  %4403 = vmatpush.bf16.msra.mxu0 %v6138_v53  ;;  %v6238_v21 = vld [vmem:[%s9339_s19] ss:$0 sm:$0xff] }
0x1372   : > { %v4220_v14 = vsub.f32 1.0, %v4219_v46  ;;  %v4202_v15 = vmul.f32 %v4201_v61, %v4105_v27  ;;  %vm4228_vm4 = vcmp.eq.f32.partialorder %v4227_v36, 8.507059e+37  ;;  %v6236_v27 = vld [vmem:[%s9332_s7] ss:$0 sm:$0xff]  ;;  %vm9344_vm11 = vmmov %vm9334_vm5 }
0x1373   : > { %v6240_v36 = vld [vmem:[%s9341_s24] ss:$0 sm:$0xff] }
0x1374   : > { %v4221_v23 = vmul.f32 %v8366_v1, %v4220_v14  ;;  %v4243_v56 = vmul.f32 %v6881_v42, %v4202_v15  ;;  %v6136_v15 = vld [vmem:[%s9335_s13] sm:$0xff] }
0x1375   : > { %4351 = vmatpush.bf16.msrb.mxu1 %v6134_v16  ;;  %4404 = vmatpush.bf16.msra.mxu0 %v6137_v63 }
0x1376   : > { %v4222_v60 = vadd.f32 %v8366_v1, %v4221_v23  ;;  %v4244_v2 = vadd.f32 %v4243_v56, %v4242_v25 }
0x1378   : > { %v4226_v28 = vsel %vm4225_vm2, %v8366_v1, %v4222_v60  ;;  %v6239_v60 = vld [vmem:[%s9340_s20] ss:$0 sm:$0xff] }
0x1379   : > { %v4108_v32 = vpop.f32.mrf.mxu2  ;;  %v4231_v45 = vsel %vm4228_vm4, %v4230_v0, %v4226_v28  ;;  %4405 = vmatpush.bf16.msra.mxu0 %v6136_v15  ;;  %vm9346_vm4 = vmmov %vm9334_vm5 }
0x137a   : > { %v4217_v57 = vmul.f32 %v4216_v29, %v4108_v32 }
0x137c   : > { %v4245_v40 = vmul.f32 %v6883_v43, %v4217_v57 }
0x137e   : > { %v4246_v58 = vadd.f32 %v4245_v40, %v4244_v2 }
0x1381   : > { %v4110_v46 = vpop.f32.mrf.mxu2 }
0x1382   : > { %v4232_v33 = vmul.f32 %v4231_v45, %v4110_v46 }
0x1384   : > { %v4247_v38 = vmul.f32 %v6885_v44, %v4232_v33 }
0x1386   : > { %v4248_v4 = vadd.f32 %v4247_v38, %v4246_v58  ;;  %v6141_v58 = vld [vmem:[%s9235_s10 + $0x18] sm:$0xff]  ;;  %v6140_v38 = vld [vmem:[%s9235_s10 + $0x10] sm:$0xff]  ;;  %s9352_s10 = smov 64  }
0x1387   : > { %4476 = vmatpush.bf16.msra.mxu1 %v6141_v58  ;;  %v6562_v58 = vld [vmem:[%s7931_s18 + $0x18] sm:$0xff] }
0x1388   : > { %v4253_v7 = vpack.c.bf16 %v4248_v4, %v4248_v4 }
0x138a   : > { %5928 = vmatmul.msk.bf16.vlgmr.msrb.gmra.mxu0 %vm9334_vm5, %v4253_v7  ;;  %vm9347_vm5 = vmmov %vm9346_vm4 }
0x138b   : > { %4477 = vmatpush.bf16.msra.mxu1 %v6140_v38 }
0x1407   : > { %v4278_v1 = vpop.f32.mrf.mxu0 }
0x1408   : > { %v4282_v10 = vadd.f32 %v4278_v1, %v8192_v62 }
0x140a   : > { %v4287_v14 = vadd.f32 %v6236_v27, %v4282_v10 }
0x140c   : > { %v4290_v18 = vsel %vm9336_vm9, %v4287_v14, 0.0  ;;  %vm9348_vm9 = vmmov %vm9346_vm4 }
0x140d   : > { %4291 = vadd.xlane.f32.xlu2 %v4290_v18 }
0x140f   : > { %v4280_v12 = vpop.f32.mrf.mxu0 }
0x1480   : > { %v4292_v37 = vpop.xlane.xlu2 %4291 }
0x1481   : > { %v4293_v59 = vmul.f32 %v4292_v37, %v7361_v35 }
0x1483   : > { %v4294_v22 = vsub.f32 %v4287_v14, %v4293_v59  ;;  %v6241_v59 = vld [vmem:[%s9345_s25] ss:$0 sm:$0xff] }
0x1485   : > { %v4295_v13 = vmul.f32 %v4294_v22, %v4294_v22 }
0x1487   : > { %v4296_v30 = vsel %vm9337_vm6, %v4295_v13, 0.0  ;;  %v6242_v13 = vld [vmem:[%s6832_s17] ss:$0 sm:$0xff]  ;;  %vm9349_vm6 = vmmov %vm9346_vm4 }
0x1488   : > { %4297 = vadd.xlane.f32.xlu1 %v4296_v30 }
0x14fb   : > { %v4298_v62 = vpop.xlane.xlu1 %4297 }
0x14fc   : > { %v4299_v8 = vmul.f32 %v4298_v62, %v7361_v35  ;;  %v6243_v62 = vld [vmem:[%s9241_s23 + $0x1] ss:$0 sm:$0xff] }
0x14fe   : > { %v4300_v31 = vadd.f32 1e-05, %v4299_v8 }
0x1500   : > { %6469 = vrsqrt.f32 %v4300_v31  ;;  %vm4307_vm0 = vweird.f32 %v4300_v31 }
0x1506   : > { %v6470_v26 = vpop.eup %6469 }
0x1507   : > { %v4302_v6 = vmul.f32 %v6470_v26, %v4300_v31  ;;  %vm4308_vm13 = vweird.f32 %v6470_v26 }
0x1508   : > { %vm4309_vm3 = vmor %vm4307_vm0, %vm4308_vm13 }
0x1509   : > { %v4303_v23 = vmul.f32 %v6470_v26, %v4302_v6  ;;  %vm9350_vm13 = vmmov %vm9346_vm4 }
0x150a   : > { %vm9351_vm0 = vmmov %vm9346_vm4 }
0x150b   : > { %v4304_v52 = vmul.f32 0.5, %v4303_v23 }
0x150d   : > { %v4305_v9 = vsub.f32 1.5, %v4304_v52 }
0x150f   : > { %v4306_v55 = vmul.f32 %v6470_v26, %v4305_v9 }
0x1511   : > { %v4310_v24 = vsel %vm4309_vm3, %v6470_v26, %v4306_v55 }
0x1512   : > { %v4311_v3 = vmul.f32 %v4310_v24, %v4294_v22 }
0x1514   : > { %v4315_v61 = vmul.f32 %v6237_v19, %v4311_v3 }
0x1516   : > { %v4319_v32 = vadd.f32 %v6238_v21, %v4315_v61 }
0x1518   : > { %v4324_v34 = vpack.c.bf16 %v4319_v32, %v4319_v32 }
0x151a   : > { %5937 = vmatmul.msk.bf16.vlgmr.msrb.gmra.mxu1 %vm9342_vm8, %v4324_v34 }
0x1597   : > { %v4353_v39 = vpop.f32.mrf.mxu1 }
0x1598   : > { %v4354_v29 = vadd.f32 %v6239_v60, %v4353_v39 }
0x159a   : > { %v4357_v47 = vmax.f32 %v4354_v29, 0.0  ;;  %v6559_v29 = vld [vmem:[%s7931_s18] sm:$0xff] }
0x159c   : > { %v4366_v11 = vpack.c.bf16 %v4357_v47, %v4357_v47 }
0x159e   : > { %5954 = vmatmul.msk.bf16.vlgmr.msra.gmra.mxu0 %vm2371_vm7, %v4366_v11 }
0x159f   : > { %v4355_v57 = vpop.f32.mrf.mxu1 }
0x161b   : > { %v4407_v54 = vpop.f32.mrf.mxu0 }
0x161c   : > { %v4408_v56 = vadd.f32 %v6240_v36, %v4407_v54  ;;  %v6560_v54 = vld [vmem:[%s7931_s18 + $0x8] sm:$0xff] }
0x161e   : > { %v4411_v28 = vadd.f32 %v4408_v56, %v4319_v32 }
0x1620   : > { %v4414_v0 = vsel %vm9343_vm10, %v4411_v28, 0.0 }
0x1621   : > { %4415 = vadd.xlane.f32.xlu2 %v4414_v0 }
0x1623   : > { %v4409_v25 = vpop.f32.mrf.mxu0 }
0x1694   : > { %v4416_v40 = vpop.xlane.xlu2 %4415 }
0x1695   : > { %v4417_v46 = vmul.f32 %v4416_v40, %v7361_v35  ;;  %v6561_v40 = vld [vmem:[%s7931_s18 + $0x10] sm:$0xff] }
0x1697   : > { %v4418_v45 = vsub.f32 %v4411_v28, %v4417_v46 }
0x1699   : > { %v4419_v2 = vmul.f32 %v4418_v45, %v4418_v45 }
0x169b   : > { %v4420_v33 = vsel %vm9344_vm11, %v4419_v2, 0.0 }
0x169c   : > { %4421 = vadd.xlane.f32.xlu0 %v4420_v33 }
0x170f   : > { %v4422_v4 = vpop.xlane.xlu0 %4421 }
0x1710   : > { %v4423_v7 = vmul.f32 %v4422_v4, %v7361_v35 }
0x1712   : > { %v4424_v27 = vadd.f32 1e-05, %v4423_v7 }
0x1714   : > { %6471 = vrsqrt.f32 %v4424_v27  ;;  %vm4431_vm1 = vweird.f32 %v4424_v27 }
0x171a   : > { %v6472_v1 = vpop.eup %6471 }
0x171b   : > { %v4426_v10 = vmul.f32 %v6472_v1, %v4424_v27  ;;  %vm4432_vm12 = vweird.f32 %v6472_v1 }
0x171c   : > { %vm4433_vm2 = vmor %vm4431_vm1, %vm4432_vm12 }
0x171d   : > { %v4427_v14 = vmul.f32 %v6472_v1, %v4426_v10 }
0x171f   : > { %v4428_v18 = vmul.f32 0.5, %v4427_v14 }
0x1721   : > { %v4429_v12 = vsub.f32 1.5, %v4428_v18 }
0x1723   : > { %v4430_v37 = vmul.f32 %v6472_v1, %v4429_v12 }
0x1725   : > { %v4434_v22 = vsel %vm4433_vm2, %v6472_v1, %v4430_v37  ;;  %v6563_v1 = vld [vmem:[%s7931_s18 + $0x20] sm:$0xff]  ;;  %v6564_v37 = vld [vmem:[%s7931_s18 + $0x28] sm:$0xff] }
0x1726   : > { %v4435_v30 = vmul.f32 %v4434_v22, %v4418_v45 }
0x1728   : > { %v4439_v5 = vmul.f32 %v6241_v59, %v4435_v30 }
0x172a   : > { %v8470_v16 = vadd.f32 %v6242_v13, %v4439_v5 }
0x172c   : > { %v4449_v17 = vpack.c.bf16 %v8470_v16, %v8470_v16 }
0x172e   : > { %5968 = vmatmul.msk.bf16.vlgmr.msra.gmra.mxu1 %vm9346_vm4, %v4449_v17  ;;  %v6565_v17 = vld [vmem:[%s7931_s18 + $0x38] sm:$0xff] }
0x17ab   : > { %v4479_v8 = vpop.f32.mrf.mxu1 }
0x17ac   : > { %v4480_v53 = vadd.f32 %v6243_v62, %v4479_v8 }
0x17ae   : > { %v4495_v31 = vpack.c.bf16 %v4480_v53, %v4480_v53  ;;  %v4483_v52 = vmul.f32 %v6888_v48, %v4480_v53  ;;  %v4484_v9 = vmul.f32 %v6890_v49, %v4480_v53  ;;  %v4485_v19 = vmul.f32 %v6892_v50, %v4480_v53 }
0x17af   : > { %v4486_v24 = vmul.f32 %v6894_v51, %v4480_v53  ;;  %v4487_v3 = vmul.f32 %v6879_v41, %v4480_v53  ;;  %v4488_v61 = vmul.f32 %v6881_v42, %v4480_v53  ;;  %v4489_v34 = vmul.f32 %v6883_v43, %v4480_v53 }
0x17b0   : > { %4497 = vrot.lane.b32.xlu1 %v4495_v31, %s9279_s1  ;;  %v4491_v55 = vpack.c.bf16 %v4484_v9, %v4483_v52  ;;  %v4490_v63 = vmul.f32 %v6885_v44, %v4480_v53 }
0x17b1   : > { %v4492_v21 = vpack.c.bf16 %v4486_v24, %v4485_v19  ;;  %v4493_v32 = vpack.c.bf16 %v4488_v61, %v4487_v3 }
0x17b2   : > { %v4494_v15 = vpack.c.bf16 %v4490_v63, %v4489_v34 }
0x17b3   : > { %v4481_v26 = vpop.f32.mrf.mxu1 }
0x1822   : > { %v4498_v6 = vpop.permute.xlu1 %4497 }
0x1823   : > { %v4512_v23 = vsel %vm9347_vm5, %v4498_v6, 0 }
0x1824   : > { %4521 = vmatpush.bf16.xpose.msra.mxu3 %v4512_v23 }
0x182b   : > { %5969 = vmatmul.msk.bf16.vlgmr.msra.gmra.mxu3 %vm9348_vm9, %v4491_v55 }
0x183b   : > { %5970 = vmatmul.msk.bf16.gmra.mxu3 %vm9349_vm6, %v4492_v21 }
0x184b   : > { %5971 = vmatmul.msk.bf16.gmra.mxu3 %vm9350_vm13, %v4493_v32 }
0x185b   : > { %5972 = vmatmul.msk.bf16.gmra.mxu3 %vm9351_vm0, %v4494_v15 }
0x18ae   : > { %v4523_v60 = vpop.f32.mrf.mxu3 }
0x18af   : > { %v4543_v39 = vmul.f32 0.5, %v4523_v60 }
0x18b1   : > { %v4551_v47 = vadd.f32 %v6559_v29, %v4543_v39 }
0x18b3   : > { %v4559_v11 = vsel %vm3513_vm14, %v4551_v47, -inf }
0x18b4   : > { %4560 = vmax.xlane.f32.xlu2 %v4559_v11 }
0x18b6   : > { %v4525_v57 = vpop.f32.mrf.mxu3 }
0x18b7   : > { %v4544_v36 = vmul.f32 0.5, %v4525_v57 }
0x18b9   : > { %v4552_v56 = vadd.f32 %v6560_v54, %v4544_v36 }
0x18bb   : > { %v4562_v28 = vsel %vm3513_vm14, %v4552_v56, -inf }
0x18bc   : > { %4563 = vmax.xlane.f32.xlu0 %v4562_v28 }
0x18be   : > { %v4528_v0 = vpop.f32.mrf.mxu3 }
0x18bf   : > { %v4545_v25 = vmul.f32 0.5, %v4528_v0 }
0x18c1   : > { %v4553_v46 = vadd.f32 %v6561_v40, %v4545_v25 }
0x18c3   : > { %v4565_v45 = vsel %vm3513_vm14, %v4553_v46, -inf }
0x18c4   : > { %4566 = vmax.xlane.f32.xlu0 %v4565_v45 }
0x18c6   : > { %v4530_v2 = vpop.f32.mrf.mxu3 }
0x18c7   : > { %v4546_v33 = vmul.f32 0.5, %v4530_v2 }
0x18c9   : > { %v4554_v38 = vadd.f32 %v6562_v58, %v4546_v33 }
0x18cb   : > { %v4568_v4 = vsel %vm3513_vm14, %v4554_v38, -inf }
0x18cc   : > { %4635 = vrot.lane.b32.xlu2 %v4495_v31, %s9352_s10  ;;  %4569 = vmax.xlane.f32.xlu0 %v4568_v4  ;;  %v6566_v31 = vld [vmem:[%s7931_s18 + $0x30] sm:$0xff] }
0x18ce   : > { %v4533_v7 = vpop.f32.mrf.mxu3 }
0x18cf   : > { %v4547_v27 = vmul.f32 0.5, %v4533_v7 }
0x18d1   : > { %v4555_v10 = vadd.f32 %v6563_v1, %v4547_v27 }
0x18d3   : > { %v4571_v14 = vsel %vm3513_vm14, %v4555_v10, -inf }
0x18d4   : > { %4572 = vmax.xlane.f32.xlu1 %v4571_v14 }
0x18d6   : > { %v4535_v18 = vpop.f32.mrf.mxu3 }
0x18d7   : > { %v4548_v12 = vmul.f32 0.5, %v4535_v18 }
0x18d9   : > { %v4556_v59 = vadd.f32 %v6564_v37, %v4548_v12 }
0x18db   : > { %v4574_v22 = vsel %vm3513_vm14, %v4556_v59, -inf }
0x18dc   : > { %4575 = vmax.xlane.f32.xlu0 %v4574_v22 }
0x18de   : > { %v4538_v13 = vpop.f32.mrf.mxu3 }
0x18df   : > { %v4549_v53 = vmul.f32 0.5, %v4538_v13 }
0x18e1   : > { %v4557_v26 = vadd.f32 %v6566_v31, %v4549_v53 }
0x18e3   : > { %v4577_v6 = vsel %vm3513_vm14, %v4557_v26, -inf }
0x18e6   : > { %v4540_v30 = vpop.f32.mrf.mxu3 }
0x18e7   : > { %v4550_v5 = vmul.f32 0.5, %v4540_v30 }
0x18e9   : > { %v4558_v62 = vadd.f32 %v6565_v17, %v4550_v5 }
0x18eb   : > { %v4580_v8 = vsel %vm3513_vm14, %v4558_v62, -inf }
0x18ec   : > { %4581 = vmax.xlane.f32.xlu0 %v4580_v8 }
0x18f5   : > { %4578 = vmax.xlane.f32.xlu2 %v4577_v6 }
0x1927   : > { %v4561_v23 = vpop.xlane.xlu2 %4560 }
0x1928   : > { %v4583_v52 = vsub.f32 %v4551_v47, %v4561_v23 }
0x192a   : > { %v4591_v9 = vmul.f32 1.442695, %v4583_v52 }
0x192c   : > { %6473 = vpow2.f32 %v4591_v9 }
0x192f   : > { %v4636_v55 = vpop.permute.xlu2 %4635  ;;  %v4564_v19 = vpop.xlane.xlu0 %4563 }
0x1930   : > { %v4650_v24 = vsel %vm3604_vm15, %v4636_v55, 0  ;;  %v4584_v21 = vsub.f32 %v4552_v56, %v4564_v19 }
0x1931   : > { %4659 = vmatpush.bf16.msrb.mxu0 %v4650_v24 }
0x1932   : > { %v6474_v3 = vpop.eup %6473  ;;  %v4593_v61 = vmul.f32 1.442695, %v4584_v21 }
0x1933   : > { %v4607_v32 = vsel %vm3513_vm14, %v6474_v3, 0.0 }
0x1934   : > { %6475 = vpow2.f32 %v4593_v61  ;;  %4608 = vadd.xlane.f32.xlu0 %v4607_v32 }
0x1937   : > { %v4567_v34 = vpop.xlane.xlu0 %4566 }
0x1938   : > { %v4585_v63 = vsub.f32 %v4553_v46, %v4567_v34 }
0x193a   : > { %v6476_v15 = vpop.eup %6475  ;;  %v4595_v60 = vmul.f32 1.442695, %v4585_v63 }
0x193b   : > { %v4631_v39 = vpack.c.bf16 %v6476_v15, %v6474_v3  ;;  %v4610_v29 = vsel %vm3513_vm14, %v6476_v15, 0.0 }
0x193c   : > { %6477 = vpow2.f32 %v4595_v60  ;;  %4611 = vadd.xlane.f32.xlu0 %v4610_v29 }
0x193d   : > { %5973 = vmatmul.msk.bf16.vlgmr.msrb.gmra.mxu0 %vm3513_vm14, %v4631_v39 }
0x193f   : > { %v4570_v47 = vpop.xlane.xlu0 %4569 }
0x1940   : > { %v4586_v11 = vsub.f32 %v4554_v38, %v4570_v47 }
0x1942   : > { %v6478_v57 = vpop.eup %6477  ;;  %v4597_v36 = vmul.f32 1.442695, %v4586_v11 }
0x1943   : > { %v4613_v54 = vsel %vm3513_vm14, %v6478_v57, 0.0 }
0x1944   : > { %6479 = vpow2.f32 %v4597_v36  ;;  %4614 = vadd.xlane.f32.xlu0 %v4613_v54 }
0x1947   : > { %v4573_v56 = vpop.xlane.xlu1 %4572 }
0x1948   : > { %v4587_v28 = vsub.f32 %v4555_v10, %v4573_v56 }
0x194a   : > { %v6480_v0 = vpop.eup %6479  ;;  %v4599_v25 = vmul.f32 1.442695, %v4587_v28 }
0x194b   : > { %v4616_v40 = vsel %vm3513_vm14, %v6480_v0, 0.0  ;;  %v4632_v46 = vpack.c.bf16 %v6480_v0, %v6478_v57  ;;  %v6143_v57 = vld [vmem:[%s9249_s26 + $0x18] sm:$0xff] }
0x194c   : > { %6481 = vpow2.f32 %v4599_v25  ;;  %4617 = vadd.xlane.f32.xlu1 %v4616_v40  ;;  %4844 = vmatpush.bf16.msrb.mxu1 %v6143_v57 }
0x194d   : > { %5974 = vmatmul.msk.bf16.gmra.mxu0 %vm3513_vm14, %v4632_v46 }
0x194f   : > { %v4576_v45 = vpop.xlane.xlu0 %4575 }
0x1950   : > { %v4588_v2 = vsub.f32 %v4556_v59, %v4576_v45 }
0x1952   : > { %v6482_v33 = vpop.eup %6481  ;;  %v4601_v58 = vmul.f32 1.442695, %v4588_v2 }
0x1953   : > { %v4619_v38 = vsel %vm3513_vm14, %v6482_v33, 0.0 }
0x1954   : > { %6483 = vpow2.f32 %v4601_v58  ;;  %4620 = vadd.xlane.f32.xlu0 %v4619_v38 }
0x195a   : > { %v6484_v4 = vpop.eup %6483 }
0x195b   : > { %v4622_v7 = vsel %vm3513_vm14, %v6484_v4, 0.0  ;;  %v4633_v27 = vpack.c.bf16 %v6484_v4, %v6482_v33  ;;  %v6142_v4 = vld [vmem:[%s9249_s26 + $0x10] sm:$0xff] }
0x195c   : > { %4623 = vadd.xlane.f32.xlu1 %v4622_v7  ;;  %4845 = vmatpush.bf16.msrb.mxu1 %v6142_v4 }
0x195d   : > { %5975 = vmatmul.msk.bf16.gmra.mxu0 %vm3513_vm14, %v4633_v27 }
0x195f   : > { %v4582_v1 = vpop.xlane.xlu0 %4581 }
0x1960   : > { %v4590_v10 = vsub.f32 %v4558_v62, %v4582_v1 }
0x1962   : > { %v4605_v14 = vmul.f32 1.442695, %v4590_v10 }
0x1964   : > { %6485 = vpow2.f32 %v4605_v14 }
0x1968   : > { %v4579_v18 = vpop.xlane.xlu2 %4578 }
0x1969   : > { %v4589_v12 = vsub.f32 %v4557_v26, %v4579_v18 }
0x196a   : > { %v6486_v37 = vpop.eup %6485 }
0x196b   : > { %v4603_v59 = vmul.f32 1.442695, %v4589_v12  ;;  %v4628_v22 = vsel %vm3513_vm14, %v6486_v37, 0.0 }
0x196c   : > { %4629 = vadd.xlane.f32.xlu0 %v4628_v22  ;;  %v6147_v22 = vld [vmem:[%s9271_s0 + $0x18] sm:$0xff] }
0x196d   : > { %6487 = vpow2.f32 %v4603_v59  ;;  %4959 = vmatpush.bf16.msra.mxu1 %v6147_v22 }
0x1973   : > { %v6488_v13 = vpop.eup %6487 }
0x1974   : > { %v4625_v30 = vsel %vm3513_vm14, %v6488_v13, 0.0  ;;  %v4634_v5 = vpack.c.bf16 %v6486_v37, %v6488_v13 }
0x1975   : > { %4626 = vadd.xlane.f32.xlu2 %v4625_v30 }
0x1976   : > { %5976 = vmatmul.msk.bf16.gmra.mxu0 %vm3513_vm14, %v4634_v5 }
0x19a7   : > { %v4609_v17 = vpop.xlane.xlu0 %4608 }
0x19a8   : > { %6489 = vrcp.f32 %v4609_v17  ;;  %vm4686_vm15 = vweird.f32 %v4609_v17  ;;  %v4690_v40 = vand.u32 2147483647, %v4609_v17  ;;  %v4692_v46 = vand.u32 2147483648, %v4609_v17 }
0x19aa   : > { %vm4691_vm12 = vcmp.eq.f32.partialorder %v4690_v40, 8.507059e+37  ;;  %v4693_v12 = vor.u32 1.1754944e-38, %v4692_v46 }
0x19ae   : > { %v6490_v23 = vpop.eup %6489 }
0x19af   : > { %v8522_v62 = vpop.xlane.xlu0 %4611  ;;  %v4682_v9 = vmul.f32 %v6490_v23, %v4609_v17  ;;  %vm4687_vm14 = vweird.f32 %v6490_v23 }
0x19b0   : > { %6491 = vrcp.f32 %v8522_v62  ;;  %vm8569_vm3 = vmor %vm4686_vm15, %vm4687_vm14  ;;  %v4705_v33 = vand.u32 2147483647, %v8522_v62  ;;  %v4707_v58 = vand.u32 2147483648, %v8522_v62  ;;  %vm4701_vm10 = vweird.f32 %v8522_v62 }
0x19b1   : > { %v4683_v3 = vsub.f32 1.0, %v4682_v9 }
0x19b2   : > { %vm8598_vm2 = vcmp.eq.f32.partialorder %v4705_v33, 8.507059e+37  ;;  %v4708_v5 = vor.u32 1.1754944e-38, %v4707_v58  ;;  %v6244_v58 = vld [vmem:[%s9273_s28 + $0x1] ss:$0 sm:$0xff] }
0x19b3   : > { %v4684_v15 = vmul.f32 %v6490_v23, %v4683_v3  ;;  %v6146_v3 = vld [vmem:[%s9271_s0 + $0x10] sm:$0xff] }
0x19b4   : > { %4960 = vmatpush.bf16.msra.mxu1 %v6146_v3 }
0x19b5   : > { %v4685_v36 = vadd.f32 %v6490_v23, %v4684_v15 }
0x19b6   : > { %v8534_v52 = vpop.eup %6491 }
0x19b7   : > { %v8526_v31 = vpop.xlane.xlu0 %4614  ;;  %v4697_v21 = vmul.f32 %v8534_v52, %v8522_v62  ;;  %vm4702_vm8 = vweird.f32 %v8534_v52  ;;  %v4689_v7 = vsel %vm8569_vm3, %v6490_v23, %v4685_v36 }
0x19b8   : > { %6493 = vrcp.f32 %v8526_v31  ;;  %v4720_v1 = vand.u32 2147483647, %v8526_v31  ;;  %vm8589_vm1 = vmor %vm4701_vm10, %vm4702_vm8  ;;  %v4722_v59 = vand.u32 2147483648, %v8526_v31  ;;  %vm4716_vm4 = vweird.f32 %v8526_v31 }
0x19b9   : > { %v4698_v63 = vsub.f32 1.0, %v4697_v21  ;;  %v4694_v62 = vsel %vm4691_vm12, %v4693_v12, %v4689_v7 }
0x19ba   : > { %v8520_v8 = vpop.f32.mrf.mxu0  ;;  %vm8611_vm9 = vcmp.eq.f32.partialorder %v4720_v1, 8.507059e+37 }
0x19bb   : > { %v4699_v11 = vmul.f32 %v8534_v52, %v4698_v63  ;;  %v4695_v15 = vmul.f32 %v4694_v62, %v8520_v8 }
0x19bd   : > { %v4700_v2 = vadd.f32 %v8534_v52, %v4699_v11  ;;  %v4801_v1 = vmul.f32 %v6888_v48, %v4695_v15 }
0x19be   : > { %v8541_v24 = vpop.eup %6493 }
0x19bf   : > { %v8528_v26 = vpop.xlane.xlu1 %4617  ;;  %v4712_v61 = vmul.f32 %v8541_v24, %v8526_v31  ;;  %vm4717_vm11 = vweird.f32 %v8541_v24  ;;  %v4704_v13 = vsel %vm8589_vm1, %v8534_v52, %v4700_v2 }
0x19c0   : > { %6495 = vrcp.f32 %v8528_v26  ;;  %vm8607_vm5 = vmor %vm4716_vm4, %vm4717_vm11  ;;  %v4737_v52 = vand.u32 2147483648, %v8528_v26  ;;  %vm4731_vm13 = vweird.f32 %v8528_v26 }
0x19c1   : > { %v4713_v39 = vsub.f32 1.0, %v4712_v61 }
0x19c2   : > { %v8524_v53 = vpop.f32.mrf.mxu0 }
0x19c3   : > { %v4714_v28 = vmul.f32 %v8541_v24, %v4713_v39  ;;  %v4709_v39 = vsel %vm8598_vm2, %v4708_v5, %v4704_v13 }
0x19c4   : > { %v4710_v36 = vmul.f32 %v4709_v39, %v8524_v53 }
0x19c5   : > { %v4715_v10 = vadd.f32 %v8541_v24, %v4714_v28 }
0x19c6   : > { %v8551_v34 = vpop.eup %6495  ;;  %v4803_v4 = vmul.f32 %v6890_v49, %v4710_v36 }
0x19c7   : > { %v8537_v55 = vpop.xlane.xlu0 %4620  ;;  %v4727_v29 = vmul.f32 %v8551_v34, %v8528_v26  ;;  %v4719_v31 = vsel %vm8607_vm5, %v8541_v24, %v4715_v10  ;;  %vm4732_vm6 = vweird.f32 %v8551_v34  ;;  %v4735_v24 = vand.u32 2147483647, %v8528_v26 }
0x19c8   : > { %6497 = vrcp.f32 %v8537_v55  ;;  %vm8637_vm0 = vmor %vm4731_vm13, %vm4732_vm6  ;;  %v4752_v26 = vand.u32 2147483648, %v8537_v55  ;;  %vm4746_vm3 = vweird.f32 %v8537_v55  ;;  %v4750_v46 = vand.u32 2147483647, %v8537_v55 }
0x19c9   : > { %v4728_v56 = vsub.f32 1.0, %v4727_v29  ;;  %v4723_v29 = vor.u32 1.1754944e-38, %v4722_v59  ;;  %vm4736_vm8 = vcmp.eq.f32.partialorder %v4735_v24, 8.507059e+37  ;;  %v4804_v22 = vadd.f32 %v4803_v4, %v4801_v1  ;;  %v6245_v1 = vld [vmem:[%s9276_s22 + $0x1] ss:$0 sm:$0xff] }
0x19ca   : > { %v8531_v6 = vpop.f32.mrf.mxu0  ;;  %vm4751_vm1 = vcmp.eq.f32.partialorder %v4750_v46, 8.507059e+37 }
0x19cb   : > { %v4729_v18 = vmul.f32 %v8551_v34, %v4728_v56  ;;  %v4724_v8 = vsel %vm8611_vm9, %v4723_v29, %v4719_v31  ;;  %v4738_v56 = vor.u32 1.1754944e-38, %v4737_v52 }
0x19cc   : > { %v4725_v33 = vmul.f32 %v4724_v8, %v8531_v6 }
0x19cd   : > { %v4730_v61 = vadd.f32 %v8551_v34, %v4729_v18 }
0x19ce   : > { %v8553_v60 = vpop.eup %6497  ;;  %v4805_v37 = vmul.f32 %v6892_v50, %v4725_v33  ;;  %v6144_v33 = vld [vmem:[%s9274_s11 + $0x10] sm:$0xff] }
0x19cf   : > { %v8539_v19 = vpop.xlane.xlu1 %4623  ;;  %v4742_v54 = vmul.f32 %v8553_v60, %v8537_v55  ;;  %vm4747_vm14 = vweird.f32 %v8553_v60  ;;  %v4734_v53 = vsel %vm8637_vm0, %v8551_v34, %v4730_v61 }
0x19d0   : > { %6499 = vrcp.f32 %v8539_v19  ;;  %v4767_v2 = vand.u32 2147483648, %v8539_v19  ;;  %vm8653_vm10 = vmor %vm4746_vm3, %vm4747_vm14  ;;  %vm4761_vm11 = vweird.f32 %v8539_v19  ;;  %v4765_v34 = vand.u32 2147483647, %v8539_v19 }
0x19d1   : > { %v4743_v27 = vsub.f32 1.0, %v4742_v54  ;;  %v4739_v7 = vsel %vm4736_vm8, %v4738_v56, %v4734_v53  ;;  %v4806_v3 = vadd.f32 %v4805_v37, %v4804_v22  ;;  %vm9371_vm3 = vcmask 261120  }
0x19d2   : > { %v8549_v32 = vpop.f32.mrf.mxu0  ;;  %v4768_v18 = vor.u32 1.1754944e-38, %v4767_v2  ;;  %vm4766_vm2 = vcmp.eq.f32.partialorder %v4765_v34, 8.507059e+37  ;;  %vm9372_vm8 = vmmov %vm9371_vm3  ;;  %v6145_v2 = vld [vmem:[%s9274_s11 + $0x18] sm:$0xff] }
0x19d3   : > { %v4744_v21 = vmul.f32 %v8553_v60, %v4743_v27  ;;  %v4740_v10 = vmul.f32 %v4739_v7, %v8549_v32  ;;  %4924 = vmatpush.bf16.msrb.mxu2 %v6145_v2  ;;  %v6567_v2 = vld [vmem:[%s8213_s8] sm:$0xff] }
0x19d5   : > { %v4745_v28 = vadd.f32 %v8553_v60, %v4744_v21  ;;  %v4807_v5 = vmul.f32 %v6894_v51, %v4740_v10 }
0x19d6   : > { %v8557_v47 = vpop.eup %6499 }
0x19d7   : > { %v4757_v0 = vmul.f32 %v8557_v47, %v8539_v19  ;;  %vm4762_vm15 = vweird.f32 %v8557_v47  ;;  %v4749_v55 = vsel %vm8653_vm10, %v8553_v60, %v4745_v28  ;;  %v4808_v39 = vadd.f32 %v4807_v5, %v4806_v3  ;;  %4925 = vmatpush.bf16.msrb.mxu2 %v6144_v33  ;;  %vm9373_vm10 = vmmov %vm9371_vm3 }
0x19d8   : > { %vm8663_vm12 = vmor %vm4761_vm11, %vm4762_vm15 }
0x19d9   : > { %v4758_v14 = vsub.f32 1.0, %v4757_v0  ;;  %vm9374_vm11 = vmmov %vm9371_vm3 }
0x19da   : > { %v8577_v38 = vpop.f32.mrf.mxu0 }
0x19db   : > { %v4759_v63 = vmul.f32 %v8557_v47, %v4758_v14  ;;  %v4753_v14 = vor.u32 1.1754944e-38, %v4752_v26 }
0x19dd   : > { %v4760_v40 = vadd.f32 %v8557_v47, %v4759_v63  ;;  %v4754_v59 = vsel %vm4751_vm1, %v4753_v14, %v4749_v55 }
0x19de   : > { %v4755_v13 = vmul.f32 %v4754_v59, %v8577_v38 }
0x19df   : > { %v8566_v25 = vpop.xlane.xlu0 %4629  ;;  %v4764_v19 = vsel %vm8663_vm12, %v8557_v47, %v4760_v40  ;;  %vm9375_vm12 = vmmov %vm9371_vm3 }
0x19e0   : > { %6501 = vrcp.f32 %v8566_v25  ;;  %v4769_v30 = vsel %vm4766_vm2, %v4768_v18, %v4764_v19  ;;  %vm4791_vm9 = vweird.f32 %v8566_v25  ;;  %v4797_v38 = vand.u32 2147483648, %v8566_v25 }
0x19e1   : > { %v4809_v31 = vmul.f32 %v6879_v41, %v4755_v13  ;;  %v4795_v15 = vand.u32 2147483647, %v8566_v25 }
0x19e2   : > { %v4673_v0 = vpop.f32.mrf.mxu0 }
0x19e3   : > { %v4770_v62 = vmul.f32 %v4769_v30, %v4673_v0  ;;  %v4810_v54 = vadd.f32 %v4809_v31, %v4808_v39  ;;  %vm4796_vm15 = vcmp.eq.f32.partialorder %v4795_v15, 8.507059e+37  ;;  %v6248_v39 = vld [vmem:[%s9282_s5 + $0x1] ss:$0 sm:$0xff] }
0x19e6   : > { %v8603_v17 = vpop.eup %6501 }
0x19e7   : > { %v4787_v11 = vmul.f32 %v8603_v17, %v8566_v25  ;;  %vm4792_vm4 = vweird.f32 %v8603_v17 }
0x19e8   : > { %v8629_v57 = vpop.xlane.xlu2 %4626  ;;  %vm8685_vm13 = vmor %vm4791_vm9, %vm4792_vm4 }
0x19e9   : > { %6503 = vrcp.f32 %v8629_v57  ;;  %v4788_v45 = vsub.f32 1.0, %v4787_v11  ;;  %v4782_v47 = vand.u32 2147483648, %v8629_v57  ;;  %v4780_v52 = vand.u32 2147483647, %v8629_v57  ;;  %vm9377_vm9 = vmmov %vm9371_vm3 }
0x19ea   : > { %vm4776_vm6 = vweird.f32 %v8629_v57  ;;  %v4811_v11 = vmul.f32 %v6881_v42, %v4770_v62 }
0x19eb   : > { %v4789_v60 = vmul.f32 %v8603_v17, %v4788_v45  ;;  %v4783_v29 = vor.u32 1.1754944e-38, %v4782_v47  ;;  %vm4781_vm14 = vcmp.eq.f32.partialorder %v4780_v52, 8.507059e+37 }
0x19ec   : > { %v4812_v53 = vadd.f32 %v4811_v11, %v4810_v54 }
0x19ed   : > { %v4790_v21 = vadd.f32 %v8603_v17, %v4789_v60 }
0x19ef   : > { %v6504_v6 = vpop.eup %6503  ;;  %v4794_v24 = vsel %vm8685_vm13, %v8603_v17, %v4790_v21  ;;  %v6246_v21 = vld [vmem:[%s9280_s2 + $0x1] ss:$0 sm:$0xff]  ;;  %vm9379_vm13 = vmmov %vm9371_vm3 }
0x19f0   : > { %v4772_v12 = vmul.f32 %v6504_v6, %v8629_v57  ;;  %vm4777_vm5 = vweird.f32 %v6504_v6  ;;  %v4798_v57 = vor.u32 1.1754944e-38, %v4797_v38  ;;  %v6247_v38 = vld [vmem:[%s9281_s3 + $0x1] ss:$0 sm:$0xff] }
0x19f1   : > { %vm4778_vm0 = vmor %vm4776_vm6, %vm4777_vm5 }
0x19f2   : > { %v4773_v32 = vsub.f32 1.0, %v4772_v12  ;;  %v4799_v28 = vsel %vm4796_vm15, %v4798_v57, %v4794_v24  ;;  %vm9376_vm5 = vmmov %vm9371_vm3 }
0x19f3   : > { %v4676_v23 = vpop.f32.mrf.mxu0  ;;  %vm9378_vm6 = vmmov %vm9371_vm3 }
0x19f4   : > { %v4774_v9 = vmul.f32 %v6504_v6, %v4773_v32 }
0x19f6   : > { %v4775_v61 = vadd.f32 %v6504_v6, %v4774_v9 }
0x19f8   : > { %v4779_v36 = vsel %vm4778_vm0, %v6504_v6, %v4775_v61  ;;  %vm9380_vm0 = vmmov %vm9371_vm3 }
0x19f9   : > { %v4784_v8 = vsel %vm4781_vm14, %v4783_v29, %v4779_v36  ;;  %vm9381_vm14 = vcmask 130048  }
0x19fa   : > { %v4785_v56 = vmul.f32 %v4784_v8, %v4676_v23  ;;  %vm9382_vm15 = vmmov %vm9381_vm14 }
0x19fb   : > { %v4678_v25 = vpop.f32.mrf.mxu0 }
0x19fc   : > { %v4813_v26 = vmul.f32 %v6883_v43, %v4785_v56  ;;  %v4800_v0 = vmul.f32 %v4799_v28, %v4678_v25 }
0x19fe   : > { %v4814_v40 = vadd.f32 %v4813_v26, %v4812_v53  ;;  %v4815_v46 = vmul.f32 %v6885_v44, %v4800_v0 }
0x1a00   : > { %v4816_v45 = vadd.f32 %v4815_v46, %v4814_v40 }
0x1a02   : > { %v4822_v17 = vpack.c.bf16 %v4816_v45, %v4816_v45 }
0x1a04   : > { %5989 = vmatmul.msk.bf16.vlgmr.msrb.gmra.mxu1 %vm9371_vm3, %v4822_v17  ;;  %vm9383_vm3 = vmmov %vm9381_vm14 }
0x1a14   : > { %6020 = vmatmul.msk.bf16.vlgmr.msra.gmra.mxu1 %vm9372_vm8, %v8176_v20  ;;  %vm9384_vm8 = vmmov %vm9383_vm3 }
0x1a81   : > { %v4847_v34 = vpop.f32.mrf.mxu1 }
0x1a82   : > { %v4851_v4 = vadd.f32 %v4847_v34, %v8470_v16 }
0x1a84   : > { %v4857_v7 = vadd.f32 %v6244_v58, %v4851_v4 }
0x1a86   : > { %v4862_v55 = vsel %vm9373_vm10, %v4857_v7, 0.0  ;;  %vm9385_vm10 = vmmov %vm9383_vm3 }
0x1a87   : > { %4863 = vadd.xlane.f32.xlu1 %v4862_v55 }
0x1a89   : > { %v4849_v27 = vpop.f32.mrf.mxu1 }
0x1a91   : > { %v4962_v6 = vpop.f32.mrf.mxu1 }
0x1a92   : > { %v4963_v14 = vadd.f32 %v6245_v1, %v4962_v6 }
0x1a99   : > { %v4964_v10 = vpop.f32.mrf.mxu1 }
0x1a9a   : > { %v4965_v19 = vadd.f32 %v6245_v1, %v4964_v10  ;;  %v6569_v10 = vld [vmem:[%s8213_s8 + $0x10] sm:$0xff] }
0x1a9c   : > { %v4979_v18 = vpack.c.bf16 %v4965_v19, %v4963_v14 }
0x1a9e   : > { %v4993_v20 = vsel %vm9374_vm11, %v4979_v18, 0  ;;  %vm9386_vm11 = vmmov %vm9383_vm3 }
0x1a9f   : > { %5002 = vmatpush.bf16.xpose.msra.mxu2 %v4993_v20 }
0x1afa   : > { %v4864_v12 = vpop.xlane.xlu1 %4863 }
0x1afb   : > { %v4865_v60 = vmul.f32 %v4864_v12, %v7361_v35  ;;  %v6570_v12 = vld [vmem:[%s8213_s8 + $0x18] sm:$0xff] }
0x1afd   : > { %v4866_v37 = vsub.f32 %v4857_v7, %v4865_v60  ;;  %v6568_v7 = vld [vmem:[%s8213_s8 + $0x8] sm:$0xff] }
0x1aff   : > { %v4867_v59 = vmul.f32 %v4866_v37, %v4866_v37 }
0x1b01   : > { %v4868_v16 = vsel %vm9375_vm12, %v4867_v59, 0.0  ;;  %vm9387_vm12 = vmmov %vm9383_vm3 }
0x1b02   : > { %4869 = vadd.xlane.f32.xlu2 %v4868_v16 }
0x1b1a   : > { %5117 = vrot.lane.b32.xlu2 %v4979_v18, %s9279_s1 }
0x1b75   : > { %v4870_v22 = vpop.xlane.xlu2 %4869 }
0x1b76   : > { %v4871_v13 = vmul.f32 %v4870_v22, %v7361_v35  ;;  %v6571_v22 = vld [vmem:[%s8213_s8 + $0x20] sm:$0xff] }
0x1b78   : > { %v4872_v30 = vadd.f32 1e-05, %v4871_v13 }
0x1b7a   : > { %6505 = vrsqrt.f32 %v4872_v30  ;;  %vm4879_vm2 = vweird.f32 %v4872_v30 }
0x1b7d   : > { %v5118_v32 = vpop.permute.xlu2 %5117 }
0x1b7e   : > { %5139 = vmatpush.bf16.msrb.mxu1 %v5118_v32 }
0x1b80   : > { %v6506_v5 = vpop.eup %6505 }
0x1b81   : > { %v4874_v62 = vmul.f32 %v6506_v5, %v4872_v30  ;;  %vm4880_vm1 = vweird.f32 %v6506_v5 }
0x1b82   : > { %vm4881_vm4 = vmor %vm4879_vm2, %vm4880_vm1 }
0x1b83   : > { %v4875_v23 = vmul.f32 %v6506_v5, %v4874_v62  ;;  %v6572_v62 = vld [vmem:[%s8213_s8 + $0x28] sm:$0xff]  ;;  %vm9388_vm1 = vmmov %vm9383_vm3 }
0x1b84   : > { %vm9389_vm2 = vmmov %vm9388_vm1 }
0x1b85   : > { %v4876_v47 = vmul.f32 0.5, %v4875_v23 }
0x1b87   : > { %v4877_v9 = vsub.f32 1.5, %v4876_v47 }
0x1b89   : > { %v4878_v52 = vmul.f32 %v6506_v5, %v4877_v9 }
0x1b8b   : > { %v4882_v3 = vsel %vm4881_vm4, %v6506_v5, %v4878_v52  ;;  %vm9390_vm4 = vmmov %vm9388_vm1 }
0x1b8c   : > { %v4883_v31 = vmul.f32 %v4882_v3, %v4866_v37 }
0x1b8e   : > { %v4887_v61 = vmul.f32 %v6246_v21, %v4883_v31  ;;  %v6573_v21 = vld [vmem:[%s8213_s8 + $0x30] sm:$0xff] }
0x1b90   : > { %v8712_v63 = vadd.f32 %v6247_v38, %v4887_v61 }
0x1b92   : > { %v4897_v15 = vpack.c.bf16 %v8712_v63, %v8712_v63 }
0x1b94   : > { %6006 = vmatmul.msk.bf16.vlgmr.msrb.gmra.mxu2 %vm9376_vm5, %v4897_v15  ;;  %v6574_v15 = vld [vmem:[%s8213_s8 + $0x38] sm:$0xff]  ;;  %vm9391_vm5 = vmmov %vm9388_vm1  ;;  %s9428_s8 = sshll.u32 %s9430_s16, 3 }
0x1b95   : > { %s1341_s1 = scalar_lea.vmem %s6847_s21, %s9428_s8 }
0x1c17   : > { %v4927_v29 = vpop.f32.mrf.mxu2 }
0x1c18   : > { %v4928_v11 = vadd.f32 %v6248_v39, %v4927_v29 }
0x1c1a   : > { %v4967_v36 = vmul.f32 %v6888_v48, %v4928_v11  ;;  %v4968_v24 = vmul.f32 %v6890_v49, %v4928_v11  ;;  %v4969_v54 = vmul.f32 %v6892_v50, %v4928_v11  ;;  %v4970_v56 = vmul.f32 %v6894_v51, %v4928_v11 }
0x1c1b   : > { %v4971_v28 = vmul.f32 %v6879_v41, %v4928_v11  ;;  %v4972_v53 = vmul.f32 %v6881_v42, %v4928_v11  ;;  %v4973_v0 = vmul.f32 %v6883_v43, %v4928_v11  ;;  %v4974_v40 = vmul.f32 %v6885_v44, %v4928_v11 }
0x1c1c   : > { %v4975_v8 = vpack.c.bf16 %v4968_v24, %v4967_v36  ;;  %v4976_v25 = vpack.c.bf16 %v4970_v56, %v4969_v54 }
0x1c1d   : > { %v4977_v26 = vpack.c.bf16 %v4972_v53, %v4971_v28  ;;  %v4978_v46 = vpack.c.bf16 %v4974_v40, %v4973_v0 }
0x1c1e   : > { %6021 = vmatmul.msk.bf16.vlgmr.msra.gmra.mxu2 %vm9377_vm9, %v4975_v8  ;;  %vm9392_vm9 = vmmov %vm9388_vm1 }
0x1c1f   : > { %v4929_v57 = vpop.f32.mrf.mxu2 }
0x1c2e   : > { %6022 = vmatmul.msk.bf16.gmra.mxu2 %vm9378_vm6, %v4976_v25  ;;  %vm9393_vm6 = vmmov %vm9388_vm1 }
0x1c3e   : > { %6023 = vmatmul.msk.bf16.gmra.mxu2 %vm9379_vm13, %v4977_v26  ;;  %vm9394_vm13 = vmmov %vm9388_vm1 }
0x1c4e   : > { %6024 = vmatmul.msk.bf16.gmra.mxu2 %vm9380_vm0, %v4978_v46  ;;  %vm9395_vm0 = vmmov %vm9388_vm1 }
0x1ca1   : > { %v5004_v45 = vpop.f32.mrf.mxu2 }
0x1ca2   : > { %v5024_v17 = vmul.f32 0.5, %v5004_v45 }
0x1ca4   : > { %v5032_v33 = vadd.f32 %v6567_v2, %v5024_v17 }
0x1ca6   : > { %v5040_v58 = vsel %vm9381_vm14, %v5032_v33, -inf  ;;  %vm9396_vm14 = vmmov %vm9395_vm0 }
0x1ca7   : > { %5041 = vmax.xlane.f32.xlu0 %v5040_v58 }
0x1ca9   : > { %v5006_v34 = vpop.f32.mrf.mxu2 }
0x1caa   : > { %v5025_v4 = vmul.f32 0.5, %v5006_v34 }
0x1cac   : > { %v5033_v55 = vadd.f32 %v6568_v7, %v5025_v4 }
0x1cae   : > { %v5043_v27 = vsel %vm9382_vm15, %v5033_v55, -inf  ;;  %vm9397_vm15 = vmmov %vm9395_vm0 }
0x1caf   : > { %5044 = vmax.xlane.f32.xlu1 %v5043_v27 }
0x1cb1   : > { %v5009_v6 = vpop.f32.mrf.mxu2 }
0x1cb2   : > { %v5026_v1 = vmul.f32 0.5, %v5009_v6 }
0x1cb4   : > { %v5034_v14 = vadd.f32 %v6569_v10, %v5026_v1 }
0x1cb6   : > { %v5046_v19 = vsel %vm9383_vm3, %v5034_v14, -inf  ;;  %vm9398_vm3 = vmmov %vm9395_vm0 }
0x1cb7   : > { %5047 = vmax.xlane.f32.xlu0 %v5046_v19 }
0x1cb9   : > { %v5011_v18 = vpop.f32.mrf.mxu2 }
0x1cba   : > { %v5027_v20 = vmul.f32 0.5, %v5011_v18 }
0x1cbc   : > { %v5035_v60 = vadd.f32 %v6570_v12, %v5027_v20 }
0x1cbe   : > { %v5049_v37 = vsel %vm9384_vm8, %v5035_v60, -inf  ;;  %vm9399_vm8 = vmmov %vm9395_vm0 }
0x1cbf   : > { %5050 = vmax.xlane.f32.xlu1 %v5049_v37 }
0x1cc1   : > { %v5014_v59 = vpop.f32.mrf.mxu2 }
0x1cc2   : > { %v5028_v16 = vmul.f32 0.5, %v5014_v59 }
0x1cc4   : > { %v5036_v13 = vadd.f32 %v6571_v22, %v5028_v16 }
0x1cc6   : > { %v5052_v30 = vsel %vm9385_vm10, %v5036_v13, -inf  ;;  %vm9400_vm10 = vmmov %vm9395_vm0 }
0x1cc7   : > { %5053 = vmax.xlane.f32.xlu0 %v5052_v30 }
0x1cc9   : > { %v5016_v32 = vpop.f32.mrf.mxu2 }
0x1cca   : > { %v5029_v5 = vmul.f32 0.5, %v5016_v32 }
0x1ccc   : > { %v5037_v23 = vadd.f32 %v6572_v62, %v5029_v5 }
0x1cce   : > { %v5055_v47 = vsel %vm9386_vm11, %v5037_v23, -inf }
0x1ccf   : > { %5056 = vmax.xlane.f32.xlu1 %v5055_v47 }
0x1cd1   : > { %v5019_v9 = vpop.f32.mrf.mxu2 }
0x1cd2   : > { %v5030_v52 = vmul.f32 0.5, %v5019_v9 }
0x1cd4   : > { %v5038_v3 = vadd.f32 %v6573_v21, %v5030_v52 }
0x1cd6   : > { %v5058_v38 = vsel %vm9387_vm12, %v5038_v3, -inf }
0x1cd7   : > { %5059 = vmax.xlane.f32.xlu0 %v5058_v38 }
0x1cd9   : > { %v5021_v31 = vpop.f32.mrf.mxu2 }
0x1cda   : > { %v5031_v61 = vmul.f32 0.5, %v5021_v31 }
0x1cdc   : > { %v5039_v39 = vadd.f32 %v6574_v15, %v5031_v61 }
0x1cde   : > { %v5061_v29 = vsel %vm9388_vm1, %v5039_v39, -inf }
0x1cdf   : > { %5062 = vmax.xlane.f32.xlu1 %v5061_v29 }
0x1d1a   : > { %v5042_v11 = vpop.xlane.xlu0 %5041 }
0x1d1b   : > { %v5064_v36 = vsub.f32 %v5032_v33, %v5042_v11 }
0x1d1d   : > { %v5072_v24 = vmul.f32 1.442695, %v5064_v36 }
0x1d1f   : > { %6507 = vpow2.f32 %v5072_v24 }
0x1d22   : > { %v5045_v8 = vpop.xlane.xlu1 %5044 }
0x1d23   : > { %v5065_v57 = vsub.f32 %v5033_v55, %v5045_v8 }
0x1d25   : > { %v6508_v54 = vpop.eup %6507  ;;  %v5074_v56 = vmul.f32 1.442695, %v5065_v57 }
0x1d26   : > { %v5088_v25 = vsel %vm9389_vm2, %v6508_v54, 0.0 }
0x1d27   : > { %6509 = vpow2.f32 %v5074_v56  ;;  %5089 = vadd.xlane.f32.xlu2 %v5088_v25 }
0x1d2a   : > { %v5048_v28 = vpop.xlane.xlu0 %5047 }
0x1d2b   : > { %v5066_v53 = vsub.f32 %v5034_v14, %v5048_v28 }
0x1d2d   : > { %v6510_v26 = vpop.eup %6509  ;;  %v5076_v0 = vmul.f32 1.442695, %v5066_v53 }
0x1d2e   : > { %v5112_v40 = vpack.c.bf16 %v6510_v26, %v6508_v54  ;;  %v5091_v46 = vsel %vm9390_vm4, %v6510_v26, 0.0 }
0x1d2f   : > { %6511 = vpow2.f32 %v5076_v0  ;;  %5092 = vadd.xlane.f32.xlu0 %v5091_v46 }
0x1d30   : > { %6025 = vmatmul.msk.bf16.vlgmr.msrb.gmra.mxu1 %vm9391_vm5, %v5112_v40 }
0x1d32   : > { %v5051_v45 = vpop.xlane.xlu1 %5050 }
0x1d33   : > { %v5067_v17 = vsub.f32 %v5035_v60, %v5051_v45 }
0x1d35   : > { %v6512_v2 = vpop.eup %6511  ;;  %v5078_v33 = vmul.f32 1.442695, %v5067_v17 }
0x1d36   : > { %v5094_v58 = vsel %vm9392_vm9, %v6512_v2, 0.0 }
0x1d37   : > { %6513 = vpow2.f32 %v5078_v33  ;;  %5095 = vadd.xlane.f32.xlu1 %v5094_v58 }
0x1d3a   : > { %v5054_v34 = vpop.xlane.xlu0 %5053 }
0x1d3b   : > { %v5068_v4 = vsub.f32 %v5036_v13, %v5054_v34 }
0x1d3d   : > { %v6514_v7 = vpop.eup %6513  ;;  %v5080_v55 = vmul.f32 1.442695, %v5068_v4 }
0x1d3e   : > { %v5097_v27 = vsel %vm9393_vm6, %v6514_v7, 0.0  ;;  %v5113_v6 = vpack.c.bf16 %v6514_v7, %v6512_v2  ;;  %v6149_v2 = vld [vmem:[%s9309_s6 + $0x18] sm:$0xff] }
0x1d3f   : > { %6515 = vpow2.f32 %v5080_v55  ;;  %5098 = vadd.xlane.f32.xlu0 %v5097_v27  ;;  %5324 = vmatpush.bf16.msrb.mxu3 %v6149_v2 }
0x1d40   : > { %6026 = vmatmul.msk.bf16.gmra.mxu1 %vm9394_vm13, %v5113_v6 }
0x1d42   : > { %v5057_v1 = vpop.xlane.xlu1 %5056 }
0x1d43   : > { %v5069_v10 = vsub.f32 %v5037_v23, %v5057_v1 }
0x1d45   : > { %v6516_v14 = vpop.eup %6515  ;;  %v5082_v19 = vmul.f32 1.442695, %v5069_v10 }
0x1d46   : > { %v5100_v18 = vsel %vm9395_vm0, %v6516_v14, 0.0 }
0x1d47   : > { %6517 = vpow2.f32 %v5082_v19  ;;  %5101 = vadd.xlane.f32.xlu1 %v5100_v18 }
0x1d4a   : > { %v5060_v20 = vpop.xlane.xlu0 %5059 }
0x1d4b   : > { %v5070_v12 = vsub.f32 %v5038_v3, %v5060_v20  ;;  %v6148_v20 = vld [vmem:[%s9309_s6 + $0x10] sm:$0xff] }
0x1d4c   : > { %5325 = vmatpush.bf16.msrb.mxu3 %v6148_v20 }
0x1d4d   : > { %v6518_v60 = vpop.eup %6517  ;;  %v5084_v37 = vmul.f32 1.442695, %v5070_v12 }
0x1d4e   : > { %v5103_v59 = vsel %vm9396_vm14, %v6518_v60, 0.0  ;;  %v5114_v16 = vpack.c.bf16 %v6518_v60, %v6516_v14 }
0x1d4f   : > { %6519 = vpow2.f32 %v5084_v37  ;;  %5104 = vadd.xlane.f32.xlu0 %v5103_v59 }
0x1d50   : > { %6027 = vmatmul.msk.bf16.gmra.mxu1 %vm9397_vm15, %v5114_v16 }
0x1d52   : > { %v5063_v22 = vpop.xlane.xlu1 %5062 }
0x1d53   : > { %v5071_v13 = vsub.f32 %v5039_v39, %v5063_v22 }
0x1d55   : > { %v6520_v30 = vpop.eup %6519  ;;  %v5086_v32 = vmul.f32 1.442695, %v5071_v13 }
0x1d56   : > { %v5106_v5 = vsel %vm9398_vm3, %v6520_v30, 0.0 }
0x1d57   : > { %6521 = vpow2.f32 %v5086_v32  ;;  %5107 = vadd.xlane.f32.xlu1 %v5106_v5 }
0x1d5d   : > { %v6522_v62 = vpop.eup %6521 }
0x1d5e   : > { %v5109_v23 = vsel %vm9399_vm8, %v6522_v62, 0.0  ;;  %v5115_v47 = vpack.c.bf16 %v6522_v62, %v6520_v30 }
0x1d5f   : > { %5110 = vadd.xlane.f32.xlu0 %v5109_v23 }
0x1d60   : > { %6028 = vmatmul.msk.bf16.gmra.mxu1 %vm9400_vm10, %v5115_v47 }
0x1d9a   : > { %v5090_v52 = vpop.xlane.xlu2 %5089 }
0x1d9b   : > { %6523 = vrcp.f32 %v5090_v52  ;;  %v5170_v17 = vand.u32 2147483647, %v5090_v52  ;;  %v5172_v33 = vand.u32 2147483648, %v5090_v52  ;;  %vm5166_vm12 = vweird.f32 %v5090_v52 }
0x1d9d   : > { %vm5171_vm2 = vcmp.eq.f32.partialorder %v5170_v17, 8.507059e+37  ;;  %v5173_v12 = vor.u32 1.1754944e-38, %v5172_v33 }
0x1da1   : > { %v6524_v31 = vpop.eup %6523 }
0x1da2   : > { %v8760_v21 = vpop.xlane.xlu0 %5092  ;;  %v5162_v39 = vmul.f32 %v6524_v31, %v5090_v52  ;;  %vm5167_vm11 = vweird.f32 %v6524_v31 }
0x1da3   : > { %6525 = vrcp.f32 %v8760_v21  ;;  %v5185_v7 = vand.u32 2147483647, %v8760_v21  ;;  %vm8803_vm1 = vmor %vm5166_vm12, %vm5167_vm11  ;;  %v5187_v6 = vand.u32 2147483648, %v8760_v21  ;;  %vm5181_vm5 = vweird.f32 %v8760_v21 }
0x1da4   : > { %v5163_v24 = vsub.f32 1.0, %v5162_v39 }
0x1da5   : > { %vm8821_vm9 = vcmp.eq.f32.partialorder %v5185_v7, 8.507059e+37  ;;  %v5188_v30 = vor.u32 1.1754944e-38, %v5187_v6 }
0x1da6   : > { %v5164_v28 = vmul.f32 %v6524_v31, %v5163_v24 }
0x1da8   : > { %v5165_v45 = vadd.f32 %v6524_v31, %v5164_v28 }
0x1da9   : > { %v8773_v29 = vpop.eup %6525 }
0x1daa   : > { %v8762_v3 = vpop.xlane.xlu1 %5095  ;;  %v5177_v8 = vmul.f32 %v8773_v29, %v8760_v21  ;;  %v5169_v19 = vsel %vm8803_vm1, %v6524_v31, %v5165_v45  ;;  %vm5182_vm4 = vweird.f32 %v8773_v29 }
0x1dab   : > { %6527 = vrcp.f32 %v8762_v3  ;;  %v5200_v18 = vand.u32 2147483647, %v8762_v3  ;;  %v5174_v13 = vsel %vm5171_vm2, %v5173_v12, %v5169_v19  ;;  %vm8831_vm13 = vmor %vm5181_vm5, %vm5182_vm4  ;;  %vm5196_vm0 = vweird.f32 %v8762_v3 }
0x1dac   : > { %v5178_v53 = vsub.f32 1.0, %v5177_v8  ;;  %v5202_v52 = vand.u32 2147483648, %v8762_v3 }
0x1dad   : > { %v8758_v9 = vpop.f32.mrf.mxu1  ;;  %vm8836_vm14 = vcmp.eq.f32.partialorder %v5200_v18, 8.507059e+37 }
0x1dae   : > { %v5179_v34 = vmul.f32 %v8773_v29, %v5178_v53  ;;  %v5175_v62 = vmul.f32 %v5174_v13, %v8758_v9 }
0x1db0   : > { %v5180_v60 = vadd.f32 %v8773_v29, %v5179_v34 }
0x1db1   : > { %v8778_v36 = vpop.eup %6527 }
0x1db2   : > { %v8768_v61 = vpop.xlane.xlu0 %5098  ;;  %v5192_v54 = vmul.f32 %v8778_v36, %v8762_v3  ;;  %vm5197_vm6 = vweird.f32 %v8778_v36  ;;  %v5184_v21 = vsel %vm8831_vm13, %v8773_v29, %v5180_v60 }
0x1db3   : > { %6529 = vrcp.f32 %v8768_v61  ;;  %vm8844_vm15 = vmor %vm5196_vm0, %vm5197_vm6  ;;  %v5215_v39 = vand.u32 2147483647, %v8768_v61  ;;  %vm5211_vm8 = vweird.f32 %v8768_v61  ;;  %v5217_v29 = vand.u32 2147483648, %v8768_v61 }
0x1db4   : > { %v5193_v0 = vsub.f32 1.0, %v5192_v54 }
0x1db5   : > { %v8764_v38 = vpop.f32.mrf.mxu1  ;;  %vm5216_vm12 = vcmp.eq.f32.partialorder %v5215_v39, 8.507059e+37 }
0x1db6   : > { %v5194_v55 = vmul.f32 %v8778_v36, %v5193_v0  ;;  %v5203_v0 = vor.u32 1.1754944e-38, %v5202_v52 }
0x1db8   : > { %v5195_v16 = vadd.f32 %v8778_v36, %v5194_v55 }
0x1db9   : > { %v8782_v57 = vpop.eup %6529 }
0x1dba   : > { %v8770_v15 = vpop.xlane.xlu1 %5101  ;;  %v5207_v26 = vmul.f32 %v8782_v57, %v8768_v61  ;;  %vm5212_vm3 = vweird.f32 %v8782_v57  ;;  %v5199_v3 = vsel %vm8844_vm15, %v8778_v36, %v5195_v16  ;;  %v5189_v36 = vsel %vm8821_vm9, %v5188_v30, %v5184_v21 }
0x1dbb   : > { %6531 = vrcp.f32 %v8770_v15  ;;  %v5230_v8 = vand.u32 2147483647, %v8770_v15  ;;  %vm8868_vm11 = vmor %vm5211_vm8, %vm5212_vm3  ;;  %v5232_v61 = vand.u32 2147483648, %v8770_v15  ;;  %vm5226_vm1 = vweird.f32 %v8770_v15 }
0x1dbc   : > { %v5208_v58 = vsub.f32 1.0, %v5207_v26  ;;  %v5190_v2 = vmul.f32 %v5189_v36, %v8764_v38  ;;  %v5204_v33 = vsel %vm8836_vm14, %v5203_v0, %v5199_v3 }
0x1dbd   : > { %v8776_v11 = vpop.f32.mrf.mxu1  ;;  %vm8887_vm4 = vcmp.eq.f32.partialorder %v5230_v8, 8.507059e+37 }
0x1dbe   : > { %v5209_v37 = vmul.f32 %v8782_v57, %v5208_v58  ;;  %v5218_v58 = vor.u32 1.1754944e-38, %v5217_v29  ;;  %v5205_v27 = vmul.f32 %v5204_v33, %v8776_v11  ;;  %v5283_v20 = vmul.f32 %v6890_v49, %v5190_v2 }
0x1dc0   : > { %v5210_v9 = vadd.f32 %v8782_v57, %v5209_v37  ;;  %v5285_v16 = vmul.f32 %v6892_v50, %v5205_v27  ;;  %v6150_v27 = vld [vmem:[%s9333_s12 + $0x10] sm:$0xff] }
0x1dc1   : > { %v8788_v25 = vpop.eup %6531 }
0x1dc2   : > { %v8786_v56 = vpop.xlane.xlu0 %5104  ;;  %v5222_v46 = vmul.f32 %v8788_v25, %v8770_v15  ;;  %vm5227_vm10 = vweird.f32 %v8788_v25  ;;  %v5214_v45 = vsel %vm8868_vm11, %v8782_v57, %v5210_v9 }
0x1dc3   : > { %6533 = vrcp.f32 %v8786_v56  ;;  %vm8883_vm2 = vmor %vm5226_vm1, %vm5227_vm10  ;;  %v5219_v6 = vsel %vm5216_vm12, %v5218_v58, %v5214_v45  ;;  %vm5241_vm9 = vweird.f32 %v8786_v56  ;;  %v5245_v19 = vand.u32 2147483647, %v8786_v56 }
0x1dc4   : > { %v5223_v1 = vsub.f32 1.0, %v5222_v46  ;;  %vm9421_vm1 = vcmask 261120  }
0x1dc5   : > { %v8793_v40 = vpop.f32.mrf.mxu1  ;;  %vm5246_vm15 = vcmp.eq.f32.partialorder %v5245_v19, 8.507059e+37 }
0x1dc6   : > { %v5224_v5 = vmul.f32 %v8788_v25, %v5223_v1  ;;  %v5233_v1 = vor.u32 1.1754944e-38, %v5232_v61  ;;  %v5220_v12 = vmul.f32 %v5219_v6, %v8793_v40  ;;  %v5281_v40 = vmul.f32 %v6888_v48, %v5175_v62  ;;  %v6155_v6 = vld [vmem:[%s9335_s13 + $0x38] sm:$0xff] }
0x1dc7   : > { %5458 = vmatpush.bf16.msra.mxu3 %v6155_v6 }
0x1dc8   : > { %v5225_v28 = vadd.f32 %v8788_v25, %v5224_v5  ;;  %v5287_v48 = vmul.f32 %v6894_v51, %v5220_v12 }
0x1dc9   : > { %v8799_v4 = vpop.eup %6533 }
0x1dca   : > { %v5237_v10 = vmul.f32 %v8799_v4, %v8786_v56  ;;  %v8810_v14 = vpop.xlane.xlu1 %5107  ;;  %v5229_v15 = vsel %vm8883_vm2, %v8788_v25, %v5225_v28  ;;  %vm5242_vm5 = vweird.f32 %v8799_v4  ;;  %vm9422_vm2 = vmmov %vm9421_vm1 }
0x1dcb   : > { %6535 = vrcp.f32 %v8810_v14  ;;  %v5234_v11 = vsel %vm8887_vm4, %v5233_v1, %v5229_v15  ;;  %vm8907_vm13 = vmor %vm5241_vm9, %vm5242_vm5  ;;  %v5262_v37 = vand.u32 2147483648, %v8810_v14  ;;  %vm5256_vm0 = vweird.f32 %v8810_v14 }
0x1dcc   : > { %v5238_v32 = vsub.f32 1.0, %v5237_v10  ;;  %v5247_v10 = vand.u32 2147483648, %v8786_v56  ;;  %v5260_v49 = vand.u32 2147483647, %v8810_v14  ;;  %vm9423_vm4 = vmmov %vm9421_vm1 }
0x1dcd   : > { %v8827_v22 = vpop.f32.mrf.mxu1  ;;  %v5263_v23 = vor.u32 1.1754944e-38, %v5262_v37  ;;  %v6250_v37 = vld [vmem:[%s9338_s14 + $0x1] ss:$0 sm:$0xff] }
0x1dce   : > { %v5239_v26 = vmul.f32 %v8799_v4, %v5238_v32  ;;  %v5235_v13 = vmul.f32 %v5234_v11, %v8827_v22  ;;  %v5248_v30 = vor.u32 1.1754944e-38, %v5247_v10  ;;  %vm5261_vm3 = vcmp.eq.f32.partialorder %v5260_v49, 8.507059e+37  ;;  %v6154_v10 = vld [vmem:[%s9335_s13 + $0x30] sm:$0xff]  ;;  %v6152_v32 = vld [vmem:[%s9335_s13 + $0x20] sm:$0xff] }
0x1dcf   : > { %5459 = vmatpush.bf16.msra.mxu3 %v6154_v10 }
0x1dd0   : > { %v5240_v38 = vadd.f32 %v8799_v4, %v5239_v26  ;;  %v5289_v21 = vmul.f32 %v6879_v41, %v5235_v13 }
0x1dd1   : > { %v8851_v24 = vpop.eup %6535 }
0x1dd2   : > { %v5252_v54 = vmul.f32 %v8851_v24, %v8810_v14  ;;  %v8863_v53 = vpop.xlane.xlu0 %5110  ;;  %vm5257_vm6 = vweird.f32 %v8851_v24  ;;  %v5244_v59 = vsel %vm8907_vm13, %v8799_v4, %v5240_v38  ;;  %v5284_v14 = vadd.f32 %v5283_v20, %v5281_v40  ;;  %vm9424_vm13 = vmmov %vm9421_vm1 }
0x1dd3   : > { %6537 = vrcp.f32 %v8863_v53  ;;  %vm8923_vm14 = vmor %vm5256_vm0, %vm5257_vm6  ;;  %v5249_v62 = vsel %vm5246_vm15, %v5248_v30, %v5244_v59  ;;  %v5277_v9 = vand.u32 2147483648, %v8863_v53  ;;  %vm5271_vm10 = vweird.f32 %v8863_v53  ;;  %v6251_v59 = vld [vmem:[%s9339_s19 + $0x1] ss:$0 sm:$0xff]  ;;  %v6153_v30 = vld [vmem:[%s9335_s13 + $0x28] sm:$0xff] }
0x1dd4   : > { %v5253_v17 = vsub.f32 1.0, %v5252_v54  ;;  %v5286_v52 = vadd.f32 %v5285_v16, %v5284_v14  ;;  %5460 = vmatpush.bf16.msra.mxu3 %v6153_v30  ;;  %vm9425_vm0 = vmmov %vm9421_vm1 }
0x1dd5   : > { %v5153_v57 = vpop.f32.mrf.mxu1  ;;  %v5278_v54 = vor.u32 1.1754944e-38, %v5277_v9 }
0x1dd6   : > { %v5254_v55 = vmul.f32 %v8851_v24, %v5253_v17  ;;  %v5250_v22 = vmul.f32 %v5249_v62, %v5153_v57  ;;  %v5288_v51 = vadd.f32 %v5287_v48, %v5286_v52 }
0x1dd8   : > { %v5255_v18 = vadd.f32 %v8851_v24, %v5254_v55  ;;  %v5291_v29 = vmul.f32 %v6881_v42, %v5250_v22  ;;  %v5290_v28 = vadd.f32 %v5289_v21, %v5288_v51  ;;  %v6249_v42 = vld [vmem:[%s9332_s7 + $0x1] ss:$0 sm:$0xff]  ;;  %v6151_v55 = vld [vmem:[%s9333_s12 + $0x18] sm:$0xff]  ;;  %5461 = vmatpush.bf16.msra.mxu3 %v6152_v32 }
0x1dd9   : > { %v6538_v25 = vpop.eup %6537  ;;  %5404 = vmatpush.bf16.msra.mxu0 %v6151_v55 }
0x1dda   : > { %v5267_v56 = vmul.f32 %v6538_v25, %v8863_v53  ;;  %v5259_v4 = vsel %vm8923_vm14, %v8851_v24, %v5255_v18  ;;  %vm5272_vm8 = vweird.f32 %v6538_v25  ;;  %v5275_v24 = vand.u32 2147483647, %v8863_v53  ;;  %vm9426_vm14 = vmmov %vm9425_vm0 }
0x1ddb   : > { %v5264_v31 = vsel %vm5261_vm3, %v5263_v23, %v5259_v4  ;;  %vm5273_vm11 = vmor %vm5271_vm10, %vm5272_vm8  ;;  %v5292_v0 = vadd.f32 %v5291_v29, %v5290_v28  ;;  %v6253_v23 = vld [vmem:[%s9341_s24 + $0x1] ss:$0 sm:$0xff]  ;;  %v6157_v29 = vld [vmem:[%s6837_s9 + $0x8] sm:$0xff] }
0x1ddc   : > { %v5268_v5 = vsub.f32 1.0, %v5267_v56  ;;  %vm5276_vm12 = vcmp.eq.f32.partialorder %v5275_v24, 8.507059e+37  ;;  %vm9427_vm8 = vmmov %vm9425_vm0 }
0x1ddd   : > { %v5156_v50 = vpop.f32.mrf.mxu1  ;;  %5405 = vmatpush.bf16.msra.mxu0 %v6150_v27 }
0x1dde   : > { %v5269_v47 = vmul.f32 %v6538_v25, %v5268_v5  ;;  %v5265_v39 = vmul.f32 %v5264_v31, %v5156_v50  ;;  %v6252_v5 = vld [vmem:[%s9340_s20 + $0x1] ss:$0 sm:$0xff] }
0x1de0   : > { %v5270_v3 = vadd.f32 %v6538_v25, %v5269_v47  ;;  %v5293_v26 = vmul.f32 %v6883_v43, %v5265_v39 }
0x1de1   : > { %5532 = vmatpush.bf16.msrb.mxu0 %v6157_v29 }
0x1de2   : > { %v5274_v8 = vsel %vm5273_vm11, %v6538_v25, %v5270_v3  ;;  %v5294_v61 = vadd.f32 %v5293_v26, %v5292_v0 }
0x1de3   : > { %v5279_v36 = vsel %vm5276_vm12, %v5278_v54, %v5274_v8  ;;  %v6156_v8 = vld [vmem:[%s6837_s9] sm:$0xff] }
0x1de5   : > { %v5158_v41 = vpop.f32.mrf.mxu1  ;;  %5533 = vmatpush.bf16.msrb.mxu0 %v6156_v8 }
0x1de6   : > { %v5280_v46 = vmul.f32 %v5279_v36, %v5158_v41 }
0x1de8   : > { %v5295_v45 = vmul.f32 %v6885_v44, %v5280_v46 }
0x1dea   : > { %v5296_v17 = vadd.f32 %v5295_v45, %v5294_v61 }
0x1dec   : > { %v5302_v53 = vpack.c.bf16 %v5296_v17, %v5296_v17  ;;  %v6254_v17 = vld [vmem:[%s9345_s25 + $0x1] ss:$0 sm:$0xff] }
0x1dee   : > { %6041 = vmatmul.msk.bf16.vlgmr.msrb.gmra.mxu3 %vm9421_vm1, %v5302_v53 }
0x1e71   : > { %v5327_v2 = vpop.f32.mrf.mxu3 }
0x1e72   : > { %v5331_v33 = vadd.f32 %v5327_v2, %v8712_v63 }
0x1e74   : > { %v5337_v43 = vadd.f32 %v6249_v42, %v5331_v33  ;;  %v6255_v42 = vld [vmem:[%s6832_s17 + $0x1] ss:$0 sm:$0xff] }
0x1e76   : > { %v5342_v58 = vsel %vm9422_vm2, %v5337_v43, 0.0 }
0x1e77   : > { %5343 = vadd.xlane.f32.xlu1 %v5342_v58  ;;  %v6256_v58 = vld [vmem:[%s6842_s4] ss:$0 sm:$0xff] }
0x1e79   : > { %v5329_v34 = vpop.f32.mrf.mxu3 }
0x1eea   : > { %v5344_v7 = vpop.xlane.xlu1 %5343 }
0x1eeb   : > { %v5345_v44 = vmul.f32 %v5344_v7, %v7361_v35 }
0x1eed   : > { %v5346_v57 = vsub.f32 %v5337_v43, %v5345_v44 }
0x1eef   : > { %v5347_v15 = vmul.f32 %v5346_v57, %v5346_v57 }
0x1ef1   : > { %v5348_v38 = vsel %vm9423_vm4, %v5347_v15, 0.0 }
0x1ef2   : > { %5349 = vadd.xlane.f32.xlu0 %v5348_v38 }
0x1f65   : > { %v5350_v63 = vpop.xlane.xlu0 %5349 }
0x1f66   : > { %v5351_v1 = vmul.f32 %v5350_v63, %v7361_v35 }
0x1f68   : > { %v5352_v19 = vadd.f32 1e-05, %v5351_v1 }
0x1f6a   : > { %6539 = vrsqrt.f32 %v5352_v19  ;;  %vm5359_vm9 = vweird.f32 %v5352_v19 }
0x1f70   : > { %v6540_v18 = vpop.eup %6539 }
0x1f71   : > { %v5354_v25 = vmul.f32 %v6540_v18, %v5352_v19  ;;  %vm5360_vm5 = vweird.f32 %v6540_v18 }
0x1f72   : > { %vm5361_vm6 = vmor %vm5359_vm9, %vm5360_vm5 }
0x1f73   : > { %v5355_v20 = vmul.f32 %v6540_v18, %v5354_v25 }
0x1f75   : > { %v5356_v12 = vmul.f32 0.5, %v5355_v20 }
0x1f77   : > { %v5357_v11 = vsub.f32 1.5, %v5356_v12 }
0x1f79   : > { %v5358_v60 = vmul.f32 %v6540_v18, %v5357_v11 }
0x1f7b   : > { %v5362_v56 = vsel %vm5361_vm6, %v6540_v18, %v5358_v60 }
0x1f7c   : > { %v5363_v49 = vmul.f32 %v5362_v56, %v5346_v57 }
0x1f7e   : > { %v5367_v40 = vmul.f32 %v6250_v37, %v5363_v49 }
0x1f80   : > { %v5371_v16 = vadd.f32 %v6251_v59, %v5367_v40 }
0x1f82   : > { %v5377_v13 = vpack.c.bf16 %v5371_v16, %v5371_v16 }
0x1f84   : > { %6058 = vmatmul.msk.bf16.vlgmr.msra.gmra.mxu0 %vm9424_vm13, %v5377_v13 }
0x2001   : > { %v5407_v4 = vpop.f32.mrf.mxu0 }
0x2002   : > { %v5408_v14 = vadd.f32 %v6252_v5, %v5407_v4 }
0x2004   : > { %v5411_v48 = vmax.f32 %v5408_v14, 0.0 }
0x2006   : > { %v5421_v62 = vpack.c.bf16 %v5411_v48, %v5411_v48 }
0x2008   : > { %6084 = vmatmul.msk.bf16.vlgmr.msra.gmra.mxu3 %vm2371_vm7, %v5421_v62 }
0x2009   : > { %v5409_v50 = vpop.f32.mrf.mxu0 }
0x208b   : > { %v5463_v22 = vpop.f32.mrf.mxu3 }
0x208c   : > { %v5464_v47 = vadd.f32 %v6253_v23, %v5463_v22 }
0x208e   : > { %v5467_v52 = vadd.f32 %v5464_v47, %v5371_v16 }
0x2090   : > { %v5472_v21 = vsel %vm9425_vm0, %v5467_v52, 0.0 }
0x2091   : > { %5473 = vadd.xlane.f32.xlu1 %v5472_v21 }
0x2093   : > { %v5465_v31 = vpop.f32.mrf.mxu3 }
0x2104   : > { %v5474_v9 = vpop.xlane.xlu1 %5473 }
0x2105   : > { %v5475_v39 = vmul.f32 %v5474_v9, %v7361_v35 }
0x2107   : > { %v5476_v3 = vsub.f32 %v5467_v52, %v5475_v39 }
0x2109   : > { %v5477_v24 = vmul.f32 %v5476_v3, %v5476_v3 }
0x210b   : > { %v5478_v51 = vsel %vm9426_vm14, %v5477_v24, 0.0 }
0x210c   : > { %5479 = vadd.xlane.f32.xlu2 %v5478_v51 }
0x217f   : > { %v5480_v54 = vpop.xlane.xlu2 %5479 }
0x2180   : > { %v5481_v28 = vmul.f32 %v5480_v54, %v7361_v35 }
0x2182   : > { %v5482_v26 = vadd.f32 1e-05, %v5481_v28 }
0x2184   : > { %6541 = vrsqrt.f32 %v5482_v26  ;;  %vm5489_vm15 = vweird.f32 %v5482_v26 }
0x218a   : > { %v6542_v41 = vpop.eup %6541 }
0x218b   : > { %v5484_v36 = vmul.f32 %v6542_v41, %v5482_v26  ;;  %vm5490_vm7 = vweird.f32 %v6542_v41 }
0x218c   : > { %vm5491_vm3 = vmor %vm5489_vm15, %vm5490_vm7 }
0x218d   : > { %v5485_v0 = vmul.f32 %v6542_v41, %v5484_v36 }
0x218f   : > { %v5486_v46 = vmul.f32 0.5, %v5485_v0 }
0x2191   : > { %v5487_v61 = vsub.f32 1.5, %v5486_v46 }
0x2193   : > { %v5488_v45 = vmul.f32 %v6542_v41, %v5487_v61 }
0x2195   : > { %v5492_v53 = vsel %vm5491_vm3, %v6542_v41, %v5488_v45 }
0x2196   : > { %v5493_v2 = vmul.f32 %v5492_v53, %v5476_v3 }
0x2198   : > { %v5497_v33 = vmul.f32 %v6254_v17, %v5493_v2 }
0x219a   : > { %v5501_v35 = vadd.f32 %v6255_v42, %v5497_v33 }
0x219c   : > { %v5506_v43 = vpack.c.bf16 %v5501_v35, %v5501_v35 }
0x219e   : > { %6095 = vmatmul.msk.bf16.vlgmr.msrb.gmra.mxu0 %vm9427_vm8, %v5506_v43 }
0x221b   : > { %v5535_v34 = vpop.f32.mrf.mxu0 }
0x221c   : > { %v5536_v7 = vadd.f32 %v6256_v58, %v5535_v34 }
0x221e   : > { %5539 = vst [vmem:[%s1341_s1] sm:$0xff] %v5536_v7 }
0x2223   : > { %v5537_v44 = vpop.f32.mrf.mxu0 }
0x2224 PF: > { %s95_s15 = sadd.s32 1, %s6581_s15  }
0x2225   : > { %p92_p4 = scmp.ge.s32.totalorder %s95_s15, 4  }
0x2227   :  { %94 = sbr.rel (!%p92_p4) target bundleno = 85 (0x55), region = 304 }

</bundles_post_ra>
